<compile_context>
chip_gen: v7x
topology: tpu7x:2x2x1
jax: 0.10.0
libtpu: 0.0.40
codegen_flags: <defaults>
</compile_context>

<pallas_src>
import math
import jax
import jax.numpy as jnp
from jax.experimental import pallas as pl
from jax.experimental.pallas import tpu as pltpu


# --------------------------------------------------------------------------
# Pallas kernel: fused inverse-GDN + channel-contraction matmul
# --------------------------------------------------------------------------
def _igdn_convt_kernel(x_ref, gamma_ref, beta_ref, w_ref, o_ref, y_ref):
    """grid = (M tiles, N tiles); N (j) is the inner axis.

    At j == 0 compute the inverse GDN  y = x * sqrt(beta + x^2 @ gamma)
    into a VMEM scratch (bf16); every j multiplies it with one N tile of the
    transposed-conv weight on the MXU (bf16 operands, f32 accumulation)."""
    @pl.when(pl.program_id(1) == 0)
    def _():
        x = x_ref[...]                                        # (tm, C) f32
        norm = jnp.dot(x * x, gamma_ref[...],
                       preferred_element_type=jnp.float32) + beta_ref[...]
        y_ref[...] = (x * jnp.sqrt(norm)).astype(y_ref.dtype)

    o_ref[...] = jnp.dot(y_ref[...], w_ref[...],
                         preferred_element_type=jnp.float32).astype(o_ref.dtype)


# --------------------------------------------------------------------------
# Wrappers
# --------------------------------------------------------------------------
def _cdiv(a, b):
    return -(-a // b)


def _round_up(a, b):
    return _cdiv(a, b) * b


def _pad_axis(x, axis, size):
    pad = size - x.shape[axis]
    if pad == 0:
        return x
    widths = [(0, 0)] * x.ndim
    widths[axis] = (0, pad)
    return jnp.pad(x, widths)


def _pick_tm(m):
    if m <= 8:
        return 8
    if m <= 512:
        return _round_up(_cdiv(m, 2), 8)       # >=2 parallel M tiles (v7x megacore)
    return 256


def _pick_tn(np_):
    if np_ <= 4096:
        return np_
    best, t = 128, 128
    while t <= 4096:
        if np_ % t == 0:
            best = t
        t += 128
    return best


def igdn_convt_matmul(x2d, gamma_t, beta, w_bf16):
    """rows (M, C) -> inverse GDN -> @ w (C, Nout), fused in one pallas_call."""
    M, C = x2d.shape
    N = w_bf16.shape[1]
    tm = _pick_tm(M)
    Mp = _round_up(M, tm)
    Np = _round_up(N, 128)
    tn = _pick_tn(Np)
    Np = _round_up(Np, tn)

    xp = _pad_axis(x2d, 0, Mp)          # zero rows -> IGDN(0)=0 -> zero output rows
    wp = _pad_axis(w_bf16, 1, Np)       # zero cols -> zero output cols (sliced off)

    out = pl.pallas_call(
        _igdn_convt_kernel,
        out_shape=jax.ShapeDtypeStruct((Mp, Np), jnp.float32),
        grid_spec=pltpu.PrefetchScalarGridSpec(
            num_scalar_prefetch=0,
            grid=(Mp // tm, Np // tn),
            in_specs=[
                pl.BlockSpec((tm, C), lambda i, j: (i, 0)),
                pl.BlockSpec((C, C), lambda i, j: (0, 0)),
                pl.BlockSpec((1, C), lambda i, j: (0, 0)),
                pl.BlockSpec((C, tn), lambda i, j: (0, j)),
            ],
            out_specs=pl.BlockSpec((tm, tn), lambda i, j: (i, j)),
            scratch_shapes=[pltpu.VMEM((tm, C), jnp.bfloat16)],
        ),
        compiler_params=pltpu.CompilerParams(
            dimension_semantics=("parallel", "arbitrary")),
    )(xp, gamma_t, beta.reshape(1, C), wp)
    return out[:M, :N]


def igdn_up_convt(x_nhwc, gamma_t, beta, w_mat, bias, *, up, kh, kw, cout):
    """IGDN -> nearest upsample(up) -> ConvTranspose2d(k, stride 1, pad 0)."""
    N, H, W, C = x_nhwc.shape
    u = igdn_convt_matmul(x_nhwc.reshape(N * H * W, C), gamma_t, beta, w_mat)
    u = u.reshape(N, H, W, kh * kw * cout)
    # nearest upsample commutes with the per-pixel channel contraction above.
    u = jnp.repeat(jnp.repeat(u, up, axis=1), up, axis=2)
    # col2im scatter-add (ConvTranspose2d semantics: out[iy+ky, ix+kx] += ...)
    h, w = H * up, W * up
    u = u.reshape(N, h, w, kh, kw, cout)
    y = jnp.zeros((N, h + kh - 1, w + kw - 1, cout), jnp.float32)
    for ky in range(kh):
        for kx in range(kw):
            y = y.at[:, ky:ky + h, kx:kx + w, :].add(u[:, :, :, ky, kx, :])
    return y + bias.reshape(1, 1, 1, cout)


def nearest_upsample_frac(x, scale, axes):
    # torch nn.Upsample(scale_factor=s, mode='nearest'):
    #   out_size = floor(in * s), src = min(floor(dst / s), in - 1)
    for ax in axes:
        n = x.shape[ax]
        on = int(math.floor(n * scale))
        idx = jnp.minimum(jnp.floor(jnp.arange(on) / scale).astype(jnp.int32), n - 1)
        x = jnp.take(x, idx, axis=ax)
    return x


# --------------------------------------------------------------------------
# Parameter init (deterministic, mirrors the torch __init__)
# --------------------------------------------------------------------------
def init_params(key):
    def xavier_normal_convT(k, shape, gain):
        cin, cout, kh, kw = shape               # torch ConvTranspose2d weight layout
        fan_in = cout * kh * kw                 # torch counts dim 1 as input fmaps
        fan_out = cin * kh * kw
        std = gain * math.sqrt(2.0 / (fan_in + fan_out))
        return std * jax.random.normal(k, shape, jnp.float32)

    k1, k2, k3 = jax.random.split(key, 3)
    w5_1 = xavier_normal_convT(k1, (256, 256, 5, 5), math.sqrt(2.0))
    w5_2 = xavier_normal_convT(k2, (256, 256, 5, 5), math.sqrt(2.0))
    w9_1 = xavier_normal_convT(k3, (256, 3, 9, 9), math.sqrt(2.0))

    def to_mat(w):   # (Cin, Cout, KH, KW) -> (Cin, KH*KW*Cout), bf16 for the MXU
        cin, cout, kh, kw = w.shape
        return (jnp.transpose(w, (0, 2, 3, 1))
                .reshape(cin, kh * kw * cout).astype(jnp.bfloat16))

    params = {
        "w5_1": w5_1, "w5_2": w5_2, "w9_1": w9_1,
        "w5_1_mat": to_mat(w5_1), "w5_2_mat": to_mat(w5_2), "w9_1_mat": to_mat(w9_1),
        "b5_1": jnp.full((256,), 0.01, jnp.float32),
        "b5_2": jnp.full((256,), 0.01, jnp.float32),
        "b9_1": jnp.full((3,), 0.01, jnp.float32),
    }
    # TODO(synk): the GDN class is not part of the provided snippet; the standard
    # Balle inverse-GDN y = x * sqrt(beta + gamma @ x^2) with deterministic
    # placeholder parameters (gamma = 0.1*I, beta = 1) is used for all IGDNs.
    for n in (1, 2, 3):
        params[f"gdn{n}_gamma_t"] = 0.1 * jnp.eye(256, dtype=jnp.float32)  # gamma^T
        params[f"gdn{n}_beta"] = jnp.ones((256,), jnp.float32)
    return params


# --------------------------------------------------------------------------
# Forward pass
# --------------------------------------------------------------------------
@jax.jit
def synthesis_forward(params, x_nchw):
    x = jnp.transpose(x_nchw, (0, 2, 3, 1))                # NCHW -> NHWC
    x = igdn_up_convt(x, params["gdn1_gamma_t"], params["gdn1_beta"],
                      params["w5_1_mat"], params["b5_1"], up=2, kh=5, kw=5, cout=256)
    x = igdn_up_convt(x, params["gdn2_gamma_t"], params["gdn2_beta"],
                      params["w5_2_mat"], params["b5_2"], up=2, kh=5, kw=5, cout=256)
    x = igdn_up_convt(x, params["gdn3_gamma_t"], params["gdn3_beta"],
                      params["w9_1_mat"], params["b9_1"], up=4, kh=9, kw=9, cout=3)
    x = nearest_upsample_frac(x, 1.035, axes=(1, 2))
    return jnp.transpose(x, (0, 3, 1, 2))                  # NHWC -> NCHW


# --------------------------------------------------------------------------
# Pure-JAX reference (independent lowering, for correctness check only)
# --------------------------------------------------------------------------
@jax.jit
def reference_forward(params, x_nchw):
    hi = jax.lax.Precision.HIGHEST

    def igdn(x, gamma_t, beta):
        norm = jnp.einsum("ncij,cd->ndij", x * x, gamma_t, precision=hi)
        return x * jnp.sqrt(norm + beta.reshape(1, -1, 1, 1))

    def up(x, s):
        return jnp.repeat(jnp.repeat(x, s, axis=2), s, axis=3)

    def convT(x, w, b):   # torch ConvTranspose2d (stride 1, pad 0) == full conv, flipped
        kh, kw = w.shape[2], w.shape[3]
        wf = jnp.transpose(jnp.flip(w, axis=(2, 3)), (1, 0, 2, 3))     # -> OIHW
        y = jax.lax.conv_general_dilated(
            x, wf, (1, 1), [(kh - 1, kh - 1), (kw - 1, kw - 1)],
            dimension_numbers=("NCHW", "OIHW", "NCHW"), precision=hi)
        return y + b.reshape(1, -1, 1, 1)

    x = convT(up(igdn(x_nchw, params["gdn1_gamma_t"], params["gdn1_beta"]), 2),
              params["w5_1"], params["b5_1"])
    x = convT(up(igdn(x, params["gdn2_gamma_t"], params["gdn2_beta"]), 2),
              params["w5_2"], params["b5_2"])
    x = convT(up(igdn(x, params["gdn3_gamma_t"], params["gdn3_beta"]), 4),
              params["w9_1"], params["b9_1"])
    return nearest_upsample_frac(x, 1.035, axes=(2, 3))


# --------------------------------------------------------------------------
if __name__ == "__main__":
    key = jax.random.PRNGKey(0)
    pkey, xkey = jax.random.split(key)
    params = init_params(pkey)

    # latent input: batch=2, channels=256 (fixed by the module), 2x2 spatial
    x = jax.random.normal(xkey, (2, 256, 2, 2), jnp.float32)

    out = jax.block_until_ready(synthesis_forward(params, x))
    # 2 -> up2 4 -> conv5 8 -> up2 16 -> conv5 20 -> up4 80 -> conv9 88 -> x1.035 -> 91
    assert out.shape == (2, 3, 91, 91), out.shape

    ref = jax.block_until_ready(reference_forward(params, x))
    scale = jnp.max(jnp.abs(ref))
    err = jnp.max(jnp.abs(out - ref))
    # bf16 MXU operands: check max error against 2% of the output dynamic range
    assert float(err) <= 2e-2 * float(scale), (float(err), float(scale))

    print("KERNEL_OK")
</pallas_src>

<mosaic_0001>
module attributes {stable_mosaic.version = 11 : i64} {
  func.func @_igdn_convt_kernel(%arg0: i32, %arg1: i32, %arg2: memref<8x256xf32, #tpu.memory_space<vmem>>, %arg3: memref<256x256xf32, #tpu.memory_space<vmem>>, %arg4: memref<1x256xf32, #tpu.memory_space<vmem>>, %arg5: memref<256x3200xbf16, #tpu.memory_space<vmem>>, %arg6: memref<8x3200xf32, #tpu.memory_space<vmem>>, %arg7: memref<8x256xbf16, #tpu.memory_space<vmem>>) attributes {dimension_semantics = [#tpu.dimension_semantics<parallel>, #tpu.dimension_semantics<arbitrary>], iteration_bounds = array<i64: 1, 2>, scalar_prefetch = 0 : i64, scratch_operands = 1 : i64, tpu.core_type = #tpu.core_type<tc>, window_params = [{transform_indices = @transform_0, window_bounds = array<i64: 8, 256>}, {pipeline_mode = #tpu.pipeline_mode<synchronous>, transform_indices = @transform_1, window_bounds = array<i64: 256, 256>}, {pipeline_mode = #tpu.pipeline_mode<synchronous>, transform_indices = @transform_2, window_bounds = array<i64: 1, 256>}, {transform_indices = @transform_3, window_bounds = array<i64: 256, 3200>}, {transform_indices = @transform_4, window_bounds = array<i64: 8, 3200>}]} {
    %c0_i32 = arith.constant 0 : i32
    %0 = arith.cmpi eq, %arg1, %c0_i32 : i32
    %1 = arith.extui %0 : i1 to i32
    %c0_i32_0 = arith.constant 0 : i32
    %2 = arith.cmpi ne, %1, %c0_i32_0 : i32
    scf.if %2 {
      %c0_6 = arith.constant 0 : index
      %c0_7 = arith.constant 0 : index
      %7 = vector.load %arg2[%c0_6, %c0_7] : memref<8x256xf32, #tpu.memory_space<vmem>>, vector<8x256xf32>
      %8 = arith.mulf %7, %7 : vector<8x256xf32>
      %c0_8 = arith.constant 0 : index
      %c0_9 = arith.constant 0 : index
      %9 = vector.load %arg3[%c0_8, %c0_9] : memref<256x256xf32, #tpu.memory_space<vmem>>, vector<256x256xf32>
      %cst_10 = arith.constant dense<0.000000e+00> : vector<8x256xf32>
      %10 = tpu.matmul %8, %9, %cst_10 {dimension_numbers = #tpu.dot_dimension_numbers<[1], [0], [0], [1], [0, 0, 1, 1], [], []>} : vector<8x256xf32>, vector<256x256xf32>, vector<8x256xf32> -> vector<8x256xf32>
      %c0_11 = arith.constant 0 : index
      %c0_12 = arith.constant 0 : index
      %11 = vector.load %arg4[%c0_11, %c0_12] : memref<1x256xf32, #tpu.memory_space<vmem>>, vector<1x256xf32>
      %12 = vector.broadcast %11 : vector<1x256xf32> to vector<8x256xf32>
      %13 = arith.addf %10, %12 : vector<8x256xf32>
      %14 = math.sqrt %13 : vector<8x256xf32>
      %15 = arith.mulf %7, %14 : vector<8x256xf32>
      %16 = arith.truncf %15 : vector<8x256xf32> to vector<8x256xbf16>
      %c0_13 = arith.constant 0 : index
      %c0_14 = arith.constant 0 : index
      %17 = vector.load %arg7[%c0_13, %c0_14] : memref<8x256xbf16, #tpu.memory_space<vmem>>, vector<8x256xbf16>
      tpu.vector_store %arg7[%c0_13, %c0_14], %16 {strides = array<i32>} : memref<8x256xbf16, #tpu.memory_space<vmem>>, vector<8x256xbf16>,
    } else {
    }
    %c0 = arith.constant 0 : index
    %c0_1 = arith.constant 0 : index
    %3 = vector.load %arg7[%c0, %c0_1] : memref<8x256xbf16, #tpu.memory_space<vmem>>, vector<8x256xbf16>
    %c0_2 = arith.constant 0 : index
    %c0_3 = arith.constant 0 : index
    %4 = vector.load %arg5[%c0_2, %c0_3] : memref<256x3200xbf16, #tpu.memory_space<vmem>>, vector<256x3200xbf16>
    %cst = arith.constant dense<0.000000e+00> : vector<8x3200xf32>
    %5 = tpu.matmul %3, %4, %cst {dimension_numbers = #tpu.dot_dimension_numbers<[1], [0], [0], [1], [0, 0, 1, 1], [], []>} : vector<8x256xbf16>, vector<256x3200xbf16>, vector<8x3200xf32> -> vector<8x3200xf32>
    %c0_4 = arith.constant 0 : index
    %c0_5 = arith.constant 0 : index
    %6 = vector.load %arg6[%c0_4, %c0_5] : memref<8x3200xf32, #tpu.memory_space<vmem>>, vector<8x3200xf32>
    tpu.vector_store %arg6[%c0_4, %c0_5], %5 {strides = array<i32>} : memref<8x3200xf32, #tpu.memory_space<vmem>>, vector<8x3200xf32>,
    return
  }
  func.func @transform_0(%arg0: i32, %arg1: i32) -> (i32, i32) {
    %c0_i32 = arith.constant 0 : i32
    %c0_i32_0 = arith.constant 0 : i32
    return %arg0, %c0_i32 : i32, i32
  }
  func.func @transform_1(%arg0: i32, %arg1: i32) -> (i32, i32) {
    %c0_i32 = arith.constant 0 : i32
    %c0_i32_0 = arith.constant 0 : i32
    %c0_i32_1 = arith.constant 0 : i32
    return %c0_i32, %c0_i32_0 : i32, i32
  }
  func.func @transform_2(%arg0: i32, %arg1: i32) -> (i32, i32) {
    %c0_i32 = arith.constant 0 : i32
    %c0_i32_0 = arith.constant 0 : i32
    %c0_i32_1 = arith.constant 0 : i32
    return %c0_i32, %c0_i32_0 : i32, i32
  }
  func.func @transform_3(%arg0: i32, %arg1: i32) -> (i32, i32) {
    %c0_i32 = arith.constant 0 : i32
    %c0_i32_0 = arith.constant 0 : i32
    return %c0_i32, %arg1 : i32, i32
  }
  func.func @transform_4(%arg0: i32, %arg1: i32) -> (i32, i32) {
    %c0_i32 = arith.constant 0 : i32
    return %arg0, %arg1 : i32, i32
  }
}

module attributes {stable_mosaic.version = 11 : i64} {
  func.func @_igdn_convt_kernel(%arg0: i32, %arg1: i32, %arg2: memref<64x256xf32, #tpu.memory_space<vmem>>, %arg3: memref<256x256xf32, #tpu.memory_space<vmem>>, %arg4: memref<1x256xf32, #tpu.memory_space<vmem>>, %arg5: memref<256x3200xbf16, #tpu.memory_space<vmem>>, %arg6: memref<64x3200xf32, #tpu.memory_space<vmem>>, %arg7: memref<64x256xbf16, #tpu.memory_space<vmem>>) attributes {dimension_semantics = [#tpu.dimension_semantics<parallel>, #tpu.dimension_semantics<arbitrary>], iteration_bounds = array<i64: 2, 2>, scalar_prefetch = 0 : i64, scratch_operands = 1 : i64, tpu.core_type = #tpu.core_type<tc>, window_params = [{transform_indices = @transform_0, window_bounds = array<i64: 64, 256>}, {pipeline_mode = #tpu.pipeline_mode<synchronous>, transform_indices = @transform_1, window_bounds = array<i64: 256, 256>}, {pipeline_mode = #tpu.pipeline_mode<synchronous>, transform_indices = @transform_2, window_bounds = array<i64: 1, 256>}, {transform_indices = @transform_3, window_bounds = array<i64: 256, 3200>}, {transform_indices = @transform_4, window_bounds = array<i64: 64, 3200>}]} {
    %c0_i32 = arith.constant 0 : i32
    %0 = arith.cmpi eq, %arg1, %c0_i32 : i32
    %1 = arith.extui %0 : i1 to i32
    %c0_i32_0 = arith.constant 0 : i32
    %2 = arith.cmpi ne, %1, %c0_i32_0 : i32
    scf.if %2 {
      %c0_6 = arith.constant 0 : index
      %c0_7 = arith.constant 0 : index
      %7 = vector.load %arg2[%c0_6, %c0_7] : memref<64x256xf32, #tpu.memory_space<vmem>>, vector<64x256xf32>
      %8 = arith.mulf %7, %7 : vector<64x256xf32>
      %c0_8 = arith.constant 0 : index
      %c0_9 = arith.constant 0 : index
      %9 = vector.load %arg3[%c0_8, %c0_9] : memref<256x256xf32, #tpu.memory_space<vmem>>, vector<256x256xf32>
      %cst_10 = arith.constant dense<0.000000e+00> : vector<64x256xf32>
      %10 = tpu.matmul %8, %9, %cst_10 {dimension_numbers = #tpu.dot_dimension_numbers<[1], [0], [0], [1], [0, 0, 1, 1], [], []>} : vector<64x256xf32>, vector<256x256xf32>, vector<64x256xf32> -> vector<64x256xf32>
      %c0_11 = arith.constant 0 : index
      %c0_12 = arith.constant 0 : index
      %11 = vector.load %arg4[%c0_11, %c0_12] : memref<1x256xf32, #tpu.memory_space<vmem>>, vector<1x256xf32>
      %12 = vector.broadcast %11 : vector<1x256xf32> to vector<64x256xf32>
      %13 = arith.addf %10, %12 : vector<64x256xf32>
      %14 = math.sqrt %13 : vector<64x256xf32>
      %15 = arith.mulf %7, %14 : vector<64x256xf32>
      %16 = arith.truncf %15 : vector<64x256xf32> to vector<64x256xbf16>
      %c0_13 = arith.constant 0 : index
      %c0_14 = arith.constant 0 : index
      %17 = vector.load %arg7[%c0_13, %c0_14] : memref<64x256xbf16, #tpu.memory_space<vmem>>, vector<64x256xbf16>
      tpu.vector_store %arg7[%c0_13, %c0_14], %16 {strides = array<i32>} : memref<64x256xbf16, #tpu.memory_space<vmem>>, vector<64x256xbf16>,
    } else {
    }
    %c0 = arith.constant 0 : index
    %c0_1 = arith.constant 0 : index
    %3 = vector.load %arg7[%c0, %c0_1] : memref<64x256xbf16, #tpu.memory_space<vmem>>, vector<64x256xbf16>
    %c0_2 = arith.constant 0 : index
    %c0_3 = arith.constant 0 : index
    %4 = vector.load %arg5[%c0_2, %c0_3] : memref<256x3200xbf16, #tpu.memory_space<vmem>>, vector<256x3200xbf16>
    %cst = arith.constant dense<0.000000e+00> : vector<64x3200xf32>
    %5 = tpu.matmul %3, %4, %cst {dimension_numbers = #tpu.dot_dimension_numbers<[1], [0], [0], [1], [0, 0, 1, 1], [], []>} : vector<64x256xbf16>, vector<256x3200xbf16>, vector<64x3200xf32> -> vector<64x3200xf32>
    %c0_4 = arith.constant 0 : index
    %c0_5 = arith.constant 0 : index
    %6 = vector.load %arg6[%c0_4, %c0_5] : memref<64x3200xf32, #tpu.memory_space<vmem>>, vector<64x3200xf32>
    tpu.vector_store %arg6[%c0_4, %c0_5], %5 {strides = array<i32>} : memref<64x3200xf32, #tpu.memory_space<vmem>>, vector<64x3200xf32>,
    return
  }
  func.func @transform_0(%arg0: i32, %arg1: i32) -> (i32, i32) {
    %c0_i32 = arith.constant 0 : i32
    %c0_i32_0 = arith.constant 0 : i32
    return %arg0, %c0_i32 : i32, i32
  }
  func.func @transform_1(%arg0: i32, %arg1: i32) -> (i32, i32) {
    %c0_i32 = arith.constant 0 : i32
    %c0_i32_0 = arith.constant 0 : i32
    %c0_i32_1 = arith.constant 0 : i32
    return %c0_i32, %c0_i32_0 : i32, i32
  }
  func.func @transform_2(%arg0: i32, %arg1: i32) -> (i32, i32) {
    %c0_i32 = arith.constant 0 : i32
    %c0_i32_0 = arith.constant 0 : i32
    %c0_i32_1 = arith.constant 0 : i32
    return %c0_i32, %c0_i32_0 : i32, i32
  }
  func.func @transform_3(%arg0: i32, %arg1: i32) -> (i32, i32) {
    %c0_i32 = arith.constant 0 : i32
    %c0_i32_0 = arith.constant 0 : i32
    return %c0_i32, %arg1 : i32, i32
  }
  func.func @transform_4(%arg0: i32, %arg1: i32) -> (i32, i32) {
    %c0_i32 = arith.constant 0 : i32
    return %arg0, %arg1 : i32, i32
  }
}

module attributes {stable_mosaic.version = 11 : i64} {
  func.func @_igdn_convt_kernel(%arg0: i32, %arg1: i32, %arg2: memref<256x256xf32, #tpu.memory_space<vmem>>, %arg3: memref<256x256xf32, #tpu.memory_space<vmem>>, %arg4: memref<1x256xf32, #tpu.memory_space<vmem>>, %arg5: memref<256x256xbf16, #tpu.memory_space<vmem>>, %arg6: memref<256x256xf32, #tpu.memory_space<vmem>>, %arg7: memref<256x256xbf16, #tpu.memory_space<vmem>>) attributes {dimension_semantics = [#tpu.dimension_semantics<parallel>, #tpu.dimension_semantics<arbitrary>], iteration_bounds = array<i64: 4, 1>, scalar_prefetch = 0 : i64, scratch_operands = 1 : i64, tpu.core_type = #tpu.core_type<tc>, window_params = [{transform_indices = @transform_0, window_bounds = array<i64: 256, 256>}, {pipeline_mode = #tpu.pipeline_mode<synchronous>, transform_indices = @transform_1, window_bounds = array<i64: 256, 256>}, {pipeline_mode = #tpu.pipeline_mode<synchronous>, transform_indices = @transform_2, window_bounds = array<i64: 1, 256>}, {transform_indices = @transform_3, window_bounds = array<i64: 256, 256>}, {transform_indices = @transform_4, window_bounds = array<i64: 256, 256>}]} {
    %c0_i32 = arith.constant 0 : i32
    %0 = arith.cmpi eq, %arg1, %c0_i32 : i32
    %1 = arith.extui %0 : i1 to i32
    %c0_i32_0 = arith.constant 0 : i32
    %2 = arith.cmpi ne, %1, %c0_i32_0 : i32
    scf.if %2 {
      %c0_6 = arith.constant 0 : index
      %c0_7 = arith.constant 0 : index
      %7 = vector.load %arg2[%c0_6, %c0_7] : memref<256x256xf32, #tpu.memory_space<vmem>>, vector<256x256xf32>
      %8 = arith.mulf %7, %7 : vector<256x256xf32>
      %c0_8 = arith.constant 0 : index
      %c0_9 = arith.constant 0 : index
      %9 = vector.load %arg3[%c0_8, %c0_9] : memref<256x256xf32, #tpu.memory_space<vmem>>, vector<256x256xf32>
      %cst_10 = arith.constant dense<0.000000e+00> : vector<256x256xf32>
      %10 = tpu.matmul %8, %9, %cst_10 {dimension_numbers = #tpu.dot_dimension_numbers<[1], [0], [0], [1], [0, 0, 1, 1], [], []>} : vector<256x256xf32>, vector<256x256xf32>, vector<256x256xf32> -> vector<256x256xf32>
      %c0_11 = arith.constant 0 : index
      %c0_12 = arith.constant 0 : index
      %11 = vector.load %arg4[%c0_11, %c0_12] : memref<1x256xf32, #tpu.memory_space<vmem>>, vector<1x256xf32>
      %12 = vector.broadcast %11 : vector<1x256xf32> to vector<256x256xf32>
      %13 = arith.addf %10, %12 : vector<256x256xf32>
      %14 = math.sqrt %13 : vector<256x256xf32>
      %15 = arith.mulf %7, %14 : vector<256x256xf32>
      %16 = arith.truncf %15 : vector<256x256xf32> to vector<256x256xbf16>
      %c0_13 = arith.constant 0 : index
      %c0_14 = arith.constant 0 : index
      %17 = vector.load %arg7[%c0_13, %c0_14] : memref<256x256xbf16, #tpu.memory_space<vmem>>, vector<256x256xbf16>
      tpu.vector_store %arg7[%c0_13, %c0_14], %16 {strides = array<i32>} : memref<256x256xbf16, #tpu.memory_space<vmem>>, vector<256x256xbf16>,
    } else {
    }
    %c0 = arith.constant 0 : index
    %c0_1 = arith.constant 0 : index
    %3 = vector.load %arg7[%c0, %c0_1] : memref<256x256xbf16, #tpu.memory_space<vmem>>, vector<256x256xbf16>
    %c0_2 = arith.constant 0 : index
    %c0_3 = arith.constant 0 : index
    %4 = vector.load %arg5[%c0_2, %c0_3] : memref<256x256xbf16, #tpu.memory_space<vmem>>, vector<256x256xbf16>
    %cst = arith.constant dense<0.000000e+00> : vector<256x256xf32>
    %5 = tpu.matmul %3, %4, %cst {dimension_numbers = #tpu.dot_dimension_numbers<[1], [0], [0], [1], [0, 0, 1, 1], [], []>} : vector<256x256xbf16>, vector<256x256xbf16>, vector<256x256xf32> -> vector<256x256xf32>
    %c0_4 = arith.constant 0 : index
    %c0_5 = arith.constant 0 : index
    %6 = vector.load %arg6[%c0_4, %c0_5] : memref<256x256xf32, #tpu.memory_space<vmem>>, vector<256x256xf32>
    tpu.vector_store %arg6[%c0_4, %c0_5], %5 {strides = array<i32>} : memref<256x256xf32, #tpu.memory_space<vmem>>, vector<256x256xf32>,
    return
  }
  func.func @transform_0(%arg0: i32, %arg1: i32) -> (i32, i32) {
    %c0_i32 = arith.constant 0 : i32
    %c0_i32_0 = arith.constant 0 : i32
    return %arg0, %c0_i32 : i32, i32
  }
  func.func @transform_1(%arg0: i32, %arg1: i32) -> (i32, i32) {
    %c0_i32 = arith.constant 0 : i32
    %c0_i32_0 = arith.constant 0 : i32
    %c0_i32_1 = arith.constant 0 : i32
    return %c0_i32, %c0_i32_0 : i32, i32
  }
  func.func @transform_2(%arg0: i32, %arg1: i32) -> (i32, i32) {
    %c0_i32 = arith.constant 0 : i32
    %c0_i32_0 = arith.constant 0 : i32
    %c0_i32_1 = arith.constant 0 : i32
    return %c0_i32, %c0_i32_0 : i32, i32
  }
  func.func @transform_3(%arg0: i32, %arg1: i32) -> (i32, i32) {
    %c0_i32 = arith.constant 0 : i32
    %c0_i32_0 = arith.constant 0 : i32
    return %c0_i32, %arg1 : i32, i32
  }
  func.func @transform_4(%arg0: i32, %arg1: i32) -> (i32, i32) {
    %c0_i32 = arith.constant 0 : i32
    return %arg0, %arg1 : i32, i32
  }
}

</mosaic_0001>

<bundles_post_ra>
// kernel: synthesis_forward.3
= control target key start
LH: loop header
LB: loop body
LE: loop exit
PB: predicated region body
PF: predicated region fallthrough
CT: control target
= control target key end

     0   :  { %9 = vsyncpa [#allocation4], 0  ;;  %s5636_s0 = inlined_call_operand.vmem [shape: f32[8,256], index: 0, kind: input, shape index: {}]   ;;  %s5637_s1 = inlined_call_operand.hbm [shape: f32[256,256], index: 1, kind: input, shape index: {}]   ;;  %s5638_s2 = inlined_call_operand.hbm [shape: f32[1,256], index: 2, kind: input, shape index: {}]   ;;  %s5639_s3 = inlined_call_operand.hbm [shape: bf16[256,6400], index: 3, kind: input, shape index: {}]   ;;  %s5640_s4 = inlined_call_operand.vmem [shape: f32[8,6400], index: 4, kind: output, shape index: {}]  }
   0x1   :  { %10 = vsyncpa [#allocation6], 0  ;;  %s4957_s15 = smov 0   ;;  %s4959_s16 = smov 0  }
   0x2   :  { %s4961_s17 = smov 0   ;;  %s4963_s18 = smov 0  }
   0x3   :  { %s4965_s19 = smov 0   ;;  %s4967_s20 = smov 0  }
   0x4 LB: > { %s3591_s21 = sadd.s32 4294967295, %s4922_s20   ;;  %s103_s22 = sadd.s32 1, %s4910_s17  ;;  %s4922_s20 = sphi %s4967_s20, %s16_s20   ;;  %s4918_s19 = sphi %s4965_s19, %s5655_s19   ;;  %s4914_s18 = sphi %s4963_s18, %s5654_s18   ;;  %s4910_s17 = sphi %s4961_s17, %s5653_s17   ;;  %s4906_s16 = sphi %s4959_s16, %s5652_s16   ;;  %s4902_s15 = sphi %s4957_s15, %s5651_s15  }
   0x5   : > { %p110_p0 = scmp.ne.s32.totalorder %s4910_s17, %s4906_s16  ;;  %p111_p1 = scmp.eq.s32.totalorder %s4922_s20, 0 }
   0x6   : > { %p116_p2 = scmp.ne.s32.totalorder %s4906_s16, %s4902_s15  ;;  %p4993_p3 = scmp.eq.s32.totalorder %s3591_s21, 0 }
   0x7   : > { %p112_p4 = por %p111_p1, %p110_p0  ;;  %p3593_p5 = scmp.ge.s32.totalorder %s4922_s20, 1 }
   0x8   : > { %s5644_s23 = scalar_select %p4993_p3, 1, 0 }
   0x9   : > { %p5000_p6 = por %p4993_p3, %p116_p2  ;;  %p155_p7 = scmp.lt.s32.totalorder %s4922_s20, 3 }
   0xa   : > { %s4924_s26 = smov [#allocation3]   ;;  %p4122_p10 = scmp.lt.s32.totalorder %s4922_s20, 2 }
   0xb   : > { %s5645_s24 = scalar_select %p5000_p6, 1, 0 }
   0xc   : > { %p5005_p8 = pnand %p3593_p5, %p155_p7  ;;  %s175_s27 = sshll.u32 %s4924_s26, 4  ;;  %s5009_s27 = int_to_ptr.vmem [resolvable:$true] %s175_s27 }
   0xd   : > { %p5020_p12 = pnand %p4122_p10, %p112_p4  ;;  %s4925_s30 = smov [#allocation5]  }
   0xe   : > { %p4109_p9 = pneg %p5005_p8  ;;  %s189_s5 = sshll.u32 %s4925_s30, 4  ;;  %s5024_s5 = int_to_ptr.vmem [resolvable:$true] %s189_s5 }
   0xf   : > { %s4778_s8 = scalar_lea.hbm %s5637_s1, 8192 }
  0x10   : > { %p5016_p11 = pnand %p4109_p9, %p4993_p3  ;;  %p4779_p13 = scmp.ne.s32.totalorder %s5637_s1, %s4778_s8 }
  0x11   : > { %p4785_p4 = scmp.lt.u32.totalorder %s4778_s8, %s5637_s1 }
  0x12   : > { %p4780_p0 = pneg %p5016_p11 }
  0x14   : > { %p4781_p1 = pnand %p4780_p0, %p4779_p13 }
  0x16   : > { %p4782_p2 = pneg %p4781_p1 }
  0x18   : > { %p4787_p5 = pnand %p4785_p4, %p4782_p2 }
  0x1a   : > { %4790 = shalt.err (!%p4787_p5)
}
  0x1b   : > { %s4791_s13 = scalar_lea.vmem %s5009_s27, 8192  ;;  %p4799_p6 = scmp.lt.s32.totalorder %s5009_s27, %s5009_s27 }
  0x1c   : > { %p4792_p7 = scmp.ne.s32.totalorder %s5009_s27, %s4791_s13  ;;  %p4800_p13 = scmp.lt.s32.totalorder %s4791_s13, %s4791_s13 }
  0x1e   : > { %p4794_p9 = pnand %p4792_p7, %p4780_p0  ;;  %p4801_p1 = por %p4800_p13, %p4799_p6 }
  0x20   : > { %p4795_p10 = pneg %p4794_p9 }
  0x22   : > { %p4802_p3 = pnand %p4801_p1, %p4795_p10 }
  0x24   : > { %4805 = shalt.err (!%p4802_p3)
}
  0x25   : > { %s4926_s14 = smov 256   ;;  %s4927_s15 = smov 16  }
  0x26   : > { %4112 = dma.hbm_to_vmem [thread:$0]  (!%p5016_p11), %s5637_s1, 8192, %s5009_s27, [#allocation4], %s4926_s14, %s4926_s14, %s4927_s15  }
  0x27   : > { %s4806_s8 = scalar_lea.hbm %s5638_s2, 32 }
  0x28   : > { %p4807_p6 = scmp.ne.s32.totalorder %s5638_s2, %s4806_s8  ;;  %p4813_p4 = scmp.lt.u32.totalorder %s4806_s8, %s5638_s2 }
  0x2a   : > { %p4809_p3 = pnand %p4807_p6, %p4780_p0 }
  0x2c   : > { %p4810_p2 = pneg %p4809_p3 }
  0x2e   : > { %p4815_p5 = pnand %p4813_p4, %p4810_p2 }
  0x30   : > { %4818 = shalt.err (!%p4815_p5)
}
  0x31   : > { %s4819_s27 = scalar_lea.vmem %s5024_s5, 32  ;;  %p4827_p13 = scmp.lt.s32.totalorder %s5024_s5, %s5024_s5 }
  0x32   : > { %p4820_p7 = scmp.ne.s32.totalorder %s5024_s5, %s4819_s27  ;;  %p4828_p1 = scmp.lt.s32.totalorder %s4819_s27, %s4819_s27 }
  0x34   : > { %p4822_p9 = pnand %p4820_p7, %p4780_p0  ;;  %p4829_p6 = por %p4828_p1, %p4827_p13 }
  0x36   : > { %p4823_p10 = pneg %p4822_p9 }
  0x38   : > { %p4830_p3 = pnand %p4829_p6, %p4823_p10 }
  0x3a   : > { %4833 = shalt.err (!%p4830_p3)
}
  0x3b   : > { %4115 = dma.hbm_to_vmem [thread:$0]  (!%p5016_p11), %s5638_s2, 32, %s5024_s5, [#allocation6]  }
  0x3c   : > { %s200_s15 = sand.u32 1, %s4922_s20   ;;  %s25_s26 = sadd.s32 1, %s4918_s19 }
  0x3d   : > { %p26_p0 = scmp.ge.s32.totalorder %s25_s26, 2  ;;  %s202_s30 = sand.u32 1, %s4910_s17  }
  0x3e   : > { %s4097_s6 = smul.u32 3200, %s202_s30  ;;  %s5098_s27 = scalar_lea.sflag [#allocation4], %s200_s15 }
  0x3f   : > { %s5657_s26 = smov (%p26_p0, %s25_s26), 0  ;;  %s4009_s28 = smul.u32 1600, %s4918_s19 }
  0x40   : > { %s100_s7 = ssub.s32 %s4918_s19, %s5657_s26  ;;  %s204_s8 = scalar_lea.vmem [#allocation7], %s4097_s6 }
  0x41   : > { %s211_s9 = sshll.u32 %s204_s8, 4  ;;  %p101_p2 = scmp.eq.s32.totalorder %s100_s7, 0  ;;  %s5091_s9 = int_to_ptr.vmem [resolvable:$true] %s211_s9 }
  0x42   : > { %s5089_s12 = scalar_lea.hbm %s5639_s3, %s4009_s28  ;;  %p4836_p4 = pneg %p5020_p12 }
  0x43   : > { %s5096_s5 = scalar_select %p101_p2, %s4910_s17, %s103_s22  }
  0x44   : > { %s4834_s13 = scalar_lea.hbm %s5089_s12, 51200  ;;  %s4839_s6 = scalar_lea.hbm %s5639_s3, 102400 }
  0x45   : > { %p4835_p11 = scmp.ne.s32.totalorder %s5089_s12, %s4834_s13  ;;  %p4840_p9 = scmp.lt.u32.totalorder %s5089_s12, %s5639_s3 }
  0x46   : > { %p4841_p10 = scmp.lt.u32.totalorder %s4839_s6, %s4834_s13  ;;  %p4843_p1 = scmp.lt.u32.totalorder %s4834_s13, %s5089_s12 }
  0x47   : > { %p4837_p5 = pnand %p4836_p4, %p4835_p11 }
  0x48   : > { %p4842_p13 = por %p4841_p10, %p4840_p9 }
  0x49   : > { %p4838_p7 = pneg %p4837_p5 }
  0x4a   : > { %p4844_p6 = por %p4843_p1, %p4842_p13 }
  0x4c   : > { %p4845_p3 = pnand %p4844_p6, %p4838_p7 }
  0x4e   : > { %4848 = shalt.err (!%p4845_p3)
}
  0x4f   : > { %s4849_s22 = scalar_lea.vmem %s5091_s9, 51200  ;;  %s4928_s15 = smov [#allocation7]  }
  0x50   : > { %p4850_p0 = scmp.ne.s32.totalorder %s5091_s9, %s4849_s22  ;;  %s4854_s8 = sshll.u32 %s4928_s15, 4  ;;  %s4855_s8 = int_to_ptr.vmem [resolvable:$false] %s4854_s8 }
  0x51   : > { %s4856_s10 = scalar_lea.vmem %s4855_s8, 102400  ;;  %p4857_p5 = scmp.lt.s32.totalorder %s5091_s9, %s4855_s8 }
  0x52   : > { %p4852_p2 = pnand %p4850_p0, %p4836_p4  ;;  %p4858_p9 = scmp.lt.s32.totalorder %s4856_s10, %s4849_s22 }
  0x54   : > { %p4853_p11 = pneg %p4852_p2  ;;  %p4859_p10 = por %p4858_p9, %p4857_p5 }
  0x56   : > { %p4860_p13 = pnand %p4859_p10, %p4853_p11 }
  0x58   : > { %4863 = shalt.err (!%p4860_p13)
}
  0x59   : > { %s4929_s11 = smov 3200   ;;  %s4930_s13 = smov 1600  }
  0x5a   : > { %s4931_s14 = smov 100   ;;  %223 = sbr.rel (%p5005_p8) target bundleno = 1041 (0x411), region = 36 }
  0x5b   : > { %4119 = dma.hbm_to_vmem [thread:$0]  (!%p5020_p12), %s5089_s12, 51200, %s5091_s9, %s5098_s27, %s4929_s11, %s4930_s13, %s4931_s14  }
  0x5c   : > { %p5649_p4 = scmp.ne.s32.totalorder (!%p5005_p8), %s5644_s23, 0 }
  0x61   : > { %4889 = dma.done.wait (%p5649_p4), [#allocation4], 8192  }
  0x62   : > { %4891 = vsyncadd (%p5649_p4), [#allocation4], 4294959104 }
  0x63   : > { %4893 = dma.done.wait (%p5649_p4), [#allocation6], 32  }
  0x64   : > { %4895 = vsyncadd (%p5649_p4), [#allocation6], 4294967264  ;;  %s233_s29 = sand.u32 1, %s3591_s21   ;;  %s235_s9 = sand.u32 1, %s4906_s16  }
  0x65   : > { %s4098_s25 = smul.u32 3200, %s235_s9  ;;  %s234_s12 = scalar_lea.sflag [#allocation4], %s233_s29 }
  0x66   : > { %p5650_p8 = scmp.ne.s32.totalorder %s5645_s24, 0 }
  0x67   : > { %s5139_s27 = scalar_lea.vmem [#allocation7], %s4098_s25 }
  0x68   : > { %4897 = dma.done.wait (%p5650_p8), %s234_s12, 51200  }
  0x69   : > { %4899 = vsyncadd (%p5650_p8), %s234_s12, 4294916096  ;;  %s277_s30 = smul.u32 25, %s4914_s18  ;;  %p3603_p7 = scmp.ne.s32.totalorder %s4914_s18, 0 }
  0x6a   : > { %v297_v0 = vld [vmem:[#allocation3 + $0x8] sm:$0xff] (!%p3603_p7)  ;;  %v299_v1 = vld [vmem:[#allocation3 + $0x18] sm:$0xff] (!%p3603_p7)  ;;  %v296_v2 = vld [vmem:[#allocation3] sm:$0xff] (!%p3603_p7) }
  0x6b   : > { %p280_p12 = scmp.lt.s32.totalorder %s277_s30, 49  ;;  %291 = sbr.rel (%p3603_p7) target bundleno = 408 (0x198), region = 52  ;;  %v4033_v3 = vpack.c.bf16 (!%p3603_p7), %v299_v1, %v297_v0  ;;  %v298_v4 = vld [vmem:[#allocation3 + $0x10] sm:$0xff] (!%p3603_p7)  ;;  %v301_v5 = vld [vmem:[#allocation3 + $0x28] sm:$0xff] (!%p3603_p7)  ;;  %v303_v6 = vld [vmem:[#allocation3 + $0x38] sm:$0xff] (!%p3603_p7) }
  0x6c   : > { %v4035_v7 = vpack.c.bf16 (!%p3603_p7), %v298_v4, %v296_v2  ;;  %v4037_v8 = vpack.c.bf16 (!%p3603_p7), %v303_v6, %v301_v5  ;;  %v300_v9 = vld [vmem:[#allocation3 + $0x20] sm:$0xff] (!%p3603_p7)  ;;  %v302_v10 = vld [vmem:[#allocation3 + $0x30] sm:$0xff] (!%p3603_p7)  ;;  %v305_v11 = vld [vmem:[#allocation3 + $0x48] sm:$0xff] (!%p3603_p7) }
  0x6d   : > { %s5659_s30 = smov (!%p280_p12, %s277_s30), 49  ;;  %4034 = vmatprep.subr.bf16.mxu0 (!%p3603_p7), %v4033_v3  ;;  %v307_v12 = vld [vmem:[#allocation3 + $0x58] sm:$0xff] (!%p3603_p7)  ;;  %v4039_v13 = vpack.c.bf16 (!%p3603_p7), %v302_v10, %v300_v9  ;;  %v304_v15 = vld [vmem:[#allocation3 + $0x40] sm:$0xff] (!%p3603_p7)  ;;  %v306_v16 = vld [vmem:[#allocation3 + $0x50] sm:$0xff] (!%p3603_p7) }
  0x6e   : > { %s3602_s23 = sshll.u32 %s5659_s30, 3  ;;  %4036 = vmatpush1.bf16.msra.mxu0 (!%p3603_p7), %v4035_v7  ;;  %v4041_v14 = vpack.c.bf16 (!%p3603_p7), %v307_v12, %v305_v11  ;;  %v309_v17 = vld [vmem:[#allocation3 + $0x68] sm:$0xff] (!%p3603_p7)  ;;  %v311_v18 = vld [vmem:[#allocation3 + $0x78] sm:$0xff] (!%p3603_p7)  ;;  %v4043_v19 = vpack.c.bf16 (!%p3603_p7), %v306_v16, %v304_v15  ;;  %v308_v21 = vld [vmem:[#allocation3 + $0x60] sm:$0xff] (!%p3603_p7) }
  0x6f   : > { %s5149_s7 = scalar_lea.vmem %s5640_s4, %s3602_s23  ;;  %4038 = vmatprep.subr.bf16.mxu0 (!%p3603_p7), %v4037_v8  ;;  %v4045_v20 = vpack.c.bf16 (!%p3603_p7), %v311_v18, %v309_v17  ;;  %v310_v22 = vld [vmem:[#allocation3 + $0x70] sm:$0xff] (!%p3603_p7)  ;;  %v313_v23 = vld [vmem:[#allocation3 + $0x88] sm:$0xff] (!%p3603_p7)  ;;  %v315_v24 = vld [vmem:[#allocation3 + $0x98] sm:$0xff] (!%p3603_p7) }
  0x70   : > { %v4047_v25 = vpack.c.bf16 (!%p3603_p7), %v310_v22, %v308_v21  ;;  %v4049_v26 = vpack.c.bf16 (!%p3603_p7), %v315_v24, %v313_v23  ;;  %v312_v27 = vld [vmem:[#allocation3 + $0x80] sm:$0xff] (!%p3603_p7)  ;;  %v314_v28 = vld [vmem:[#allocation3 + $0x90] sm:$0xff] (!%p3603_p7)  ;;  %v317_v29 = vld [vmem:[#allocation3 + $0xa8] sm:$0xff] (!%p3603_p7) }
  0x71   : > { %v319_v30 = vld [vmem:[#allocation3 + $0xb8] sm:$0xff] (!%p3603_p7)  ;;  %v4051_v31 = vpack.c.bf16 (!%p3603_p7), %v314_v28, %v312_v27  ;;  %v316_v33 = vld [vmem:[#allocation3 + $0xa0] sm:$0xff] (!%p3603_p7)  ;;  %v318_v34 = vld [vmem:[#allocation3 + $0xb0] sm:$0xff] (!%p3603_p7) }
  0x72   : > { %4040 = vmatpush1.bf16.msra.mxu0 %v4039_v13  ;;  %v4053_v32 = vpack.c.bf16 %v319_v30, %v317_v29  ;;  %v321_v35 = vld [vmem:[#allocation3 + $0xc8] sm:$0xff]  ;;  %v323_v36 = vld [vmem:[#allocation3 + $0xd8] sm:$0xff]  ;;  %v4055_v37 = vpack.c.bf16 %v318_v34, %v316_v33  ;;  %v320_v39 = vld [vmem:[#allocation3 + $0xc0] sm:$0xff] }
  0x73   : > { %4042 = vmatprep.subr.bf16.mxu0 %v4041_v14  ;;  %v4057_v38 = vpack.c.bf16 %v323_v36, %v321_v35  ;;  %v322_v40 = vld [vmem:[#allocation3 + $0xd0] sm:$0xff]  ;;  %v325_v42 = vld [vmem:[#allocation3 + $0xe8] sm:$0xff]  ;;  %v327_v43 = vld [vmem:[#allocation3 + $0xf8] sm:$0xff]  ;;  %v362_v36 = vlaneseq }
  0x74   : > { %v5155_v41 = vld [vmem:[%s5636_s0 + $0x8] sm:$0xff]  ;;  %v4059_v45 = vpack.c.bf16 %v322_v40, %v320_v39  ;;  %v4061_v46 = vpack.c.bf16 %v327_v43, %v325_v42  ;;  %v324_v47 = vld [vmem:[#allocation3 + $0xe0] sm:$0xff]  ;;  %v329_v49 = vld [vmem:[#allocation3 + $0x108] sm:$0xff] }
  0x75   : > { %v295_v44 = vmul.f32 %v5155_v41, %v5155_v41  ;;  %v326_v48 = vld [vmem:[#allocation3 + $0xf0] sm:$0xff]  ;;  %v331_v50 = vld [vmem:[#allocation3 + $0x118] sm:$0xff]  ;;  %v328_v53 = vld [vmem:[#allocation3 + $0x100] sm:$0xff] }
  0x76   : > { %4044 = vmatpush1.bf16.msra.mxu0 %v4043_v19  ;;  %v4063_v51 = vpack.c.bf16 %v326_v48, %v324_v47  ;;  %v4065_v52 = vpack.c.bf16 %v331_v50, %v329_v49  ;;  %v330_v54 = vld [vmem:[#allocation3 + $0x110] sm:$0xff]  ;;  %v333_v55 = vld [vmem:[#allocation3 + $0x128] sm:$0xff]  ;;  %v335_v56 = vld [vmem:[#allocation3 + $0x138] sm:$0xff] }
  0x77   : > { %4046 = vmatprep.subr.bf16.mxu0 %v4045_v20  ;;  %436 = vmatprep.mubr.f32.mxu0 %v295_v44  ;;  %v4067_v57 = vpack.c.bf16 %v330_v54, %v328_v53  ;;  %v4069_v58 = vpack.c.bf16 %v335_v56, %v333_v55  ;;  %v332_v59 = vld [vmem:[#allocation3 + $0x120] sm:$0xff]  ;;  %v334_v60 = vld [vmem:[#allocation3 + $0x130] sm:$0xff]  ;;  %v337_v61 = vld [vmem:[#allocation3 + $0x148] sm:$0xff] }
  0x78   : > { %v339_v62 = vld [vmem:[#allocation3 + $0x158] sm:$0xff]  ;;  %v4071_v63 = vpack.c.bf16 %v334_v60, %v332_v59  ;;  %v336_v1 = vld [vmem:[#allocation3 + $0x140] sm:$0xff]  ;;  %v338_v2 = vld [vmem:[#allocation3 + $0x150] sm:$0xff] }
  0x79   : > { %v4073_v0 = vpack.c.bf16 %v339_v62, %v337_v61  ;;  %v341_v3 = vld [vmem:[#allocation3 + $0x168] sm:$0xff]  ;;  %v343_v4 = vld [vmem:[#allocation3 + $0x178] sm:$0xff]  ;;  %v4075_v5 = vpack.c.bf16 %v338_v2, %v336_v1  ;;  %v340_v7 = vld [vmem:[#allocation3 + $0x160] sm:$0xff] }
  0x7a   : > { %4048 = vmatpush1.bf16.msra.mxu0 %v4047_v25  ;;  %v4077_v6 = vpack.c.bf16 %v343_v4, %v341_v3  ;;  %v342_v8 = vld [vmem:[#allocation3 + $0x170] sm:$0xff]  ;;  %v345_v9 = vld [vmem:[#allocation3 + $0x188] sm:$0xff]  ;;  %v347_v10 = vld [vmem:[#allocation3 + $0x198] sm:$0xff] }
  0x7b   : > { %4050 = vmatprep.subr.bf16.mxu0 %v4049_v26  ;;  %v4079_v11 = vpack.c.bf16 %v342_v8, %v340_v7  ;;  %v4081_v12 = vpack.c.bf16 %v347_v10, %v345_v9  ;;  %v344_v13 = vld [vmem:[#allocation3 + $0x180] sm:$0xff]  ;;  %v346_v14 = vld [vmem:[#allocation3 + $0x190] sm:$0xff]  ;;  %v349_v15 = vld [vmem:[#allocation3 + $0x1a8] sm:$0xff] }
  0x7c   : > { %v351_v16 = vld [vmem:[#allocation3 + $0x1b8] sm:$0xff]  ;;  %v4083_v17 = vpack.c.bf16 %v346_v14, %v344_v13  ;;  %v348_v19 = vld [vmem:[#allocation3 + $0x1a0] sm:$0xff]  ;;  %v350_v20 = vld [vmem:[#allocation3 + $0x1b0] sm:$0xff] }
  0x7d   : > { %v4085_v18 = vpack.c.bf16 %v351_v16, %v349_v15  ;;  %v353_v21 = vld [vmem:[#allocation3 + $0x1c8] sm:$0xff]  ;;  %v355_v22 = vld [vmem:[#allocation3 + $0x1d8] sm:$0xff]  ;;  %v4087_v23 = vpack.c.bf16 %v350_v20, %v348_v19  ;;  %v352_v25 = vld [vmem:[#allocation3 + $0x1c0] sm:$0xff] }
  0x7e   : > { %4052 = vmatpush1.bf16.msra.mxu0 %v4051_v31  ;;  %v4089_v24 = vpack.c.bf16 %v355_v22, %v353_v21  ;;  %v354_v26 = vld [vmem:[#allocation3 + $0x1d0] sm:$0xff]  ;;  %v357_v27 = vld [vmem:[#allocation3 + $0x1e8] sm:$0xff]  ;;  %v359_v28 = vld [vmem:[#allocation3 + $0x1f8] sm:$0xff] }
  0x7f   : > { %4054 = vmatprep.subr.bf16.mxu0 %v4053_v32  ;;  %v4091_v29 = vpack.c.bf16 %v354_v26, %v352_v25  ;;  %v4093_v30 = vpack.c.bf16 %v359_v28, %v357_v27  ;;  %v356_v31 = vld [vmem:[#allocation3 + $0x1e0] sm:$0xff]  ;;  %v358_v32 = vld [vmem:[#allocation3 + $0x1f0] sm:$0xff]  ;;  %v292_v34 = vld [vmem:[%s5636_s0] sm:$0xff] }
  0x80   : > { %v4095_v33 = vpack.c.bf16 %v358_v32, %v356_v31  ;;  %v294_v35 = vmul.f32 %v292_v34, %v292_v34  ;;  %v360_v39 = vld [vmem:[#allocation5] sm:$0x3] }
  0x82   : > { %4056 = vmatpush1.bf16.msra.mxu0 %v4055_v37  ;;  %v363_v37 = vshrl.u32 %v362_v36, 7 }
  0x83   : > { %4058 = vmatprep.subr.bf16.mxu0 %v4057_v38 }
  0x84   : > { %v364_v38 = vsub.s32 0, %v363_v37  ;;  %v368_v40 = vsub.s32 1, %v363_v37 }
  0x86   : > { %4060 = vmatpush1.bf16.msra.mxu0 %v4059_v45  ;;  %v365_v42 = vrot.slane %v360_v39, %v364_v38  ;;  %v369_v43 = vrot.slane %v360_v39, %v368_v40 }
  0x87   : > { %4062 = vmatprep.subr.bf16.mxu0 %v4061_v46 }
  0x8a   : > { %4064 = vmatpush1.bf16.msra.mxu0 %v4063_v51 }
  0x8b   : > { %4066 = vmatprep.subr.bf16.mxu0 %v4065_v52 }
  0x8e   : > { %4068 = vmatpush1.bf16.msra.mxu0 %v4067_v57 }
  0x8f   : > { %4070 = vmatprep.subr.bf16.mxu0 %v4069_v58 }
  0x92   : > { %4072 = vmatpush1.bf16.msra.mxu0 %v4071_v63 }
  0x93   : > { %4074 = vmatprep.subr.bf16.mxu0 %v4073_v0 }
  0x96   : > { %4076 = vmatpush1.bf16.msra.mxu0 %v4075_v5 }
  0x97   : > { %4078 = vmatprep.subr.bf16.mxu0 %v4077_v6 }
  0x9a   : > { %4080 = vmatpush1.bf16.msra.mxu0 %v4079_v11 }
  0x9b   : > { %4082 = vmatprep.subr.bf16.mxu0 %v4081_v12 }
  0x9e   : > { %4084 = vmatpush1.bf16.msra.mxu0 %v4083_v17 }
  0x9f   : > { %4086 = vmatprep.subr.bf16.mxu0 %v4085_v18 }
  0xa2   : > { %4088 = vmatpush1.bf16.msra.mxu0 %v4087_v23 }
  0xa3   : > { %4090 = vmatprep.subr.bf16.mxu0 %v4089_v24 }
  0xa6   : > { %4092 = vmatpush1.bf16.msra.mxu0 %v4091_v29 }
  0xa7   : > { %4094 = vmatprep.subr.bf16.mxu0 %v4093_v30 }
  0xaa   : > { %4096 = vmatpush1.bf16.msra.mxu0 %v4095_v33 }
  0xad   : > { %437 = vmatmul.mubr.f32.vlgmr.msra.gmra.mrb[0].mxu0 %v294_v35 }
 0x180   : > { %v438_v44 = vpop.f32.mrb[0].mxu0 }
 0x181   : > { %v439_v45 = vadd.f32 %v438_v44, %v365_v42  ;;  %v440_v46 = vpop.f32.mrb[1].mxu0 }
 0x182   : > { %v441_v47 = vadd.f32 %v440_v46, %v369_v43 }
 0x183   : > { %4180 = vrsqrt.f32 %v439_v45  ;;  %vm445_vm0 = vcmp.eq.f32.partialorder %v439_v45, inf  ;;  %v448_v51 = vand.u32 2147483648, %v439_v45  ;;  %vm447_vm1 = vcmp.eq.f32.partialorder %v439_v45, 0.0 }
 0x184   : > { %4182 = vrsqrt.f32 %v441_v47  ;;  %vm452_vm2 = vcmp.eq.f32.partialorder %v441_v47, inf  ;;  %v455_v54 = vand.u32 2147483648, %v441_v47  ;;  %vm454_vm3 = vcmp.eq.f32.partialorder %v441_v47, 0.0 }
 0x18d   : > { %v4181_v48 = vpop.eup %4180 }
 0x18e   : > { %v4183_v49 = vpop.eup %4182  ;;  %v444_v50 = vmul.f32 %v4181_v48, %v439_v45 }
 0x18f   : > { %v451_v52 = vmul.f32 %v4183_v49, %v441_v47 }
 0x190   : > { %v446_v53 = vsel %vm445_vm0, %v439_v45, %v444_v50 }
 0x191   : > { %v449_v55 = vsel %vm447_vm1, %v448_v51, %v446_v53  ;;  %v453_v56 = vsel %vm452_vm2, %v441_v47, %v451_v52 }
 0x192   : > { %v457_v57 = vmul.f32 %v449_v55, %v292_v34  ;;  %v456_v58 = vsel %vm454_vm3, %v455_v54, %v453_v56 }
 0x193   : > { %v458_v59 = vmul.f32 %v456_v58, %v5155_v41 }
 0x195   : > { %v4010_v60 = vpack.c.bf16 %v458_v59, %v457_v57 }
 0x197   : > { %467 = vst [vmem:[#allocation2] sm:$0xff] %v4010_v60 }
 0x198 PF: > { %v4184_v61 = vld [vmem:[%s5139_s27 + $0x4] ss:$100 sps:$4 sm:$0xff]   ;;  %v4187_v63 = vld [vmem:[%s5139_s27 + $0xcc] ss:$100 sps:$4 sm:$0xff]   ;;  %v4190_v0 = vld [vmem:[%s5139_s27 + $0x194] ss:$100 sps:$4 sm:$0xff]  }
 0x199   : > { %v4186_v62 = vld [vmem:[%s5139_s27] ss:$100 sps:$4 sm:$0xff]   ;;  %2908 = vmatprep.subr.bf16.mxu0 %v4184_v61  ;;  %v4189_v41 = vld [vmem:[%s5139_s27 + $0xc8] ss:$100 sps:$4 sm:$0xff]   ;;  %v4192_v1 = vld [vmem:[%s5139_s27 + $0x190] ss:$100 sps:$4 sm:$0xff]  }
 0x19a   : > { %2909 = vmatpush1.bf16.msra.mxu0 %v4186_v62  ;;  %v4193_v2 = vld [vmem:[%s5139_s27 + $0x25c] ss:$100 sps:$4 sm:$0xff]   ;;  %v4208_v4 = vld [vmem:[%s5139_s27 + $0xc] ss:$100 sps:$4 sm:$0xff]   ;;  %v4196_v6 = vld [vmem:[%s5139_s27 + $0x324] ss:$100 sps:$4 sm:$0xff]  }
 0x19b   : > { %2910 = vmatprep.subr.bf16.mxu0 %v4187_v63  ;;  %v4195_v3 = vld [vmem:[%s5139_s27 + $0x258] ss:$100 sps:$4 sm:$0xff]   ;;  %v4210_v5 = vld [vmem:[%s5139_s27 + $0x8] ss:$100 sps:$4 sm:$0xff]   ;;  %2949 = vmatprep.subr.bf16.mxu1 %v4208_v4  ;;  %v4216_v8 = vld [vmem:[%s5139_s27 + $0xd0] ss:$100 sps:$4 sm:$0xff]  }
 0x19c   : > { %2950 = vmatpush1.bf16.msra.mxu1 %v4210_v5  ;;  %v4214_v7 = vld [vmem:[%s5139_s27 + $0xd4] ss:$100 sps:$4 sm:$0xff]   ;;  %v4198_v9 = vld [vmem:[%s5139_s27 + $0x320] ss:$100 sps:$4 sm:$0xff]   ;;  %v4199_v10 = vld [vmem:[%s5139_s27 + $0x3ec] ss:$100 sps:$4 sm:$0xff]  }
 0x19d   : > { %2951 = vmatprep.subr.bf16.mxu1 %v4214_v7  ;;  %v4220_v11 = vld [vmem:[%s5139_s27 + $0x19c] ss:$100 sps:$4 sm:$0xff]   ;;  %v4201_v13 = vld [vmem:[%s5139_s27 + $0x3e8] ss:$100 sps:$4 sm:$0xff]   ;;  %v4202_v15 = vld [vmem:[%s5139_s27 + $0x4b4] ss:$100 sps:$4 sm:$0xff]  }
 0x19e   : > { %2911 = vmatpush1.bf16.msra.mxu0 %v4189_v41  ;;  %v4222_v12 = vld [vmem:[%s5139_s27 + $0x198] ss:$100 sps:$4 sm:$0xff]   ;;  %v4226_v14 = vld [vmem:[%s5139_s27 + $0x264] ss:$100 sps:$4 sm:$0xff]   ;;  %v4204_v17 = vld [vmem:[%s5139_s27 + $0x4b0] ss:$100 sps:$4 sm:$0xff]  }
 0x19f   : > { %2912 = vmatprep.subr.bf16.mxu0 %v4190_v0  ;;  %v4228_v16 = vld [vmem:[%s5139_s27 + $0x260] ss:$100 sps:$4 sm:$0xff]   ;;  %v4232_v18 = vld [vmem:[%s5139_s27 + $0x32c] ss:$100 sps:$4 sm:$0xff]   ;;  %v4207_v21 = vld [vmem:[%s5139_s27 + $0x578] ss:$100 sps:$4 sm:$0xff]  }
 0x1a0   : > { %2952 = vmatpush1.bf16.msra.mxu1 %v4216_v8  ;;  %v4205_v19 = vld [vmem:[%s5139_s27 + $0x57c] ss:$100 sps:$4 sm:$0xff]   ;;  %v4234_v20 = vld [vmem:[%s5139_s27 + $0x328] ss:$100 sps:$4 sm:$0xff]   ;;  %v4238_v22 = vld [vmem:[%s5139_s27 + $0x3f4] ss:$100 sps:$4 sm:$0xff]  }
 0x1a1   : > { %2953 = vmatprep.subr.bf16.mxu1 %v4220_v11  ;;  %v4211_v23 = vld [vmem:[%s5139_s27 + $0x644] ss:$100 sps:$4 sm:$0xff]   ;;  %v4240_v24 = vld [vmem:[%s5139_s27 + $0x3f0] ss:$100 sps:$4 sm:$0xff]   ;;  %v4244_v26 = vld [vmem:[%s5139_s27 + $0x4bc] ss:$100 sps:$4 sm:$0xff]  }
 0x1a2   : > { %2913 = vmatpush1.bf16.msra.mxu0 %v4192_v1  ;;  %v4213_v25 = vld [vmem:[%s5139_s27 + $0x640] ss:$100 sps:$4 sm:$0xff]   ;;  %v4217_v27 = vld [vmem:[%s5139_s27 + $0x70c] ss:$100 sps:$4 sm:$0xff]   ;;  %v468_v28 = vld [vmem:[#allocation2] sm:$0xff] }
 0x1a3   : > { %2914 = vmatprep.subr.bf16.mxu0 %v4193_v2  ;;  %v4219_v29 = vld [vmem:[%s5139_s27 + $0x708] ss:$100 sps:$4 sm:$0xff]   ;;  %v4246_v30 = vld [vmem:[%s5139_s27 + $0x4b8] ss:$100 sps:$4 sm:$0xff]   ;;  %v5197_v31 = vcombine.high %v468_v28, %v468_v28  ;;  %v4225_v34 = vld [vmem:[%s5139_s27 + $0x7d0] ss:$100 sps:$4 sm:$0xff]   ;;  %v5227_v59 = vcombine.low %v468_v28, %v468_v28 }
 0x1a4   : > { %2954 = vmatpush1.bf16.msra.mxu1 %v4222_v12  ;;  %v4250_v32 = vld [vmem:[%s5139_s27 + $0x584] ss:$100 sps:$4 sm:$0xff]   ;;  %v4223_v33 = vld [vmem:[%s5139_s27 + $0x7d4] ss:$100 sps:$4 sm:$0xff]   ;;  %v4256_v36 = vld [vmem:[%s5139_s27 + $0x64c] ss:$100 sps:$4 sm:$0xff]  }
 0x1a5   : > { %2955 = vmatprep.subr.bf16.mxu1 %v4226_v14  ;;  %2940 = vmatprep.mubr.bf16.mxu0 %v5197_v31  ;;  %v4252_v35 = vld [vmem:[%s5139_s27 + $0x580] ss:$100 sps:$4 sm:$0xff]   ;;  %v4231_v38 = vld [vmem:[%s5139_s27 + $0x898] ss:$100 sps:$4 sm:$0xff]   ;;  %v4259_v39 = vld [vmem:[%s5139_s27 + $0x648] ss:$100 sps:$4 sm:$0xff]  }
 0x1a6   : > { %2915 = vmatpush1.bf16.msra.mxu0 %v4195_v3  ;;  %2981 = vmatprep.mubr.bf16.mxu1 %v5197_v31  ;;  %v4229_v37 = vld [vmem:[%s5139_s27 + $0x89c] ss:$100 sps:$4 sm:$0xff]   ;;  %v4264_v40 = vld [vmem:[%s5139_s27 + $0x714] ss:$100 sps:$4 sm:$0xff]   ;;  %v4235_v42 = vld [vmem:[%s5139_s27 + $0x964] ss:$100 sps:$4 sm:$0xff]  }
 0x1a7   : > { %2916 = vmatprep.subr.bf16.mxu0 %v4196_v6  ;;  %v4237_v43 = vld [vmem:[%s5139_s27 + $0x960] ss:$100 sps:$4 sm:$0xff]   ;;  %v4266_v44 = vld [vmem:[%s5139_s27 + $0x710] ss:$100 sps:$4 sm:$0xff]   ;;  %v4243_v47 = vld [vmem:[%s5139_s27 + $0xa28] ss:$100 sps:$4 sm:$0xff]  }
 0x1a8   : > { %2956 = vmatpush1.bf16.msra.mxu1 %v4228_v16  ;;  %v4270_v45 = vld [vmem:[%s5139_s27 + $0x7dc] ss:$100 sps:$4 sm:$0xff]   ;;  %v4241_v46 = vld [vmem:[%s5139_s27 + $0xa2c] ss:$100 sps:$4 sm:$0xff]   ;;  %v4276_v49 = vld [vmem:[%s5139_s27 + $0x8a4] ss:$100 sps:$4 sm:$0xff]  }
 0x1a9   : > { %2957 = vmatprep.subr.bf16.mxu1 %v4232_v18  ;;  %v4272_v48 = vld [vmem:[%s5139_s27 + $0x7d8] ss:$100 sps:$4 sm:$0xff]   ;;  %v4249_v51 = vld [vmem:[%s5139_s27 + $0xaf0] ss:$100 sps:$4 sm:$0xff]   ;;  %v4278_v52 = vld [vmem:[%s5139_s27 + $0x8a0] ss:$100 sps:$4 sm:$0xff]  }
 0x1aa   : > { %2917 = vmatpush1.bf16.msra.mxu0 %v4198_v9  ;;  %v4247_v50 = vld [vmem:[%s5139_s27 + $0xaf4] ss:$100 sps:$4 sm:$0xff]   ;;  %v4282_v53 = vld [vmem:[%s5139_s27 + $0x96c] ss:$100 sps:$4 sm:$0xff]   ;;  %v4253_v54 = vld [vmem:[%s5139_s27 + $0xbbc] ss:$100 sps:$4 sm:$0xff]  }
 0x1ab   : > { %2918 = vmatprep.subr.bf16.mxu0 %v4199_v10  ;;  %v4255_v55 = vld [vmem:[%s5139_s27 + $0xbb8] ss:$100 sps:$4 sm:$0xff]   ;;  %v4284_v56 = vld [vmem:[%s5139_s27 + $0x968] ss:$100 sps:$4 sm:$0xff]   ;;  %v4261_v60 = vld [vmem:[%s5139_s27 + $0x10] ss:$100 sps:$4 sm:$0xff]  }
 0x1ac   : > { %2958 = vmatpush1.bf16.msra.mxu1 %v4234_v20  ;;  %v4288_v57 = vld [vmem:[%s5139_s27 + $0xa34] ss:$100 sps:$4 sm:$0xff]   ;;  %v4294_v62 = vld [vmem:[%s5139_s27 + $0xafc] ss:$100 sps:$4 sm:$0xff]   ;;  %v4300_v1 = vld [vmem:[%s5139_s27 + $0xbc4] ss:$100 sps:$4 sm:$0xff]  }
 0x1ad   : > { %2959 = vmatprep.subr.bf16.mxu1 %v4238_v22  ;;  %v4263_v58 = vld [vmem:[%s5139_s27 + $0x14] ss:$100 sps:$4 sm:$0xff]   ;;  %v4269_v63 = vld [vmem:[%s5139_s27 + $0xdc] ss:$100 sps:$4 sm:$0xff]   ;;  %v4275_v2 = vld [vmem:[%s5139_s27 + $0x1a4] ss:$100 sps:$4 sm:$0xff]  }
 0x1ae   : > { %2919 = vmatpush1.bf16.msra.mxu0 %v4201_v13  ;;  %v4290_v61 = vld [vmem:[%s5139_s27 + $0xa30] ss:$100 sps:$4 sm:$0xff]   ;;  %v4267_v41 = vld [vmem:[%s5139_s27 + $0xd8] ss:$100 sps:$4 sm:$0xff]   ;;  %v4273_v3 = vld [vmem:[%s5139_s27 + $0x1a0] ss:$100 sps:$4 sm:$0xff]  }
 0x1af   : > { %2920 = vmatprep.subr.bf16.mxu0 %v4202_v15  ;;  %v4296_v0 = vld [vmem:[%s5139_s27 + $0xaf8] ss:$100 sps:$4 sm:$0xff]   ;;  %v4302_v4 = vld [vmem:[%s5139_s27 + $0xbc0] ss:$100 sps:$4 sm:$0xff]   ;;  %v4281_v6 = vld [vmem:[%s5139_s27 + $0x26c] ss:$100 sps:$4 sm:$0xff]  }
 0x1b0   : > { %2960 = vmatpush1.bf16.msra.mxu1 %v4240_v24  ;;  %v4308_v5 = vld [vmem:[%s5139_s27 + $0x1c] ss:$100 sps:$4 sm:$0xff]   ;;  %v4279_v7 = vld [vmem:[%s5139_s27 + $0x268] ss:$100 sps:$4 sm:$0xff]   ;;  %v4287_v10 = vld [vmem:[%s5139_s27 + $0x334] ss:$100 sps:$4 sm:$0xff]  }
 0x1b1   : > { %2961 = vmatprep.subr.bf16.mxu1 %v4244_v26  ;;  %v4306_v8 = vld [vmem:[%s5139_s27 + $0x18] ss:$100 sps:$4 sm:$0xff]   ;;  %v4314_v9 = vld [vmem:[%s5139_s27 + $0xe4] ss:$100 sps:$4 sm:$0xff]   ;;  %v4285_v11 = vld [vmem:[%s5139_s27 + $0x330] ss:$100 sps:$4 sm:$0xff]  }
 0x1b2   : > { %2921 = vmatpush1.bf16.msra.mxu0 %v4204_v17  ;;  %v4312_v12 = vld [vmem:[%s5139_s27 + $0xe0] ss:$100 sps:$4 sm:$0xff]   ;;  %v4320_v13 = vld [vmem:[%s5139_s27 + $0x1ac] ss:$100 sps:$4 sm:$0xff]   ;;  %v4291_v15 = vld [vmem:[%s5139_s27 + $0x3f8] ss:$100 sps:$4 sm:$0xff]  }
 0x1b3   : > { %2922 = vmatprep.subr.bf16.mxu0 %v4205_v19  ;;  %v4293_v14 = vld [vmem:[%s5139_s27 + $0x3fc] ss:$100 sps:$4 sm:$0xff]   ;;  %v4318_v16 = vld [vmem:[%s5139_s27 + $0x1a8] ss:$100 sps:$4 sm:$0xff]   ;;  %v4326_v17 = vld [vmem:[%s5139_s27 + $0x274] ss:$100 sps:$4 sm:$0xff]  }
 0x1b4   : > { %2962 = vmatpush1.bf16.msra.mxu1 %v4246_v30  ;;  %v4299_v18 = vld [vmem:[%s5139_s27 + $0x4c4] ss:$100 sps:$4 sm:$0xff]   ;;  %v4324_v20 = vld [vmem:[%s5139_s27 + $0x270] ss:$100 sps:$4 sm:$0xff]   ;;  %v4330_v24 = vld [vmem:[%s5139_s27 + $0x338] ss:$100 sps:$4 sm:$0xff]  }
 0x1b5   : > { %2963 = vmatprep.subr.bf16.mxu1 %v4250_v32  ;;  %v4297_v19 = vld [vmem:[%s5139_s27 + $0x4c0] ss:$100 sps:$4 sm:$0xff]   ;;  %v4305_v22 = vld [vmem:[%s5139_s27 + $0x58c] ss:$100 sps:$4 sm:$0xff]   ;;  %v4311_v26 = vld [vmem:[%s5139_s27 + $0x654] ss:$100 sps:$4 sm:$0xff]  }
 0x1b6   : > { %2923 = vmatpush1.bf16.msra.mxu0 %v4207_v21  ;;  %v4332_v21 = vld [vmem:[%s5139_s27 + $0x33c] ss:$100 sps:$4 sm:$0xff]  }
 0x1b7   : > { %2924 = vmatprep.subr.bf16.mxu0 %v4211_v23  ;;  %v4303_v23 = vld [vmem:[%s5139_s27 + $0x588] ss:$100 sps:$4 sm:$0xff]   ;;  %v4336_v28 = vld [vmem:[%s5139_s27 + $0x400] ss:$100 sps:$4 sm:$0xff]   ;;  %v4315_v32 = vld [vmem:[%s5139_s27 + $0x718] ss:$100 sps:$4 sm:$0xff]  }
 0x1b8   : > { %2964 = vmatpush1.bf16.msra.mxu1 %v4252_v35  ;;  %v4317_v30 = vld [vmem:[%s5139_s27 + $0x71c] ss:$100 sps:$4 sm:$0xff]   ;;  %v4323_v35 = vld [vmem:[%s5139_s27 + $0x7e4] ss:$100 sps:$4 sm:$0xff]  }
 0x1b9   : > { %2965 = vmatprep.subr.bf16.mxu1 %v4256_v36  ;;  %v4321_v36 = vld [vmem:[%s5139_s27 + $0x7e0] ss:$100 sps:$4 sm:$0xff]  }
 0x1ba   : > { %2925 = vmatpush1.bf16.msra.mxu0 %v4213_v25  ;;  %v4338_v25 = vld [vmem:[%s5139_s27 + $0x404] ss:$100 sps:$4 sm:$0xff]  }
 0x1bb   : > { %2926 = vmatprep.subr.bf16.mxu0 %v4217_v27  ;;  %v4309_v27 = vld [vmem:[%s5139_s27 + $0x650] ss:$100 sps:$4 sm:$0xff]  }
 0x1bc   : > { %2966 = vmatpush1.bf16.msra.mxu1 %v4259_v39  ;;  %v4329_v39 = vld [vmem:[%s5139_s27 + $0x8ac] ss:$100 sps:$4 sm:$0xff]  }
 0x1bd   : > { %2967 = vmatprep.subr.bf16.mxu1 %v4264_v40  ;;  %v4327_v40 = vld [vmem:[%s5139_s27 + $0x8a8] ss:$100 sps:$4 sm:$0xff]  }
 0x1be   : > { %2927 = vmatpush1.bf16.msra.mxu0 %v4219_v29  ;;  %v4344_v29 = vld [vmem:[%s5139_s27 + $0x4cc] ss:$100 sps:$4 sm:$0xff]  }
 0x1bf   : > { %2928 = vmatprep.subr.bf16.mxu0 %v4223_v33  ;;  %v4342_v33 = vld [vmem:[%s5139_s27 + $0x4c8] ss:$100 sps:$4 sm:$0xff]  }
 0x1c0   : > { %2968 = vmatpush1.bf16.msra.mxu1 %v4266_v44  ;;  %v4335_v44 = vld [vmem:[%s5139_s27 + $0x974] ss:$100 sps:$4 sm:$0xff]  }
 0x1c1   : > { %2969 = vmatprep.subr.bf16.mxu1 %v4270_v45  ;;  %v4333_v45 = vld [vmem:[%s5139_s27 + $0x970] ss:$100 sps:$4 sm:$0xff]  }
 0x1c2   : > { %2929 = vmatpush1.bf16.msra.mxu0 %v4225_v34  ;;  %v4350_v34 = vld [vmem:[%s5139_s27 + $0x594] ss:$100 sps:$4 sm:$0xff]  }
 0x1c3   : > { %2930 = vmatprep.subr.bf16.mxu0 %v4229_v37  ;;  %v4348_v37 = vld [vmem:[%s5139_s27 + $0x590] ss:$100 sps:$4 sm:$0xff]  }
 0x1c4   : > { %2970 = vmatpush1.bf16.msra.mxu1 %v4272_v48  ;;  %v4341_v48 = vld [vmem:[%s5139_s27 + $0xa3c] ss:$100 sps:$4 sm:$0xff]  }
 0x1c5   : > { %2971 = vmatprep.subr.bf16.mxu1 %v4276_v49  ;;  %v4339_v49 = vld [vmem:[%s5139_s27 + $0xa38] ss:$100 sps:$4 sm:$0xff]  }
 0x1c6   : > { %2931 = vmatpush1.bf16.msra.mxu0 %v4231_v38  ;;  %v4356_v38 = vld [vmem:[%s5139_s27 + $0x65c] ss:$100 sps:$4 sm:$0xff]  }
 0x1c7   : > { %2932 = vmatprep.subr.bf16.mxu0 %v4235_v42  ;;  %v4354_v42 = vld [vmem:[%s5139_s27 + $0x658] ss:$100 sps:$4 sm:$0xff]  }
 0x1c8   : > { %2972 = vmatpush1.bf16.msra.mxu1 %v4278_v52  ;;  %v4347_v52 = vld [vmem:[%s5139_s27 + $0xb04] ss:$100 sps:$4 sm:$0xff]  }
 0x1c9   : > { %2973 = vmatprep.subr.bf16.mxu1 %v4282_v53  ;;  %v4345_v53 = vld [vmem:[%s5139_s27 + $0xb00] ss:$100 sps:$4 sm:$0xff]  }
 0x1ca   : > { %2933 = vmatpush1.bf16.msra.mxu0 %v4237_v43  ;;  %v4362_v43 = vld [vmem:[%s5139_s27 + $0x724] ss:$100 sps:$4 sm:$0xff]  }
 0x1cb   : > { %2934 = vmatprep.subr.bf16.mxu0 %v4241_v46  ;;  %v4360_v46 = vld [vmem:[%s5139_s27 + $0x720] ss:$100 sps:$4 sm:$0xff]  }
 0x1cc   : > { %2974 = vmatpush1.bf16.msra.mxu1 %v4284_v56  ;;  %v4353_v56 = vld [vmem:[%s5139_s27 + $0xbcc] ss:$100 sps:$4 sm:$0xff]  }
 0x1cd   : > { %2975 = vmatprep.subr.bf16.mxu1 %v4288_v57  ;;  %v4351_v57 = vld [vmem:[%s5139_s27 + $0xbc8] ss:$100 sps:$4 sm:$0xff]  }
 0x1ce   : > { %2935 = vmatpush1.bf16.msra.mxu0 %v4243_v47  ;;  %v4368_v47 = vld [vmem:[%s5139_s27 + $0x7ec] ss:$100 sps:$4 sm:$0xff]  }
 0x1cf   : > { %2936 = vmatprep.subr.bf16.mxu0 %v4247_v50  ;;  %v4366_v50 = vld [vmem:[%s5139_s27 + $0x7e8] ss:$100 sps:$4 sm:$0xff]  }
 0x1d0   : > { %2976 = vmatpush1.bf16.msra.mxu1 %v4290_v61  ;;  %v4359_v61 = vld [vmem:[%s5139_s27 + $0x24] ss:$100 sps:$4 sm:$0xff]  }
 0x1d1   : > { %2977 = vmatprep.subr.bf16.mxu1 %v4294_v62  ;;  %v4357_v62 = vld [vmem:[%s5139_s27 + $0x20] ss:$100 sps:$4 sm:$0xff]  }
 0x1d2   : > { %2937 = vmatpush1.bf16.msra.mxu0 %v4249_v51  ;;  %v4374_v51 = vld [vmem:[%s5139_s27 + $0x8b4] ss:$100 sps:$4 sm:$0xff]  }
 0x1d3   : > { %2938 = vmatprep.subr.bf16.mxu0 %v4253_v54  ;;  %v4372_v54 = vld [vmem:[%s5139_s27 + $0x8b0] ss:$100 sps:$4 sm:$0xff]  }
 0x1d4   : > { %2978 = vmatpush1.bf16.msra.mxu1 %v4296_v0  ;;  %v4365_v0 = vld [vmem:[%s5139_s27 + $0xec] ss:$100 sps:$4 sm:$0xff]  }
 0x1d5   : > { %2979 = vmatprep.subr.bf16.mxu1 %v4300_v1  ;;  %v4363_v1 = vld [vmem:[%s5139_s27 + $0xe8] ss:$100 sps:$4 sm:$0xff]  }
 0x1d6   : > { %2939 = vmatpush1.bf16.msra.mxu0 %v4255_v55  ;;  %v4380_v55 = vld [vmem:[%s5139_s27 + $0x97c] ss:$100 sps:$4 sm:$0xff]  }
 0x1d7   : > { %2990 = vmatprep.subr.bf16.mxu0 %v4263_v58  ;;  %v4378_v58 = vld [vmem:[%s5139_s27 + $0x978] ss:$100 sps:$4 sm:$0xff]  }
 0x1d8   : > { %2980 = vmatpush1.bf16.msra.mxu1 %v4302_v4  ;;  %v4371_v4 = vld [vmem:[%s5139_s27 + $0x1b4] ss:$100 sps:$4 sm:$0xff]  }
 0x1d9   : > { %2941 = vmatmul.mubr.bf16.vlgmr.msra.gmra.mrb[0].mxu0 %v5227_v59  ;;  %3031 = vmatprep.subr.bf16.mxu1 %v4308_v5  ;;  %v4369_v5 = vld [vmem:[%s5139_s27 + $0x1b0] ss:$100 sps:$4 sm:$0xff]  }
 0x1da   : > { %2991 = vmatpush1.bf16.msra.mxu0 %v4261_v60  ;;  %3022 = vmatprep.mubr.bf16.mxu0 %v5197_v31  ;;  %v4386_v60 = vld [vmem:[%s5139_s27 + $0xa44] ss:$100 sps:$4 sm:$0xff]  }
 0x1db   : > { %2992 = vmatprep.subr.bf16.mxu0 %v4269_v63  ;;  %2982 = vmatmul.mubr.bf16.vlgmr.msra.gmra.mrb[0].mxu1 %v5227_v59  ;;  %v4384_v63 = vld [vmem:[%s5139_s27 + $0xa40] ss:$100 sps:$4 sm:$0xff]  }
 0x1dc   : > { %3032 = vmatpush1.bf16.msra.mxu1 %v4306_v8  ;;  %3063 = vmatprep.mubr.bf16.mxu1 %v5197_v31  ;;  %v4377_v8 = vld [vmem:[%s5139_s27 + $0x27c] ss:$100 sps:$4 sm:$0xff]  }
 0x1dd   : > { %3033 = vmatprep.subr.bf16.mxu1 %v4314_v9  ;;  %v4375_v9 = vld [vmem:[%s5139_s27 + $0x278] ss:$100 sps:$4 sm:$0xff]  }
 0x1de   : > { %2993 = vmatpush1.bf16.msra.mxu0 %v4267_v41  ;;  %v4392_v41 = vld [vmem:[%s5139_s27 + $0xb0c] ss:$100 sps:$4 sm:$0xff]  }
 0x1df   : > { %2994 = vmatprep.subr.bf16.mxu0 %v4275_v2  ;;  %v4390_v2 = vld [vmem:[%s5139_s27 + $0xb08] ss:$100 sps:$4 sm:$0xff]  }
 0x1e0   : > { %3034 = vmatpush1.bf16.msra.mxu1 %v4312_v12  ;;  %v4383_v12 = vld [vmem:[%s5139_s27 + $0x344] ss:$100 sps:$4 sm:$0xff]  }
 0x1e1   : > { %3035 = vmatprep.subr.bf16.mxu1 %v4320_v13  ;;  %v4381_v13 = vld [vmem:[%s5139_s27 + $0x340] ss:$100 sps:$4 sm:$0xff]  }
 0x1e2   : > { %2995 = vmatpush1.bf16.msra.mxu0 %v4273_v3  ;;  %v4398_v3 = vld [vmem:[%s5139_s27 + $0xbd4] ss:$100 sps:$4 sm:$0xff]  }
 0x1e3   : > { %2996 = vmatprep.subr.bf16.mxu0 %v4281_v6  ;;  %v4396_v6 = vld [vmem:[%s5139_s27 + $0xbd0] ss:$100 sps:$4 sm:$0xff]  }
 0x1e4   : > { %3036 = vmatpush1.bf16.msra.mxu1 %v4318_v16  ;;  %v4389_v16 = vld [vmem:[%s5139_s27 + $0x40c] ss:$100 sps:$4 sm:$0xff]  }
 0x1e5   : > { %3037 = vmatprep.subr.bf16.mxu1 %v4326_v17  ;;  %v4387_v17 = vld [vmem:[%s5139_s27 + $0x408] ss:$100 sps:$4 sm:$0xff]  }
 0x1e6   : > { %2997 = vmatpush1.bf16.msra.mxu0 %v4279_v7  ;;  %v4404_v7 = vld [vmem:[%s5139_s27 + $0x2c] ss:$100 sps:$4 sm:$0xff]  }
 0x1e7   : > { %2998 = vmatprep.subr.bf16.mxu0 %v4287_v10  ;;  %v4402_v10 = vld [vmem:[%s5139_s27 + $0x28] ss:$100 sps:$4 sm:$0xff]  }
 0x1e8   : > { %3038 = vmatpush1.bf16.msra.mxu1 %v4324_v20  ;;  %v4395_v20 = vld [vmem:[%s5139_s27 + $0x4d4] ss:$100 sps:$4 sm:$0xff]  }
 0x1e9   : > { %3039 = vmatprep.subr.bf16.mxu1 %v4332_v21  ;;  %v4393_v21 = vld [vmem:[%s5139_s27 + $0x4d0] ss:$100 sps:$4 sm:$0xff]  }
 0x1ea   : > { %2999 = vmatpush1.bf16.msra.mxu0 %v4285_v11  ;;  %v4410_v11 = vld [vmem:[%s5139_s27 + $0xf4] ss:$100 sps:$4 sm:$0xff]  }
 0x1eb   : > { %3000 = vmatprep.subr.bf16.mxu0 %v4293_v14  ;;  %v4408_v14 = vld [vmem:[%s5139_s27 + $0xf0] ss:$100 sps:$4 sm:$0xff]  }
 0x1ec   : > { %3040 = vmatpush1.bf16.msra.mxu1 %v4330_v24  ;;  %v4401_v24 = vld [vmem:[%s5139_s27 + $0x59c] ss:$100 sps:$4 sm:$0xff]  }
 0x1ed   : > { %3041 = vmatprep.subr.bf16.mxu1 %v4338_v25  ;;  %v4399_v25 = vld [vmem:[%s5139_s27 + $0x598] ss:$100 sps:$4 sm:$0xff]  }
 0x1ee   : > { %3001 = vmatpush1.bf16.msra.mxu0 %v4291_v15  ;;  %v4416_v15 = vld [vmem:[%s5139_s27 + $0x1bc] ss:$100 sps:$4 sm:$0xff]  }
 0x1ef   : > { %3002 = vmatprep.subr.bf16.mxu0 %v4299_v18  ;;  %v4414_v18 = vld [vmem:[%s5139_s27 + $0x1b8] ss:$100 sps:$4 sm:$0xff]  }
 0x1f0   : > { %3042 = vmatpush1.bf16.msra.mxu1 %v4336_v28  ;;  %v4407_v28 = vld [vmem:[%s5139_s27 + $0x664] ss:$100 sps:$4 sm:$0xff]  }
 0x1f1   : > { %3043 = vmatprep.subr.bf16.mxu1 %v4344_v29  ;;  %v4405_v29 = vld [vmem:[%s5139_s27 + $0x660] ss:$100 sps:$4 sm:$0xff]  }
 0x1f2   : > { %3003 = vmatpush1.bf16.msra.mxu0 %v4297_v19  ;;  %v4422_v19 = vld [vmem:[%s5139_s27 + $0x284] ss:$100 sps:$4 sm:$0xff]  }
 0x1f3   : > { %3004 = vmatprep.subr.bf16.mxu0 %v4305_v22  ;;  %v4420_v22 = vld [vmem:[%s5139_s27 + $0x280] ss:$100 sps:$4 sm:$0xff]  }
 0x1f4   : > { %3044 = vmatpush1.bf16.msra.mxu1 %v4342_v33  ;;  %v4413_v33 = vld [vmem:[%s5139_s27 + $0x72c] ss:$100 sps:$4 sm:$0xff]  }
 0x1f5   : > { %3045 = vmatprep.subr.bf16.mxu1 %v4350_v34  ;;  %v4411_v34 = vld [vmem:[%s5139_s27 + $0x728] ss:$100 sps:$4 sm:$0xff]  }
 0x1f6   : > { %3005 = vmatpush1.bf16.msra.mxu0 %v4303_v23  ;;  %v4428_v23 = vld [vmem:[%s5139_s27 + $0x34c] ss:$100 sps:$4 sm:$0xff]  }
 0x1f7   : > { %3006 = vmatprep.subr.bf16.mxu0 %v4311_v26  ;;  %v4426_v26 = vld [vmem:[%s5139_s27 + $0x348] ss:$100 sps:$4 sm:$0xff]  }
 0x1f8   : > { %3046 = vmatpush1.bf16.msra.mxu1 %v4348_v37  ;;  %v4419_v37 = vld [vmem:[%s5139_s27 + $0x7f4] ss:$100 sps:$4 sm:$0xff]  }
 0x1f9   : > { %3047 = vmatprep.subr.bf16.mxu1 %v4356_v38  ;;  %v4417_v38 = vld [vmem:[%s5139_s27 + $0x7f0] ss:$100 sps:$4 sm:$0xff]  }
 0x1fa   : > { %3007 = vmatpush1.bf16.msra.mxu0 %v4309_v27  ;;  %v4434_v27 = vld [vmem:[%s5139_s27 + $0x414] ss:$100 sps:$4 sm:$0xff]  }
 0x1fb   : > { %3008 = vmatprep.subr.bf16.mxu0 %v4317_v30  ;;  %v4432_v30 = vld [vmem:[%s5139_s27 + $0x410] ss:$100 sps:$4 sm:$0xff]  }
 0x1fc   : > { %3048 = vmatpush1.bf16.msra.mxu1 %v4354_v42  ;;  %v4425_v42 = vld [vmem:[%s5139_s27 + $0x8bc] ss:$100 sps:$4 sm:$0xff]  }
 0x1fd   : > { %3049 = vmatprep.subr.bf16.mxu1 %v4362_v43  ;;  %v4423_v43 = vld [vmem:[%s5139_s27 + $0x8b8] ss:$100 sps:$4 sm:$0xff]  }
 0x1fe   : > { %3009 = vmatpush1.bf16.msra.mxu0 %v4315_v32  ;;  %v4440_v32 = vld [vmem:[%s5139_s27 + $0x4dc] ss:$100 sps:$4 sm:$0xff]  }
 0x1ff   : > { %3010 = vmatprep.subr.bf16.mxu0 %v4323_v35  ;;  %v4438_v35 = vld [vmem:[%s5139_s27 + $0x4d8] ss:$100 sps:$4 sm:$0xff]  }
 0x200   : > { %3050 = vmatpush1.bf16.msra.mxu1 %v4360_v46  ;;  %v4431_v46 = vld [vmem:[%s5139_s27 + $0x984] ss:$100 sps:$4 sm:$0xff]  }
 0x201   : > { %3051 = vmatprep.subr.bf16.mxu1 %v4368_v47  ;;  %v4429_v47 = vld [vmem:[%s5139_s27 + $0x980] ss:$100 sps:$4 sm:$0xff]  }
 0x202   : > { %3011 = vmatpush1.bf16.msra.mxu0 %v4321_v36  ;;  %v4446_v36 = vld [vmem:[%s5139_s27 + $0x5a4] ss:$100 sps:$4 sm:$0xff]  }
 0x203   : > { %3012 = vmatprep.subr.bf16.mxu0 %v4329_v39  ;;  %v4444_v39 = vld [vmem:[%s5139_s27 + $0x5a0] ss:$100 sps:$4 sm:$0xff]  }
 0x204   : > { %3052 = vmatpush1.bf16.msra.mxu1 %v4366_v50  ;;  %v4437_v50 = vld [vmem:[%s5139_s27 + $0xa4c] ss:$100 sps:$4 sm:$0xff]  }
 0x205   : > { %3053 = vmatprep.subr.bf16.mxu1 %v4374_v51  ;;  %v4435_v51 = vld [vmem:[%s5139_s27 + $0xa48] ss:$100 sps:$4 sm:$0xff]  }
 0x206   : > { %3013 = vmatpush1.bf16.msra.mxu0 %v4327_v40  ;;  %v4452_v40 = vld [vmem:[%s5139_s27 + $0x66c] ss:$100 sps:$4 sm:$0xff]  }
 0x207   : > { %3014 = vmatprep.subr.bf16.mxu0 %v4335_v44  ;;  %v4450_v44 = vld [vmem:[%s5139_s27 + $0x668] ss:$100 sps:$4 sm:$0xff]  }
 0x208   : > { %3054 = vmatpush1.bf16.msra.mxu1 %v4372_v54  ;;  %v4443_v54 = vld [vmem:[%s5139_s27 + $0xb14] ss:$100 sps:$4 sm:$0xff]  }
 0x209   : > { %3055 = vmatprep.subr.bf16.mxu1 %v4380_v55  ;;  %v4441_v55 = vld [vmem:[%s5139_s27 + $0xb10] ss:$100 sps:$4 sm:$0xff]  }
 0x20a   : > { %3015 = vmatpush1.bf16.msra.mxu0 %v4333_v45  ;;  %v4458_v45 = vld [vmem:[%s5139_s27 + $0x734] ss:$100 sps:$4 sm:$0xff]  }
 0x20b   : > { %3016 = vmatprep.subr.bf16.mxu0 %v4341_v48  ;;  %v4456_v48 = vld [vmem:[%s5139_s27 + $0x730] ss:$100 sps:$4 sm:$0xff]  }
 0x20c   : > { %3056 = vmatpush1.bf16.msra.mxu1 %v4378_v58  ;;  %v4449_v58 = vld [vmem:[%s5139_s27 + $0xbdc] ss:$100 sps:$4 sm:$0xff]  }
 0x20d   : > { %3057 = vmatprep.subr.bf16.mxu1 %v4386_v60  ;;  %v4447_v60 = vld [vmem:[%s5139_s27 + $0xbd8] ss:$100 sps:$4 sm:$0xff]  }
 0x20e   : > { %3017 = vmatpush1.bf16.msra.mxu0 %v4339_v49  ;;  %v4464_v49 = vld [vmem:[%s5139_s27 + $0x7fc] ss:$100 sps:$4 sm:$0xff]  }
 0x20f   : > { %3018 = vmatprep.subr.bf16.mxu0 %v4347_v52  ;;  %v4462_v52 = vld [vmem:[%s5139_s27 + $0x7f8] ss:$100 sps:$4 sm:$0xff]  }
 0x210   : > { %3058 = vmatpush1.bf16.msra.mxu1 %v4384_v63  ;;  %v4455_v63 = vld [vmem:[%s5139_s27 + $0x34] ss:$100 sps:$4 sm:$0xff]  }
 0x211   : > { %3059 = vmatprep.subr.bf16.mxu1 %v4392_v41  ;;  %v4453_v41 = vld [vmem:[%s5139_s27 + $0x30] ss:$100 sps:$4 sm:$0xff]  }
 0x212   : > { %3019 = vmatpush1.bf16.msra.mxu0 %v4345_v53  ;;  %v4470_v53 = vld [vmem:[%s5139_s27 + $0x8c4] ss:$100 sps:$4 sm:$0xff]  }
 0x213   : > { %3020 = vmatprep.subr.bf16.mxu0 %v4353_v56  ;;  %v4468_v56 = vld [vmem:[%s5139_s27 + $0x8c0] ss:$100 sps:$4 sm:$0xff]  }
 0x214   : > { %3060 = vmatpush1.bf16.msra.mxu1 %v4390_v2  ;;  %v4461_v2 = vld [vmem:[%s5139_s27 + $0xfc] ss:$100 sps:$4 sm:$0xff]  }
 0x215   : > { %3061 = vmatprep.subr.bf16.mxu1 %v4398_v3  ;;  %v4459_v3 = vld [vmem:[%s5139_s27 + $0xf8] ss:$100 sps:$4 sm:$0xff]  }
 0x216   : > { %3021 = vmatpush1.bf16.msra.mxu0 %v4351_v57  ;;  %v4476_v57 = vld [vmem:[%s5139_s27 + $0x98c] ss:$100 sps:$4 sm:$0xff]  }
 0x217   : > { %3072 = vmatprep.subr.bf16.mxu0 %v4359_v61  ;;  %v4474_v61 = vld [vmem:[%s5139_s27 + $0x988] ss:$100 sps:$4 sm:$0xff]  }
 0x218   : > { %3062 = vmatpush1.bf16.msra.mxu1 %v4396_v6  ;;  %v4467_v6 = vld [vmem:[%s5139_s27 + $0x1c4] ss:$100 sps:$4 sm:$0xff]  }
 0x219   : > { %3023 = vmatmul.mubr.bf16.vlgmr.msra.gmra.mrb[4].mxu0 %v5227_v59  ;;  %3113 = vmatprep.subr.bf16.mxu1 %v4404_v7  ;;  %v4465_v7 = vld [vmem:[%s5139_s27 + $0x1c0] ss:$100 sps:$4 sm:$0xff]  }
 0x21a   : > { %3073 = vmatpush1.bf16.msra.mxu0 %v4357_v62  ;;  %3104 = vmatprep.mubr.bf16.mxu0 %v5197_v31  ;;  %v4482_v62 = vld [vmem:[%s5139_s27 + $0xa54] ss:$100 sps:$4 sm:$0xff]  }
 0x21b   : > { %3074 = vmatprep.subr.bf16.mxu0 %v4365_v0  ;;  %3064 = vmatmul.mubr.bf16.vlgmr.msra.gmra.mrb[4].mxu1 %v5227_v59  ;;  %v4480_v0 = vld [vmem:[%s5139_s27 + $0xa50] ss:$100 sps:$4 sm:$0xff]  }
 0x21c   : > { %3114 = vmatpush1.bf16.msra.mxu1 %v4402_v10  ;;  %3145 = vmatprep.mubr.bf16.mxu1 %v5197_v31  ;;  %v4473_v10 = vld [vmem:[%s5139_s27 + $0x28c] ss:$100 sps:$4 sm:$0xff]  }
 0x21d   : > { %3115 = vmatprep.subr.bf16.mxu1 %v4410_v11  ;;  %v4471_v11 = vld [vmem:[%s5139_s27 + $0x288] ss:$100 sps:$4 sm:$0xff]  }
 0x21e   : > { %3075 = vmatpush1.bf16.msra.mxu0 %v4363_v1  ;;  %v4488_v1 = vld [vmem:[%s5139_s27 + $0xb1c] ss:$100 sps:$4 sm:$0xff]  }
 0x21f   : > { %3076 = vmatprep.subr.bf16.mxu0 %v4371_v4  ;;  %v4486_v4 = vld [vmem:[%s5139_s27 + $0xb18] ss:$100 sps:$4 sm:$0xff]  }
 0x220   : > { %3116 = vmatpush1.bf16.msra.mxu1 %v4408_v14  ;;  %v4479_v14 = vld [vmem:[%s5139_s27 + $0x354] ss:$100 sps:$4 sm:$0xff]  }
 0x221   : > { %3117 = vmatprep.subr.bf16.mxu1 %v4416_v15  ;;  %v4477_v15 = vld [vmem:[%s5139_s27 + $0x350] ss:$100 sps:$4 sm:$0xff]  }
 0x222   : > { %3077 = vmatpush1.bf16.msra.mxu0 %v4369_v5  ;;  %v4494_v5 = vld [vmem:[%s5139_s27 + $0xbe4] ss:$100 sps:$4 sm:$0xff]  }
 0x223   : > { %3078 = vmatprep.subr.bf16.mxu0 %v4377_v8  ;;  %v4492_v8 = vld [vmem:[%s5139_s27 + $0xbe0] ss:$100 sps:$4 sm:$0xff]  }
 0x224   : > { %3118 = vmatpush1.bf16.msra.mxu1 %v4414_v18  ;;  %v4485_v18 = vld [vmem:[%s5139_s27 + $0x41c] ss:$100 sps:$4 sm:$0xff]  }
 0x225   : > { %3119 = vmatprep.subr.bf16.mxu1 %v4422_v19  ;;  %v4483_v19 = vld [vmem:[%s5139_s27 + $0x418] ss:$100 sps:$4 sm:$0xff]  }
 0x226   : > { %3079 = vmatpush1.bf16.msra.mxu0 %v4375_v9  ;;  %v4500_v9 = vld [vmem:[%s5139_s27 + $0x3c] ss:$100 sps:$4 sm:$0xff]  }
 0x227   : > { %3080 = vmatprep.subr.bf16.mxu0 %v4383_v12  ;;  %v4498_v12 = vld [vmem:[%s5139_s27 + $0x38] ss:$100 sps:$4 sm:$0xff]  }
 0x228   : > { %3120 = vmatpush1.bf16.msra.mxu1 %v4420_v22  ;;  %v4491_v22 = vld [vmem:[%s5139_s27 + $0x4e4] ss:$100 sps:$4 sm:$0xff]  }
 0x229   : > { %3121 = vmatprep.subr.bf16.mxu1 %v4428_v23  ;;  %v4489_v23 = vld [vmem:[%s5139_s27 + $0x4e0] ss:$100 sps:$4 sm:$0xff]  }
 0x22a   : > { %3081 = vmatpush1.bf16.msra.mxu0 %v4381_v13  ;;  %v4506_v13 = vld [vmem:[%s5139_s27 + $0x104] ss:$100 sps:$4 sm:$0xff]  }
 0x22b   : > { %3082 = vmatprep.subr.bf16.mxu0 %v4389_v16  ;;  %v4504_v16 = vld [vmem:[%s5139_s27 + $0x100] ss:$100 sps:$4 sm:$0xff]  }
 0x22c   : > { %3122 = vmatpush1.bf16.msra.mxu1 %v4426_v26  ;;  %v4497_v26 = vld [vmem:[%s5139_s27 + $0x5ac] ss:$100 sps:$4 sm:$0xff]  }
 0x22d   : > { %3123 = vmatprep.subr.bf16.mxu1 %v4434_v27  ;;  %v4495_v27 = vld [vmem:[%s5139_s27 + $0x5a8] ss:$100 sps:$4 sm:$0xff]  }
 0x22e   : > { %3083 = vmatpush1.bf16.msra.mxu0 %v4387_v17  ;;  %v4512_v17 = vld [vmem:[%s5139_s27 + $0x1cc] ss:$100 sps:$4 sm:$0xff]  }
 0x22f   : > { %3084 = vmatprep.subr.bf16.mxu0 %v4395_v20  ;;  %v4510_v20 = vld [vmem:[%s5139_s27 + $0x1c8] ss:$100 sps:$4 sm:$0xff]  }
 0x230   : > { %3124 = vmatpush1.bf16.msra.mxu1 %v4432_v30  ;;  %v4503_v30 = vld [vmem:[%s5139_s27 + $0x674] ss:$100 sps:$4 sm:$0xff]  }
 0x231   : > { %3125 = vmatprep.subr.bf16.mxu1 %v4440_v32  ;;  %v4501_v32 = vld [vmem:[%s5139_s27 + $0x670] ss:$100 sps:$4 sm:$0xff]  }
 0x232   : > { %3085 = vmatpush1.bf16.msra.mxu0 %v4393_v21  ;;  %v4518_v21 = vld [vmem:[%s5139_s27 + $0x294] ss:$100 sps:$4 sm:$0xff]  }
 0x233   : > { %3086 = vmatprep.subr.bf16.mxu0 %v4401_v24  ;;  %v4516_v24 = vld [vmem:[%s5139_s27 + $0x290] ss:$100 sps:$4 sm:$0xff]  }
 0x234   : > { %3126 = vmatpush1.bf16.msra.mxu1 %v4438_v35  ;;  %v4509_v35 = vld [vmem:[%s5139_s27 + $0x73c] ss:$100 sps:$4 sm:$0xff]  }
 0x235   : > { %3127 = vmatprep.subr.bf16.mxu1 %v4446_v36  ;;  %v4507_v36 = vld [vmem:[%s5139_s27 + $0x738] ss:$100 sps:$4 sm:$0xff]  }
 0x236   : > { %3087 = vmatpush1.bf16.msra.mxu0 %v4399_v25  ;;  %v4524_v25 = vld [vmem:[%s5139_s27 + $0x35c] ss:$100 sps:$4 sm:$0xff]  }
 0x237   : > { %3088 = vmatprep.subr.bf16.mxu0 %v4407_v28  ;;  %v4522_v28 = vld [vmem:[%s5139_s27 + $0x358] ss:$100 sps:$4 sm:$0xff]  }
 0x238   : > { %3128 = vmatpush1.bf16.msra.mxu1 %v4444_v39  ;;  %v4515_v39 = vld [vmem:[%s5139_s27 + $0x804] ss:$100 sps:$4 sm:$0xff]  }
 0x239   : > { %3129 = vmatprep.subr.bf16.mxu1 %v4452_v40  ;;  %v4540_v40 = vld [vmem:[%s5139_s27 + $0x5b0] ss:$100 sps:$4 sm:$0xff]  }
 0x23a   : > { %3089 = vmatpush1.bf16.msra.mxu0 %v4405_v29  ;;  %v4530_v29 = vld [vmem:[%s5139_s27 + $0x424] ss:$100 sps:$4 sm:$0xff]  }
 0x23b   : > { %3090 = vmatprep.subr.bf16.mxu0 %v4413_v33  ;;  %v4528_v33 = vld [vmem:[%s5139_s27 + $0x420] ss:$100 sps:$4 sm:$0xff]  }
 0x23c   : > { %3130 = vmatpush1.bf16.msra.mxu1 %v4450_v44  ;;  %v4521_v44 = vld [vmem:[%s5139_s27 + $0x8cc] ss:$100 sps:$4 sm:$0xff]  }
 0x23d   : > { %3131 = vmatprep.subr.bf16.mxu1 %v4458_v45  ;;  %v4546_v45 = vld [vmem:[%s5139_s27 + $0x678] ss:$100 sps:$4 sm:$0xff]  }
 0x23e   : > { %3091 = vmatpush1.bf16.msra.mxu0 %v4411_v34  ;;  %v4536_v34 = vld [vmem:[%s5139_s27 + $0x4ec] ss:$100 sps:$4 sm:$0xff]  }
 0x23f   : > { %3092 = vmatprep.subr.bf16.mxu0 %v4419_v37  ;;  %v4534_v37 = vld [vmem:[%s5139_s27 + $0x4e8] ss:$100 sps:$4 sm:$0xff]  }
 0x240   : > { %3132 = vmatpush1.bf16.msra.mxu1 %v4456_v48  ;;  %v4554_v48 = vld [vmem:[%s5139_s27 + $0x744] ss:$100 sps:$4 sm:$0xff]  }
 0x241   : > { %3133 = vmatprep.subr.bf16.mxu1 %v4464_v49  ;;  %v4552_v49 = vld [vmem:[%s5139_s27 + $0x740] ss:$100 sps:$4 sm:$0xff]  }
 0x242   : > { %3093 = vmatpush1.bf16.msra.mxu0 %v4417_v38  ;;  %v4542_v38 = vld [vmem:[%s5139_s27 + $0x5b4] ss:$100 sps:$4 sm:$0xff]  }
 0x243   : > { %3094 = vmatprep.subr.bf16.mxu0 %v4425_v42  ;;  %v4513_v42 = vld [vmem:[%s5139_s27 + $0x800] ss:$100 sps:$4 sm:$0xff]  }
 0x244   : > { %3134 = vmatpush1.bf16.msra.mxu1 %v4462_v52  ;;  %v4560_v52 = vld [vmem:[%s5139_s27 + $0x80c] ss:$100 sps:$4 sm:$0xff]  }
 0x245   : > { %3135 = vmatprep.subr.bf16.mxu1 %v4470_v53  ;;  %v4558_v53 = vld [vmem:[%s5139_s27 + $0x808] ss:$100 sps:$4 sm:$0xff]  }
 0x246   : > { %3095 = vmatpush1.bf16.msra.mxu0 %v4423_v43  ;;  %v4548_v43 = vld [vmem:[%s5139_s27 + $0x67c] ss:$100 sps:$4 sm:$0xff]  }
 0x247   : > { %3096 = vmatprep.subr.bf16.mxu0 %v4431_v46  ;;  %v4519_v46 = vld [vmem:[%s5139_s27 + $0x8c8] ss:$100 sps:$4 sm:$0xff]  }
 0x248   : > { %3136 = vmatpush1.bf16.msra.mxu1 %v4468_v56  ;;  %v4566_v56 = vld [vmem:[%s5139_s27 + $0x8d4] ss:$100 sps:$4 sm:$0xff]  }
 0x249   : > { %3137 = vmatprep.subr.bf16.mxu1 %v4476_v57  ;;  %v4564_v57 = vld [vmem:[%s5139_s27 + $0x8d0] ss:$100 sps:$4 sm:$0xff]  }
 0x24a   : > { %3097 = vmatpush1.bf16.msra.mxu0 %v4429_v47  ;;  %v4527_v47 = vld [vmem:[%s5139_s27 + $0x994] ss:$100 sps:$4 sm:$0xff]  }
 0x24b   : > { %3098 = vmatprep.subr.bf16.mxu0 %v4437_v50  ;;  %v4525_v50 = vld [vmem:[%s5139_s27 + $0x990] ss:$100 sps:$4 sm:$0xff]  }
 0x24c   : > { %3138 = vmatpush1.bf16.msra.mxu1 %v4474_v61  ;;  %v4572_v61 = vld [vmem:[%s5139_s27 + $0x99c] ss:$100 sps:$4 sm:$0xff]  }
 0x24d   : > { %3139 = vmatprep.subr.bf16.mxu1 %v4482_v62  ;;  %v4570_v62 = vld [vmem:[%s5139_s27 + $0x998] ss:$100 sps:$4 sm:$0xff]  }
 0x24e   : > { %3099 = vmatpush1.bf16.msra.mxu0 %v4435_v51  ;;  %v4533_v51 = vld [vmem:[%s5139_s27 + $0xa5c] ss:$100 sps:$4 sm:$0xff]  }
 0x24f   : > { %3100 = vmatprep.subr.bf16.mxu0 %v4443_v54  ;;  %v4531_v54 = vld [vmem:[%s5139_s27 + $0xa58] ss:$100 sps:$4 sm:$0xff]  }
 0x250   : > { %3140 = vmatpush1.bf16.msra.mxu1 %v4480_v0  ;;  %v4578_v0 = vld [vmem:[%s5139_s27 + $0xa64] ss:$100 sps:$4 sm:$0xff]  }
 0x251   : > { %3141 = vmatprep.subr.bf16.mxu1 %v4488_v1  ;;  %v4549_v1 = vld [vmem:[%s5139_s27 + $0x40] ss:$100 sps:$4 sm:$0xff]  }
 0x252   : > { %3101 = vmatpush1.bf16.msra.mxu0 %v4441_v55  ;;  %v4539_v55 = vld [vmem:[%s5139_s27 + $0xb24] ss:$100 sps:$4 sm:$0xff]  }
 0x253   : > { %3102 = vmatprep.subr.bf16.mxu0 %v4449_v58  ;;  %v4537_v58 = vld [vmem:[%s5139_s27 + $0xb20] ss:$100 sps:$4 sm:$0xff]  }
 0x254   : > { %3142 = vmatpush1.bf16.msra.mxu1 %v4486_v4  ;;  %v4557_v4 = vld [vmem:[%s5139_s27 + $0x10c] ss:$100 sps:$4 sm:$0xff]  }
 0x255   : > { %3143 = vmatprep.subr.bf16.mxu1 %v4494_v5  ;;  %v4582_v5 = vld [vmem:[%s5139_s27 + $0xb28] ss:$100 sps:$4 sm:$0xff]  }
 0x256   : > { %3103 = vmatpush1.bf16.msra.mxu0 %v4447_v60  ;;  %v4545_v60 = vld [vmem:[%s5139_s27 + $0xbec] ss:$100 sps:$4 sm:$0xff]  }
 0x257   : > { %3154 = vmatprep.subr.bf16.mxu0 %v4455_v63  ;;  %v4543_v63 = vld [vmem:[%s5139_s27 + $0xbe8] ss:$100 sps:$4 sm:$0xff]  }
 0x258   : > { %3144 = vmatpush1.bf16.msra.mxu1 %v4492_v8  ;;  %v4563_v8 = vld [vmem:[%s5139_s27 + $0x1d4] ss:$100 sps:$4 sm:$0xff]  }
 0x259   : > { %3105 = vmatmul.mubr.bf16.vlgmr.msra.gmra.mrb[8].mxu0 %v5227_v59  ;;  %3195 = vmatprep.subr.bf16.mxu1 %v4500_v9  ;;  %v4588_v9 = vld [vmem:[%s5139_s27 + $0xbf0] ss:$100 sps:$4 sm:$0xff]  }
 0x25a   : > { %3155 = vmatpush1.bf16.msra.mxu0 %v4453_v41  ;;  %3186 = vmatprep.mubr.bf16.mxu0 %v5197_v31  ;;  %v4551_v41 = vld [vmem:[%s5139_s27 + $0x44] ss:$100 sps:$4 sm:$0xff]  }
 0x25b   : > { %3156 = vmatprep.subr.bf16.mxu0 %v4461_v2  ;;  %3146 = vmatmul.mubr.bf16.vlgmr.msra.gmra.mrb[8].mxu1 %v5227_v59  ;;  %v4576_v2 = vld [vmem:[%s5139_s27 + $0xa60] ss:$100 sps:$4 sm:$0xff]  }
 0x25c   : > { %3196 = vmatpush1.bf16.msra.mxu1 %v4498_v12  ;;  %3227 = vmatprep.mubr.bf16.mxu1 %v5197_v31  ;;  %v4569_v12 = vld [vmem:[%s5139_s27 + $0x29c] ss:$100 sps:$4 sm:$0xff]  }
 0x25d   : > { %3197 = vmatprep.subr.bf16.mxu1 %v4506_v13  ;;  %v4594_v13 = vld [vmem:[%s5139_s27 + $0x48] ss:$100 sps:$4 sm:$0xff]  }
 0x25e   : > { %3157 = vmatpush1.bf16.msra.mxu0 %v4459_v3  ;;  %v4584_v3 = vld [vmem:[%s5139_s27 + $0xb2c] ss:$100 sps:$4 sm:$0xff]  }
 0x25f   : > { %3158 = vmatprep.subr.bf16.mxu0 %v4467_v6  ;;  %v4555_v6 = vld [vmem:[%s5139_s27 + $0x108] ss:$100 sps:$4 sm:$0xff]  }
 0x260   : > { %3198 = vmatpush1.bf16.msra.mxu1 %v4504_v16  ;;  %v4575_v16 = vld [vmem:[%s5139_s27 + $0x364] ss:$100 sps:$4 sm:$0xff]  }
 0x261   : > { %3199 = vmatprep.subr.bf16.mxu1 %v4512_v17  ;;  %v4600_v17 = vld [vmem:[%s5139_s27 + $0x110] ss:$100 sps:$4 sm:$0xff]  }
 0x262   : > { %3159 = vmatpush1.bf16.msra.mxu0 %v4465_v7  ;;  %v4590_v7 = vld [vmem:[%s5139_s27 + $0xbf4] ss:$100 sps:$4 sm:$0xff]  }
 0x263   : > { %3160 = vmatprep.subr.bf16.mxu0 %v4473_v10  ;;  %v4561_v10 = vld [vmem:[%s5139_s27 + $0x1d0] ss:$100 sps:$4 sm:$0xff]  }
 0x264   : > { %3200 = vmatpush1.bf16.msra.mxu1 %v4510_v20  ;;  %v4581_v20 = vld [vmem:[%s5139_s27 + $0x42c] ss:$100 sps:$4 sm:$0xff]  }
 0x265   : > { %3201 = vmatprep.subr.bf16.mxu1 %v4518_v21  ;;  %v4606_v21 = vld [vmem:[%s5139_s27 + $0x1d8] ss:$100 sps:$4 sm:$0xff]  }
 0x266   : > { %3161 = vmatpush1.bf16.msra.mxu0 %v4471_v11  ;;  %v4596_v11 = vld [vmem:[%s5139_s27 + $0x4c] ss:$100 sps:$4 sm:$0xff]  }
 0x267   : > { %3162 = vmatprep.subr.bf16.mxu0 %v4479_v14  ;;  %v4567_v14 = vld [vmem:[%s5139_s27 + $0x298] ss:$100 sps:$4 sm:$0xff]  }
 0x268   : > { %3202 = vmatpush1.bf16.msra.mxu1 %v4516_v24  ;;  %v4587_v24 = vld [vmem:[%s5139_s27 + $0x4f4] ss:$100 sps:$4 sm:$0xff]  }
 0x269   : > { %3203 = vmatprep.subr.bf16.mxu1 %v4524_v25 }
 0x26a   : > { %3163 = vmatpush1.bf16.msra.mxu0 %v4477_v15  ;;  %v4602_v15 = vld [vmem:[%s5139_s27 + $0x114] ss:$100 sps:$4 sm:$0xff]  }
 0x26b   : > { %3164 = vmatprep.subr.bf16.mxu0 %v4485_v18  ;;  %v4573_v18 = vld [vmem:[%s5139_s27 + $0x360] ss:$100 sps:$4 sm:$0xff]  }
 0x26c   : > { %3204 = vmatpush1.bf16.msra.mxu1 %v4522_v28 }
 0x26d   : > { %3205 = vmatprep.subr.bf16.mxu1 %v4530_v29  ;;  %v4585_v29 = vld [vmem:[%s5139_s27 + $0x4f0] ss:$100 sps:$4 sm:$0xff]  }
 0x26e   : > { %3165 = vmatpush1.bf16.msra.mxu0 %v4483_v19  ;;  %v4608_v19 = vld [vmem:[%s5139_s27 + $0x1dc] ss:$100 sps:$4 sm:$0xff]  }
 0x26f   : > { %3166 = vmatprep.subr.bf16.mxu0 %v4491_v22  ;;  %v4579_v22 = vld [vmem:[%s5139_s27 + $0x428] ss:$100 sps:$4 sm:$0xff]  }
 0x270   : > { %3206 = vmatpush1.bf16.msra.mxu1 %v4528_v33  ;;  %v4593_v33 = vld [vmem:[%s5139_s27 + $0x5bc] ss:$100 sps:$4 sm:$0xff]  }
 0x271   : > { %3207 = vmatprep.subr.bf16.mxu1 %v4536_v34  ;;  %v4618_v34 = vld [vmem:[%s5139_s27 + $0x368] ss:$100 sps:$4 sm:$0xff]  }
 0x272   : > { %3167 = vmatpush1.bf16.msra.mxu0 %v4489_v23  ;;  %v4614_v23 = vld [vmem:[%s5139_s27 + $0x2a4] ss:$100 sps:$4 sm:$0xff]  }
 0x273   : > { %3168 = vmatprep.subr.bf16.mxu0 %v4497_v26 }
 0x274   : > { %3208 = vmatpush1.bf16.msra.mxu1 %v4534_v37  ;;  %v4599_v37 = vld [vmem:[%s5139_s27 + $0x684] ss:$100 sps:$4 sm:$0xff]  }
 0x275   : > { %3209 = vmatprep.subr.bf16.mxu1 %v4542_v38  ;;  %v4624_v38 = vld [vmem:[%s5139_s27 + $0x430] ss:$100 sps:$4 sm:$0xff]  }
 0x276   : > { %3169 = vmatpush1.bf16.msra.mxu0 %v4495_v27  ;;  %v4612_v27 = vld [vmem:[%s5139_s27 + $0x2a0] ss:$100 sps:$4 sm:$0xff]  }
 0x277   : > { %3170 = vmatprep.subr.bf16.mxu0 %v4503_v30  ;;  %v4620_v30 = vld [vmem:[%s5139_s27 + $0x36c] ss:$100 sps:$4 sm:$0xff]  }
 0x278   : > { %3210 = vmatpush1.bf16.msra.mxu1 %v4540_v40  ;;  %v4632_v40 = vld [vmem:[%s5139_s27 + $0x4fc] ss:$100 sps:$4 sm:$0xff]  }
 0x279   : > { %3211 = vmatprep.subr.bf16.mxu1 %v4548_v43 }
 0x27a   : > { %3171 = vmatpush1.bf16.msra.mxu0 %v4501_v32 }
 0x27b   : > { %3172 = vmatprep.subr.bf16.mxu0 %v4509_v35  ;;  %v4591_v35 = vld [vmem:[%s5139_s27 + $0x5b8] ss:$100 sps:$4 sm:$0xff]  }
 0x27c   : > { %3212 = vmatpush1.bf16.msra.mxu1 %v4546_v45 }
 0x27d   : > { %3213 = vmatprep.subr.bf16.mxu1 %v4554_v48 }
 0x27e   : > { %3173 = vmatpush1.bf16.msra.mxu0 %v4507_v36  ;;  %v4626_v36 = vld [vmem:[%s5139_s27 + $0x434] ss:$100 sps:$4 sm:$0xff]  }
 0x27f   : > { %3174 = vmatprep.subr.bf16.mxu0 %v4515_v39  ;;  %v4597_v39 = vld [vmem:[%s5139_s27 + $0x680] ss:$100 sps:$4 sm:$0xff]  }
 0x280   : > { %3214 = vmatpush1.bf16.msra.mxu1 %v4552_v49  ;;  %v4638_v49 = vld [vmem:[%s5139_s27 + $0x5c4] ss:$100 sps:$4 sm:$0xff]  }
 0x281   : > { %3215 = vmatprep.subr.bf16.mxu1 %v4560_v52  ;;  %v4609_v52 = vld [vmem:[%s5139_s27 + $0x810] ss:$100 sps:$4 sm:$0xff]  }
 0x282   : > { %3175 = vmatpush1.bf16.msra.mxu0 %v4513_v42  ;;  %v4605_v42 = vld [vmem:[%s5139_s27 + $0x74c] ss:$100 sps:$4 sm:$0xff]  }
 0x283   : > { %3176 = vmatprep.subr.bf16.mxu0 %v4521_v44 }
 0x284   : > { %3216 = vmatpush1.bf16.msra.mxu1 %v4558_v53  ;;  %v4644_v53 = vld [vmem:[%s5139_s27 + $0x68c] ss:$100 sps:$4 sm:$0xff]  }
 0x285   : > { %3217 = vmatprep.subr.bf16.mxu1 %v4566_v56  ;;  %v4615_v56 = vld [vmem:[%s5139_s27 + $0x8d8] ss:$100 sps:$4 sm:$0xff]  }
 0x286   : > { %3177 = vmatpush1.bf16.msra.mxu0 %v4519_v46  ;;  %v4630_v46 = vld [vmem:[%s5139_s27 + $0x4f8] ss:$100 sps:$4 sm:$0xff]  }
 0x287   : > { %3178 = vmatprep.subr.bf16.mxu0 %v4527_v47  ;;  %v4603_v47 = vld [vmem:[%s5139_s27 + $0x748] ss:$100 sps:$4 sm:$0xff]  }
 0x288   : > { %3218 = vmatpush1.bf16.msra.mxu1 %v4564_v57  ;;  %v4650_v57 = vld [vmem:[%s5139_s27 + $0x754] ss:$100 sps:$4 sm:$0xff]  }
 0x289   : > { %3219 = vmatprep.subr.bf16.mxu1 %v4572_v61  ;;  %v4621_v61 = vld [vmem:[%s5139_s27 + $0x9a0] ss:$100 sps:$4 sm:$0xff]  }
 0x28a   : > { %3179 = vmatpush1.bf16.msra.mxu0 %v4525_v50  ;;  %v4611_v50 = vld [vmem:[%s5139_s27 + $0x814] ss:$100 sps:$4 sm:$0xff]  }
 0x28b   : > { %3180 = vmatprep.subr.bf16.mxu0 %v4533_v51  ;;  %v4636_v51 = vld [vmem:[%s5139_s27 + $0x5c0] ss:$100 sps:$4 sm:$0xff]  }
 0x28c   : > { %3220 = vmatpush1.bf16.msra.mxu1 %v4570_v62  ;;  %v4656_v62 = vld [vmem:[%s5139_s27 + $0x81c] ss:$100 sps:$4 sm:$0xff]  }
 0x28d   : > { %3221 = vmatprep.subr.bf16.mxu1 %v4578_v0  ;;  %v4627_v0 = vld [vmem:[%s5139_s27 + $0xa68] ss:$100 sps:$4 sm:$0xff]  }
 0x28e   : > { %3181 = vmatpush1.bf16.msra.mxu0 %v4531_v54  ;;  %v4617_v54 = vld [vmem:[%s5139_s27 + $0x8dc] ss:$100 sps:$4 sm:$0xff]  }
 0x28f   : > { %3182 = vmatprep.subr.bf16.mxu0 %v4539_v55  ;;  %v4642_v55 = vld [vmem:[%s5139_s27 + $0x688] ss:$100 sps:$4 sm:$0xff]  }
 0x290   : > { %3222 = vmatpush1.bf16.msra.mxu1 %v4576_v2  ;;  %v4635_v2 = vld [vmem:[%s5139_s27 + $0xb34] ss:$100 sps:$4 sm:$0xff]  }
 0x291   : > { %3223 = vmatprep.subr.bf16.mxu1 %v4584_v3  ;;  %v4660_v3 = vld [vmem:[%s5139_s27 + $0x8e0] ss:$100 sps:$4 sm:$0xff]  }
 0x292   : > { %3183 = vmatpush1.bf16.msra.mxu0 %v4537_v58  ;;  %v4623_v58 = vld [vmem:[%s5139_s27 + $0x9a4] ss:$100 sps:$4 sm:$0xff]  }
 0x293   : > { %3184 = vmatprep.subr.bf16.mxu0 %v4545_v60  ;;  %v4648_v60 = vld [vmem:[%s5139_s27 + $0x750] ss:$100 sps:$4 sm:$0xff]  }
 0x294   : > { %3224 = vmatpush1.bf16.msra.mxu1 %v4582_v5  ;;  %v4668_v5 = vld [vmem:[%s5139_s27 + $0x9ac] ss:$100 sps:$4 sm:$0xff]  }
 0x295   : > { %3225 = vmatprep.subr.bf16.mxu1 %v4590_v7  ;;  %v4666_v7 = vld [vmem:[%s5139_s27 + $0x9a8] ss:$100 sps:$4 sm:$0xff]  }
 0x296   : > { %3185 = vmatpush1.bf16.msra.mxu0 %v4543_v63  ;;  %v4629_v63 = vld [vmem:[%s5139_s27 + $0xa6c] ss:$100 sps:$4 sm:$0xff]  }
 0x297   : > { %3236 = vmatprep.subr.bf16.mxu0 %v4551_v41  ;;  %v4654_v41 = vld [vmem:[%s5139_s27 + $0x818] ss:$100 sps:$4 sm:$0xff]  }
 0x298   : > { %3226 = vmatpush1.bf16.msra.mxu1 %v4588_v9  ;;  %v4674_v9 = vld [vmem:[%s5139_s27 + $0xa74] ss:$100 sps:$4 sm:$0xff]  }
 0x299   : > { %3187 = vmatmul.mubr.bf16.vlgmr.msra.gmra.mrb[12].mxu0 %v5227_v59  ;;  %3277 = vmatprep.subr.bf16.mxu1 %v4596_v11  ;;  %v4672_v11 = vld [vmem:[%s5139_s27 + $0xa70] ss:$100 sps:$4 sm:$0xff]  }
 0x29a   : > { %3237 = vmatpush1.bf16.msra.mxu0 %v4549_v1  ;;  %3268 = vmatprep.mubr.bf16.mxu0 %v5197_v31  ;;  %v4662_v1 = vld [vmem:[%s5139_s27 + $0x8e4] ss:$100 sps:$4 sm:$0xff]  }
 0x29b   : > { %3238 = vmatprep.subr.bf16.mxu0 %v4557_v4  ;;  %3228 = vmatmul.mubr.bf16.vlgmr.msra.gmra.mrb[12].mxu1 %v5227_v59  ;;  %v4633_v4 = vld [vmem:[%s5139_s27 + $0xb30] ss:$100 sps:$4 sm:$0xff]  }
 0x29c   : > { %3278 = vmatpush1.bf16.msra.mxu1 %v4594_v13  ;;  %3309 = vmatprep.mubr.bf16.mxu1 %v5197_v31  ;;  %v4680_v13 = vld [vmem:[%s5139_s27 + $0xb3c] ss:$100 sps:$4 sm:$0xff]  }
 0x29d   : > { %3279 = vmatprep.subr.bf16.mxu1 %v4602_v15  ;;  %v4678_v15 = vld [vmem:[%s5139_s27 + $0xb38] ss:$100 sps:$4 sm:$0xff]  }
 0x29e   : > { %3239 = vmatpush1.bf16.msra.mxu0 %v4555_v6  ;;  %v4641_v6 = vld [vmem:[%s5139_s27 + $0xbfc] ss:$100 sps:$4 sm:$0xff]  }
 0x29f   : > { %3240 = vmatprep.subr.bf16.mxu0 %v4563_v8  ;;  %v4639_v8 = vld [vmem:[%s5139_s27 + $0xbf8] ss:$100 sps:$4 sm:$0xff]  }
 0x2a0   : > { %3280 = vmatpush1.bf16.msra.mxu1 %v4600_v17  ;;  %v4686_v17 = vld [vmem:[%s5139_s27 + $0xc04] ss:$100 sps:$4 sm:$0xff]  }
 0x2a1   : > { %3281 = vmatprep.subr.bf16.mxu1 %v4608_v19  ;;  %v4684_v19 = vld [vmem:[%s5139_s27 + $0xc00] ss:$100 sps:$4 sm:$0xff]  }
 0x2a2   : > { %3241 = vmatpush1.bf16.msra.mxu0 %v4561_v10  ;;  %v4647_v10 = vld [vmem:[%s5139_s27 + $0x54] ss:$100 sps:$4 sm:$0xff]  }
 0x2a3   : > { %3242 = vmatprep.subr.bf16.mxu0 %v4569_v12  ;;  %v4645_v12 = vld [vmem:[%s5139_s27 + $0x50] ss:$100 sps:$4 sm:$0xff]  }
 0x2a4   : > { %3282 = vmatpush1.bf16.msra.mxu1 %v4606_v21  ;;  %v4692_v21 = vld [vmem:[%s5139_s27 + $0x5c] ss:$100 sps:$4 sm:$0xff]  }
 0x2a5   : > { %3283 = vmatprep.subr.bf16.mxu1 %v4614_v23  ;;  %v4690_v23 = vld [vmem:[%s5139_s27 + $0x58] ss:$100 sps:$4 sm:$0xff]  }
 0x2a6   : > { %3243 = vmatpush1.bf16.msra.mxu0 %v4567_v14  ;;  %v4653_v14 = vld [vmem:[%s5139_s27 + $0x11c] ss:$100 sps:$4 sm:$0xff]  }
 0x2a7   : > { %3244 = vmatprep.subr.bf16.mxu0 %v4575_v16  ;;  %v4651_v16 = vld [vmem:[%s5139_s27 + $0x118] ss:$100 sps:$4 sm:$0xff]  }
 0x2a8   : > { %3284 = vmatpush1.bf16.msra.mxu1 %v4612_v27  ;;  %v4696_v27 = vld [vmem:[%s5139_s27 + $0x120] ss:$100 sps:$4 sm:$0xff]  }
 0x2a9   : > { %3285 = vmatprep.subr.bf16.mxu1 %v4620_v30  ;;  %v4677_v30 = vld [vmem:[%s5139_s27 + $0x43c] ss:$100 sps:$4 sm:$0xff]  }
 0x2aa   : > { %3245 = vmatpush1.bf16.msra.mxu0 %v4573_v18  ;;  %v4659_v18 = vld [vmem:[%s5139_s27 + $0x1e4] ss:$100 sps:$4 sm:$0xff]  }
 0x2ab   : > { %3246 = vmatprep.subr.bf16.mxu0 %v4581_v20  ;;  %v4657_v20 = vld [vmem:[%s5139_s27 + $0x1e0] ss:$100 sps:$4 sm:$0xff]  }
 0x2ac   : > { %v2942_v25 = vpop.f32.mrb[0].mxu0  ;;  %3286 = vmatpush1.bf16.msra.mxu1 %v4618_v34  ;;  %v4710_v34 = vld [vmem:[%s5139_s27 + $0x2b4] ss:$100 sps:$4 sm:$0xff]  }
 0x2ad   : > { %3440 = vst [vmem:[%s5149_s7] sm:$0xff] %v2942_v25  ;;  %v2944_v26 = vpop.f32.mrb[1].mxu0  ;;  %3287 = vmatprep.subr.bf16.mxu1 %v4626_v36  ;;  %v4698_v25 = vld [vmem:[%s5139_s27 + $0x124] ss:$100 sps:$4 sm:$0xff]  }
 0x2ae   : > { %3441 = vst [vmem:[%s5149_s7 + $0x8] sm:$0xff] %v2944_v26  ;;  %v2946_v28 = vpop.f32.mrb[2].mxu0  ;;  %3247 = vmatpush1.bf16.msra.mxu0 %v4579_v22  ;;  %v2983_v43 = vpop.f32.mrb[0].mxu1  ;;  %v4665_v22 = vld [vmem:[%s5139_s27 + $0x2ac] ss:$100 sps:$4 sm:$0xff]  }
 0x2af   : > { %v2947_v32 = vpop.f32.mrb[3].mxu0  ;;  %3248 = vmatprep.subr.bf16.mxu0 %v4587_v24  ;;  %3442 = vst [vmem:[%s5149_s7 + $0x10] sm:$0xff] %v2983_v43  ;;  %v2985_v44 = vpop.f32.mrb[1].mxu1  ;;  %v4663_v24 = vld [vmem:[%s5139_s27 + $0x2a8] ss:$100 sps:$4 sm:$0xff]  }
 0x2b0   : > { %3443 = vst [vmem:[%s5149_s7 + $0x18] sm:$0xff] %v2985_v44  ;;  %3288 = vmatpush1.bf16.msra.mxu1 %v4624_v38  ;;  %v2987_v45 = vpop.f32.mrb[2].mxu1  ;;  %v4671_v26 = vld [vmem:[%s5139_s27 + $0x374] ss:$100 sps:$4 sm:$0xff]   ;;  %v4702_v32 = vld [vmem:[%s5139_s27 + $0x1e8] ss:$100 sps:$4 sm:$0xff]  }
 0x2b1   : > { %v2988_v48 = vpop.f32.mrb[3].mxu1  ;;  %3289 = vmatprep.subr.bf16.mxu1 %v4632_v40  ;;  %v4669_v28 = vld [vmem:[%s5139_s27 + $0x370] ss:$100 sps:$4 sm:$0xff]   ;;  %v4681_v40 = vld [vmem:[%s5139_s27 + $0x500] ss:$100 sps:$4 sm:$0xff]  }
 0x2b2   : > { %3249 = vmatpush1.bf16.msra.mxu0 %v4585_v29  ;;  %v4704_v29 = vld [vmem:[%s5139_s27 + $0x1ec] ss:$100 sps:$4 sm:$0xff]   ;;  %v4714_v45 = vld [vmem:[%s5139_s27 + $0x378] ss:$100 sps:$4 sm:$0xff]  }
 0x2b3   : > { %3250 = vmatprep.subr.bf16.mxu0 %v4593_v33  ;;  %v4675_v33 = vld [vmem:[%s5139_s27 + $0x438] ss:$100 sps:$4 sm:$0xff]   ;;  %v4708_v38 = vld [vmem:[%s5139_s27 + $0x2b0] ss:$100 sps:$4 sm:$0xff]  }
 0x2b4   : > { %3290 = vmatpush1.bf16.msra.mxu1 %v4630_v46  ;;  %v4689_v44 = vld [vmem:[%s5139_s27 + $0x5cc] ss:$100 sps:$4 sm:$0xff]   ;;  %v4695_v48 = vld [vmem:[%s5139_s27 + $0x694] ss:$100 sps:$4 sm:$0xff]  }
 0x2b5   : > { %3291 = vmatprep.subr.bf16.mxu1 %v4638_v49  ;;  %v4687_v46 = vld [vmem:[%s5139_s27 + $0x5c8] ss:$100 sps:$4 sm:$0xff]   ;;  %v4720_v49 = vld [vmem:[%s5139_s27 + $0x440] ss:$100 sps:$4 sm:$0xff]  }
 0x2b6   : > { %3251 = vmatpush1.bf16.msra.mxu0 %v4591_v35  ;;  %v4683_v35 = vld [vmem:[%s5139_s27 + $0x504] ss:$100 sps:$4 sm:$0xff]  }
 0x2b7   : > { %3252 = vmatprep.subr.bf16.mxu0 %v4599_v37 }
 0x2b8   : > { %3292 = vmatpush1.bf16.msra.mxu1 %v4636_v51  ;;  %v4728_v51 = vld [vmem:[%s5139_s27 + $0x50c] ss:$100 sps:$4 sm:$0xff]  }
 0x2b9   : > { %3293 = vmatprep.subr.bf16.mxu1 %v4644_v53 }
 0x2ba   : > { %3253 = vmatpush1.bf16.msra.mxu0 %v4597_v39 }
 0x2bb   : > { %3254 = vmatprep.subr.bf16.mxu0 %v4605_v42  ;;  %v4716_v42 = vld [vmem:[%s5139_s27 + $0x37c] ss:$100 sps:$4 sm:$0xff]  }
 0x2bc   : > { %3294 = vmatpush1.bf16.msra.mxu1 %v4642_v55 }
 0x2bd   : > { %3295 = vmatprep.subr.bf16.mxu1 %v4650_v57  ;;  %v4699_v57 = vld [vmem:[%s5139_s27 + $0x758] ss:$100 sps:$4 sm:$0xff]  }
 0x2be   : > { %3255 = vmatpush1.bf16.msra.mxu0 %v4603_v47  ;;  %v4722_v47 = vld [vmem:[%s5139_s27 + $0x444] ss:$100 sps:$4 sm:$0xff]  }
 0x2bf   : > { %3256 = vmatprep.subr.bf16.mxu0 %v4611_v50  ;;  %v4693_v50 = vld [vmem:[%s5139_s27 + $0x690] ss:$100 sps:$4 sm:$0xff]  }
 0x2c0   : > { %3296 = vmatpush1.bf16.msra.mxu1 %v4648_v60  ;;  %v4734_v60 = vld [vmem:[%s5139_s27 + $0x5d4] ss:$100 sps:$4 sm:$0xff]  }
 0x2c1   : > { %3297 = vmatprep.subr.bf16.mxu1 %v4656_v62  ;;  %v4732_v62 = vld [vmem:[%s5139_s27 + $0x5d0] ss:$100 sps:$4 sm:$0xff]  }
 0x2c2   : > { %3257 = vmatpush1.bf16.msra.mxu0 %v4609_v52  ;;  %v4701_v52 = vld [vmem:[%s5139_s27 + $0x75c] ss:$100 sps:$4 sm:$0xff]  }
 0x2c3   : > { %3258 = vmatprep.subr.bf16.mxu0 %v4617_v54 }
 0x2c4   : > { %3298 = vmatpush1.bf16.msra.mxu1 %v4654_v41  ;;  %v4740_v41 = vld [vmem:[%s5139_s27 + $0x69c] ss:$100 sps:$4 sm:$0xff]  }
 0x2c5   : > { %3299 = vmatprep.subr.bf16.mxu1 %v4662_v1  ;;  %v4738_v1 = vld [vmem:[%s5139_s27 + $0x698] ss:$100 sps:$4 sm:$0xff]  }
 0x2c6   : > { %3259 = vmatpush1.bf16.msra.mxu0 %v4615_v56  ;;  %v4726_v56 = vld [vmem:[%s5139_s27 + $0x508] ss:$100 sps:$4 sm:$0xff]  }
 0x2c7   : > { %3260 = vmatprep.subr.bf16.mxu0 %v4623_v58 }
 0x2c8   : > { %3300 = vmatpush1.bf16.msra.mxu1 %v4660_v3  ;;  %v4745_v3 = vld [vmem:[%s5139_s27 + $0x764] ss:$100 sps:$4 sm:$0xff]  }
 0x2c9   : > { %3301 = vmatprep.subr.bf16.mxu1 %v4668_v5  ;;  %v4743_v5 = vld [vmem:[%s5139_s27 + $0x760] ss:$100 sps:$4 sm:$0xff]  }
 0x2ca   : > { %3261 = vmatpush1.bf16.msra.mxu0 %v4621_v61  ;;  %v4707_v61 = vld [vmem:[%s5139_s27 + $0x824] ss:$100 sps:$4 sm:$0xff]  }
 0x2cb   : > { %3262 = vmatprep.subr.bf16.mxu0 %v4629_v63  ;;  %v4705_v63 = vld [vmem:[%s5139_s27 + $0x820] ss:$100 sps:$4 sm:$0xff]  }
 0x2cc   : > { %3302 = vmatpush1.bf16.msra.mxu1 %v4666_v7  ;;  %v4750_v7 = vld [vmem:[%s5139_s27 + $0x82c] ss:$100 sps:$4 sm:$0xff]  }
 0x2cd   : > { %3303 = vmatprep.subr.bf16.mxu1 %v4674_v9  ;;  %v4748_v9 = vld [vmem:[%s5139_s27 + $0x828] ss:$100 sps:$4 sm:$0xff]  }
 0x2ce   : > { %3263 = vmatpush1.bf16.msra.mxu0 %v4627_v0  ;;  %v4713_v0 = vld [vmem:[%s5139_s27 + $0x8ec] ss:$100 sps:$4 sm:$0xff]  }
 0x2cf   : > { %3264 = vmatprep.subr.bf16.mxu0 %v4635_v2  ;;  %v4711_v2 = vld [vmem:[%s5139_s27 + $0x8e8] ss:$100 sps:$4 sm:$0xff]  }
 0x2d0   : > { %3304 = vmatpush1.bf16.msra.mxu1 %v4672_v11  ;;  %v4755_v11 = vld [vmem:[%s5139_s27 + $0x8f4] ss:$100 sps:$4 sm:$0xff]  }
 0x2d1   : > { %3305 = vmatprep.subr.bf16.mxu1 %v4680_v13  ;;  %v4753_v13 = vld [vmem:[%s5139_s27 + $0x8f0] ss:$100 sps:$4 sm:$0xff]  }
 0x2d2   : > { %3265 = vmatpush1.bf16.msra.mxu0 %v4633_v4  ;;  %v4719_v4 = vld [vmem:[%s5139_s27 + $0x9b4] ss:$100 sps:$4 sm:$0xff]  }
 0x2d3   : > { %3266 = vmatprep.subr.bf16.mxu0 %v4641_v6  ;;  %v4717_v6 = vld [vmem:[%s5139_s27 + $0x9b0] ss:$100 sps:$4 sm:$0xff]  }
 0x2d4   : > { %3306 = vmatpush1.bf16.msra.mxu1 %v4678_v15  ;;  %v4760_v15 = vld [vmem:[%s5139_s27 + $0x9bc] ss:$100 sps:$4 sm:$0xff]  }
 0x2d5   : > { %3307 = vmatprep.subr.bf16.mxu1 %v4686_v17  ;;  %v4758_v17 = vld [vmem:[%s5139_s27 + $0x9b8] ss:$100 sps:$4 sm:$0xff]  }
 0x2d6   : > { %3267 = vmatpush1.bf16.msra.mxu0 %v4639_v8  ;;  %v4725_v8 = vld [vmem:[%s5139_s27 + $0xa7c] ss:$100 sps:$4 sm:$0xff]  }
 0x2d7   : > { %3318 = vmatprep.subr.bf16.mxu0 %v4647_v10  ;;  %v4723_v10 = vld [vmem:[%s5139_s27 + $0xa78] ss:$100 sps:$4 sm:$0xff]  }
 0x2d8   : > { %3308 = vmatpush1.bf16.msra.mxu1 %v4684_v19  ;;  %v4765_v19 = vld [vmem:[%s5139_s27 + $0xa84] ss:$100 sps:$4 sm:$0xff]  }
 0x2d9   : > { %3269 = vmatmul.mubr.bf16.vlgmr.msra.gmra.mrb[16].mxu0 %v5227_v59  ;;  %3359 = vmatprep.subr.bf16.mxu1 %v4692_v21  ;;  %v4763_v21 = vld [vmem:[%s5139_s27 + $0xa80] ss:$100 sps:$4 sm:$0xff]  }
 0x2da   : > { %3319 = vmatpush1.bf16.msra.mxu0 %v4645_v12  ;;  %3350 = vmatprep.mubr.bf16.mxu0 %v5197_v31  ;;  %v4731_v12 = vld [vmem:[%s5139_s27 + $0xb44] ss:$100 sps:$4 sm:$0xff]  }
 0x2db   : > { %3320 = vmatprep.subr.bf16.mxu0 %v4653_v14  ;;  %3310 = vmatmul.mubr.bf16.vlgmr.msra.gmra.mrb[16].mxu1 %v5227_v59  ;;  %v4729_v14 = vld [vmem:[%s5139_s27 + $0xb40] ss:$100 sps:$4 sm:$0xff]  }
 0x2dc   : > { %3360 = vmatpush1.bf16.msra.mxu1 %v4690_v23  ;;  %3391 = vmatprep.mubr.bf16.mxu1 %v5197_v31  ;;  %v4770_v23 = vld [vmem:[%s5139_s27 + $0xb4c] ss:$100 sps:$4 sm:$0xff]  }
 0x2dd   : > { %3361 = vmatprep.subr.bf16.mxu1 %v4698_v25  ;;  %v4768_v25 = vld [vmem:[%s5139_s27 + $0xb48] ss:$100 sps:$4 sm:$0xff]  }
 0x2de   : > { %3321 = vmatpush1.bf16.msra.mxu0 %v4651_v16  ;;  %v4737_v16 = vld [vmem:[%s5139_s27 + $0xc0c] ss:$100 sps:$4 sm:$0xff]  }
 0x2df   : > { %3322 = vmatprep.subr.bf16.mxu0 %v4659_v18  ;;  %v4735_v18 = vld [vmem:[%s5139_s27 + $0xc08] ss:$100 sps:$4 sm:$0xff]  }
 0x2e0   : > { %3362 = vmatpush1.bf16.msra.mxu1 %v4696_v27  ;;  %v4775_v27 = vld [vmem:[%s5139_s27 + $0xc14] ss:$100 sps:$4 sm:$0xff]  }
 0x2e1   : > { %3363 = vmatprep.subr.bf16.mxu1 %v4704_v29  ;;  %v4773_v29 = vld [vmem:[%s5139_s27 + $0xc10] ss:$100 sps:$4 sm:$0xff]  }
 0x2e2   : > { %3323 = vmatpush1.bf16.msra.mxu0 %v4657_v20  ;;  %v4741_v20 = vld [vmem:[%s5139_s27 + $0x6a0] ss:$100 sps:$4 sm:$0xff]  }
 0x2e3   : > { %3324 = vmatprep.subr.bf16.mxu0 %v4665_v22  ;;  %v4742_v22 = vld [vmem:[%s5139_s27 + $0x60] ss:$100 sps:$4 sm:$0xff]  }
 0x2e4   : > { %3364 = vmatpush1.bf16.msra.mxu1 %v4702_v32  ;;  %v4756_v32 = vld [vmem:[%s5139_s27 + $0x8f8] ss:$100 sps:$4 sm:$0xff]  }
 0x2e5   : > { %3365 = vmatprep.subr.bf16.mxu1 %v4710_v34  ;;  %v4761_v34 = vld [vmem:[%s5139_s27 + $0x9c0] ss:$100 sps:$4 sm:$0xff]  }
 0x2e6   : > { %3325 = vmatpush1.bf16.msra.mxu0 %v4663_v24  ;;  %v4746_v24 = vld [vmem:[%s5139_s27 + $0x768] ss:$100 sps:$4 sm:$0xff]  }
 0x2e7   : > { %3326 = vmatprep.subr.bf16.mxu0 %v4671_v26  ;;  %v4747_v26 = vld [vmem:[%s5139_s27 + $0x128] ss:$100 sps:$4 sm:$0xff]  }
 0x2e8   : > { %3366 = vmatpush1.bf16.msra.mxu1 %v4708_v38 }
 0x2e9   : > { %3367 = vmatprep.subr.bf16.mxu1 %v4716_v42  ;;  %v4772_v42 = vld [vmem:[%s5139_s27 + $0x510] ss:$100 sps:$4 sm:$0xff]  }
 0x2ea   : > { %3327 = vmatpush1.bf16.msra.mxu0 %v4669_v28  ;;  %v4751_v28 = vld [vmem:[%s5139_s27 + $0x830] ss:$100 sps:$4 sm:$0xff]  }
 0x2eb   : > { %3328 = vmatprep.subr.bf16.mxu0 %v4677_v30  ;;  %v4752_v30 = vld [vmem:[%s5139_s27 + $0x1f0] ss:$100 sps:$4 sm:$0xff]  }
 0x2ec   : > { %v3024_v36 = vpop.f32.mrb[4].mxu0  ;;  %3368 = vmatpush1.bf16.msra.mxu1 %v4714_v45  ;;  %v4777_v45 = vld [vmem:[%s5139_s27 + $0x5d8] ss:$100 sps:$4 sm:$0xff]  }
 0x2ed   : > { %3444 = vst [vmem:[%s5149_s7 + $0x20] sm:$0xff] %v3024_v36  ;;  %v3026_v37 = vpop.f32.mrb[5].mxu0  ;;  %3369 = vmatprep.subr.bf16.mxu1 %v4722_v47  ;;  %v4767_v36 = vld [vmem:[%s5139_s27 + $0x448] ss:$100 sps:$4 sm:$0xff]  }
 0x2ee   : > { %3445 = vst [vmem:[%s5149_s7 + $0x28] sm:$0xff] %v3026_v37  ;;  %v3028_v39 = vpop.f32.mrb[6].mxu0  ;;  %3329 = vmatpush1.bf16.msra.mxu0 %v4675_v33  ;;  %v3065_v53 = vpop.f32.mrb[4].mxu1  ;;  %v4757_v33 = vld [vmem:[%s5139_s27 + $0x2b8] ss:$100 sps:$4 sm:$0xff]  }
 0x2ef   : > { %v3029_v43 = vpop.f32.mrb[7].mxu0  ;;  %3330 = vmatprep.subr.bf16.mxu0 %v4683_v35  ;;  %3446 = vst [vmem:[%s5149_s7 + $0x30] sm:$0xff] %v3065_v53  ;;  %v3067_v54 = vpop.f32.mrb[5].mxu1  ;;  %v4766_v35 = vld [vmem:[%s5139_s27 + $0xa88] ss:$100 sps:$4 sm:$0xff]  }
 0x2f0   : > { %3447 = vst [vmem:[%s5149_s7 + $0x38] sm:$0xff] %v3067_v54  ;;  %3370 = vmatpush1.bf16.msra.mxu1 %v4720_v49  ;;  %v3069_v55 = vpop.f32.mrb[6].mxu1  ;;  %v4771_v37 = vld [vmem:[%s5139_s27 + $0xb50] ss:$100 sps:$4 sm:$0xff]  }
 0x2f1   : > { %v3070_v58 = vpop.f32.mrb[7].mxu1  ;;  %3371 = vmatprep.subr.bf16.mxu1 %v4728_v51 }
 0x2f2   : > { %3331 = vmatpush1.bf16.msra.mxu0 %v4681_v40 }
 0x2f3   : > { %3332 = vmatprep.subr.bf16.mxu0 %v4689_v44  ;;  %v4776_v44 = vld [vmem:[%s5139_s27 + $0xc18] ss:$100 sps:$4 sm:$0xff]  }
 0x2f4   : > { %3372 = vmatpush1.bf16.msra.mxu1 %v4726_v56 }
 0x2f5   : > { %3373 = vmatprep.subr.bf16.mxu1 %v4734_v60 }
 0x2f6   : > { %3333 = vmatpush1.bf16.msra.mxu0 %v4687_v46 }
 0x2f7   : > { %3334 = vmatprep.subr.bf16.mxu0 %v4695_v48 }
 0x2f8   : > { %3374 = vmatpush1.bf16.msra.mxu1 %v4732_v62 }
 0x2f9   : > { %3375 = vmatprep.subr.bf16.mxu1 %v4740_v41 }
 0x2fa   : > { %3335 = vmatpush1.bf16.msra.mxu0 %v4693_v50 }
 0x2fb   : > { %3336 = vmatprep.subr.bf16.mxu0 %v4701_v52 }
 0x2fc   : > { %3376 = vmatpush1.bf16.msra.mxu1 %v4738_v1 }
 0x2fd   : > { %3377 = vmatprep.subr.bf16.mxu1 %v4745_v3 }
 0x2fe   : > { %3337 = vmatpush1.bf16.msra.mxu0 %v4699_v57 }
 0x2ff   : > { %3338 = vmatprep.subr.bf16.mxu0 %v4707_v61 }
 0x300   : > { %3378 = vmatpush1.bf16.msra.mxu1 %v4743_v5 }
 0x301   : > { %3379 = vmatprep.subr.bf16.mxu1 %v4750_v7 }
 0x302   : > { %3339 = vmatpush1.bf16.msra.mxu0 %v4705_v63 }
 0x303   : > { %3340 = vmatprep.subr.bf16.mxu0 %v4713_v0 }
 0x304   : > { %3380 = vmatpush1.bf16.msra.mxu1 %v4748_v9 }
 0x305   : > { %3381 = vmatprep.subr.bf16.mxu1 %v4755_v11 }
 0x306   : > { %3341 = vmatpush1.bf16.msra.mxu0 %v4711_v2 }
 0x307   : > { %3342 = vmatprep.subr.bf16.mxu0 %v4719_v4 }
 0x308   : > { %3382 = vmatpush1.bf16.msra.mxu1 %v4753_v13 }
 0x309   : > { %3383 = vmatprep.subr.bf16.mxu1 %v4760_v15 }
 0x30a   : > { %3343 = vmatpush1.bf16.msra.mxu0 %v4717_v6 }
 0x30b   : > { %3344 = vmatprep.subr.bf16.mxu0 %v4725_v8 }
 0x30c   : > { %3384 = vmatpush1.bf16.msra.mxu1 %v4758_v17 }
 0x30d   : > { %3385 = vmatprep.subr.bf16.mxu1 %v4765_v19 }
 0x30e   : > { %3345 = vmatpush1.bf16.msra.mxu0 %v4723_v10 }
 0x30f   : > { %3346 = vmatprep.subr.bf16.mxu0 %v4731_v12 }
 0x310   : > { %3386 = vmatpush1.bf16.msra.mxu1 %v4763_v21 }
 0x311   : > { %3387 = vmatprep.subr.bf16.mxu1 %v4770_v23 }
 0x312   : > { %3347 = vmatpush1.bf16.msra.mxu0 %v4729_v14 }
 0x313   : > { %3348 = vmatprep.subr.bf16.mxu0 %v4737_v16 }
 0x314   : > { %3388 = vmatpush1.bf16.msra.mxu1 %v4768_v25 }
 0x315   : > { %3389 = vmatprep.subr.bf16.mxu1 %v4775_v27 }
 0x316   : > { %3349 = vmatpush1.bf16.msra.mxu0 %v4735_v18 }
 0x317   : > { %4011 = vmatprep.subr.bf16.mxu0 %v4741_v20 }
 0x318   : > { %3390 = vmatpush1.bf16.msra.mxu1 %v4773_v29 }
 0x319   : > { %3351 = vmatmul.mubr.bf16.vlgmr.msra.gmra.mrb[20].mxu0 %v5227_v59 }
 0x31a   : > { %4012 = vmatpush3.bf16.msra.mxu0 %v4742_v22  ;;  %3432 = vmatprep.mubr.bf16.mxu0 %v5197_v31  ;;  %v4762_v31 = vld [vmem:[%s5139_s27 + $0x380] ss:$100 sps:$4 sm:$0xff]  }
 0x31b   : > { %4013 = vmatprep.subr.bf16.mxu0 %v4746_v24  ;;  %3392 = vmatmul.mubr.bf16.vlgmr.msra.gmra.mrb[20].mxu1 %v5227_v59 }
 0x31e   : > { %4014 = vmatpush3.bf16.msra.mxu0 %v4747_v26 }
 0x31f   : > { %4015 = vmatprep.subr.bf16.mxu0 %v4751_v28 }
 0x322   : > { %4016 = vmatpush3.bf16.msra.mxu0 %v4752_v30 }
 0x323   : > { %4017 = vmatprep.subr.bf16.mxu0 %v4756_v32 }
 0x326   : > { %4018 = vmatpush3.bf16.msra.mxu0 %v4757_v33 }
 0x327   : > { %4019 = vmatprep.subr.bf16.mxu0 %v4761_v34 }
 0x32a   : > { %4020 = vmatpush3.bf16.msra.mxu0 %v4762_v31 }
 0x32b   : > { %4021 = vmatprep.subr.bf16.mxu0 %v4766_v35 }
 0x32c   : > { %v3106_v38 = vpop.f32.mrb[8].mxu0 }
 0x32d   : > { %3448 = vst [vmem:[%s5149_s7 + $0x40] sm:$0xff] %v3106_v38  ;;  %v3108_v39 = vpop.f32.mrb[9].mxu0 }
 0x32e   : > { %3449 = vst [vmem:[%s5149_s7 + $0x48] sm:$0xff] %v3108_v39  ;;  %v3110_v40 = vpop.f32.mrb[10].mxu0  ;;  %4022 = vmatpush3.bf16.msra.mxu0 %v4767_v36  ;;  %v3147_v46 = vpop.f32.mrb[8].mxu1 }
 0x32f   : > { %v3111_v43 = vpop.f32.mrb[11].mxu0  ;;  %4023 = vmatprep.subr.bf16.mxu0 %v4771_v37  ;;  %3450 = vst [vmem:[%s5149_s7 + $0x50] sm:$0xff] %v3147_v46  ;;  %v3149_v47 = vpop.f32.mrb[9].mxu1 }
 0x330   : > { %3451 = vst [vmem:[%s5149_s7 + $0x58] sm:$0xff] %v3149_v47  ;;  %v3151_v48 = vpop.f32.mrb[10].mxu1 }
 0x331   : > { %v3152_v49 = vpop.f32.mrb[11].mxu1 }
 0x332   : > { %4024 = vmatpush3.bf16.msra.mxu0 %v4772_v42 }
 0x333   : > { %4025 = vmatprep.subr.bf16.mxu0 %v4776_v44 }
 0x336   : > { %4026 = vmatpush3.bf16.msra.mxu0 %v4777_v45 }
 0x339   : > { %3433 = vmatmul.mubr.bf16.vlgmr.msra.gmra.mrb[24].mxu0 %v5227_v59 }
 0x36c   : > { %v3188_v50 = vpop.f32.mrb[12].mxu0 }
 0x36d   : > { %3452 = vst [vmem:[%s5149_s7 + $0x60] sm:$0xff] %v3188_v50  ;;  %v3190_v51 = vpop.f32.mrb[13].mxu0 }
 0x36e   : > { %3453 = vst [vmem:[%s5149_s7 + $0x68] sm:$0xff] %v3190_v51  ;;  %v3192_v52 = vpop.f32.mrb[14].mxu0  ;;  %v3229_v54 = vpop.f32.mrb[12].mxu1 }
 0x36f   : > { %v3193_v53 = vpop.f32.mrb[15].mxu0  ;;  %3454 = vst [vmem:[%s5149_s7 + $0x70] sm:$0xff] %v3229_v54  ;;  %v3231_v55 = vpop.f32.mrb[13].mxu1 }
 0x370   : > { %3455 = vst [vmem:[%s5149_s7 + $0x78] sm:$0xff] %v3231_v55  ;;  %v3233_v56 = vpop.f32.mrb[14].mxu1 }
 0x371   : > { %v3234_v59 = vpop.f32.mrb[15].mxu1 }
 0x3ac   : > { %v3270_v57 = vpop.f32.mrb[16].mxu0 }
 0x3ad   : > { %3456 = vst [vmem:[%s5149_s7 + $0x80] sm:$0xff] %v3270_v57  ;;  %v3272_v58 = vpop.f32.mrb[17].mxu0 }
 0x3ae   : > { %3457 = vst [vmem:[%s5149_s7 + $0x88] sm:$0xff] %v3272_v58  ;;  %v3274_v60 = vpop.f32.mrb[18].mxu0  ;;  %v3311_v62 = vpop.f32.mrb[16].mxu1 }
 0x3af   : > { %v3275_v61 = vpop.f32.mrb[19].mxu0  ;;  %3458 = vst [vmem:[%s5149_s7 + $0x90] sm:$0xff] %v3311_v62  ;;  %v3313_v63 = vpop.f32.mrb[17].mxu1 }
 0x3b0   : > { %3459 = vst [vmem:[%s5149_s7 + $0x98] sm:$0xff] %v3313_v63  ;;  %v3315_v41 = vpop.f32.mrb[18].mxu1 }
 0x3b1   : > { %v3316_v0 = vpop.f32.mrb[19].mxu1 }
 0x3ec   : > { %v3352_v1 = vpop.f32.mrb[20].mxu0 }
 0x3ed   : > { %3460 = vst [vmem:[%s5149_s7 + $0xa0] sm:$0xff] %v3352_v1  ;;  %v3354_v2 = vpop.f32.mrb[21].mxu0 }
 0x3ee   : > { %3461 = vst [vmem:[%s5149_s7 + $0xa8] sm:$0xff] %v3354_v2  ;;  %v3356_v3 = vpop.f32.mrb[22].mxu0  ;;  %v3393_v5 = vpop.f32.mrb[20].mxu1 }
 0x3ef   : > { %v3357_v4 = vpop.f32.mrb[23].mxu0  ;;  %3462 = vst [vmem:[%s5149_s7 + $0xb0] sm:$0xff] %v3393_v5  ;;  %v3395_v6 = vpop.f32.mrb[21].mxu1 }
 0x3f0   : > { %3463 = vst [vmem:[%s5149_s7 + $0xb8] sm:$0xff] %v3395_v6  ;;  %v3397_v7 = vpop.f32.mrb[22].mxu1 }
 0x3f1   : > { %v3398_v8 = vpop.f32.mrb[23].mxu1 }
 0x40c   : > { %v4027_v9 = vpop.f32.mrb[24].mxu0 }
 0x40d   : > { %v4028_v10 = vpop.f32.mrb[25].mxu0 }
 0x40e   : > { %v4029_v11 = vadd.f32 %v4028_v10, %v4027_v9  ;;  %v4030_v12 = vpop.f32.mrb[26].mxu0 }
 0x40f   : > { %v4031_v13 = vpop.f32.mrb[27].mxu0 }
 0x410   : > { %3464 = vst [vmem:[%s5149_s7 + $0xc0] sm:$0xff] %v4029_v11 }
 0x411 PF: > { %s16_s20 = sadd.s32 1, %s4922_s20   ;;  %s5651_s15 = smov %s4906_s16 }
 0x412   : > { %p13_p1 = scmp.ge.s32.totalorder %s16_s20, 4   ;;  %s5652_s16 = smov %s4910_s17 }
 0x413   : > { %s5653_s17 = smov %s5096_s5  ;;  %s5654_s18 = smov %s4918_s19 }
 0x414   : > { %s5655_s19 = smov %s5657_s26  ;;  %15 = sbr.rel (!%p13_p1) target bundleno = 4 (0x4), region = 90 }
 0x41b   :  { %3495 = vsyncpa [#allocation4], 1 }
 0x41c   :  { %3497 = vsyncpa [#allocation4 + $0x1], 1 }
 0x41d   :  { %3498 = vsyncpa [#allocation6], 1 }

// kernel: synthesis_forward.4
= control target key start
LH: loop header
LB: loop body
LE: loop exit
PB: predicated region body
PF: predicated region fallthrough
CT: control target
= control target key end

     0   :  { %s7001_s15 = smov 0   ;;  %s7003_s16 = smov 0   ;;  %s9585_s0 = inlined_call_operand.vmem [shape: f32[128,256], index: 0, kind: input, shape index: {}]   ;;  %s9586_s1 = inlined_call_operand.vmem [shape: f32[256,256], index: 1, kind: input, shape index: {}]   ;;  %s9587_s2 = inlined_call_operand.vmem [shape: f32[1,256], index: 2, kind: input, shape index: {}]   ;;  %s9588_s3 = inlined_call_operand.vmem [shape: bf16[256,6400], index: 3, kind: input, shape index: {}]   ;;  %s9589_s4 = inlined_call_operand.vmem [shape: f32[128,6400], index: 4, kind: output, shape index: {}]  }
   0x1   :  { %s7005_s17 = smov 0   ;;  %s7007_s18 = smov 0  }
   0x2   :  { %s7009_s19 = smov 0   ;;  %s7011_s20 = smov 0  }
   0x3   :  { %s7013_s21 = smov 0   ;;  %s7015_s22 = smov 0  }
   0x4   :  { %s7017_s23 = smov 0  }
   0x5 LB: > { %s5559_s24 = sadd.s32 4294967295, %s6974_s23   ;;  %s23_s25 = sadd.s32 1, %s6966_s21  ;;  %s6974_s23 = sphi %s7017_s23, %s14_s23   ;;  %s6970_s22 = sphi %s7015_s22, %s9598_s22   ;;  %s6966_s21 = sphi %s7013_s21, %s9597_s21   ;;  %s6962_s20 = sphi %s7011_s20, %s9596_s20   ;;  %s6958_s19 = sphi %s7009_s19, %s9595_s19   ;;  %s6954_s18 = sphi %s7007_s18, %s9594_s18   ;;  %s6950_s17 = sphi %s7005_s17, %s9593_s17   ;;  %s6946_s16 = sphi %s7003_s16, %s9592_s16   ;;  %s6942_s15 = sphi %s7001_s15, %s9591_s15  }
   0x6   : > { %p24_p0 = scmp.ge.s32.totalorder %s23_s25, 2  ;;  %s26_s26 = sadd.s32 1, %s6970_s22 }
   0x7   : > { %s101_s27 = sadd.s32 1, %s6954_s18  ;;  %p108_p1 = scmp.ne.s32.totalorder %s6954_s18, %s6950_s17 }
   0x8   : > { %s9600_s25 = smov (%p24_p0, %s23_s25), 0  ;;  %s9602_s26 = smov (!%p24_p0, %s26_s26), %s6970_s22 }
   0x9   : > { %s98_s28 = ssub.s32 %s6966_s21, %s9600_s25  ;;  %p109_p2 = scmp.eq.s32.totalorder %s6974_s23, 0 }
   0xa   : > { %p28_p3 = scmp.ge.s32.totalorder %s9602_s26, 2  ;;  %p99_p4 = scmp.eq.s32.totalorder %s98_s28, 0 }
   0xb   : > { %p110_p5 = por %p109_p2, %p108_p1  ;;  %s129_s29 = sadd.s32 1, %s6946_s16 }
   0xc   : > { %s9604_s26 = smov (%p28_p3, %s9602_s26), 0  ;;  %p139_p6 = scmp.ne.s32.totalorder %s6946_s16, %s6942_s15 }
   0xd   : > { %s7062_s30 = scalar_select %p99_p4, %s6954_s18, %s101_s27  }
   0xe   : > { %s124_s5 = ssub.s32 %s6970_s22, %s9604_s26  ;;  %p140_p7 = scmp.eq.s32.totalorder %s5559_s24, 3 }
   0xf   : > { %s126_s6 = sor.u32 %s124_s5, %s98_s28  ;;  %p5562_p10 = scmp.ge.s32.totalorder %s6974_s23, 4 }
  0x10   : > { %p127_p8 = scmp.eq.s32.totalorder %s126_s6, 0  ;;  %p7068_p9 = por %p140_p7, %p139_p6 }
  0x11   : > { %168 = sbr.rel (%p5562_p10) target bundleno = 242 (0xf2), region = 24 }
  0x12   : > { %s7073_s8 = scalar_select %p127_p8, %s6946_s16, %s129_s29  }
  0x18   : > { %181 = sbr.rel (!%p110_p5) target bundleno = 242 (0xf2), region = 32  ;;  %s183_s9 = sand.u32 (%p110_p5), 1, %s6954_s18  }
  0x19   : > { %s6038_s10 = smul.u32 (%p110_p5), 100, %s6966_s21 }
  0x1a   : > { %s6192_s11 = smul.u32 (%p110_p5), 3200, %s183_s9 }
  0x1b   : > { %s7081_s14 = scalar_lea.vmem (%p110_p5), %s9588_s3, %s6038_s10 }
  0x1c   : > { %v203_v0 = vld [vmem:[%s7081_s14] sm:$0xff] (%p110_p5)  ;;  %v205_v1 = vld [vmem:[%s7081_s14 + $0x8] sm:$0xff] (%p110_p5)  ;;  %v207_v2 = vld [vmem:[%s7081_s14 + $0x10] sm:$0xff] (%p110_p5)  ;;  %s7086_s24 = scalar_lea.vmem (%p110_p5), [#allocation3], %s6192_s11 }
  0x1d   : > { %204 = vst [vmem:[%s7086_s24] sm:$0xff] (%p110_p5), %v203_v0  ;;  %206 = vst [vmem:[%s7086_s24 + $0x8] sm:$0xff] (%p110_p5), %v205_v1  ;;  %v209_v3 = vld [vmem:[%s7081_s14 + $0x18] sm:$0xff] (%p110_p5)  ;;  %v211_v4 = vld [vmem:[%s7081_s14 + $0x20] sm:$0xff] (%p110_p5) }
  0x1e   : > { %208 = vst [vmem:[%s7086_s24 + $0x10] sm:$0xff] (%p110_p5), %v207_v2  ;;  %v213_v5 = vld [vmem:[%s7081_s14 + $0x28] sm:$0xff] (%p110_p5)  ;;  %210 = vst [vmem:[%s7086_s24 + $0x18] sm:$0xff] (%p110_p5), %v209_v3  ;;  %v215_v6 = vld [vmem:[%s7081_s14 + $0x30] sm:$0xff] (%p110_p5) }
  0x1f   : > { %212 = vst [vmem:[%s7086_s24 + $0x20] sm:$0xff] %v211_v4  ;;  %214 = vst [vmem:[%s7086_s24 + $0x28] sm:$0xff] %v213_v5  ;;  %v217_v7 = vld [vmem:[%s7081_s14 + $0x38] sm:$0xff]  ;;  %v219_v8 = vld [vmem:[%s7081_s14 + $0x40] sm:$0xff] }
  0x20   : > { %216 = vst [vmem:[%s7086_s24 + $0x30] sm:$0xff] %v215_v6  ;;  %218 = vst [vmem:[%s7086_s24 + $0x38] sm:$0xff] %v217_v7  ;;  %v221_v9 = vld [vmem:[%s7081_s14 + $0x48] sm:$0xff]  ;;  %v223_v10 = vld [vmem:[%s7081_s14 + $0x50] sm:$0xff] }
  0x21   : > { %220 = vst [vmem:[%s7086_s24 + $0x40] sm:$0xff] %v219_v8  ;;  %v225_v11 = vld [vmem:[%s7081_s14 + $0x58] sm:$0xff]  ;;  %222 = vst [vmem:[%s7086_s24 + $0x48] sm:$0xff] %v221_v9  ;;  %v227_v12 = vld [vmem:[%s7081_s14 + $0xc8] sm:$0xff] }
  0x22   : > { %224 = vst [vmem:[%s7086_s24 + $0x50] sm:$0xff] %v223_v10  ;;  %226 = vst [vmem:[%s7086_s24 + $0x58] sm:$0xff] %v225_v11  ;;  %v229_v13 = vld [vmem:[%s7081_s14 + $0xd0] sm:$0xff]  ;;  %v231_v14 = vld [vmem:[%s7081_s14 + $0xd8] sm:$0xff] }
  0x23   : > { %228 = vst [vmem:[%s7086_s24 + $0x64] sm:$0xff] %v227_v12  ;;  %230 = vst [vmem:[%s7086_s24 + $0x6c] sm:$0xff] %v229_v13  ;;  %v233_v15 = vld [vmem:[%s7081_s14 + $0xe0] sm:$0xff]  ;;  %v235_v16 = vld [vmem:[%s7081_s14 + $0xe8] sm:$0xff] }
  0x24   : > { %232 = vst [vmem:[%s7086_s24 + $0x74] sm:$0xff] %v231_v14  ;;  %v237_v17 = vld [vmem:[%s7081_s14 + $0xf0] sm:$0xff]  ;;  %234 = vst [vmem:[%s7086_s24 + $0x7c] sm:$0xff] %v233_v15  ;;  %v239_v18 = vld [vmem:[%s7081_s14 + $0xf8] sm:$0xff] }
  0x25   : > { %236 = vst [vmem:[%s7086_s24 + $0x84] sm:$0xff] %v235_v16  ;;  %238 = vst [vmem:[%s7086_s24 + $0x8c] sm:$0xff] %v237_v17  ;;  %v241_v19 = vld [vmem:[%s7081_s14 + $0x100] sm:$0xff]  ;;  %v243_v20 = vld [vmem:[%s7081_s14 + $0x108] sm:$0xff] }
  0x26   : > { %240 = vst [vmem:[%s7086_s24 + $0x94] sm:$0xff] %v239_v18  ;;  %242 = vst [vmem:[%s7086_s24 + $0x9c] sm:$0xff] %v241_v19  ;;  %v245_v21 = vld [vmem:[%s7081_s14 + $0x110] sm:$0xff]  ;;  %v247_v22 = vld [vmem:[%s7081_s14 + $0x118] sm:$0xff] }
  0x27   : > { %244 = vst [vmem:[%s7086_s24 + $0xa4] sm:$0xff] %v243_v20  ;;  %v249_v23 = vld [vmem:[%s7081_s14 + $0x120] sm:$0xff]  ;;  %246 = vst [vmem:[%s7086_s24 + $0xac] sm:$0xff] %v245_v21  ;;  %v251_v24 = vld [vmem:[%s7081_s14 + $0x190] sm:$0xff] }
  0x28   : > { %248 = vst [vmem:[%s7086_s24 + $0xb4] sm:$0xff] %v247_v22  ;;  %250 = vst [vmem:[%s7086_s24 + $0xbc] sm:$0xff] %v249_v23  ;;  %v253_v25 = vld [vmem:[%s7081_s14 + $0x198] sm:$0xff]  ;;  %v255_v26 = vld [vmem:[%s7081_s14 + $0x1a0] sm:$0xff] }
  0x29   : > { %252 = vst [vmem:[%s7086_s24 + $0xc8] sm:$0xff] %v251_v24  ;;  %254 = vst [vmem:[%s7086_s24 + $0xd0] sm:$0xff] %v253_v25  ;;  %v257_v27 = vld [vmem:[%s7081_s14 + $0x1a8] sm:$0xff]  ;;  %v259_v28 = vld [vmem:[%s7081_s14 + $0x1b0] sm:$0xff] }
  0x2a   : > { %256 = vst [vmem:[%s7086_s24 + $0xd8] sm:$0xff] %v255_v26  ;;  %v261_v29 = vld [vmem:[%s7081_s14 + $0x1b8] sm:$0xff]  ;;  %258 = vst [vmem:[%s7086_s24 + $0xe0] sm:$0xff] %v257_v27  ;;  %v263_v30 = vld [vmem:[%s7081_s14 + $0x1c0] sm:$0xff] }
  0x2b   : > { %260 = vst [vmem:[%s7086_s24 + $0xe8] sm:$0xff] %v259_v28  ;;  %262 = vst [vmem:[%s7086_s24 + $0xf0] sm:$0xff] %v261_v29  ;;  %v265_v31 = vld [vmem:[%s7081_s14 + $0x1c8] sm:$0xff]  ;;  %v267_v32 = vld [vmem:[%s7081_s14 + $0x1d0] sm:$0xff] }
  0x2c   : > { %264 = vst [vmem:[%s7086_s24 + $0xf8] sm:$0xff] %v263_v30  ;;  %266 = vst [vmem:[%s7086_s24 + $0x100] sm:$0xff] %v265_v31  ;;  %v269_v33 = vld [vmem:[%s7081_s14 + $0x1d8] sm:$0xff]  ;;  %v271_v34 = vld [vmem:[%s7081_s14 + $0x1e0] sm:$0xff] }
  0x2d   : > { %268 = vst [vmem:[%s7086_s24 + $0x108] sm:$0xff] %v267_v32  ;;  %v273_v35 = vld [vmem:[%s7081_s14 + $0x1e8] sm:$0xff]  ;;  %270 = vst [vmem:[%s7086_s24 + $0x110] sm:$0xff] %v269_v33  ;;  %v275_v36 = vld [vmem:[%s7081_s14 + $0x258] sm:$0xff] }
  0x2e   : > { %272 = vst [vmem:[%s7086_s24 + $0x118] sm:$0xff] %v271_v34  ;;  %274 = vst [vmem:[%s7086_s24 + $0x120] sm:$0xff] %v273_v35  ;;  %v277_v37 = vld [vmem:[%s7081_s14 + $0x260] sm:$0xff]  ;;  %v279_v38 = vld [vmem:[%s7081_s14 + $0x268] sm:$0xff] }
  0x2f   : > { %276 = vst [vmem:[%s7086_s24 + $0x12c] sm:$0xff] %v275_v36  ;;  %278 = vst [vmem:[%s7086_s24 + $0x134] sm:$0xff] %v277_v37  ;;  %v281_v39 = vld [vmem:[%s7081_s14 + $0x270] sm:$0xff]  ;;  %v283_v40 = vld [vmem:[%s7081_s14 + $0x278] sm:$0xff] }
  0x30   : > { %280 = vst [vmem:[%s7086_s24 + $0x13c] sm:$0xff] %v279_v38  ;;  %v285_v41 = vld [vmem:[%s7081_s14 + $0x280] sm:$0xff]  ;;  %282 = vst [vmem:[%s7086_s24 + $0x144] sm:$0xff] %v281_v39  ;;  %v287_v42 = vld [vmem:[%s7081_s14 + $0x288] sm:$0xff] }
  0x31   : > { %284 = vst [vmem:[%s7086_s24 + $0x14c] sm:$0xff] %v283_v40  ;;  %286 = vst [vmem:[%s7086_s24 + $0x154] sm:$0xff] %v285_v41  ;;  %v289_v43 = vld [vmem:[%s7081_s14 + $0x290] sm:$0xff]  ;;  %v291_v44 = vld [vmem:[%s7081_s14 + $0x298] sm:$0xff] }
  0x32   : > { %288 = vst [vmem:[%s7086_s24 + $0x15c] sm:$0xff] %v287_v42  ;;  %290 = vst [vmem:[%s7086_s24 + $0x164] sm:$0xff] %v289_v43  ;;  %v293_v45 = vld [vmem:[%s7081_s14 + $0x2a0] sm:$0xff]  ;;  %v295_v46 = vld [vmem:[%s7081_s14 + $0x2a8] sm:$0xff] }
  0x33   : > { %292 = vst [vmem:[%s7086_s24 + $0x16c] sm:$0xff] %v291_v44  ;;  %v297_v47 = vld [vmem:[%s7081_s14 + $0x2b0] sm:$0xff]  ;;  %294 = vst [vmem:[%s7086_s24 + $0x174] sm:$0xff] %v293_v45  ;;  %v299_v48 = vld [vmem:[%s7081_s14 + $0x320] sm:$0xff] }
  0x34   : > { %296 = vst [vmem:[%s7086_s24 + $0x17c] sm:$0xff] %v295_v46  ;;  %298 = vst [vmem:[%s7086_s24 + $0x184] sm:$0xff] %v297_v47  ;;  %v301_v49 = vld [vmem:[%s7081_s14 + $0x328] sm:$0xff]  ;;  %v303_v50 = vld [vmem:[%s7081_s14 + $0x330] sm:$0xff] }
  0x35   : > { %300 = vst [vmem:[%s7086_s24 + $0x190] sm:$0xff] %v299_v48  ;;  %302 = vst [vmem:[%s7086_s24 + $0x198] sm:$0xff] %v301_v49  ;;  %v305_v51 = vld [vmem:[%s7081_s14 + $0x338] sm:$0xff]  ;;  %v307_v52 = vld [vmem:[%s7081_s14 + $0x340] sm:$0xff] }
  0x36   : > { %304 = vst [vmem:[%s7086_s24 + $0x1a0] sm:$0xff] %v303_v50  ;;  %v309_v53 = vld [vmem:[%s7081_s14 + $0x348] sm:$0xff]  ;;  %306 = vst [vmem:[%s7086_s24 + $0x1a8] sm:$0xff] %v305_v51  ;;  %v311_v54 = vld [vmem:[%s7081_s14 + $0x350] sm:$0xff] }
  0x37   : > { %308 = vst [vmem:[%s7086_s24 + $0x1b0] sm:$0xff] %v307_v52  ;;  %310 = vst [vmem:[%s7086_s24 + $0x1b8] sm:$0xff] %v309_v53  ;;  %v313_v55 = vld [vmem:[%s7081_s14 + $0x358] sm:$0xff]  ;;  %v315_v56 = vld [vmem:[%s7081_s14 + $0x360] sm:$0xff] }
  0x38   : > { %312 = vst [vmem:[%s7086_s24 + $0x1c0] sm:$0xff] %v311_v54  ;;  %314 = vst [vmem:[%s7086_s24 + $0x1c8] sm:$0xff] %v313_v55  ;;  %v317_v57 = vld [vmem:[%s7081_s14 + $0x368] sm:$0xff]  ;;  %v319_v58 = vld [vmem:[%s7081_s14 + $0x370] sm:$0xff] }
  0x39   : > { %316 = vst [vmem:[%s7086_s24 + $0x1d0] sm:$0xff] %v315_v56  ;;  %v321_v59 = vld [vmem:[%s7081_s14 + $0x378] sm:$0xff]  ;;  %318 = vst [vmem:[%s7086_s24 + $0x1d8] sm:$0xff] %v317_v57  ;;  %v323_v60 = vld [vmem:[%s7081_s14 + $0x3e8] sm:$0xff] }
  0x3a   : > { %320 = vst [vmem:[%s7086_s24 + $0x1e0] sm:$0xff] %v319_v58  ;;  %322 = vst [vmem:[%s7086_s24 + $0x1e8] sm:$0xff] %v321_v59  ;;  %v325_v61 = vld [vmem:[%s7081_s14 + $0x3f0] sm:$0xff]  ;;  %v327_v62 = vld [vmem:[%s7081_s14 + $0x3f8] sm:$0xff] }
  0x3b   : > { %324 = vst [vmem:[%s7086_s24 + $0x1f4] sm:$0xff] %v323_v60  ;;  %326 = vst [vmem:[%s7086_s24 + $0x1fc] sm:$0xff] %v325_v61  ;;  %v329_v63 = vld [vmem:[%s7081_s14 + $0x400] sm:$0xff]  ;;  %v331_v0 = vld [vmem:[%s7081_s14 + $0x408] sm:$0xff] }
  0x3c   : > { %328 = vst [vmem:[%s7086_s24 + $0x204] sm:$0xff] %v327_v62  ;;  %v333_v1 = vld [vmem:[%s7081_s14 + $0x410] sm:$0xff]  ;;  %330 = vst [vmem:[%s7086_s24 + $0x20c] sm:$0xff] %v329_v63  ;;  %v335_v2 = vld [vmem:[%s7081_s14 + $0x418] sm:$0xff] }
  0x3d   : > { %332 = vst [vmem:[%s7086_s24 + $0x214] sm:$0xff] %v331_v0  ;;  %334 = vst [vmem:[%s7086_s24 + $0x21c] sm:$0xff] %v333_v1  ;;  %v337_v3 = vld [vmem:[%s7081_s14 + $0x420] sm:$0xff]  ;;  %v339_v4 = vld [vmem:[%s7081_s14 + $0x428] sm:$0xff] }
  0x3e   : > { %336 = vst [vmem:[%s7086_s24 + $0x224] sm:$0xff] %v335_v2  ;;  %338 = vst [vmem:[%s7086_s24 + $0x22c] sm:$0xff] %v337_v3  ;;  %v341_v5 = vld [vmem:[%s7081_s14 + $0x430] sm:$0xff]  ;;  %v343_v6 = vld [vmem:[%s7081_s14 + $0x438] sm:$0xff] }
  0x3f   : > { %340 = vst [vmem:[%s7086_s24 + $0x234] sm:$0xff] %v339_v4  ;;  %v345_v7 = vld [vmem:[%s7081_s14 + $0x440] sm:$0xff]  ;;  %342 = vst [vmem:[%s7086_s24 + $0x23c] sm:$0xff] %v341_v5  ;;  %v347_v8 = vld [vmem:[%s7081_s14 + $0x4b0] sm:$0xff] }
  0x40   : > { %344 = vst [vmem:[%s7086_s24 + $0x244] sm:$0xff] %v343_v6  ;;  %346 = vst [vmem:[%s7086_s24 + $0x24c] sm:$0xff] %v345_v7  ;;  %v349_v9 = vld [vmem:[%s7081_s14 + $0x4b8] sm:$0xff]  ;;  %v351_v10 = vld [vmem:[%s7081_s14 + $0x4c0] sm:$0xff] }
  0x41   : > { %348 = vst [vmem:[%s7086_s24 + $0x258] sm:$0xff] %v347_v8  ;;  %350 = vst [vmem:[%s7086_s24 + $0x260] sm:$0xff] %v349_v9  ;;  %v353_v11 = vld [vmem:[%s7081_s14 + $0x4c8] sm:$0xff]  ;;  %v355_v12 = vld [vmem:[%s7081_s14 + $0x4d0] sm:$0xff] }
  0x42   : > { %352 = vst [vmem:[%s7086_s24 + $0x268] sm:$0xff] %v351_v10  ;;  %v357_v13 = vld [vmem:[%s7081_s14 + $0x4d8] sm:$0xff]  ;;  %354 = vst [vmem:[%s7086_s24 + $0x270] sm:$0xff] %v353_v11  ;;  %v359_v14 = vld [vmem:[%s7081_s14 + $0x4e0] sm:$0xff] }
  0x43   : > { %356 = vst [vmem:[%s7086_s24 + $0x278] sm:$0xff] %v355_v12  ;;  %358 = vst [vmem:[%s7086_s24 + $0x280] sm:$0xff] %v357_v13  ;;  %v361_v15 = vld [vmem:[%s7081_s14 + $0x4e8] sm:$0xff]  ;;  %v363_v16 = vld [vmem:[%s7081_s14 + $0x4f0] sm:$0xff] }
  0x44   : > { %360 = vst [vmem:[%s7086_s24 + $0x288] sm:$0xff] %v359_v14  ;;  %362 = vst [vmem:[%s7086_s24 + $0x290] sm:$0xff] %v361_v15  ;;  %v365_v17 = vld [vmem:[%s7081_s14 + $0x4f8] sm:$0xff]  ;;  %v367_v18 = vld [vmem:[%s7081_s14 + $0x500] sm:$0xff] }
  0x45   : > { %364 = vst [vmem:[%s7086_s24 + $0x298] sm:$0xff] %v363_v16  ;;  %v369_v19 = vld [vmem:[%s7081_s14 + $0x508] sm:$0xff]  ;;  %366 = vst [vmem:[%s7086_s24 + $0x2a0] sm:$0xff] %v365_v17  ;;  %v371_v20 = vld [vmem:[%s7081_s14 + $0x578] sm:$0xff] }
  0x46   : > { %368 = vst [vmem:[%s7086_s24 + $0x2a8] sm:$0xff] %v367_v18  ;;  %370 = vst [vmem:[%s7086_s24 + $0x2b0] sm:$0xff] %v369_v19  ;;  %v373_v21 = vld [vmem:[%s7081_s14 + $0x580] sm:$0xff]  ;;  %v375_v22 = vld [vmem:[%s7081_s14 + $0x588] sm:$0xff] }
  0x47   : > { %372 = vst [vmem:[%s7086_s24 + $0x2bc] sm:$0xff] %v371_v20  ;;  %374 = vst [vmem:[%s7086_s24 + $0x2c4] sm:$0xff] %v373_v21  ;;  %v377_v23 = vld [vmem:[%s7081_s14 + $0x590] sm:$0xff]  ;;  %v379_v24 = vld [vmem:[%s7081_s14 + $0x598] sm:$0xff] }
  0x48   : > { %376 = vst [vmem:[%s7086_s24 + $0x2cc] sm:$0xff] %v375_v22  ;;  %v381_v25 = vld [vmem:[%s7081_s14 + $0x5a0] sm:$0xff]  ;;  %378 = vst [vmem:[%s7086_s24 + $0x2d4] sm:$0xff] %v377_v23  ;;  %v383_v26 = vld [vmem:[%s7081_s14 + $0x5a8] sm:$0xff] }
  0x49   : > { %380 = vst [vmem:[%s7086_s24 + $0x2dc] sm:$0xff] %v379_v24  ;;  %382 = vst [vmem:[%s7086_s24 + $0x2e4] sm:$0xff] %v381_v25  ;;  %v385_v27 = vld [vmem:[%s7081_s14 + $0x5b0] sm:$0xff]  ;;  %v387_v28 = vld [vmem:[%s7081_s14 + $0x5b8] sm:$0xff] }
  0x4a   : > { %384 = vst [vmem:[%s7086_s24 + $0x2ec] sm:$0xff] %v383_v26  ;;  %386 = vst [vmem:[%s7086_s24 + $0x2f4] sm:$0xff] %v385_v27  ;;  %v389_v29 = vld [vmem:[%s7081_s14 + $0x5c0] sm:$0xff]  ;;  %v391_v30 = vld [vmem:[%s7081_s14 + $0x5c8] sm:$0xff] }
  0x4b   : > { %388 = vst [vmem:[%s7086_s24 + $0x2fc] sm:$0xff] %v387_v28  ;;  %v393_v31 = vld [vmem:[%s7081_s14 + $0x5d0] sm:$0xff]  ;;  %390 = vst [vmem:[%s7086_s24 + $0x304] sm:$0xff] %v389_v29  ;;  %v395_v32 = vld [vmem:[%s7081_s14 + $0x640] sm:$0xff] }
  0x4c   : > { %392 = vst [vmem:[%s7086_s24 + $0x30c] sm:$0xff] %v391_v30  ;;  %394 = vst [vmem:[%s7086_s24 + $0x314] sm:$0xff] %v393_v31  ;;  %v397_v33 = vld [vmem:[%s7081_s14 + $0x648] sm:$0xff]  ;;  %v399_v34 = vld [vmem:[%s7081_s14 + $0x650] sm:$0xff] }
  0x4d   : > { %396 = vst [vmem:[%s7086_s24 + $0x320] sm:$0xff] %v395_v32  ;;  %398 = vst [vmem:[%s7086_s24 + $0x328] sm:$0xff] %v397_v33  ;;  %v401_v35 = vld [vmem:[%s7081_s14 + $0x658] sm:$0xff]  ;;  %v403_v36 = vld [vmem:[%s7081_s14 + $0x660] sm:$0xff] }
  0x4e   : > { %400 = vst [vmem:[%s7086_s24 + $0x330] sm:$0xff] %v399_v34  ;;  %v405_v37 = vld [vmem:[%s7081_s14 + $0x668] sm:$0xff]  ;;  %402 = vst [vmem:[%s7086_s24 + $0x338] sm:$0xff] %v401_v35  ;;  %v407_v38 = vld [vmem:[%s7081_s14 + $0x670] sm:$0xff] }
  0x4f   : > { %404 = vst [vmem:[%s7086_s24 + $0x340] sm:$0xff] %v403_v36  ;;  %406 = vst [vmem:[%s7086_s24 + $0x348] sm:$0xff] %v405_v37  ;;  %v409_v39 = vld [vmem:[%s7081_s14 + $0x678] sm:$0xff]  ;;  %v411_v40 = vld [vmem:[%s7081_s14 + $0x680] sm:$0xff] }
  0x50   : > { %408 = vst [vmem:[%s7086_s24 + $0x350] sm:$0xff] %v407_v38  ;;  %410 = vst [vmem:[%s7086_s24 + $0x358] sm:$0xff] %v409_v39  ;;  %v413_v41 = vld [vmem:[%s7081_s14 + $0x688] sm:$0xff]  ;;  %v415_v42 = vld [vmem:[%s7081_s14 + $0x690] sm:$0xff] }
  0x51   : > { %412 = vst [vmem:[%s7086_s24 + $0x360] sm:$0xff] %v411_v40  ;;  %v417_v43 = vld [vmem:[%s7081_s14 + $0x698] sm:$0xff]  ;;  %414 = vst [vmem:[%s7086_s24 + $0x368] sm:$0xff] %v413_v41  ;;  %v419_v44 = vld [vmem:[%s7081_s14 + $0x708] sm:$0xff] }
  0x52   : > { %416 = vst [vmem:[%s7086_s24 + $0x370] sm:$0xff] %v415_v42  ;;  %418 = vst [vmem:[%s7086_s24 + $0x378] sm:$0xff] %v417_v43  ;;  %v421_v45 = vld [vmem:[%s7081_s14 + $0x710] sm:$0xff]  ;;  %v423_v46 = vld [vmem:[%s7081_s14 + $0x718] sm:$0xff] }
  0x53   : > { %420 = vst [vmem:[%s7086_s24 + $0x384] sm:$0xff] %v419_v44  ;;  %422 = vst [vmem:[%s7086_s24 + $0x38c] sm:$0xff] %v421_v45  ;;  %v425_v47 = vld [vmem:[%s7081_s14 + $0x720] sm:$0xff]  ;;  %v427_v48 = vld [vmem:[%s7081_s14 + $0x728] sm:$0xff] }
  0x54   : > { %424 = vst [vmem:[%s7086_s24 + $0x394] sm:$0xff] %v423_v46  ;;  %v429_v49 = vld [vmem:[%s7081_s14 + $0x730] sm:$0xff]  ;;  %426 = vst [vmem:[%s7086_s24 + $0x39c] sm:$0xff] %v425_v47  ;;  %v431_v50 = vld [vmem:[%s7081_s14 + $0x738] sm:$0xff] }
  0x55   : > { %428 = vst [vmem:[%s7086_s24 + $0x3a4] sm:$0xff] %v427_v48  ;;  %430 = vst [vmem:[%s7086_s24 + $0x3ac] sm:$0xff] %v429_v49  ;;  %v433_v51 = vld [vmem:[%s7081_s14 + $0x740] sm:$0xff]  ;;  %v435_v52 = vld [vmem:[%s7081_s14 + $0x748] sm:$0xff] }
  0x56   : > { %432 = vst [vmem:[%s7086_s24 + $0x3b4] sm:$0xff] %v431_v50  ;;  %434 = vst [vmem:[%s7086_s24 + $0x3bc] sm:$0xff] %v433_v51  ;;  %v437_v53 = vld [vmem:[%s7081_s14 + $0x750] sm:$0xff]  ;;  %v439_v54 = vld [vmem:[%s7081_s14 + $0x758] sm:$0xff] }
  0x57   : > { %436 = vst [vmem:[%s7086_s24 + $0x3c4] sm:$0xff] %v435_v52  ;;  %v441_v55 = vld [vmem:[%s7081_s14 + $0x760] sm:$0xff]  ;;  %438 = vst [vmem:[%s7086_s24 + $0x3cc] sm:$0xff] %v437_v53  ;;  %v443_v56 = vld [vmem:[%s7081_s14 + $0x7d0] sm:$0xff] }
  0x58   : > { %440 = vst [vmem:[%s7086_s24 + $0x3d4] sm:$0xff] %v439_v54  ;;  %442 = vst [vmem:[%s7086_s24 + $0x3dc] sm:$0xff] %v441_v55  ;;  %v445_v57 = vld [vmem:[%s7081_s14 + $0x7d8] sm:$0xff]  ;;  %v447_v58 = vld [vmem:[%s7081_s14 + $0x7e0] sm:$0xff] }
  0x59   : > { %444 = vst [vmem:[%s7086_s24 + $0x3e8] sm:$0xff] %v443_v56  ;;  %446 = vst [vmem:[%s7086_s24 + $0x3f0] sm:$0xff] %v445_v57  ;;  %v449_v59 = vld [vmem:[%s7081_s14 + $0x7e8] sm:$0xff]  ;;  %v451_v60 = vld [vmem:[%s7081_s14 + $0x7f0] sm:$0xff] }
  0x5a   : > { %448 = vst [vmem:[%s7086_s24 + $0x3f8] sm:$0xff] %v447_v58  ;;  %v453_v61 = vld [vmem:[%s7081_s14 + $0x7f8] sm:$0xff]  ;;  %450 = vst [vmem:[%s7086_s24 + $0x400] sm:$0xff] %v449_v59  ;;  %v455_v62 = vld [vmem:[%s7081_s14 + $0x800] sm:$0xff] }
  0x5b   : > { %452 = vst [vmem:[%s7086_s24 + $0x408] sm:$0xff] %v451_v60  ;;  %454 = vst [vmem:[%s7086_s24 + $0x410] sm:$0xff] %v453_v61  ;;  %v457_v63 = vld [vmem:[%s7081_s14 + $0x808] sm:$0xff]  ;;  %v459_v0 = vld [vmem:[%s7081_s14 + $0x810] sm:$0xff] }
  0x5c   : > { %456 = vst [vmem:[%s7086_s24 + $0x418] sm:$0xff] %v455_v62  ;;  %458 = vst [vmem:[%s7086_s24 + $0x420] sm:$0xff] %v457_v63  ;;  %v461_v1 = vld [vmem:[%s7081_s14 + $0x818] sm:$0xff]  ;;  %v463_v2 = vld [vmem:[%s7081_s14 + $0x820] sm:$0xff] }
  0x5d   : > { %460 = vst [vmem:[%s7086_s24 + $0x428] sm:$0xff] %v459_v0  ;;  %v465_v3 = vld [vmem:[%s7081_s14 + $0x828] sm:$0xff]  ;;  %462 = vst [vmem:[%s7086_s24 + $0x430] sm:$0xff] %v461_v1  ;;  %v467_v4 = vld [vmem:[%s7081_s14 + $0x898] sm:$0xff] }
  0x5e   : > { %464 = vst [vmem:[%s7086_s24 + $0x438] sm:$0xff] %v463_v2  ;;  %466 = vst [vmem:[%s7086_s24 + $0x440] sm:$0xff] %v465_v3  ;;  %v469_v5 = vld [vmem:[%s7081_s14 + $0x8a0] sm:$0xff]  ;;  %v471_v6 = vld [vmem:[%s7081_s14 + $0x8a8] sm:$0xff] }
  0x5f   : > { %468 = vst [vmem:[%s7086_s24 + $0x44c] sm:$0xff] %v467_v4  ;;  %470 = vst [vmem:[%s7086_s24 + $0x454] sm:$0xff] %v469_v5  ;;  %v473_v7 = vld [vmem:[%s7081_s14 + $0x8b0] sm:$0xff]  ;;  %v475_v8 = vld [vmem:[%s7081_s14 + $0x8b8] sm:$0xff] }
  0x60   : > { %472 = vst [vmem:[%s7086_s24 + $0x45c] sm:$0xff] %v471_v6  ;;  %v477_v9 = vld [vmem:[%s7081_s14 + $0x8c0] sm:$0xff]  ;;  %474 = vst [vmem:[%s7086_s24 + $0x464] sm:$0xff] %v473_v7  ;;  %v479_v10 = vld [vmem:[%s7081_s14 + $0x8c8] sm:$0xff] }
  0x61   : > { %476 = vst [vmem:[%s7086_s24 + $0x46c] sm:$0xff] %v475_v8  ;;  %478 = vst [vmem:[%s7086_s24 + $0x474] sm:$0xff] %v477_v9  ;;  %v481_v11 = vld [vmem:[%s7081_s14 + $0x8d0] sm:$0xff]  ;;  %v483_v12 = vld [vmem:[%s7081_s14 + $0x8d8] sm:$0xff] }
  0x62   : > { %480 = vst [vmem:[%s7086_s24 + $0x47c] sm:$0xff] %v479_v10  ;;  %482 = vst [vmem:[%s7086_s24 + $0x484] sm:$0xff] %v481_v11  ;;  %v485_v13 = vld [vmem:[%s7081_s14 + $0x8e0] sm:$0xff]  ;;  %v487_v14 = vld [vmem:[%s7081_s14 + $0x8e8] sm:$0xff] }
  0x63   : > { %484 = vst [vmem:[%s7086_s24 + $0x48c] sm:$0xff] %v483_v12  ;;  %v489_v15 = vld [vmem:[%s7081_s14 + $0x8f0] sm:$0xff]  ;;  %486 = vst [vmem:[%s7086_s24 + $0x494] sm:$0xff] %v485_v13  ;;  %v491_v16 = vld [vmem:[%s7081_s14 + $0x960] sm:$0xff] }
  0x64   : > { %488 = vst [vmem:[%s7086_s24 + $0x49c] sm:$0xff] %v487_v14  ;;  %490 = vst [vmem:[%s7086_s24 + $0x4a4] sm:$0xff] %v489_v15  ;;  %v493_v17 = vld [vmem:[%s7081_s14 + $0x968] sm:$0xff]  ;;  %v495_v18 = vld [vmem:[%s7081_s14 + $0x970] sm:$0xff] }
  0x65   : > { %492 = vst [vmem:[%s7086_s24 + $0x4b0] sm:$0xff] %v491_v16  ;;  %494 = vst [vmem:[%s7086_s24 + $0x4b8] sm:$0xff] %v493_v17  ;;  %v497_v19 = vld [vmem:[%s7081_s14 + $0x978] sm:$0xff]  ;;  %v499_v20 = vld [vmem:[%s7081_s14 + $0x980] sm:$0xff] }
  0x66   : > { %496 = vst [vmem:[%s7086_s24 + $0x4c0] sm:$0xff] %v495_v18  ;;  %v501_v21 = vld [vmem:[%s7081_s14 + $0x988] sm:$0xff]  ;;  %498 = vst [vmem:[%s7086_s24 + $0x4c8] sm:$0xff] %v497_v19  ;;  %v503_v22 = vld [vmem:[%s7081_s14 + $0x990] sm:$0xff] }
  0x67   : > { %500 = vst [vmem:[%s7086_s24 + $0x4d0] sm:$0xff] %v499_v20  ;;  %502 = vst [vmem:[%s7086_s24 + $0x4d8] sm:$0xff] %v501_v21  ;;  %v505_v23 = vld [vmem:[%s7081_s14 + $0x998] sm:$0xff]  ;;  %v507_v24 = vld [vmem:[%s7081_s14 + $0x9a0] sm:$0xff] }
  0x68   : > { %504 = vst [vmem:[%s7086_s24 + $0x4e0] sm:$0xff] %v503_v22  ;;  %506 = vst [vmem:[%s7086_s24 + $0x4e8] sm:$0xff] %v505_v23  ;;  %v509_v25 = vld [vmem:[%s7081_s14 + $0x9a8] sm:$0xff]  ;;  %v511_v26 = vld [vmem:[%s7081_s14 + $0x9b0] sm:$0xff] }
  0x69   : > { %508 = vst [vmem:[%s7086_s24 + $0x4f0] sm:$0xff] %v507_v24  ;;  %v513_v27 = vld [vmem:[%s7081_s14 + $0x9b8] sm:$0xff]  ;;  %510 = vst [vmem:[%s7086_s24 + $0x4f8] sm:$0xff] %v509_v25  ;;  %v515_v28 = vld [vmem:[%s7081_s14 + $0xa28] sm:$0xff] }
  0x6a   : > { %512 = vst [vmem:[%s7086_s24 + $0x500] sm:$0xff] %v511_v26  ;;  %514 = vst [vmem:[%s7086_s24 + $0x508] sm:$0xff] %v513_v27  ;;  %v517_v29 = vld [vmem:[%s7081_s14 + $0xa30] sm:$0xff]  ;;  %v519_v30 = vld [vmem:[%s7081_s14 + $0xa38] sm:$0xff] }
  0x6b   : > { %516 = vst [vmem:[%s7086_s24 + $0x514] sm:$0xff] %v515_v28  ;;  %518 = vst [vmem:[%s7086_s24 + $0x51c] sm:$0xff] %v517_v29  ;;  %v521_v31 = vld [vmem:[%s7081_s14 + $0xa40] sm:$0xff]  ;;  %v523_v32 = vld [vmem:[%s7081_s14 + $0xa48] sm:$0xff] }
  0x6c   : > { %520 = vst [vmem:[%s7086_s24 + $0x524] sm:$0xff] %v519_v30  ;;  %v525_v33 = vld [vmem:[%s7081_s14 + $0xa50] sm:$0xff]  ;;  %522 = vst [vmem:[%s7086_s24 + $0x52c] sm:$0xff] %v521_v31  ;;  %v527_v34 = vld [vmem:[%s7081_s14 + $0xa58] sm:$0xff] }
  0x6d   : > { %524 = vst [vmem:[%s7086_s24 + $0x534] sm:$0xff] %v523_v32  ;;  %526 = vst [vmem:[%s7086_s24 + $0x53c] sm:$0xff] %v525_v33  ;;  %v529_v35 = vld [vmem:[%s7081_s14 + $0xa60] sm:$0xff]  ;;  %v531_v36 = vld [vmem:[%s7081_s14 + $0xa68] sm:$0xff] }
  0x6e   : > { %528 = vst [vmem:[%s7086_s24 + $0x544] sm:$0xff] %v527_v34  ;;  %530 = vst [vmem:[%s7086_s24 + $0x54c] sm:$0xff] %v529_v35  ;;  %v533_v37 = vld [vmem:[%s7081_s14 + $0xa70] sm:$0xff]  ;;  %v535_v38 = vld [vmem:[%s7081_s14 + $0xa78] sm:$0xff] }
  0x6f   : > { %532 = vst [vmem:[%s7086_s24 + $0x554] sm:$0xff] %v531_v36  ;;  %v537_v39 = vld [vmem:[%s7081_s14 + $0xa80] sm:$0xff]  ;;  %534 = vst [vmem:[%s7086_s24 + $0x55c] sm:$0xff] %v533_v37  ;;  %v539_v40 = vld [vmem:[%s7081_s14 + $0xaf0] sm:$0xff] }
  0x70   : > { %536 = vst [vmem:[%s7086_s24 + $0x564] sm:$0xff] %v535_v38  ;;  %538 = vst [vmem:[%s7086_s24 + $0x56c] sm:$0xff] %v537_v39  ;;  %v541_v41 = vld [vmem:[%s7081_s14 + $0xaf8] sm:$0xff]  ;;  %v543_v42 = vld [vmem:[%s7081_s14 + $0xb00] sm:$0xff] }
  0x71   : > { %540 = vst [vmem:[%s7086_s24 + $0x578] sm:$0xff] %v539_v40  ;;  %542 = vst [vmem:[%s7086_s24 + $0x580] sm:$0xff] %v541_v41  ;;  %v545_v43 = vld [vmem:[%s7081_s14 + $0xb08] sm:$0xff]  ;;  %v547_v44 = vld [vmem:[%s7081_s14 + $0xb10] sm:$0xff] }
  0x72   : > { %544 = vst [vmem:[%s7086_s24 + $0x588] sm:$0xff] %v543_v42  ;;  %v549_v45 = vld [vmem:[%s7081_s14 + $0xb18] sm:$0xff]  ;;  %546 = vst [vmem:[%s7086_s24 + $0x590] sm:$0xff] %v545_v43  ;;  %v551_v46 = vld [vmem:[%s7081_s14 + $0xb20] sm:$0xff] }
  0x73   : > { %548 = vst [vmem:[%s7086_s24 + $0x598] sm:$0xff] %v547_v44  ;;  %550 = vst [vmem:[%s7086_s24 + $0x5a0] sm:$0xff] %v549_v45  ;;  %v553_v47 = vld [vmem:[%s7081_s14 + $0xb28] sm:$0xff]  ;;  %v555_v48 = vld [vmem:[%s7081_s14 + $0xb30] sm:$0xff] }
  0x74   : > { %552 = vst [vmem:[%s7086_s24 + $0x5a8] sm:$0xff] %v551_v46  ;;  %554 = vst [vmem:[%s7086_s24 + $0x5b0] sm:$0xff] %v553_v47  ;;  %v557_v49 = vld [vmem:[%s7081_s14 + $0xb38] sm:$0xff]  ;;  %v559_v50 = vld [vmem:[%s7081_s14 + $0xb40] sm:$0xff] }
  0x75   : > { %556 = vst [vmem:[%s7086_s24 + $0x5b8] sm:$0xff] %v555_v48  ;;  %v561_v51 = vld [vmem:[%s7081_s14 + $0xb48] sm:$0xff]  ;;  %558 = vst [vmem:[%s7086_s24 + $0x5c0] sm:$0xff] %v557_v49  ;;  %v563_v52 = vld [vmem:[%s7081_s14 + $0xbb8] sm:$0xff] }
  0x76   : > { %560 = vst [vmem:[%s7086_s24 + $0x5c8] sm:$0xff] %v559_v50  ;;  %562 = vst [vmem:[%s7086_s24 + $0x5d0] sm:$0xff] %v561_v51  ;;  %v565_v53 = vld [vmem:[%s7081_s14 + $0xbc0] sm:$0xff]  ;;  %v567_v54 = vld [vmem:[%s7081_s14 + $0xbc8] sm:$0xff] }
  0x77   : > { %564 = vst [vmem:[%s7086_s24 + $0x5dc] sm:$0xff] %v563_v52  ;;  %566 = vst [vmem:[%s7086_s24 + $0x5e4] sm:$0xff] %v565_v53  ;;  %v569_v55 = vld [vmem:[%s7081_s14 + $0xbd0] sm:$0xff]  ;;  %v571_v56 = vld [vmem:[%s7081_s14 + $0xbd8] sm:$0xff] }
  0x78   : > { %568 = vst [vmem:[%s7086_s24 + $0x5ec] sm:$0xff] %v567_v54  ;;  %v573_v57 = vld [vmem:[%s7081_s14 + $0xbe0] sm:$0xff]  ;;  %570 = vst [vmem:[%s7086_s24 + $0x5f4] sm:$0xff] %v569_v55  ;;  %v575_v58 = vld [vmem:[%s7081_s14 + $0xbe8] sm:$0xff] }
  0x79   : > { %572 = vst [vmem:[%s7086_s24 + $0x5fc] sm:$0xff] %v571_v56  ;;  %574 = vst [vmem:[%s7086_s24 + $0x604] sm:$0xff] %v573_v57  ;;  %v577_v59 = vld [vmem:[%s7081_s14 + $0xbf0] sm:$0xff]  ;;  %v579_v60 = vld [vmem:[%s7081_s14 + $0xbf8] sm:$0xff] }
  0x7a   : > { %576 = vst [vmem:[%s7086_s24 + $0x60c] sm:$0xff] %v575_v58  ;;  %578 = vst [vmem:[%s7086_s24 + $0x614] sm:$0xff] %v577_v59  ;;  %v581_v61 = vld [vmem:[%s7081_s14 + $0xc00] sm:$0xff]  ;;  %v583_v62 = vld [vmem:[%s7081_s14 + $0xc08] sm:$0xff] }
  0x7b   : > { %580 = vst [vmem:[%s7086_s24 + $0x61c] sm:$0xff] %v579_v60  ;;  %v585_v63 = vld [vmem:[%s7081_s14 + $0xc10] sm:$0xff]  ;;  %582 = vst [vmem:[%s7086_s24 + $0x624] sm:$0xff] %v581_v61  ;;  %v587_v0 = vld [vmem:[%s7081_s14 + $0xc80] sm:$0xff] }
  0x7c   : > { %584 = vst [vmem:[%s7086_s24 + $0x62c] sm:$0xff] %v583_v62  ;;  %586 = vst [vmem:[%s7086_s24 + $0x634] sm:$0xff] %v585_v63  ;;  %v589_v1 = vld [vmem:[%s7081_s14 + $0xc88] sm:$0xff]  ;;  %v591_v2 = vld [vmem:[%s7081_s14 + $0xc90] sm:$0xff] }
  0x7d   : > { %588 = vst [vmem:[%s7086_s24 + $0x640] sm:$0xff] %v587_v0  ;;  %590 = vst [vmem:[%s7086_s24 + $0x648] sm:$0xff] %v589_v1  ;;  %v593_v3 = vld [vmem:[%s7081_s14 + $0xc98] sm:$0xff]  ;;  %v595_v4 = vld [vmem:[%s7081_s14 + $0xca0] sm:$0xff] }
  0x7e   : > { %592 = vst [vmem:[%s7086_s24 + $0x650] sm:$0xff] %v591_v2  ;;  %v597_v5 = vld [vmem:[%s7081_s14 + $0xca8] sm:$0xff]  ;;  %594 = vst [vmem:[%s7086_s24 + $0x658] sm:$0xff] %v593_v3  ;;  %v599_v6 = vld [vmem:[%s7081_s14 + $0xcb0] sm:$0xff] }
  0x7f   : > { %596 = vst [vmem:[%s7086_s24 + $0x660] sm:$0xff] %v595_v4  ;;  %598 = vst [vmem:[%s7086_s24 + $0x668] sm:$0xff] %v597_v5  ;;  %v601_v7 = vld [vmem:[%s7081_s14 + $0xcb8] sm:$0xff]  ;;  %v603_v8 = vld [vmem:[%s7081_s14 + $0xcc0] sm:$0xff] }
  0x80   : > { %600 = vst [vmem:[%s7086_s24 + $0x670] sm:$0xff] %v599_v6  ;;  %602 = vst [vmem:[%s7086_s24 + $0x678] sm:$0xff] %v601_v7  ;;  %v605_v9 = vld [vmem:[%s7081_s14 + $0xcc8] sm:$0xff]  ;;  %v607_v10 = vld [vmem:[%s7081_s14 + $0xcd0] sm:$0xff] }
  0x81   : > { %604 = vst [vmem:[%s7086_s24 + $0x680] sm:$0xff] %v603_v8  ;;  %v609_v11 = vld [vmem:[%s7081_s14 + $0xcd8] sm:$0xff]  ;;  %606 = vst [vmem:[%s7086_s24 + $0x688] sm:$0xff] %v605_v9  ;;  %v611_v12 = vld [vmem:[%s7081_s14 + $0xd48] sm:$0xff] }
  0x82   : > { %608 = vst [vmem:[%s7086_s24 + $0x690] sm:$0xff] %v607_v10  ;;  %610 = vst [vmem:[%s7086_s24 + $0x698] sm:$0xff] %v609_v11  ;;  %v613_v13 = vld [vmem:[%s7081_s14 + $0xd50] sm:$0xff]  ;;  %v615_v14 = vld [vmem:[%s7081_s14 + $0xd58] sm:$0xff] }
  0x83   : > { %612 = vst [vmem:[%s7086_s24 + $0x6a4] sm:$0xff] %v611_v12  ;;  %614 = vst [vmem:[%s7086_s24 + $0x6ac] sm:$0xff] %v613_v13  ;;  %v617_v15 = vld [vmem:[%s7081_s14 + $0xd60] sm:$0xff]  ;;  %v619_v16 = vld [vmem:[%s7081_s14 + $0xd68] sm:$0xff] }
  0x84   : > { %616 = vst [vmem:[%s7086_s24 + $0x6b4] sm:$0xff] %v615_v14  ;;  %v621_v17 = vld [vmem:[%s7081_s14 + $0xd70] sm:$0xff]  ;;  %618 = vst [vmem:[%s7086_s24 + $0x6bc] sm:$0xff] %v617_v15  ;;  %v623_v18 = vld [vmem:[%s7081_s14 + $0xd78] sm:$0xff] }
  0x85   : > { %620 = vst [vmem:[%s7086_s24 + $0x6c4] sm:$0xff] %v619_v16  ;;  %622 = vst [vmem:[%s7086_s24 + $0x6cc] sm:$0xff] %v621_v17  ;;  %v625_v19 = vld [vmem:[%s7081_s14 + $0xd80] sm:$0xff]  ;;  %v627_v20 = vld [vmem:[%s7081_s14 + $0xd88] sm:$0xff] }
  0x86   : > { %624 = vst [vmem:[%s7086_s24 + $0x6d4] sm:$0xff] %v623_v18  ;;  %626 = vst [vmem:[%s7086_s24 + $0x6dc] sm:$0xff] %v625_v19  ;;  %v629_v21 = vld [vmem:[%s7081_s14 + $0xd90] sm:$0xff]  ;;  %v631_v22 = vld [vmem:[%s7081_s14 + $0xd98] sm:$0xff] }
  0x87   : > { %628 = vst [vmem:[%s7086_s24 + $0x6e4] sm:$0xff] %v627_v20  ;;  %v633_v23 = vld [vmem:[%s7081_s14 + $0xda0] sm:$0xff]  ;;  %630 = vst [vmem:[%s7086_s24 + $0x6ec] sm:$0xff] %v629_v21  ;;  %v635_v24 = vld [vmem:[%s7081_s14 + $0xe10] sm:$0xff] }
  0x88   : > { %632 = vst [vmem:[%s7086_s24 + $0x6f4] sm:$0xff] %v631_v22  ;;  %634 = vst [vmem:[%s7086_s24 + $0x6fc] sm:$0xff] %v633_v23  ;;  %v637_v25 = vld [vmem:[%s7081_s14 + $0xe18] sm:$0xff]  ;;  %v639_v26 = vld [vmem:[%s7081_s14 + $0xe20] sm:$0xff] }
  0x89   : > { %636 = vst [vmem:[%s7086_s24 + $0x708] sm:$0xff] %v635_v24  ;;  %638 = vst [vmem:[%s7086_s24 + $0x710] sm:$0xff] %v637_v25  ;;  %v641_v27 = vld [vmem:[%s7081_s14 + $0xe28] sm:$0xff]  ;;  %v643_v28 = vld [vmem:[%s7081_s14 + $0xe30] sm:$0xff] }
  0x8a   : > { %640 = vst [vmem:[%s7086_s24 + $0x718] sm:$0xff] %v639_v26  ;;  %v645_v29 = vld [vmem:[%s7081_s14 + $0xe38] sm:$0xff]  ;;  %642 = vst [vmem:[%s7086_s24 + $0x720] sm:$0xff] %v641_v27  ;;  %v647_v30 = vld [vmem:[%s7081_s14 + $0xe40] sm:$0xff] }
  0x8b   : > { %644 = vst [vmem:[%s7086_s24 + $0x728] sm:$0xff] %v643_v28  ;;  %646 = vst [vmem:[%s7086_s24 + $0x730] sm:$0xff] %v645_v29  ;;  %v649_v31 = vld [vmem:[%s7081_s14 + $0xe48] sm:$0xff]  ;;  %v651_v32 = vld [vmem:[%s7081_s14 + $0xe50] sm:$0xff] }
  0x8c   : > { %648 = vst [vmem:[%s7086_s24 + $0x738] sm:$0xff] %v647_v30  ;;  %650 = vst [vmem:[%s7086_s24 + $0x740] sm:$0xff] %v649_v31  ;;  %v653_v33 = vld [vmem:[%s7081_s14 + $0xe58] sm:$0xff]  ;;  %v655_v34 = vld [vmem:[%s7081_s14 + $0xe60] sm:$0xff] }
  0x8d   : > { %652 = vst [vmem:[%s7086_s24 + $0x748] sm:$0xff] %v651_v32  ;;  %v657_v35 = vld [vmem:[%s7081_s14 + $0xe68] sm:$0xff]  ;;  %654 = vst [vmem:[%s7086_s24 + $0x750] sm:$0xff] %v653_v33  ;;  %v659_v36 = vld [vmem:[%s7081_s14 + $0xed8] sm:$0xff] }
  0x8e   : > { %656 = vst [vmem:[%s7086_s24 + $0x758] sm:$0xff] %v655_v34  ;;  %658 = vst [vmem:[%s7086_s24 + $0x760] sm:$0xff] %v657_v35  ;;  %v661_v37 = vld [vmem:[%s7081_s14 + $0xee0] sm:$0xff]  ;;  %v663_v38 = vld [vmem:[%s7081_s14 + $0xee8] sm:$0xff] }
  0x8f   : > { %660 = vst [vmem:[%s7086_s24 + $0x76c] sm:$0xff] %v659_v36  ;;  %662 = vst [vmem:[%s7086_s24 + $0x774] sm:$0xff] %v661_v37  ;;  %v665_v39 = vld [vmem:[%s7081_s14 + $0xef0] sm:$0xff]  ;;  %v667_v40 = vld [vmem:[%s7081_s14 + $0xef8] sm:$0xff] }
  0x90   : > { %664 = vst [vmem:[%s7086_s24 + $0x77c] sm:$0xff] %v663_v38  ;;  %v669_v41 = vld [vmem:[%s7081_s14 + $0xf00] sm:$0xff]  ;;  %666 = vst [vmem:[%s7086_s24 + $0x784] sm:$0xff] %v665_v39  ;;  %v671_v42 = vld [vmem:[%s7081_s14 + $0xf08] sm:$0xff] }
  0x91   : > { %668 = vst [vmem:[%s7086_s24 + $0x78c] sm:$0xff] %v667_v40  ;;  %670 = vst [vmem:[%s7086_s24 + $0x794] sm:$0xff] %v669_v41  ;;  %v673_v43 = vld [vmem:[%s7081_s14 + $0xf10] sm:$0xff]  ;;  %v675_v44 = vld [vmem:[%s7081_s14 + $0xf18] sm:$0xff] }
  0x92   : > { %672 = vst [vmem:[%s7086_s24 + $0x79c] sm:$0xff] %v671_v42  ;;  %674 = vst [vmem:[%s7086_s24 + $0x7a4] sm:$0xff] %v673_v43  ;;  %v677_v45 = vld [vmem:[%s7081_s14 + $0xf20] sm:$0xff]  ;;  %v679_v46 = vld [vmem:[%s7081_s14 + $0xf28] sm:$0xff] }
  0x93   : > { %676 = vst [vmem:[%s7086_s24 + $0x7ac] sm:$0xff] %v675_v44  ;;  %v681_v47 = vld [vmem:[%s7081_s14 + $0xf30] sm:$0xff]  ;;  %678 = vst [vmem:[%s7086_s24 + $0x7b4] sm:$0xff] %v677_v45  ;;  %v683_v48 = vld [vmem:[%s7081_s14 + $0xfa0] sm:$0xff] }
  0x94   : > { %680 = vst [vmem:[%s7086_s24 + $0x7bc] sm:$0xff] %v679_v46  ;;  %682 = vst [vmem:[%s7086_s24 + $0x7c4] sm:$0xff] %v681_v47  ;;  %v685_v49 = vld [vmem:[%s7081_s14 + $0xfa8] sm:$0xff]  ;;  %v687_v50 = vld [vmem:[%s7081_s14 + $0xfb0] sm:$0xff] }
  0x95   : > { %684 = vst [vmem:[%s7086_s24 + $0x7d0] sm:$0xff] %v683_v48  ;;  %686 = vst [vmem:[%s7086_s24 + $0x7d8] sm:$0xff] %v685_v49  ;;  %v689_v51 = vld [vmem:[%s7081_s14 + $0xfb8] sm:$0xff]  ;;  %v691_v52 = vld [vmem:[%s7081_s14 + $0xfc0] sm:$0xff] }
  0x96   : > { %688 = vst [vmem:[%s7086_s24 + $0x7e0] sm:$0xff] %v687_v50  ;;  %v693_v53 = vld [vmem:[%s7081_s14 + $0xfc8] sm:$0xff]  ;;  %690 = vst [vmem:[%s7086_s24 + $0x7e8] sm:$0xff] %v689_v51  ;;  %v695_v54 = vld [vmem:[%s7081_s14 + $0xfd0] sm:$0xff] }
  0x97   : > { %692 = vst [vmem:[%s7086_s24 + $0x7f0] sm:$0xff] %v691_v52  ;;  %694 = vst [vmem:[%s7086_s24 + $0x7f8] sm:$0xff] %v693_v53  ;;  %v697_v55 = vld [vmem:[%s7081_s14 + $0xfd8] sm:$0xff]  ;;  %v699_v56 = vld [vmem:[%s7081_s14 + $0xfe0] sm:$0xff] }
  0x98   : > { %696 = vst [vmem:[%s7086_s24 + $0x800] sm:$0xff] %v695_v54  ;;  %698 = vst [vmem:[%s7086_s24 + $0x808] sm:$0xff] %v697_v55  ;;  %v701_v57 = vld [vmem:[%s7081_s14 + $0xfe8] sm:$0xff]  ;;  %v703_v58 = vld [vmem:[%s7081_s14 + $0xff0] sm:$0xff] }
  0x99   : > { %700 = vst [vmem:[%s7086_s24 + $0x810] sm:$0xff] %v699_v56  ;;  %v705_v59 = vld [vmem:[%s7081_s14 + $0xff8] sm:$0xff]  ;;  %702 = vst [vmem:[%s7086_s24 + $0x818] sm:$0xff] %v701_v57  ;;  %v707_v60 = vld [vmem:[%s7081_s14 + $0x1068] sm:$0xff] }
  0x9a   : > { %704 = vst [vmem:[%s7086_s24 + $0x820] sm:$0xff] %v703_v58  ;;  %706 = vst [vmem:[%s7086_s24 + $0x828] sm:$0xff] %v705_v59  ;;  %v709_v61 = vld [vmem:[%s7081_s14 + $0x1070] sm:$0xff]  ;;  %v711_v62 = vld [vmem:[%s7081_s14 + $0x1078] sm:$0xff] }
  0x9b   : > { %708 = vst [vmem:[%s7086_s24 + $0x834] sm:$0xff] %v707_v60  ;;  %710 = vst [vmem:[%s7086_s24 + $0x83c] sm:$0xff] %v709_v61  ;;  %v713_v63 = vld [vmem:[%s7081_s14 + $0x1080] sm:$0xff]  ;;  %v715_v0 = vld [vmem:[%s7081_s14 + $0x1088] sm:$0xff] }
  0x9c   : > { %712 = vst [vmem:[%s7086_s24 + $0x844] sm:$0xff] %v711_v62  ;;  %v717_v1 = vld [vmem:[%s7081_s14 + $0x1090] sm:$0xff]  ;;  %714 = vst [vmem:[%s7086_s24 + $0x84c] sm:$0xff] %v713_v63  ;;  %v719_v2 = vld [vmem:[%s7081_s14 + $0x1098] sm:$0xff] }
  0x9d   : > { %716 = vst [vmem:[%s7086_s24 + $0x854] sm:$0xff] %v715_v0  ;;  %718 = vst [vmem:[%s7086_s24 + $0x85c] sm:$0xff] %v717_v1  ;;  %v721_v3 = vld [vmem:[%s7081_s14 + $0x10a0] sm:$0xff]  ;;  %v723_v4 = vld [vmem:[%s7081_s14 + $0x10a8] sm:$0xff] }
  0x9e   : > { %720 = vst [vmem:[%s7086_s24 + $0x864] sm:$0xff] %v719_v2  ;;  %722 = vst [vmem:[%s7086_s24 + $0x86c] sm:$0xff] %v721_v3  ;;  %v725_v5 = vld [vmem:[%s7081_s14 + $0x10b0] sm:$0xff]  ;;  %v727_v6 = vld [vmem:[%s7081_s14 + $0x10b8] sm:$0xff] }
  0x9f   : > { %724 = vst [vmem:[%s7086_s24 + $0x874] sm:$0xff] %v723_v4  ;;  %v729_v7 = vld [vmem:[%s7081_s14 + $0x10c0] sm:$0xff]  ;;  %726 = vst [vmem:[%s7086_s24 + $0x87c] sm:$0xff] %v725_v5  ;;  %v731_v8 = vld [vmem:[%s7081_s14 + $0x1130] sm:$0xff] }
  0xa0   : > { %728 = vst [vmem:[%s7086_s24 + $0x884] sm:$0xff] %v727_v6  ;;  %730 = vst [vmem:[%s7086_s24 + $0x88c] sm:$0xff] %v729_v7  ;;  %v733_v9 = vld [vmem:[%s7081_s14 + $0x1138] sm:$0xff]  ;;  %v735_v10 = vld [vmem:[%s7081_s14 + $0x1140] sm:$0xff] }
  0xa1   : > { %732 = vst [vmem:[%s7086_s24 + $0x898] sm:$0xff] %v731_v8  ;;  %734 = vst [vmem:[%s7086_s24 + $0x8a0] sm:$0xff] %v733_v9  ;;  %v737_v11 = vld [vmem:[%s7081_s14 + $0x1148] sm:$0xff]  ;;  %v739_v12 = vld [vmem:[%s7081_s14 + $0x1150] sm:$0xff] }
  0xa2   : > { %736 = vst [vmem:[%s7086_s24 + $0x8a8] sm:$0xff] %v735_v10  ;;  %v741_v13 = vld [vmem:[%s7081_s14 + $0x1158] sm:$0xff]  ;;  %738 = vst [vmem:[%s7086_s24 + $0x8b0] sm:$0xff] %v737_v11  ;;  %v743_v14 = vld [vmem:[%s7081_s14 + $0x1160] sm:$0xff] }
  0xa3   : > { %740 = vst [vmem:[%s7086_s24 + $0x8b8] sm:$0xff] %v739_v12  ;;  %742 = vst [vmem:[%s7086_s24 + $0x8c0] sm:$0xff] %v741_v13  ;;  %v745_v15 = vld [vmem:[%s7081_s14 + $0x1168] sm:$0xff]  ;;  %v747_v16 = vld [vmem:[%s7081_s14 + $0x1170] sm:$0xff] }
  0xa4   : > { %744 = vst [vmem:[%s7086_s24 + $0x8c8] sm:$0xff] %v743_v14  ;;  %746 = vst [vmem:[%s7086_s24 + $0x8d0] sm:$0xff] %v745_v15  ;;  %v749_v17 = vld [vmem:[%s7081_s14 + $0x1178] sm:$0xff]  ;;  %v751_v18 = vld [vmem:[%s7081_s14 + $0x1180] sm:$0xff] }
  0xa5   : > { %748 = vst [vmem:[%s7086_s24 + $0x8d8] sm:$0xff] %v747_v16  ;;  %v753_v19 = vld [vmem:[%s7081_s14 + $0x1188] sm:$0xff]  ;;  %750 = vst [vmem:[%s7086_s24 + $0x8e0] sm:$0xff] %v749_v17  ;;  %v755_v20 = vld [vmem:[%s7081_s14 + $0x11f8] sm:$0xff] }
  0xa6   : > { %752 = vst [vmem:[%s7086_s24 + $0x8e8] sm:$0xff] %v751_v18  ;;  %754 = vst [vmem:[%s7086_s24 + $0x8f0] sm:$0xff] %v753_v19  ;;  %v757_v21 = vld [vmem:[%s7081_s14 + $0x1200] sm:$0xff]  ;;  %v759_v22 = vld [vmem:[%s7081_s14 + $0x1208] sm:$0xff] }
  0xa7   : > { %756 = vst [vmem:[%s7086_s24 + $0x8fc] sm:$0xff] %v755_v20  ;;  %758 = vst [vmem:[%s7086_s24 + $0x904] sm:$0xff] %v757_v21  ;;  %v761_v23 = vld [vmem:[%s7081_s14 + $0x1210] sm:$0xff]  ;;  %v763_v24 = vld [vmem:[%s7081_s14 + $0x1218] sm:$0xff] }
  0xa8   : > { %760 = vst [vmem:[%s7086_s24 + $0x90c] sm:$0xff] %v759_v22  ;;  %v765_v25 = vld [vmem:[%s7081_s14 + $0x1220] sm:$0xff]  ;;  %762 = vst [vmem:[%s7086_s24 + $0x914] sm:$0xff] %v761_v23  ;;  %v767_v26 = vld [vmem:[%s7081_s14 + $0x1228] sm:$0xff] }
  0xa9   : > { %764 = vst [vmem:[%s7086_s24 + $0x91c] sm:$0xff] %v763_v24  ;;  %766 = vst [vmem:[%s7086_s24 + $0x924] sm:$0xff] %v765_v25  ;;  %v769_v27 = vld [vmem:[%s7081_s14 + $0x1230] sm:$0xff]  ;;  %v771_v28 = vld [vmem:[%s7081_s14 + $0x1238] sm:$0xff] }
  0xaa   : > { %768 = vst [vmem:[%s7086_s24 + $0x92c] sm:$0xff] %v767_v26  ;;  %770 = vst [vmem:[%s7086_s24 + $0x934] sm:$0xff] %v769_v27  ;;  %v773_v29 = vld [vmem:[%s7081_s14 + $0x1240] sm:$0xff]  ;;  %v775_v30 = vld [vmem:[%s7081_s14 + $0x1248] sm:$0xff] }
  0xab   : > { %772 = vst [vmem:[%s7086_s24 + $0x93c] sm:$0xff] %v771_v28  ;;  %v777_v31 = vld [vmem:[%s7081_s14 + $0x1250] sm:$0xff]  ;;  %774 = vst [vmem:[%s7086_s24 + $0x944] sm:$0xff] %v773_v29  ;;  %v779_v32 = vld [vmem:[%s7081_s14 + $0x12c0] sm:$0xff] }
  0xac   : > { %776 = vst [vmem:[%s7086_s24 + $0x94c] sm:$0xff] %v775_v30  ;;  %778 = vst [vmem:[%s7086_s24 + $0x954] sm:$0xff] %v777_v31  ;;  %v781_v33 = vld [vmem:[%s7081_s14 + $0x12c8] sm:$0xff]  ;;  %v783_v34 = vld [vmem:[%s7081_s14 + $0x12d0] sm:$0xff] }
  0xad   : > { %780 = vst [vmem:[%s7086_s24 + $0x960] sm:$0xff] %v779_v32  ;;  %782 = vst [vmem:[%s7086_s24 + $0x968] sm:$0xff] %v781_v33  ;;  %v785_v35 = vld [vmem:[%s7081_s14 + $0x12d8] sm:$0xff]  ;;  %v787_v36 = vld [vmem:[%s7081_s14 + $0x12e0] sm:$0xff] }
  0xae   : > { %784 = vst [vmem:[%s7086_s24 + $0x970] sm:$0xff] %v783_v34  ;;  %v789_v37 = vld [vmem:[%s7081_s14 + $0x12e8] sm:$0xff]  ;;  %786 = vst [vmem:[%s7086_s24 + $0x978] sm:$0xff] %v785_v35  ;;  %v791_v38 = vld [vmem:[%s7081_s14 + $0x12f0] sm:$0xff] }
  0xaf   : > { %788 = vst [vmem:[%s7086_s24 + $0x980] sm:$0xff] %v787_v36  ;;  %790 = vst [vmem:[%s7086_s24 + $0x988] sm:$0xff] %v789_v37  ;;  %v793_v39 = vld [vmem:[%s7081_s14 + $0x12f8] sm:$0xff]  ;;  %v795_v40 = vld [vmem:[%s7081_s14 + $0x1300] sm:$0xff] }
  0xb0   : > { %792 = vst [vmem:[%s7086_s24 + $0x990] sm:$0xff] %v791_v38  ;;  %794 = vst [vmem:[%s7086_s24 + $0x998] sm:$0xff] %v793_v39  ;;  %v797_v41 = vld [vmem:[%s7081_s14 + $0x1308] sm:$0xff]  ;;  %v799_v42 = vld [vmem:[%s7081_s14 + $0x1310] sm:$0xff] }
  0xb1   : > { %796 = vst [vmem:[%s7086_s24 + $0x9a0] sm:$0xff] %v795_v40  ;;  %v801_v43 = vld [vmem:[%s7081_s14 + $0x1318] sm:$0xff]  ;;  %798 = vst [vmem:[%s7086_s24 + $0x9a8] sm:$0xff] %v797_v41  ;;  %v803_v44 = vld [vmem:[%s7081_s14 + $0x1388] sm:$0xff] }
  0xb2   : > { %800 = vst [vmem:[%s7086_s24 + $0x9b0] sm:$0xff] %v799_v42  ;;  %802 = vst [vmem:[%s7086_s24 + $0x9b8] sm:$0xff] %v801_v43  ;;  %v805_v45 = vld [vmem:[%s7081_s14 + $0x1390] sm:$0xff]  ;;  %v807_v46 = vld [vmem:[%s7081_s14 + $0x1398] sm:$0xff] }
  0xb3   : > { %804 = vst [vmem:[%s7086_s24 + $0x9c4] sm:$0xff] %v803_v44  ;;  %806 = vst [vmem:[%s7086_s24 + $0x9cc] sm:$0xff] %v805_v45  ;;  %v809_v47 = vld [vmem:[%s7081_s14 + $0x13a0] sm:$0xff]  ;;  %v811_v48 = vld [vmem:[%s7081_s14 + $0x13a8] sm:$0xff] }
  0xb4   : > { %808 = vst [vmem:[%s7086_s24 + $0x9d4] sm:$0xff] %v807_v46  ;;  %v813_v49 = vld [vmem:[%s7081_s14 + $0x13b0] sm:$0xff]  ;;  %810 = vst [vmem:[%s7086_s24 + $0x9dc] sm:$0xff] %v809_v47  ;;  %v815_v50 = vld [vmem:[%s7081_s14 + $0x13b8] sm:$0xff] }
  0xb5   : > { %812 = vst [vmem:[%s7086_s24 + $0x9e4] sm:$0xff] %v811_v48  ;;  %814 = vst [vmem:[%s7086_s24 + $0x9ec] sm:$0xff] %v813_v49  ;;  %v817_v51 = vld [vmem:[%s7081_s14 + $0x13c0] sm:$0xff]  ;;  %v819_v52 = vld [vmem:[%s7081_s14 + $0x13c8] sm:$0xff] }
  0xb6   : > { %816 = vst [vmem:[%s7086_s24 + $0x9f4] sm:$0xff] %v815_v50  ;;  %818 = vst [vmem:[%s7086_s24 + $0x9fc] sm:$0xff] %v817_v51  ;;  %v821_v53 = vld [vmem:[%s7081_s14 + $0x13d0] sm:$0xff]  ;;  %v823_v54 = vld [vmem:[%s7081_s14 + $0x13d8] sm:$0xff] }
  0xb7   : > { %820 = vst [vmem:[%s7086_s24 + $0xa04] sm:$0xff] %v819_v52  ;;  %v825_v55 = vld [vmem:[%s7081_s14 + $0x13e0] sm:$0xff]  ;;  %822 = vst [vmem:[%s7086_s24 + $0xa0c] sm:$0xff] %v821_v53  ;;  %v827_v56 = vld [vmem:[%s7081_s14 + $0x1450] sm:$0xff] }
  0xb8   : > { %824 = vst [vmem:[%s7086_s24 + $0xa14] sm:$0xff] %v823_v54  ;;  %826 = vst [vmem:[%s7086_s24 + $0xa1c] sm:$0xff] %v825_v55  ;;  %v829_v57 = vld [vmem:[%s7081_s14 + $0x1458] sm:$0xff]  ;;  %v831_v58 = vld [vmem:[%s7081_s14 + $0x1460] sm:$0xff] }
  0xb9   : > { %828 = vst [vmem:[%s7086_s24 + $0xa28] sm:$0xff] %v827_v56  ;;  %830 = vst [vmem:[%s7086_s24 + $0xa30] sm:$0xff] %v829_v57  ;;  %v833_v59 = vld [vmem:[%s7081_s14 + $0x1468] sm:$0xff]  ;;  %v835_v60 = vld [vmem:[%s7081_s14 + $0x1470] sm:$0xff] }
  0xba   : > { %832 = vst [vmem:[%s7086_s24 + $0xa38] sm:$0xff] %v831_v58  ;;  %v837_v61 = vld [vmem:[%s7081_s14 + $0x1478] sm:$0xff]  ;;  %834 = vst [vmem:[%s7086_s24 + $0xa40] sm:$0xff] %v833_v59  ;;  %v839_v62 = vld [vmem:[%s7081_s14 + $0x1480] sm:$0xff] }
  0xbb   : > { %836 = vst [vmem:[%s7086_s24 + $0xa48] sm:$0xff] %v835_v60  ;;  %838 = vst [vmem:[%s7086_s24 + $0xa50] sm:$0xff] %v837_v61  ;;  %v841_v63 = vld [vmem:[%s7081_s14 + $0x1488] sm:$0xff]  ;;  %v843_v0 = vld [vmem:[%s7081_s14 + $0x1490] sm:$0xff] }
  0xbc   : > { %840 = vst [vmem:[%s7086_s24 + $0xa58] sm:$0xff] %v839_v62  ;;  %842 = vst [vmem:[%s7086_s24 + $0xa60] sm:$0xff] %v841_v63  ;;  %v845_v1 = vld [vmem:[%s7081_s14 + $0x1498] sm:$0xff]  ;;  %v847_v2 = vld [vmem:[%s7081_s14 + $0x14a0] sm:$0xff] }
  0xbd   : > { %844 = vst [vmem:[%s7086_s24 + $0xa68] sm:$0xff] %v843_v0  ;;  %v849_v3 = vld [vmem:[%s7081_s14 + $0x14a8] sm:$0xff]  ;;  %846 = vst [vmem:[%s7086_s24 + $0xa70] sm:$0xff] %v845_v1  ;;  %v851_v4 = vld [vmem:[%s7081_s14 + $0x1518] sm:$0xff] }
  0xbe   : > { %848 = vst [vmem:[%s7086_s24 + $0xa78] sm:$0xff] %v847_v2  ;;  %850 = vst [vmem:[%s7086_s24 + $0xa80] sm:$0xff] %v849_v3  ;;  %v853_v5 = vld [vmem:[%s7081_s14 + $0x1520] sm:$0xff]  ;;  %v855_v6 = vld [vmem:[%s7081_s14 + $0x1528] sm:$0xff] }
  0xbf   : > { %852 = vst [vmem:[%s7086_s24 + $0xa8c] sm:$0xff] %v851_v4  ;;  %854 = vst [vmem:[%s7086_s24 + $0xa94] sm:$0xff] %v853_v5  ;;  %v857_v7 = vld [vmem:[%s7081_s14 + $0x1530] sm:$0xff]  ;;  %v859_v8 = vld [vmem:[%s7081_s14 + $0x1538] sm:$0xff] }
  0xc0   : > { %856 = vst [vmem:[%s7086_s24 + $0xa9c] sm:$0xff] %v855_v6  ;;  %v861_v9 = vld [vmem:[%s7081_s14 + $0x1540] sm:$0xff]  ;;  %858 = vst [vmem:[%s7086_s24 + $0xaa4] sm:$0xff] %v857_v7  ;;  %v863_v10 = vld [vmem:[%s7081_s14 + $0x1548] sm:$0xff] }
  0xc1   : > { %860 = vst [vmem:[%s7086_s24 + $0xaac] sm:$0xff] %v859_v8  ;;  %862 = vst [vmem:[%s7086_s24 + $0xab4] sm:$0xff] %v861_v9  ;;  %v865_v11 = vld [vmem:[%s7081_s14 + $0x1550] sm:$0xff]  ;;  %v867_v12 = vld [vmem:[%s7081_s14 + $0x1558] sm:$0xff] }
  0xc2   : > { %864 = vst [vmem:[%s7086_s24 + $0xabc] sm:$0xff] %v863_v10  ;;  %866 = vst [vmem:[%s7086_s24 + $0xac4] sm:$0xff] %v865_v11  ;;  %v869_v13 = vld [vmem:[%s7081_s14 + $0x1560] sm:$0xff]  ;;  %v871_v14 = vld [vmem:[%s7081_s14 + $0x1568] sm:$0xff] }
  0xc3   : > { %868 = vst [vmem:[%s7086_s24 + $0xacc] sm:$0xff] %v867_v12  ;;  %v873_v15 = vld [vmem:[%s7081_s14 + $0x1570] sm:$0xff]  ;;  %870 = vst [vmem:[%s7086_s24 + $0xad4] sm:$0xff] %v869_v13  ;;  %v875_v16 = vld [vmem:[%s7081_s14 + $0x15e0] sm:$0xff] }
  0xc4   : > { %872 = vst [vmem:[%s7086_s24 + $0xadc] sm:$0xff] %v871_v14  ;;  %874 = vst [vmem:[%s7086_s24 + $0xae4] sm:$0xff] %v873_v15  ;;  %v877_v17 = vld [vmem:[%s7081_s14 + $0x15e8] sm:$0xff]  ;;  %v879_v18 = vld [vmem:[%s7081_s14 + $0x15f0] sm:$0xff] }
  0xc5   : > { %876 = vst [vmem:[%s7086_s24 + $0xaf0] sm:$0xff] %v875_v16  ;;  %878 = vst [vmem:[%s7086_s24 + $0xaf8] sm:$0xff] %v877_v17  ;;  %v881_v19 = vld [vmem:[%s7081_s14 + $0x15f8] sm:$0xff]  ;;  %v883_v20 = vld [vmem:[%s7081_s14 + $0x1600] sm:$0xff] }
  0xc6   : > { %880 = vst [vmem:[%s7086_s24 + $0xb00] sm:$0xff] %v879_v18  ;;  %v885_v21 = vld [vmem:[%s7081_s14 + $0x1608] sm:$0xff]  ;;  %882 = vst [vmem:[%s7086_s24 + $0xb08] sm:$0xff] %v881_v19  ;;  %v887_v22 = vld [vmem:[%s7081_s14 + $0x1610] sm:$0xff] }
  0xc7   : > { %884 = vst [vmem:[%s7086_s24 + $0xb10] sm:$0xff] %v883_v20  ;;  %886 = vst [vmem:[%s7086_s24 + $0xb18] sm:$0xff] %v885_v21  ;;  %v889_v23 = vld [vmem:[%s7081_s14 + $0x1618] sm:$0xff]  ;;  %v891_v24 = vld [vmem:[%s7081_s14 + $0x1620] sm:$0xff] }
  0xc8   : > { %888 = vst [vmem:[%s7086_s24 + $0xb20] sm:$0xff] %v887_v22  ;;  %890 = vst [vmem:[%s7086_s24 + $0xb28] sm:$0xff] %v889_v23  ;;  %v893_v25 = vld [vmem:[%s7081_s14 + $0x1628] sm:$0xff]  ;;  %v895_v26 = vld [vmem:[%s7081_s14 + $0x1630] sm:$0xff] }
  0xc9   : > { %892 = vst [vmem:[%s7086_s24 + $0xb30] sm:$0xff] %v891_v24  ;;  %v897_v27 = vld [vmem:[%s7081_s14 + $0x1638] sm:$0xff]  ;;  %894 = vst [vmem:[%s7086_s24 + $0xb38] sm:$0xff] %v893_v25  ;;  %v899_v28 = vld [vmem:[%s7081_s14 + $0x16a8] sm:$0xff] }
  0xca   : > { %896 = vst [vmem:[%s7086_s24 + $0xb40] sm:$0xff] %v895_v26  ;;  %898 = vst [vmem:[%s7086_s24 + $0xb48] sm:$0xff] %v897_v27  ;;  %v901_v29 = vld [vmem:[%s7081_s14 + $0x16b0] sm:$0xff]  ;;  %v903_v30 = vld [vmem:[%s7081_s14 + $0x16b8] sm:$0xff] }
  0xcb   : > { %900 = vst [vmem:[%s7086_s24 + $0xb54] sm:$0xff] %v899_v28  ;;  %902 = vst [vmem:[%s7086_s24 + $0xb5c] sm:$0xff] %v901_v29  ;;  %v905_v31 = vld [vmem:[%s7081_s14 + $0x16c0] sm:$0xff]  ;;  %v907_v32 = vld [vmem:[%s7081_s14 + $0x16c8] sm:$0xff] }
  0xcc   : > { %904 = vst [vmem:[%s7086_s24 + $0xb64] sm:$0xff] %v903_v30  ;;  %v909_v33 = vld [vmem:[%s7081_s14 + $0x16d0] sm:$0xff]  ;;  %906 = vst [vmem:[%s7086_s24 + $0xb6c] sm:$0xff] %v905_v31  ;;  %v911_v34 = vld [vmem:[%s7081_s14 + $0x16d8] sm:$0xff] }
  0xcd   : > { %908 = vst [vmem:[%s7086_s24 + $0xb74] sm:$0xff] %v907_v32  ;;  %910 = vst [vmem:[%s7086_s24 + $0xb7c] sm:$0xff] %v909_v33  ;;  %v913_v35 = vld [vmem:[%s7081_s14 + $0x16e0] sm:$0xff]  ;;  %v915_v36 = vld [vmem:[%s7081_s14 + $0x16e8] sm:$0xff] }
  0xce   : > { %912 = vst [vmem:[%s7086_s24 + $0xb84] sm:$0xff] %v911_v34  ;;  %914 = vst [vmem:[%s7086_s24 + $0xb8c] sm:$0xff] %v913_v35  ;;  %v917_v37 = vld [vmem:[%s7081_s14 + $0x16f0] sm:$0xff]  ;;  %v919_v38 = vld [vmem:[%s7081_s14 + $0x16f8] sm:$0xff] }
  0xcf   : > { %916 = vst [vmem:[%s7086_s24 + $0xb94] sm:$0xff] %v915_v36  ;;  %v921_v39 = vld [vmem:[%s7081_s14 + $0x1700] sm:$0xff]  ;;  %918 = vst [vmem:[%s7086_s24 + $0xb9c] sm:$0xff] %v917_v37  ;;  %v923_v40 = vld [vmem:[%s7081_s14 + $0x1770] sm:$0xff] }
  0xd0   : > { %920 = vst [vmem:[%s7086_s24 + $0xba4] sm:$0xff] %v919_v38  ;;  %922 = vst [vmem:[%s7086_s24 + $0xbac] sm:$0xff] %v921_v39  ;;  %v925_v41 = vld [vmem:[%s7081_s14 + $0x1778] sm:$0xff]  ;;  %v927_v42 = vld [vmem:[%s7081_s14 + $0x1780] sm:$0xff] }
  0xd1   : > { %924 = vst [vmem:[%s7086_s24 + $0xbb8] sm:$0xff] %v923_v40  ;;  %926 = vst [vmem:[%s7086_s24 + $0xbc0] sm:$0xff] %v925_v41  ;;  %v929_v43 = vld [vmem:[%s7081_s14 + $0x1788] sm:$0xff]  ;;  %v931_v44 = vld [vmem:[%s7081_s14 + $0x1790] sm:$0xff] }
  0xd2   : > { %928 = vst [vmem:[%s7086_s24 + $0xbc8] sm:$0xff] %v927_v42  ;;  %v933_v45 = vld [vmem:[%s7081_s14 + $0x1798] sm:$0xff]  ;;  %930 = vst [vmem:[%s7086_s24 + $0xbd0] sm:$0xff] %v929_v43  ;;  %v935_v46 = vld [vmem:[%s7081_s14 + $0x17a0] sm:$0xff] }
  0xd3   : > { %932 = vst [vmem:[%s7086_s24 + $0xbd8] sm:$0xff] %v931_v44  ;;  %934 = vst [vmem:[%s7086_s24 + $0xbe0] sm:$0xff] %v933_v45  ;;  %v937_v47 = vld [vmem:[%s7081_s14 + $0x17a8] sm:$0xff]  ;;  %v939_v48 = vld [vmem:[%s7081_s14 + $0x17b0] sm:$0xff] }
  0xd4   : > { %936 = vst [vmem:[%s7086_s24 + $0xbe8] sm:$0xff] %v935_v46  ;;  %938 = vst [vmem:[%s7086_s24 + $0xbf0] sm:$0xff] %v937_v47  ;;  %v941_v49 = vld [vmem:[%s7081_s14 + $0x17b8] sm:$0xff]  ;;  %v943_v50 = vld [vmem:[%s7081_s14 + $0x17c0] sm:$0xff] }
  0xd5   : > { %940 = vst [vmem:[%s7086_s24 + $0xbf8] sm:$0xff] %v939_v48  ;;  %v945_v51 = vld [vmem:[%s7081_s14 + $0x17c8] sm:$0xff]  ;;  %942 = vst [vmem:[%s7086_s24 + $0xc00] sm:$0xff] %v941_v49  ;;  %v947_v52 = vld [vmem:[%s7081_s14 + $0x1838] sm:$0xff] }
  0xd6   : > { %944 = vst [vmem:[%s7086_s24 + $0xc08] sm:$0xff] %v943_v50  ;;  %946 = vst [vmem:[%s7086_s24 + $0xc10] sm:$0xff] %v945_v51  ;;  %v949_v53 = vld [vmem:[%s7081_s14 + $0x1840] sm:$0xff]  ;;  %v951_v54 = vld [vmem:[%s7081_s14 + $0x1848] sm:$0xff] }
  0xd7   : > { %948 = vst [vmem:[%s7086_s24 + $0xc1c] sm:$0xff] %v947_v52  ;;  %950 = vst [vmem:[%s7086_s24 + $0xc24] sm:$0xff] %v949_v53  ;;  %v953_v55 = vld [vmem:[%s7081_s14 + $0x1850] sm:$0xff]  ;;  %v955_v56 = vld [vmem:[%s7081_s14 + $0x1858] sm:$0xff] }
  0xd8   : > { %952 = vst [vmem:[%s7086_s24 + $0xc2c] sm:$0xff] %v951_v54  ;;  %v957_v57 = vld [vmem:[%s7081_s14 + $0x1860] sm:$0xff]  ;;  %954 = vst [vmem:[%s7086_s24 + $0xc34] sm:$0xff] %v953_v55  ;;  %v959_v58 = vld [vmem:[%s7081_s14 + $0x1868] sm:$0xff] }
  0xd9   : > { %956 = vst [vmem:[%s7086_s24 + $0xc3c] sm:$0xff] %v955_v56  ;;  %958 = vst [vmem:[%s7086_s24 + $0xc44] sm:$0xff] %v957_v57  ;;  %v961_v59 = vld [vmem:[%s7081_s14 + $0x1870] sm:$0xff]  ;;  %v963_v60 = vld [vmem:[%s7081_s14 + $0x1878] sm:$0xff] }
  0xda   : > { %960 = vst [vmem:[%s7086_s24 + $0xc4c] sm:$0xff] %v959_v58  ;;  %962 = vst [vmem:[%s7086_s24 + $0xc54] sm:$0xff] %v961_v59  ;;  %v965_v61 = vld [vmem:[%s7081_s14 + $0x1880] sm:$0xff]  ;;  %v967_v62 = vld [vmem:[%s7081_s14 + $0x1888] sm:$0xff] }
  0xdb   : > { %964 = vst [vmem:[%s7086_s24 + $0xc5c] sm:$0xff] %v963_v60  ;;  %v969_v63 = vld [vmem:[%s7081_s14 + $0x1890] sm:$0xff]  ;;  %966 = vst [vmem:[%s7086_s24 + $0xc64] sm:$0xff] %v965_v61  ;;  %v5564_v0 = vld [vmem:[%s7081_s14 + $0x60] sm:$0xf] }
  0xdc   : > { %968 = vst [vmem:[%s7086_s24 + $0xc6c] sm:$0xff] %v967_v62  ;;  %970 = vst [vmem:[%s7086_s24 + $0xc74] sm:$0xff] %v969_v63  ;;  %v5566_v1 = vld [vmem:[%s7081_s14 + $0x128] sm:$0xf]  ;;  %v5568_v2 = vld [vmem:[%s7081_s14 + $0x1f0] sm:$0xf] }
  0xdd   : > { %5565 = vst [vmem:[%s7086_s24 + $0x60] sm:$0xf] %v5564_v0  ;;  %5567 = vst [vmem:[%s7086_s24 + $0xc4] sm:$0xf] %v5566_v1  ;;  %v5570_v3 = vld [vmem:[%s7081_s14 + $0x2b8] sm:$0xf] }
  0xde   : > { %5569 = vst [vmem:[%s7086_s24 + $0x128] sm:$0xf] %v5568_v2  ;;  %v5572_v4 = vld [vmem:[%s7081_s14 + $0x380] sm:$0xf]  ;;  %v5574_v5 = vld [vmem:[%s7081_s14 + $0x448] sm:$0xf] }
  0xdf   : > { %5571 = vst [vmem:[%s7086_s24 + $0x18c] sm:$0xf] %v5570_v3  ;;  %5573 = vst [vmem:[%s7086_s24 + $0x1f0] sm:$0xf] %v5572_v4  ;;  %v5576_v6 = vld [vmem:[%s7081_s14 + $0x510] sm:$0xf] }
  0xe0   : > { %5575 = vst [vmem:[%s7086_s24 + $0x254] sm:$0xf] %v5574_v5  ;;  %v5578_v7 = vld [vmem:[%s7081_s14 + $0x5d8] sm:$0xf]  ;;  %v5580_v8 = vld [vmem:[%s7081_s14 + $0x6a0] sm:$0xf] }
  0xe1   : > { %5577 = vst [vmem:[%s7086_s24 + $0x2b8] sm:$0xf] %v5576_v6  ;;  %5579 = vst [vmem:[%s7086_s24 + $0x31c] sm:$0xf] %v5578_v7  ;;  %v5582_v9 = vld [vmem:[%s7081_s14 + $0x768] sm:$0xf] }
  0xe2   : > { %5581 = vst [vmem:[%s7086_s24 + $0x380] sm:$0xf] %v5580_v8  ;;  %v5584_v10 = vld [vmem:[%s7081_s14 + $0x830] sm:$0xf]  ;;  %v5586_v11 = vld [vmem:[%s7081_s14 + $0x8f8] sm:$0xf] }
  0xe3   : > { %5583 = vst [vmem:[%s7086_s24 + $0x3e4] sm:$0xf] %v5582_v9  ;;  %5585 = vst [vmem:[%s7086_s24 + $0x448] sm:$0xf] %v5584_v10  ;;  %v5588_v12 = vld [vmem:[%s7081_s14 + $0x9c0] sm:$0xf] }
  0xe4   : > { %5587 = vst [vmem:[%s7086_s24 + $0x4ac] sm:$0xf] %v5586_v11  ;;  %v5590_v13 = vld [vmem:[%s7081_s14 + $0xa88] sm:$0xf]  ;;  %v5592_v14 = vld [vmem:[%s7081_s14 + $0xb50] sm:$0xf] }
  0xe5   : > { %5589 = vst [vmem:[%s7086_s24 + $0x510] sm:$0xf] %v5588_v12  ;;  %5591 = vst [vmem:[%s7086_s24 + $0x574] sm:$0xf] %v5590_v13  ;;  %v5594_v15 = vld [vmem:[%s7081_s14 + $0xc18] sm:$0xf] }
  0xe6   : > { %5593 = vst [vmem:[%s7086_s24 + $0x5d8] sm:$0xf] %v5592_v14  ;;  %v5596_v16 = vld [vmem:[%s7081_s14 + $0xce0] sm:$0xf]  ;;  %v5598_v17 = vld [vmem:[%s7081_s14 + $0xda8] sm:$0xf] }
  0xe7   : > { %5595 = vst [vmem:[%s7086_s24 + $0x63c] sm:$0xf] %v5594_v15  ;;  %5597 = vst [vmem:[%s7086_s24 + $0x6a0] sm:$0xf] %v5596_v16  ;;  %v5600_v18 = vld [vmem:[%s7081_s14 + $0xe70] sm:$0xf] }
  0xe8   : > { %5599 = vst [vmem:[%s7086_s24 + $0x704] sm:$0xf] %v5598_v17  ;;  %v5602_v19 = vld [vmem:[%s7081_s14 + $0xf38] sm:$0xf]  ;;  %v5604_v20 = vld [vmem:[%s7081_s14 + $0x1000] sm:$0xf] }
  0xe9   : > { %5601 = vst [vmem:[%s7086_s24 + $0x768] sm:$0xf] %v5600_v18  ;;  %5603 = vst [vmem:[%s7086_s24 + $0x7cc] sm:$0xf] %v5602_v19  ;;  %v5606_v21 = vld [vmem:[%s7081_s14 + $0x10c8] sm:$0xf] }
  0xea   : > { %5605 = vst [vmem:[%s7086_s24 + $0x830] sm:$0xf] %v5604_v20  ;;  %v5608_v22 = vld [vmem:[%s7081_s14 + $0x1190] sm:$0xf]  ;;  %v5610_v23 = vld [vmem:[%s7081_s14 + $0x1258] sm:$0xf] }
  0xeb   : > { %5607 = vst [vmem:[%s7086_s24 + $0x894] sm:$0xf] %v5606_v21  ;;  %5609 = vst [vmem:[%s7086_s24 + $0x8f8] sm:$0xf] %v5608_v22  ;;  %v5612_v24 = vld [vmem:[%s7081_s14 + $0x1320] sm:$0xf] }
  0xec   : > { %5611 = vst [vmem:[%s7086_s24 + $0x95c] sm:$0xf] %v5610_v23  ;;  %v5614_v25 = vld [vmem:[%s7081_s14 + $0x13e8] sm:$0xf]  ;;  %v5616_v26 = vld [vmem:[%s7081_s14 + $0x14b0] sm:$0xf] }
  0xed   : > { %5613 = vst [vmem:[%s7086_s24 + $0x9c0] sm:$0xf] %v5612_v24  ;;  %5615 = vst [vmem:[%s7086_s24 + $0xa24] sm:$0xf] %v5614_v25  ;;  %v5618_v27 = vld [vmem:[%s7081_s14 + $0x1578] sm:$0xf] }
  0xee   : > { %5617 = vst [vmem:[%s7086_s24 + $0xa88] sm:$0xf] %v5616_v26  ;;  %v5620_v28 = vld [vmem:[%s7081_s14 + $0x1640] sm:$0xf]  ;;  %v5622_v29 = vld [vmem:[%s7081_s14 + $0x1708] sm:$0xf] }
  0xef   : > { %5619 = vst [vmem:[%s7086_s24 + $0xaec] sm:$0xf] %v5618_v27  ;;  %5621 = vst [vmem:[%s7086_s24 + $0xb50] sm:$0xf] %v5620_v28  ;;  %v5624_v30 = vld [vmem:[%s7081_s14 + $0x17d0] sm:$0xf] }
  0xf0   : > { %5623 = vst [vmem:[%s7086_s24 + $0xbb4] sm:$0xf] %v5622_v29  ;;  %v5626_v31 = vld [vmem:[%s7081_s14 + $0x1898] sm:$0xf]  ;;  %5625 = vst [vmem:[%s7086_s24 + $0xc18] sm:$0xf] %v5624_v30 }
  0xf1   : > { %5627 = vst [vmem:[%s7086_s24 + $0xc7c] sm:$0xf] %v5626_v31 }
  0xf2 PF: > { %p5628_p11 = scmp.ge.s32.totalorder %s6974_s23, 1  ;;  %p1046_p12 = scmp.lt.s32.totalorder %s6974_s23, 5 }
  0xf4   : > { %p1047_p13 = pnand %p5628_p11, %p1046_p12 }
  0xf5   : > { %s1053_s27 = sand.u32 (!%p1047_p13), 1, %s6950_s17   ;;  %s1080_s28 = sand.u32 (!%p1047_p13), 1, %s6942_s15  }
  0xf6   : > { %1050 = sbr.rel (%p1047_p13) target bundleno = 1286 (0x506), region = 58  ;;  %s5629_s5 = sshll.u32 (!%p1047_p13), %s6962_s20, 3 }
  0xf7   : > { %s6193_s29 = smul.u32 (!%p1047_p13), 3200, %s1053_s27  ;;  %p1084_p0 = scmp.lt.s32.totalorder (!%p1047_p13), %s5629_s5, 15 }
  0xf8   : > { %s6194_s6 = smul.u32 (!%p1047_p13), 1600, %s1080_s28  ;;  %p5632_p1 = scmp.ne.s32.totalorder (!%p1047_p13), %s6958_s19, 0 }
  0xf9   : > { %s7927_s13 = scalar_lea.vmem (!%p1047_p13), [#allocation3], %s6193_s29 }
  0xfa   : > { %s7929_s14 = scalar_lea.vmem (!%p1047_p13), [#allocation4], %s6194_s6 }
  0xfd   : > { %s9606_s5 = smov (!%p1084_p0, %s5629_s5), 15  ;;  %1097 = sbr.rel (%p5632_p1) target bundleno = 579 (0x243), region = 66 }
  0xfe   : > { %s6039_s9 = sshll.u32 %s9606_s5, 4  ;;  %v1131_v32 = vld [vmem:[%s9586_s1 + $0x8] sm:$0xff] (!%p5632_p1)  ;;  %v1133_v33 = vld [vmem:[%s9586_s1 + $0x18] sm:$0xff] (!%p5632_p1)  ;;  %v1130_v34 = vld [vmem:[%s9586_s1] sm:$0xff] (!%p5632_p1) }
  0xff   : > { %s7925_s12 = scalar_lea.vmem %s9585_s0, %s6039_s9  ;;  %v6080_v35 = vpack.c.bf16 (!%p5632_p1), %v1133_v33, %v1131_v32  ;;  %v1132_v36 = vld [vmem:[%s9586_s1 + $0x10] sm:$0xff] (!%p5632_p1)  ;;  %v1135_v37 = vld [vmem:[%s9586_s1 + $0x28] sm:$0xff] (!%p5632_p1)  ;;  %v1137_v38 = vld [vmem:[%s9586_s1 + $0x38] sm:$0xff] (!%p5632_p1) }
 0x100   : > { %v6082_v39 = vpack.c.bf16 (!%p5632_p1), %v1132_v36, %v1130_v34  ;;  %v6084_v40 = vpack.c.bf16 (!%p5632_p1), %v1137_v38, %v1135_v37  ;;  %v1134_v41 = vld [vmem:[%s9586_s1 + $0x20] sm:$0xff] (!%p5632_p1)  ;;  %v1136_v42 = vld [vmem:[%s9586_s1 + $0x30] sm:$0xff] (!%p5632_p1)  ;;  %v1139_v43 = vld [vmem:[%s9586_s1 + $0x48] sm:$0xff] (!%p5632_p1) }
 0x101   : > { %6081 = vmatprep.subr.bf16.mxu0 (!%p5632_p1), %v6080_v35  ;;  %6144 = vmatprep.subr.bf16.mxu1 (!%p5632_p1), %v6080_v35  ;;  %v1141_v44 = vld [vmem:[%s9586_s1 + $0x58] sm:$0xff] (!%p5632_p1)  ;;  %v6086_v45 = vpack.c.bf16 (!%p5632_p1), %v1136_v42, %v1134_v41  ;;  %v1138_v47 = vld [vmem:[%s9586_s1 + $0x40] sm:$0xff] (!%p5632_p1)  ;;  %v1140_v48 = vld [vmem:[%s9586_s1 + $0x50] sm:$0xff] (!%p5632_p1) }
 0x102   : > { %6083 = vmatpush1.bf16.msra.mxu0 (!%p5632_p1), %v6082_v39  ;;  %6160 = vmatpush1.bf16.msra.mxu1 (!%p5632_p1), %v6082_v39  ;;  %v6088_v46 = vpack.c.bf16 (!%p5632_p1), %v1141_v44, %v1139_v43  ;;  %v1143_v49 = vld [vmem:[%s9586_s1 + $0x68] sm:$0xff] (!%p5632_p1)  ;;  %v1145_v50 = vld [vmem:[%s9586_s1 + $0x78] sm:$0xff] (!%p5632_p1)  ;;  %v6090_v51 = vpack.c.bf16 (!%p5632_p1), %v1140_v48, %v1138_v47  ;;  %v1142_v53 = vld [vmem:[%s9586_s1 + $0x60] sm:$0xff] (!%p5632_p1) }
 0x103   : > { %6085 = vmatprep.subr.bf16.mxu0 (!%p5632_p1), %v6084_v40  ;;  %6145 = vmatprep.subr.bf16.mxu1 (!%p5632_p1), %v6084_v40  ;;  %v6092_v52 = vpack.c.bf16 (!%p5632_p1), %v1145_v50, %v1143_v49  ;;  %v1144_v54 = vld [vmem:[%s9586_s1 + $0x70] sm:$0xff] (!%p5632_p1)  ;;  %v1147_v55 = vld [vmem:[%s9586_s1 + $0x88] sm:$0xff] (!%p5632_p1)  ;;  %v1149_v56 = vld [vmem:[%s9586_s1 + $0x98] sm:$0xff] (!%p5632_p1) }
 0x104   : > { %v6094_v57 = vpack.c.bf16 %v1144_v54, %v1142_v53  ;;  %v6096_v58 = vpack.c.bf16 %v1149_v56, %v1147_v55  ;;  %v1146_v59 = vld [vmem:[%s9586_s1 + $0x80] sm:$0xff]  ;;  %v1148_v60 = vld [vmem:[%s9586_s1 + $0x90] sm:$0xff]  ;;  %v1151_v61 = vld [vmem:[%s9586_s1 + $0xa8] sm:$0xff] }
 0x105   : > { %v1153_v62 = vld [vmem:[%s9586_s1 + $0xb8] sm:$0xff]  ;;  %v6098_v63 = vpack.c.bf16 %v1148_v60, %v1146_v59  ;;  %v1150_v1 = vld [vmem:[%s9586_s1 + $0xa0] sm:$0xff]  ;;  %v1152_v2 = vld [vmem:[%s9586_s1 + $0xb0] sm:$0xff] }
 0x106   : > { %6087 = vmatpush1.bf16.msra.mxu0 %v6086_v45  ;;  %6161 = vmatpush1.bf16.msra.mxu1 %v6086_v45  ;;  %v6100_v0 = vpack.c.bf16 %v1153_v62, %v1151_v61  ;;  %v1155_v3 = vld [vmem:[%s9586_s1 + $0xc8] sm:$0xff]  ;;  %v1157_v4 = vld [vmem:[%s9586_s1 + $0xd8] sm:$0xff]  ;;  %v6102_v5 = vpack.c.bf16 %v1152_v2, %v1150_v1  ;;  %v1154_v6 = vld [vmem:[%s9586_s1 + $0xc0] sm:$0xff] }
 0x107   : > { %6089 = vmatprep.subr.bf16.mxu0 %v6088_v46  ;;  %6146 = vmatprep.subr.bf16.mxu1 %v6088_v46  ;;  %v6104_v7 = vpack.c.bf16 %v1157_v4, %v1155_v3  ;;  %v1156_v8 = vld [vmem:[%s9586_s1 + $0xd0] sm:$0xff]  ;;  %v8017_v9 = vld [vmem:[%s7925_s12 + $0x8] sm:$0xff]  ;;  %v1161_v12 = vld [vmem:[%s9586_s1 + $0xf8] sm:$0xff] }
 0x108   : > { %v8020_v10 = vld [vmem:[%s7925_s12 + $0x48] sm:$0xff]  ;;  %v1115_v13 = vmul.f32 %v8017_v9, %v8017_v9  ;;  %v6106_v15 = vpack.c.bf16 %v1156_v8, %v1154_v6  ;;  %v1158_v17 = vld [vmem:[%s9586_s1 + $0xe0] sm:$0xff]  ;;  %v1160_v18 = vld [vmem:[%s9586_s1 + $0xf0] sm:$0xff] }
 0x109   : > { %v1159_v11 = vld [vmem:[%s9586_s1 + $0xe8] sm:$0xff]  ;;  %v1123_v14 = vmul.f32 %v8020_v10, %v8020_v10  ;;  %v1165_v20 = vld [vmem:[%s9586_s1 + $0x118] sm:$0xff]  ;;  %v6110_v21 = vpack.c.bf16 %v1160_v18, %v1158_v17  ;;  %v1162_v23 = vld [vmem:[%s9586_s1 + $0x100] sm:$0xff] }
 0x10a   : > { %6091 = vmatpush1.bf16.msra.mxu0 %v6090_v51  ;;  %6162 = vmatpush1.bf16.msra.mxu1 %v6090_v51  ;;  %v6108_v16 = vpack.c.bf16 %v1161_v12, %v1159_v11  ;;  %v1163_v19 = vld [vmem:[%s9586_s1 + $0x108] sm:$0xff]  ;;  %v1164_v24 = vld [vmem:[%s9586_s1 + $0x110] sm:$0xff]  ;;  %v1169_v26 = vld [vmem:[%s9586_s1 + $0x138] sm:$0xff] }
 0x10b   : > { %6093 = vmatprep.subr.bf16.mxu0 %v6092_v52  ;;  %6147 = vmatprep.subr.bf16.mxu1 %v6092_v52  ;;  %v6112_v22 = vpack.c.bf16 %v1165_v20, %v1163_v19  ;;  %v1167_v25 = vld [vmem:[%s9586_s1 + $0x128] sm:$0xff]  ;;  %v6114_v27 = vpack.c.bf16 %v1164_v24, %v1162_v23  ;;  %v1166_v29 = vld [vmem:[%s9586_s1 + $0x120] sm:$0xff]  ;;  %v1168_v30 = vld [vmem:[%s9586_s1 + $0x130] sm:$0xff] }
 0x10c   : > { %1270 = vmatprep.mubr.f32.mxu0 %v1115_v13  ;;  %1294 = vmatprep.mubr.f32.mxu1 %v1123_v14  ;;  %v6116_v28 = vpack.c.bf16 %v1169_v26, %v1167_v25  ;;  %v1171_v31 = vld [vmem:[%s9586_s1 + $0x148] sm:$0xff]  ;;  %v1173_v32 = vld [vmem:[%s9586_s1 + $0x158] sm:$0xff]  ;;  %v6118_v33 = vpack.c.bf16 %v1168_v30, %v1166_v29  ;;  %v1170_v35 = vld [vmem:[%s9586_s1 + $0x140] sm:$0xff] }
 0x10d   : > { %v6120_v34 = vpack.c.bf16 %v1173_v32, %v1171_v31  ;;  %v1172_v36 = vld [vmem:[%s9586_s1 + $0x150] sm:$0xff]  ;;  %v1175_v37 = vld [vmem:[%s9586_s1 + $0x168] sm:$0xff]  ;;  %v1177_v38 = vld [vmem:[%s9586_s1 + $0x178] sm:$0xff] }
 0x10e   : > { %6095 = vmatpush1.bf16.msra.mxu0 %v6094_v57  ;;  %6163 = vmatpush1.bf16.msra.mxu1 %v6094_v57  ;;  %v6122_v39 = vpack.c.bf16 %v1172_v36, %v1170_v35  ;;  %v6124_v40 = vpack.c.bf16 %v1177_v38, %v1175_v37  ;;  %v1174_v41 = vld [vmem:[%s9586_s1 + $0x160] sm:$0xff]  ;;  %v1176_v42 = vld [vmem:[%s9586_s1 + $0x170] sm:$0xff]  ;;  %v1179_v43 = vld [vmem:[%s9586_s1 + $0x188] sm:$0xff] }
 0x10f   : > { %6097 = vmatprep.subr.bf16.mxu0 %v6096_v58  ;;  %6148 = vmatprep.subr.bf16.mxu1 %v6096_v58  ;;  %v1181_v44 = vld [vmem:[%s9586_s1 + $0x198] sm:$0xff]  ;;  %v6126_v45 = vpack.c.bf16 %v1176_v42, %v1174_v41  ;;  %v1178_v47 = vld [vmem:[%s9586_s1 + $0x180] sm:$0xff]  ;;  %v1180_v48 = vld [vmem:[%s9586_s1 + $0x190] sm:$0xff] }
 0x110   : > { %v6128_v46 = vpack.c.bf16 %v1181_v44, %v1179_v43  ;;  %v1183_v49 = vld [vmem:[%s9586_s1 + $0x1a8] sm:$0xff]  ;;  %v1185_v50 = vld [vmem:[%s9586_s1 + $0x1b8] sm:$0xff]  ;;  %v6130_v51 = vpack.c.bf16 %v1180_v48, %v1178_v47  ;;  %v1182_v53 = vld [vmem:[%s9586_s1 + $0x1a0] sm:$0xff] }
 0x111   : > { %v6132_v52 = vpack.c.bf16 %v1185_v50, %v1183_v49  ;;  %v1184_v54 = vld [vmem:[%s9586_s1 + $0x1b0] sm:$0xff]  ;;  %v1187_v55 = vld [vmem:[%s9586_s1 + $0x1c8] sm:$0xff]  ;;  %v1189_v56 = vld [vmem:[%s9586_s1 + $0x1d8] sm:$0xff] }
 0x112   : > { %6099 = vmatpush1.bf16.msra.mxu0 %v6098_v63  ;;  %6164 = vmatpush1.bf16.msra.mxu1 %v6098_v63  ;;  %v6134_v57 = vpack.c.bf16 %v1184_v54, %v1182_v53  ;;  %v6136_v58 = vpack.c.bf16 %v1189_v56, %v1187_v55  ;;  %v1186_v59 = vld [vmem:[%s9586_s1 + $0x1c0] sm:$0xff]  ;;  %v1188_v60 = vld [vmem:[%s9586_s1 + $0x1d0] sm:$0xff]  ;;  %v1191_v61 = vld [vmem:[%s9586_s1 + $0x1e8] sm:$0xff] }
 0x113   : > { %6101 = vmatprep.subr.bf16.mxu0 %v6100_v0  ;;  %6149 = vmatprep.subr.bf16.mxu1 %v6100_v0  ;;  %v1193_v62 = vld [vmem:[%s9586_s1 + $0x1f8] sm:$0xff]  ;;  %v6138_v63 = vpack.c.bf16 %v1188_v60, %v1186_v59  ;;  %v1190_v1 = vld [vmem:[%s9586_s1 + $0x1e0] sm:$0xff]  ;;  %v1192_v2 = vld [vmem:[%s9586_s1 + $0x1f0] sm:$0xff] }
 0x114   : > { %v6140_v0 = vpack.c.bf16 %v1193_v62, %v1191_v61  ;;  %v6142_v3 = vpack.c.bf16 %v1192_v2, %v1190_v1  ;;  %v8135_v4 = vld [vmem:[%s7925_s12] sm:$0xff]  ;;  %v8141_v6 = vld [vmem:[%s7925_s12 + $0x18] sm:$0xff]  ;;  %v8155_v14 = vld [vmem:[%s7925_s12 + $0x10] sm:$0xff] }
 0x115   : > { %v1114_v8 = vmul.f32 %v8135_v4, %v8135_v4  ;;  %v1117_v12 = vmul.f32 %v8141_v6, %v8141_v6  ;;  %v8164_v17 = vld [vmem:[%s7925_s12 + $0x68] sm:$0xff]  ;;  %v1116_v18 = vmul.f32 %v8155_v14, %v8155_v14  ;;  %v8178_v23 = vld [vmem:[%s7925_s12 + $0x60] sm:$0xff]  ;;  %v8181_v24 = vld [vmem:[%s7925_s12 + $0x38] sm:$0xff] }
 0x116   : > { %6103 = vmatpush1.bf16.msra.mxu0 %v6102_v5  ;;  %6165 = vmatpush1.bf16.msra.mxu1 %v6102_v5  ;;  %v8138_v5 = vld [vmem:[%s7925_s12 + $0x40] sm:$0xff]  ;;  %v8184_v25 = vld [vmem:[%s7925_s12 + $0x78] sm:$0xff]  ;;  %v8195_v30 = vld [vmem:[%s7925_s12 + $0x30] sm:$0xff] }
 0x117   : > { %6105 = vmatprep.subr.bf16.mxu0 %v6104_v7  ;;  %6150 = vmatprep.subr.bf16.mxu1 %v6104_v7  ;;  %v8144_v7 = vld [vmem:[%s7925_s12 + $0x58] sm:$0xff]  ;;  %v1122_v11 = vmul.f32 %v8138_v5, %v8138_v5  ;;  %v1129_v29 = vmul.f32 %v8184_v25, %v8184_v25  ;;  %v8198_v31 = vld [vmem:[%s7925_s12 + $0x70] sm:$0xff]  ;;  %v1120_v32 = vmul.f32 %v8195_v30, %v8195_v30  ;;  %v1194_v37 = vld [vmem:[%s9587_s2] sm:$0x3] }
 0x118   : > { %v1125_v13 = vmul.f32 %v8144_v7, %v8144_v7 }
 0x11a   : > { %6107 = vmatpush1.bf16.msra.mxu0 %v6106_v15  ;;  %6166 = vmatpush1.bf16.msra.mxu1 %v6106_v15  ;;  %v8158_v15 = vld [vmem:[%s7925_s12 + $0x50] sm:$0xff] }
 0x11b   : > { %6109 = vmatprep.subr.bf16.mxu0 %v6108_v16  ;;  %6151 = vmatprep.subr.bf16.mxu1 %v6108_v16  ;;  %v8161_v16 = vld [vmem:[%s7925_s12 + $0x28] sm:$0xff]  ;;  %v1124_v19 = vmul.f32 %v8158_v15, %v8158_v15 }
 0x11c   : > { %v1119_v20 = vmul.f32 %v8161_v16, %v8161_v16 }
 0x11e   : > { %6111 = vmatpush1.bf16.msra.mxu0 %v6110_v21  ;;  %6167 = vmatpush1.bf16.msra.mxu1 %v6110_v21  ;;  %v1127_v21 = vmul.f32 %v8164_v17, %v8164_v17 }
 0x11f   : > { %6113 = vmatprep.subr.bf16.mxu0 %v6112_v22  ;;  %6152 = vmatprep.subr.bf16.mxu1 %v6112_v22  ;;  %v8175_v22 = vld [vmem:[%s7925_s12 + $0x20] sm:$0xff] }
 0x120   : > { %v1118_v26 = vmul.f32 %v8175_v22, %v8175_v22 }
 0x122   : > { %6115 = vmatpush1.bf16.msra.mxu0 %v6114_v27  ;;  %6168 = vmatpush1.bf16.msra.mxu1 %v6114_v27  ;;  %v1126_v27 = vmul.f32 %v8178_v23, %v8178_v23 }
 0x123   : > { %6117 = vmatprep.subr.bf16.mxu0 %v6116_v28  ;;  %6153 = vmatprep.subr.bf16.mxu1 %v6116_v28  ;;  %v1121_v28 = vmul.f32 %v8181_v24, %v8181_v24 }
 0x126   : > { %6119 = vmatpush1.bf16.msra.mxu0 %v6118_v33  ;;  %6169 = vmatpush1.bf16.msra.mxu1 %v6118_v33  ;;  %v1128_v33 = vmul.f32 %v8198_v31, %v8198_v31 }
 0x127   : > { %6121 = vmatprep.subr.bf16.mxu0 %v6120_v34  ;;  %6154 = vmatprep.subr.bf16.mxu1 %v6120_v34  ;;  %v1196_v34 = vlaneseq }
 0x129   : > { %v1197_v35 = vshrl.u32 %v1196_v34, 7 }
 0x12a   : > { %6123 = vmatpush1.bf16.msra.mxu0 %v6122_v39  ;;  %6170 = vmatpush1.bf16.msra.mxu1 %v6122_v39 }
 0x12b   : > { %6125 = vmatprep.subr.bf16.mxu0 %v6124_v40  ;;  %6155 = vmatprep.subr.bf16.mxu1 %v6124_v40  ;;  %v1198_v36 = vsub.s32 0, %v1197_v35  ;;  %v1202_v38 = vsub.s32 1, %v1197_v35 }
 0x12d   : > { %v8207_v39 = vrot.slane %v1194_v37, %v1198_v36  ;;  %v8209_v40 = vrot.slane %v1194_v37, %v1202_v38 }
 0x12e   : > { %6127 = vmatpush1.bf16.msra.mxu0 %v6126_v45  ;;  %6171 = vmatpush1.bf16.msra.mxu1 %v6126_v45 }
 0x12f   : > { %6129 = vmatprep.subr.bf16.mxu0 %v6128_v46  ;;  %6156 = vmatprep.subr.bf16.mxu1 %v6128_v46 }
 0x132   : > { %6131 = vmatpush1.bf16.msra.mxu0 %v6130_v51  ;;  %6172 = vmatpush1.bf16.msra.mxu1 %v6130_v51 }
 0x133   : > { %6133 = vmatprep.subr.bf16.mxu0 %v6132_v52  ;;  %6157 = vmatprep.subr.bf16.mxu1 %v6132_v52 }
 0x136   : > { %6135 = vmatpush1.bf16.msra.mxu0 %v6134_v57  ;;  %6173 = vmatpush1.bf16.msra.mxu1 %v6134_v57 }
 0x137   : > { %6137 = vmatprep.subr.bf16.mxu0 %v6136_v58  ;;  %6158 = vmatprep.subr.bf16.mxu1 %v6136_v58 }
 0x13a   : > { %6139 = vmatpush1.bf16.msra.mxu0 %v6138_v63  ;;  %6174 = vmatpush1.bf16.msra.mxu1 %v6138_v63 }
 0x13b   : > { %6141 = vmatprep.subr.bf16.mxu0 %v6140_v0  ;;  %6159 = vmatprep.subr.bf16.mxu1 %v6140_v0 }
 0x13e   : > { %6143 = vmatpush1.bf16.msra.mxu0 %v6142_v3  ;;  %6175 = vmatpush1.bf16.msra.mxu1 %v6142_v3 }
 0x141   : > { %1271 = vmatmul.mubr.f32.vlgmr.msra.gmra.mrb[0].mxu0 %v1114_v8  ;;  %1295 = vmatmul.mubr.f32.vlgmr.msra.gmra.mrb[0].mxu1 %v1122_v11 }
 0x142   : > { %1276 = vmatprep.mubr.f32.mxu0 %v1117_v12  ;;  %1300 = vmatprep.mubr.f32.mxu1 %v1125_v13 }
 0x145   : > { %1277 = vmatmul.mubr.f32.gmra.mrb[2].mxu0 %v1116_v18  ;;  %1301 = vmatmul.mubr.f32.gmra.mrb[2].mxu1 %v1124_v19 }
 0x146   : > { %1282 = vmatprep.mubr.f32.mxu0 %v1119_v20  ;;  %1306 = vmatprep.mubr.f32.mxu1 %v1127_v21 }
 0x149   : > { %1283 = vmatmul.mubr.f32.gmra.mrb[4].mxu0 %v1118_v26  ;;  %1307 = vmatmul.mubr.f32.gmra.mrb[4].mxu1 %v1126_v27 }
 0x14a   : > { %1288 = vmatprep.mubr.f32.mxu0 %v1121_v28  ;;  %1312 = vmatprep.mubr.f32.mxu1 %v1129_v29 }
 0x14d   : > { %1289 = vmatmul.mubr.f32.gmra.mrb[6].mxu0 %v1120_v32  ;;  %1313 = vmatmul.mubr.f32.gmra.mrb[6].mxu1 %v1128_v33 }
 0x214   : > { %v1272_v41 = vpop.f32.mrb[0].mxu0  ;;  %v1296_v42 = vpop.f32.mrb[0].mxu1 }
 0x215   : > { %v8212_v43 = vadd.f32 %v1272_v41, %v8207_v39  ;;  %v8215_v44 = vadd.f32 %v1296_v42, %v8207_v39  ;;  %v1274_v45 = vpop.f32.mrb[1].mxu0  ;;  %v1298_v46 = vpop.f32.mrb[1].mxu1 }
 0x216   : > { %v8218_v47 = vadd.f32 %v1274_v45, %v8209_v40  ;;  %v8221_v48 = vadd.f32 %v1298_v46, %v8209_v40 }
 0x217   : > { %6268 = vrsqrt.f32 %v8212_v43  ;;  %vm1321_vm0 = vcmp.eq.f32.partialorder %v8212_v43, inf  ;;  %vm1323_vm1 = vcmp.eq.f32.partialorder %v8212_v43, 0.0  ;;  %v1324_v61 = vand.u32 2147483648, %v8212_v43 }
 0x218   : > { %6270 = vrsqrt.f32 %v8215_v44  ;;  %v1278_v49 = vpop.f32.mrb[2].mxu0  ;;  %v1302_v50 = vpop.f32.mrb[2].mxu1  ;;  %vm1377_vm2 = vcmp.eq.f32.partialorder %v8215_v44, inf  ;;  %vm1379_vm3 = vcmp.eq.f32.partialorder %v8215_v44, 0.0  ;;  %v1380_v62 = vand.u32 2147483648, %v8215_v44 }
 0x219   : > { %6272 = vrsqrt.f32 %v8218_v47  ;;  %v1280_v51 = vpop.f32.mrb[3].mxu0  ;;  %v1304_v52 = vpop.f32.mrb[3].mxu1  ;;  %v8228_v53 = vadd.f32 %v1278_v49, %v8207_v39  ;;  %v8231_v54 = vadd.f32 %v1302_v50, %v8207_v39  ;;  %vm1328_vm4 = vcmp.eq.f32.partialorder %v8218_v47, inf }
 0x21a   : > { %6274 = vrsqrt.f32 %v8221_v48  ;;  %v8234_v55 = vadd.f32 %v1280_v51, %v8209_v40  ;;  %v8237_v56 = vadd.f32 %v1304_v52, %v8209_v40  ;;  %vm1330_vm5 = vcmp.eq.f32.partialorder %v8218_v47, 0.0 }
 0x21b   : > { %6276 = vrsqrt.f32 %v8228_v53  ;;  %v1331_v2 = vand.u32 2147483648, %v8218_v47  ;;  %vm1384_vm6 = vcmp.eq.f32.partialorder %v8221_v48, inf  ;;  %v1387_v3 = vand.u32 2147483648, %v8221_v48 }
 0x21c   : > { %v1284_v57 = vpop.f32.mrb[4].mxu0  ;;  %v1308_v58 = vpop.f32.mrb[4].mxu1  ;;  %6278 = vrsqrt.f32 %v8231_v54  ;;  %vm1335_vm7 = vcmp.eq.f32.partialorder %v8228_v53, inf  ;;  %vm1337_vm8 = vcmp.eq.f32.partialorder %v8228_v53, 0.0  ;;  %v1338_v18 = vand.u32 2147483648, %v8228_v53 }
 0x21d   : > { %v1286_v59 = vpop.f32.mrb[5].mxu0  ;;  %v1310_v60 = vpop.f32.mrb[5].mxu1  ;;  %6280 = vrsqrt.f32 %v8234_v55  ;;  %v8263_v19 = vadd.f32 %v1284_v57, %v8207_v39  ;;  %vm1386_vm9 = vcmp.eq.f32.partialorder %v8221_v48, 0.0  ;;  %vm1391_vm10 = vcmp.eq.f32.partialorder %v8231_v54, inf }
 0x21e   : > { %6282 = vrsqrt.f32 %v8237_v56  ;;  %vm1393_vm11 = vcmp.eq.f32.partialorder %v8231_v54, 0.0  ;;  %v1394_v26 = vand.u32 2147483648, %v8231_v54  ;;  %vm1342_vm12 = vcmp.eq.f32.partialorder %v8234_v55, inf }
 0x21f   : > { %vm1344_vm13 = vcmp.eq.f32.partialorder %v8234_v55, 0.0  ;;  %v1345_v34 = vand.u32 2147483648, %v8234_v55  ;;  %v8282_v35 = vadd.f32 %v1308_v58, %v8207_v39  ;;  %vm1398_vm14 = vcmp.eq.f32.partialorder %v8237_v56, inf }
 0x220   : > { %v1290_v63 = vpop.f32.mrb[6].mxu0  ;;  %v1314_v0 = vpop.f32.mrb[6].mxu1  ;;  %vm1400_vm15 = vcmp.eq.f32.partialorder %v8237_v56, 0.0  ;;  %6284 = vrsqrt.f32 %v8263_v19  ;;  %v1401_v42 = vand.u32 2147483648, %v8237_v56  ;;  %v8296_v45 = vadd.f32 %v1286_v59, %v8209_v40 }
 0x221   : > { %v6269_v1 = vpop.eup %6268  ;;  %v8255_v8 = vpop.f32.mrb[7].mxu0  ;;  %v8300_v49 = vadd.f32 %v1310_v60, %v8209_v40  ;;  %v8303_v50 = vadd.f32 %v1290_v63, %v8207_v39  ;;  %6286 = vrsqrt.f32 %v8282_v35 }
 0x222   : > { %v8257_v11 = vpop.f32.mrb[7].mxu1  ;;  %v6271_v12 = vpop.eup %6270  ;;  %v1320_v13 = vmul.f32 %v6269_v1, %v8212_v43  ;;  %6288 = vrsqrt.f32 %v8296_v45 }
 0x223   : > { %v6273_v20 = vpop.eup %6272  ;;  %v1376_v21 = vmul.f32 %v6271_v12, %v8215_v44  ;;  %6290 = vrsqrt.f32 %v8300_v49 }
 0x224   : > { %v6275_v27 = vpop.eup %6274  ;;  %v1322_v28 = vsel %vm1321_vm0, %v8212_v43, %v1320_v13  ;;  %v1327_v29 = vmul.f32 %v6273_v20, %v8218_v47  ;;  %6292 = vrsqrt.f32 %v8303_v50  ;;  %vm1349_vm0 = vcmp.eq.f32.partialorder %v8263_v19, inf }
 0x225   : > { %v1378_v32 = vsel %vm1377_vm2, %v8215_v44, %v1376_v21  ;;  %v1383_v33 = vmul.f32 %v6275_v27, %v8221_v48  ;;  %v1325_v36 = vsel %vm1323_vm1, %v1324_v61, %v1322_v28  ;;  %v6277_v37 = vpop.eup %6276  ;;  %v8306_v44 = vadd.f32 %v1314_v0, %v8207_v39 }
 0x226   : > { %v1381_v38 = vsel %vm1379_vm3, %v1380_v62, %v1378_v32  ;;  %v1329_v41 = vsel %vm1328_vm4, %v8218_v47, %v1327_v29  ;;  %v6279_v43 = vpop.eup %6278  ;;  %v1334_v46 = vmul.f32 %v6277_v37, %v8228_v53  ;;  %v1431_v52 = vmul.f32 %v1325_v36, %v8135_v4 }
 0x227   : > { %v6281_v51 = vpop.eup %6280  ;;  %v1385_v57 = vsel %vm1384_vm6, %v8221_v48, %v1383_v33  ;;  %v1390_v58 = vmul.f32 %v6279_v43, %v8231_v54  ;;  %v1439_v60 = vmul.f32 %v1381_v38, %v8138_v5  ;;  %v1332_v61 = vsel %vm1330_vm5, %v1331_v2, %v1329_v41 }
 0x228   : > { %v6283_v59 = vpop.eup %6282  ;;  %v1336_v39 = vsel %vm1335_vm7, %v8228_v53, %v1334_v46  ;;  %v1341_v4 = vmul.f32 %v6281_v51, %v8234_v55  ;;  %v1388_v5 = vsel %vm1386_vm9, %v1387_v3, %v1385_v57  ;;  %v1432_v2 = vmul.f32 %v1332_v61, %v8017_v9 }
 0x229   : > { %v1339_v62 = vsel %vm1337_vm8, %v1338_v18, %v1336_v39  ;;  %v1392_v63 = vsel %vm1391_vm10, %v8231_v54, %v1390_v58  ;;  %v1397_v0 = vmul.f32 %v6283_v59, %v8237_v56  ;;  %v1440_v18 = vmul.f32 %v1388_v5, %v8020_v10 }
 0x22a   : > { %v1433_v47 = vmul.f32 %v1339_v62, %v8155_v14  ;;  %v1395_v1 = vsel %vm1393_vm11, %v1394_v26, %v1392_v63  ;;  %v1343_v53 = vsel %vm1342_vm12, %v8234_v55, %v1341_v4  ;;  %v6285_v55 = vpop.eup %6284  ;;  %v8352_v21 = vadd.f32 %v8255_v8, %v8209_v40 }
 0x22b   : > { %v1441_v12 = vmul.f32 %v1395_v1, %v8158_v15  ;;  %v1346_v13 = vsel %vm1344_vm13, %v1345_v34, %v1343_v53  ;;  %v1399_v48 = vsel %vm1398_vm14, %v8237_v56, %v1397_v0  ;;  %6294 = vrsqrt.f32 %v8306_v44  ;;  %v6287_v56 = vpop.eup %6286 }
 0x22c   : > { %v1447_v3 = vpack.c.bf16 %v1433_v47, %v1431_v52  ;;  %v1434_v14 = vmul.f32 %v1346_v13, %v8141_v6  ;;  %v1402_v54 = vsel %vm1400_vm15, %v1401_v42, %v1399_v48  ;;  %v1348_v10 = vmul.f32 %v6285_v55, %v8263_v19 }
 0x22d   : > { %v1451_v9 = vpack.c.bf16 %v1441_v12, %v1439_v60  ;;  %v1442_v15 = vmul.f32 %v1402_v54, %v8144_v7  ;;  %6296 = vrsqrt.f32 %v8352_v21  ;;  %v6289_v7 = vpop.eup %6288  ;;  %v8359_v26 = vadd.f32 %v8257_v11, %v8209_v40 }
 0x22e   : > { %1455 = vst [vmem:[#allocation2] sm:$0xff] %v1447_v3  ;;  %v1448_v20 = vpack.c.bf16 %v1434_v14, %v1432_v2  ;;  %v1404_v8 = vmul.f32 %v6287_v56, %v8282_v35  ;;  %v1350_v27 = vsel %vm1349_vm0, %v8263_v19, %v1348_v10  ;;  %vm1351_vm1 = vcmp.eq.f32.partialorder %v8263_v19, 0.0  ;;  %v6291_v28 = vpop.eup %6290 }
 0x22f   : > { %1459 = vst [vmem:[#allocation2 + $0x20] sm:$0xff] %v1451_v9  ;;  %v1452_v6 = vpack.c.bf16 %v1442_v15, %v1440_v18  ;;  %6298 = vrsqrt.f32 %v8359_v26  ;;  %v1352_v29 = vand.u32 2147483648, %v8263_v19  ;;  %vm1405_vm2 = vcmp.eq.f32.partialorder %v8282_v35, inf  ;;  %v6293_v11 = vpop.eup %6292 }
 0x230   : > { %1456 = vst [vmem:[#allocation2 + $0x8] sm:$0xff] %v1448_v20  ;;  %vm1407_vm3 = vcmp.eq.f32.partialorder %v8282_v35, 0.0  ;;  %v1355_v40 = vmul.f32 %v6289_v7, %v8296_v45  ;;  %v1408_v32 = vand.u32 2147483648, %v8282_v35  ;;  %vm1356_vm4 = vcmp.eq.f32.partialorder %v8296_v45, inf }
 0x231   : > { %1460 = vst [vmem:[#allocation2 + $0x28] sm:$0xff] %v1452_v6  ;;  %vm1358_vm5 = vcmp.eq.f32.partialorder %v8296_v45, 0.0  ;;  %v1359_v33 = vand.u32 2147483648, %v8296_v45  ;;  %v1353_v34 = vsel %vm1351_vm1, %v1352_v29, %v1350_v27  ;;  %v1406_v36 = vsel %vm1405_vm2, %v8282_v35, %v1404_v8 }
 0x232   : > { %vm1412_vm6 = vcmp.eq.f32.partialorder %v8300_v49, inf  ;;  %v1362_v19 = vmul.f32 %v6293_v11, %v8303_v50  ;;  %vm1414_vm7 = vcmp.eq.f32.partialorder %v8300_v49, 0.0  ;;  %v1415_v37 = vand.u32 2147483648, %v8300_v49 }
 0x233   : > { %vm1363_vm8 = vcmp.eq.f32.partialorder %v8303_v50, inf  ;;  %v1366_v38 = vand.u32 2147483648, %v8303_v50  ;;  %v1357_v42 = vsel %vm1356_vm4, %v8296_v45, %v1355_v40  ;;  %v1411_v43 = vmul.f32 %v6291_v28, %v8300_v49 }
 0x234   : > { %v1364_v46 = vsel %vm1363_vm8, %v8303_v50, %v1362_v19  ;;  %vm1365_vm9 = vcmp.eq.f32.partialorder %v8303_v50, 0.0  ;;  %v1435_v51 = vmul.f32 %v1353_v34, %v8175_v22  ;;  %v1409_v52 = vsel %vm1407_vm3, %v1408_v32, %v1406_v36 }
 0x235   : > { %v6295_v41 = vpop.eup %6294  ;;  %v1367_v57 = vsel %vm1365_vm9, %v1366_v38, %v1364_v46  ;;  %vm1419_vm10 = vcmp.eq.f32.partialorder %v8306_v44, inf  ;;  %vm1421_vm11 = vcmp.eq.f32.partialorder %v8306_v44, 0.0  ;;  %v1422_v61 = vand.u32 2147483648, %v8306_v44 }
 0x236   : > { %v1418_v58 = vmul.f32 %v6295_v41, %v8306_v44  ;;  %v1437_v60 = vmul.f32 %v1367_v57, %v8195_v30  ;;  %v1360_v50 = vsel %vm1358_vm5, %v1359_v33, %v1357_v42  ;;  %vm1370_vm12 = vcmp.eq.f32.partialorder %v8352_v21, inf }
 0x237   : > { %v6297_v59 = vpop.eup %6296  ;;  %v1413_v39 = vsel %vm1412_vm6, %v8300_v49, %v1411_v43  ;;  %v1373_v62 = vand.u32 2147483648, %v8352_v21  ;;  %v1443_v0 = vmul.f32 %v1409_v52, %v8178_v23  ;;  %vm1372_vm13 = vcmp.eq.f32.partialorder %v8352_v21, 0.0 }
 0x238   : > { %v1420_v22 = vsel %vm1419_vm10, %v8306_v44, %v1418_v58  ;;  %v1369_v35 = vmul.f32 %v6297_v59, %v8352_v21  ;;  %v1449_v30 = vpack.c.bf16 %v1437_v60, %v1435_v51  ;;  %v1436_v44 = vmul.f32 %v1360_v50, %v8161_v16 }
 0x239   : > { %v1423_v4 = vsel %vm1421_vm11, %v1422_v61, %v1420_v22  ;;  %v6299_v63 = vpop.eup %6298  ;;  %vm1426_vm14 = vcmp.eq.f32.partialorder %v8359_v26, inf  ;;  %v1416_v53 = vsel %vm1414_vm7, %v1415_v37, %v1413_v39  ;;  %vm1428_vm15 = vcmp.eq.f32.partialorder %v8359_v26, 0.0 }
 0x23a   : > { %v1445_v45 = vmul.f32 %v1423_v4, %v8198_v31  ;;  %v1371_v5 = vsel %vm1370_vm12, %v8352_v21, %v1369_v35  ;;  %1457 = vst [vmem:[#allocation2 + $0x10] sm:$0xff] %v1449_v30  ;;  %v1425_v1 = vmul.f32 %v6299_v63, %v8359_v26  ;;  %v1429_v31 = vand.u32 2147483648, %v8359_v26 }
 0x23b   : > { %v1374_v47 = vsel %vm1372_vm13, %v1373_v62, %v1371_v5  ;;  %v1444_v48 = vmul.f32 %v1416_v53, %v8164_v17 }
 0x23c   : > { %v1453_v2 = vpack.c.bf16 %v1445_v45, %v1443_v0  ;;  %v1438_v23 = vmul.f32 %v1374_v47, %v8181_v24  ;;  %v1427_v12 = vsel %vm1426_vm14, %v8359_v26, %v1425_v1 }
 0x23d   : > { %v1430_v13 = vsel %vm1428_vm15, %v1429_v31, %v1427_v12 }
 0x23e   : > { %1461 = vst [vmem:[#allocation2 + $0x30] sm:$0xff] %v1453_v2  ;;  %v1450_v16 = vpack.c.bf16 %v1438_v23, %v1436_v44  ;;  %v1446_v3 = vmul.f32 %v1430_v13, %v8184_v25 }
 0x240   : > { %1458 = vst [vmem:[#allocation2 + $0x18] sm:$0xff] %v1450_v16  ;;  %v1454_v14 = vpack.c.bf16 %v1446_v3, %v1444_v48 }
 0x242   : > { %1462 = vst [vmem:[#allocation2 + $0x38] sm:$0xff] %v1454_v14 }
 0x243 PF: > { %v6300_v24 = vld [vmem:[%s7927_s13 + $0x4] ss:$100 sps:$4 sm:$0xff]   ;;  %v6302_v49 = vld [vmem:[%s7927_s13 + $0xc] ss:$100 sps:$4 sm:$0xff]   ;;  %v6308_v18 = vld [vmem:[%s7927_s13 + $0xd4] ss:$100 sps:$4 sm:$0xff]  }
 0x244   : > { %3903 = vmatprep.subr.bf16.mxu0 %v6300_v24  ;;  %v6304_v17 = vld [vmem:[%s7927_s13] ss:$100 sps:$4 sm:$0xff]   ;;  %v6305_v25 = vld [vmem:[%s7927_s13 + $0x8] ss:$100 sps:$4 sm:$0xff]   ;;  %3976 = vmatprep.subr.bf16.mxu1 %v6302_v49  ;;  %v6311_v15 = vld [vmem:[%s7927_s13 + $0xd0] ss:$100 sps:$4 sm:$0xff]  }
 0x245   : > { %v6306_v54 = vld [vmem:[%s7927_s13 + $0xcc] ss:$100 sps:$4 sm:$0xff]   ;;  %3904 = vmatpush1.bf16.msra.mxu0 %v6304_v17  ;;  %3977 = vmatpush1.bf16.msra.mxu1 %v6305_v25  ;;  %v6312_v55 = vld [vmem:[%s7927_s13 + $0x194] ss:$100 sps:$4 sm:$0xff]   ;;  %v6314_v20 = vld [vmem:[%s7927_s13 + $0x19c] ss:$100 sps:$4 sm:$0xff]  }
 0x246   : > { %v6310_v9 = vld [vmem:[%s7927_s13 + $0xc8] ss:$100 sps:$4 sm:$0xff]   ;;  %3905 = vmatprep.subr.bf16.mxu0 %v6306_v54  ;;  %3978 = vmatprep.subr.bf16.mxu1 %v6308_v18  ;;  %v6316_v21 = vld [vmem:[%s7927_s13 + $0x190] ss:$100 sps:$4 sm:$0xff]   ;;  %v6317_v6 = vld [vmem:[%s7927_s13 + $0x198] ss:$100 sps:$4 sm:$0xff]  }
 0x247   : > { %v6318_v56 = vld [vmem:[%s7927_s13 + $0x25c] ss:$100 sps:$4 sm:$0xff]   ;;  %v6320_v10 = vld [vmem:[%s7927_s13 + $0x264] ss:$100 sps:$4 sm:$0xff]   ;;  %v6326_v27 = vld [vmem:[%s7927_s13 + $0x32c] ss:$100 sps:$4 sm:$0xff]  }
 0x248   : > { %v6322_v7 = vld [vmem:[%s7927_s13 + $0x258] ss:$100 sps:$4 sm:$0xff]   ;;  %v6323_v26 = vld [vmem:[%s7927_s13 + $0x260] ss:$100 sps:$4 sm:$0xff]   ;;  %v6329_v29 = vld [vmem:[%s7927_s13 + $0x328] ss:$100 sps:$4 sm:$0xff]  }
 0x249   : > { %3906 = vmatpush1.bf16.msra.mxu0 %v6310_v9  ;;  %3979 = vmatpush1.bf16.msra.mxu1 %v6311_v15  ;;  %v6324_v8 = vld [vmem:[%s7927_s13 + $0x324] ss:$100 sps:$4 sm:$0xff]   ;;  %v6330_v40 = vld [vmem:[%s7927_s13 + $0x3ec] ss:$100 sps:$4 sm:$0xff]   ;;  %v6332_v11 = vld [vmem:[%s7927_s13 + $0x3f4] ss:$100 sps:$4 sm:$0xff]  }
 0x24a   : > { %3907 = vmatprep.subr.bf16.mxu0 %v6312_v55  ;;  %3980 = vmatprep.subr.bf16.mxu1 %v6314_v20  ;;  %v6328_v28 = vld [vmem:[%s7927_s13 + $0x320] ss:$100 sps:$4 sm:$0xff]   ;;  %v6334_v32 = vld [vmem:[%s7927_s13 + $0x3e8] ss:$100 sps:$4 sm:$0xff]   ;;  %v6335_v33 = vld [vmem:[%s7927_s13 + $0x3f0] ss:$100 sps:$4 sm:$0xff]  }
 0x24b   : > { %v6336_v34 = vld [vmem:[%s7927_s13 + $0x4b4] ss:$100 sps:$4 sm:$0xff]   ;;  %v6338_v36 = vld [vmem:[%s7927_s13 + $0x4bc] ss:$100 sps:$4 sm:$0xff]   ;;  %v6344_v41 = vld [vmem:[%s7927_s13 + $0x584] ss:$100 sps:$4 sm:$0xff]  }
 0x24c   : > { %v6340_v19 = vld [vmem:[%s7927_s13 + $0x4b0] ss:$100 sps:$4 sm:$0xff]   ;;  %v6341_v37 = vld [vmem:[%s7927_s13 + $0x4b8] ss:$100 sps:$4 sm:$0xff]   ;;  %v6347_v43 = vld [vmem:[%s7927_s13 + $0x580] ss:$100 sps:$4 sm:$0xff]  }
 0x24d   : > { %3908 = vmatpush1.bf16.msra.mxu0 %v6316_v21  ;;  %3981 = vmatpush1.bf16.msra.mxu1 %v6317_v6  ;;  %v6342_v38 = vld [vmem:[%s7927_s13 + $0x57c] ss:$100 sps:$4 sm:$0xff]   ;;  %v6348_v46 = vld [vmem:[%s7927_s13 + $0x644] ss:$100 sps:$4 sm:$0xff]   ;;  %v6350_v51 = vld [vmem:[%s7927_s13 + $0x64c] ss:$100 sps:$4 sm:$0xff]  }
 0x24e   : > { %3909 = vmatprep.subr.bf16.mxu0 %v6318_v56  ;;  %3982 = vmatprep.subr.bf16.mxu1 %v6320_v10  ;;  %v6346_v42 = vld [vmem:[%s7927_s13 + $0x578] ss:$100 sps:$4 sm:$0xff]   ;;  %v6352_v52 = vld [vmem:[%s7927_s13 + $0x640] ss:$100 sps:$4 sm:$0xff]   ;;  %v6353_v57 = vld [vmem:[%s7927_s13 + $0x648] ss:$100 sps:$4 sm:$0xff]  }
 0x24f   : > { %v6354_v58 = vld [vmem:[%s7927_s13 + $0x70c] ss:$100 sps:$4 sm:$0xff]   ;;  %v6356_v59 = vld [vmem:[%s7927_s13 + $0x714] ss:$100 sps:$4 sm:$0xff]   ;;  %v6362_v22 = vld [vmem:[%s7927_s13 + $0x7dc] ss:$100 sps:$4 sm:$0xff]  }
 0x250   : > { %v6358_v60 = vld [vmem:[%s7927_s13 + $0x708] ss:$100 sps:$4 sm:$0xff]   ;;  %v6359_v61 = vld [vmem:[%s7927_s13 + $0x710] ss:$100 sps:$4 sm:$0xff]   ;;  %v6365_v39 = vld [vmem:[%s7927_s13 + $0x7d8] ss:$100 sps:$4 sm:$0xff]  }
 0x251   : > { %3910 = vmatpush1.bf16.msra.mxu0 %v6322_v7  ;;  %3983 = vmatpush1.bf16.msra.mxu1 %v6323_v26  ;;  %v6360_v50 = vld [vmem:[%s7927_s13 + $0x7d4] ss:$100 sps:$4 sm:$0xff]   ;;  %v6366_v30 = vld [vmem:[%s7927_s13 + $0x89c] ss:$100 sps:$4 sm:$0xff]   ;;  %v6368_v4 = vld [vmem:[%s7927_s13 + $0x8a4] ss:$100 sps:$4 sm:$0xff]  }
 0x252   : > { %3911 = vmatprep.subr.bf16.mxu0 %v6324_v8  ;;  %3984 = vmatprep.subr.bf16.mxu1 %v6326_v27  ;;  %v6364_v35 = vld [vmem:[%s7927_s13 + $0x7d0] ss:$100 sps:$4 sm:$0xff]   ;;  %v8463_v62 = vld [vmem:[#allocation2 + $0x8] sm:$0xff]  ;;  %v6370_v63 = vld [vmem:[%s7927_s13 + $0x898] ss:$100 sps:$4 sm:$0xff]   ;;  %s5052_s12 = smul.u32 (%p7068_p9), 25, %s6958_s19 }
 0x253   : > { %3935 = vmatprep.mubr.bf16.mxu0 %v8463_v62  ;;  %4008 = vmatprep.mubr.bf16.mxu1 %v8463_v62  ;;  %v6371_v0 = vld [vmem:[%s7927_s13 + $0x8a0] ss:$100 sps:$4 sm:$0xff]   ;;  %v6374_v5 = vld [vmem:[%s7927_s13 + $0x96c] ss:$100 sps:$4 sm:$0xff]   ;;  %v6380_v53 = vld [vmem:[%s7927_s13 + $0xa34] ss:$100 sps:$4 sm:$0xff]  }
 0x254   : > { %v6372_v45 = vld [vmem:[%s7927_s13 + $0x964] ss:$100 sps:$4 sm:$0xff]   ;;  %v6378_v1 = vld [vmem:[%s7927_s13 + $0xa2c] ss:$100 sps:$4 sm:$0xff]   ;;  %v6384_v31 = vld [vmem:[%s7927_s13 + $0xaf4] ss:$100 sps:$4 sm:$0xff]  }
 0x255   : > { %3912 = vmatpush1.bf16.msra.mxu0 %v6328_v28  ;;  %3985 = vmatpush1.bf16.msra.mxu1 %v6329_v29  ;;  %v6376_v44 = vld [vmem:[%s7927_s13 + $0x960] ss:$100 sps:$4 sm:$0xff]   ;;  %v6377_v47 = vld [vmem:[%s7927_s13 + $0x968] ss:$100 sps:$4 sm:$0xff]   ;;  %v6383_v23 = vld [vmem:[%s7927_s13 + $0xa30] ss:$100 sps:$4 sm:$0xff]  }
 0x256   : > { %3913 = vmatprep.subr.bf16.mxu0 %v6330_v40  ;;  %3986 = vmatprep.subr.bf16.mxu1 %v6332_v11  ;;  %v6382_v2 = vld [vmem:[%s7927_s13 + $0xa28] ss:$100 sps:$4 sm:$0xff]   ;;  %v6386_v12 = vld [vmem:[%s7927_s13 + $0xafc] ss:$100 sps:$4 sm:$0xff]   ;;  %v6388_v16 = vld [vmem:[%s7927_s13 + $0xaf0] ss:$100 sps:$4 sm:$0xff]  }
 0x257   : > { %v6389_v13 = vld [vmem:[%s7927_s13 + $0xaf8] ss:$100 sps:$4 sm:$0xff]   ;;  %v6392_v3 = vld [vmem:[%s7927_s13 + $0xbc4] ss:$100 sps:$4 sm:$0xff]   ;;  %v6396_v54 = vld [vmem:[%s7927_s13 + $0x10] ss:$100 sps:$4 sm:$0xff]  }
 0x258   : > { %v6390_v48 = vld [vmem:[%s7927_s13 + $0xbbc] ss:$100 sps:$4 sm:$0xff]   ;;  %v6398_v49 = vld [vmem:[%s7927_s13 + $0x14] ss:$100 sps:$4 sm:$0xff]   ;;  %v6407_v15 = vld [vmem:[%s7927_s13 + $0xe4] ss:$100 sps:$4 sm:$0xff]  }
 0x259   : > { %3914 = vmatpush1.bf16.msra.mxu0 %v6334_v32  ;;  %3987 = vmatpush1.bf16.msra.mxu1 %v6335_v33  ;;  %v6394_v14 = vld [vmem:[%s7927_s13 + $0xbb8] ss:$100 sps:$4 sm:$0xff]   ;;  %v6395_v24 = vld [vmem:[%s7927_s13 + $0xbc0] ss:$100 sps:$4 sm:$0xff]   ;;  %v6413_v6 = vld [vmem:[%s7927_s13 + $0x1ac] ss:$100 sps:$4 sm:$0xff]  }
 0x25a   : > { %3915 = vmatprep.subr.bf16.mxu0 %v6336_v34  ;;  %3988 = vmatprep.subr.bf16.mxu1 %v6338_v36  ;;  %v6401_v17 = vld [vmem:[%s7927_s13 + $0x1c] ss:$100 sps:$4 sm:$0xff]   ;;  %v6410_v21 = vld [vmem:[%s7927_s13 + $0x1a4] ss:$100 sps:$4 sm:$0xff]   ;;  %v6416_v26 = vld [vmem:[%s7927_s13 + $0x26c] ss:$100 sps:$4 sm:$0xff]  }
 0x25b   : > { %v8487_v25 = vld [vmem:[#allocation2] sm:$0xff]  ;;  %v6399_v18 = vld [vmem:[%s7927_s13 + $0x18] ss:$100 sps:$4 sm:$0xff]   ;;  %v6411_v7 = vld [vmem:[%s7927_s13 + $0x1a8] ss:$100 sps:$4 sm:$0xff]  }
 0x25c   : > { %v6404_v9 = vld [vmem:[%s7927_s13 + $0xdc] ss:$100 sps:$4 sm:$0xff]   ;;  %v8506_v8 = vld [vmem:[#allocation2 + $0x10] sm:$0xff]  ;;  %v6414_v28 = vld [vmem:[%s7927_s13 + $0x268] ss:$100 sps:$4 sm:$0xff]  }
 0x25d   : > { %3916 = vmatpush1.bf16.msra.mxu0 %v6340_v19  ;;  %3989 = vmatpush1.bf16.msra.mxu1 %v6341_v37  ;;  %v6402_v55 = vld [vmem:[%s7927_s13 + $0xd8] ss:$100 sps:$4 sm:$0xff]   ;;  %v6405_v20 = vld [vmem:[%s7927_s13 + $0xe0] ss:$100 sps:$4 sm:$0xff]   ;;  %v6417_v29 = vld [vmem:[%s7927_s13 + $0x270] ss:$100 sps:$4 sm:$0xff]  }
 0x25e   : > { %3917 = vmatprep.subr.bf16.mxu0 %v6342_v38  ;;  %3990 = vmatprep.subr.bf16.mxu1 %v6344_v41  ;;  %v6408_v56 = vld [vmem:[%s7927_s13 + $0x1a0] ss:$100 sps:$4 sm:$0xff]   ;;  %v8500_v10 = vld [vmem:[#allocation2 + $0x18] sm:$0xff]  ;;  %v8513_v40 = vld [vmem:[#allocation2 + $0x28] sm:$0xff] }
 0x25f   : > { %v6419_v27 = vld [vmem:[%s7927_s13 + $0x274] ss:$100 sps:$4 sm:$0xff]   ;;  %v6425_v32 = vld [vmem:[%s7927_s13 + $0x33c] ss:$100 sps:$4 sm:$0xff]   ;;  %v6431_v37 = vld [vmem:[%s7927_s13 + $0x404] ss:$100 sps:$4 sm:$0xff]  }
 0x260   : > { %v6422_v11 = vld [vmem:[%s7927_s13 + $0x334] ss:$100 sps:$4 sm:$0xff]   ;;  %v8521_v36 = vld [vmem:[#allocation2 + $0x20] sm:$0xff] }
 0x261   : > { %3918 = vmatpush1.bf16.msra.mxu0 %v6346_v42  ;;  %3991 = vmatpush1.bf16.msra.mxu1 %v6347_v43  ;;  %v6420_v33 = vld [vmem:[%s7927_s13 + $0x330] ss:$100 sps:$4 sm:$0xff]   ;;  %v6423_v34 = vld [vmem:[%s7927_s13 + $0x338] ss:$100 sps:$4 sm:$0xff]   ;;  %v6429_v41 = vld [vmem:[%s7927_s13 + $0x400] ss:$100 sps:$4 sm:$0xff]  }
 0x262   : > { %3919 = vmatprep.subr.bf16.mxu0 %v6348_v46  ;;  %3992 = vmatprep.subr.bf16.mxu1 %v6350_v51  ;;  %v6428_v19 = vld [vmem:[%s7927_s13 + $0x3fc] ss:$100 sps:$4 sm:$0xff]   ;;  %v6434_v43 = vld [vmem:[%s7927_s13 + $0x4c4] ss:$100 sps:$4 sm:$0xff]   ;;  %v6437_v46 = vld [vmem:[%s7927_s13 + $0x4cc] ss:$100 sps:$4 sm:$0xff]  }
 0x263   : > { %v6426_v38 = vld [vmem:[%s7927_s13 + $0x3f8] ss:$100 sps:$4 sm:$0xff]   ;;  %v6432_v51 = vld [vmem:[%s7927_s13 + $0x4c0] ss:$100 sps:$4 sm:$0xff]  }
 0x264   : > { %v8529_v42 = vld [vmem:[#allocation2 + $0x38] sm:$0xff] }
 0x265   : > { %3920 = vmatpush1.bf16.msra.mxu0 %v6352_v52  ;;  %3993 = vmatpush1.bf16.msra.mxu1 %v6353_v57  ;;  %v6435_v52 = vld [vmem:[%s7927_s13 + $0x4c8] ss:$100 sps:$4 sm:$0xff]  }
 0x266   : > { %3921 = vmatprep.subr.bf16.mxu0 %v6354_v58  ;;  %3994 = vmatprep.subr.bf16.mxu1 %v6356_v59  ;;  %v6440_v57 = vld [vmem:[%s7927_s13 + $0x58c] ss:$100 sps:$4 sm:$0xff]   ;;  %v6443_v59 = vld [vmem:[%s7927_s13 + $0x594] ss:$100 sps:$4 sm:$0xff]  }
 0x267   : > { %v8538_v58 = vld [vmem:[#allocation2 + $0x30] sm:$0xff] }
 0x269   : > { %3922 = vmatpush1.bf16.msra.mxu0 %v6358_v60  ;;  %3995 = vmatpush1.bf16.msra.mxu1 %v6359_v61  ;;  %v6438_v60 = vld [vmem:[%s7927_s13 + $0x588] ss:$100 sps:$4 sm:$0xff]   ;;  %v6441_v61 = vld [vmem:[%s7927_s13 + $0x590] ss:$100 sps:$4 sm:$0xff]  }
 0x26a   : > { %3923 = vmatprep.subr.bf16.mxu0 %v6360_v50  ;;  %3996 = vmatprep.subr.bf16.mxu1 %v6362_v22  ;;  %v6446_v50 = vld [vmem:[%s7927_s13 + $0x654] ss:$100 sps:$4 sm:$0xff]   ;;  %v6449_v22 = vld [vmem:[%s7927_s13 + $0x65c] ss:$100 sps:$4 sm:$0xff]  }
 0x26d   : > { %3924 = vmatpush1.bf16.msra.mxu0 %v6364_v35  ;;  %3997 = vmatpush1.bf16.msra.mxu1 %v6365_v39  ;;  %v6444_v35 = vld [vmem:[%s7927_s13 + $0x650] ss:$100 sps:$4 sm:$0xff]   ;;  %v6447_v39 = vld [vmem:[%s7927_s13 + $0x658] ss:$100 sps:$4 sm:$0xff]  }
 0x26e   : > { %3925 = vmatprep.subr.bf16.mxu0 %v6366_v30  ;;  %3998 = vmatprep.subr.bf16.mxu1 %v6368_v4  ;;  %v6452_v30 = vld [vmem:[%s7927_s13 + $0x71c] ss:$100 sps:$4 sm:$0xff]   ;;  %v6455_v4 = vld [vmem:[%s7927_s13 + $0x724] ss:$100 sps:$4 sm:$0xff]  }
 0x271   : > { %3926 = vmatpush1.bf16.msra.mxu0 %v6370_v63  ;;  %3999 = vmatpush1.bf16.msra.mxu1 %v6371_v0  ;;  %v6450_v63 = vld [vmem:[%s7927_s13 + $0x718] ss:$100 sps:$4 sm:$0xff]   ;;  %v6453_v0 = vld [vmem:[%s7927_s13 + $0x720] ss:$100 sps:$4 sm:$0xff]  }
 0x272   : > { %3927 = vmatprep.subr.bf16.mxu0 %v6372_v45  ;;  %4000 = vmatprep.subr.bf16.mxu1 %v6374_v5  ;;  %v6458_v45 = vld [vmem:[%s7927_s13 + $0x7e4] ss:$100 sps:$4 sm:$0xff]   ;;  %v6461_v5 = vld [vmem:[%s7927_s13 + $0x7ec] ss:$100 sps:$4 sm:$0xff]  }
 0x275   : > { %3928 = vmatpush1.bf16.msra.mxu0 %v6376_v44  ;;  %4001 = vmatpush1.bf16.msra.mxu1 %v6377_v47  ;;  %v6456_v44 = vld [vmem:[%s7927_s13 + $0x7e0] ss:$100 sps:$4 sm:$0xff]   ;;  %v6459_v47 = vld [vmem:[%s7927_s13 + $0x7e8] ss:$100 sps:$4 sm:$0xff]  }
 0x276   : > { %3929 = vmatprep.subr.bf16.mxu0 %v6378_v1  ;;  %4002 = vmatprep.subr.bf16.mxu1 %v6380_v53  ;;  %v6464_v1 = vld [vmem:[%s7927_s13 + $0x8ac] ss:$100 sps:$4 sm:$0xff]   ;;  %v6467_v53 = vld [vmem:[%s7927_s13 + $0x8b4] ss:$100 sps:$4 sm:$0xff]  }
 0x279   : > { %3930 = vmatpush1.bf16.msra.mxu0 %v6382_v2  ;;  %4003 = vmatpush1.bf16.msra.mxu1 %v6383_v23  ;;  %v6462_v2 = vld [vmem:[%s7927_s13 + $0x8a8] ss:$100 sps:$4 sm:$0xff]   ;;  %v6465_v23 = vld [vmem:[%s7927_s13 + $0x8b0] ss:$100 sps:$4 sm:$0xff]  }
 0x27a   : > { %3931 = vmatprep.subr.bf16.mxu0 %v6384_v31  ;;  %4004 = vmatprep.subr.bf16.mxu1 %v6386_v12  ;;  %v6470_v31 = vld [vmem:[%s7927_s13 + $0x974] ss:$100 sps:$4 sm:$0xff]   ;;  %v6473_v12 = vld [vmem:[%s7927_s13 + $0x97c] ss:$100 sps:$4 sm:$0xff]  }
 0x27d   : > { %3932 = vmatpush1.bf16.msra.mxu0 %v6388_v16  ;;  %4005 = vmatpush1.bf16.msra.mxu1 %v6389_v13  ;;  %v6468_v16 = vld [vmem:[%s7927_s13 + $0x970] ss:$100 sps:$4 sm:$0xff]   ;;  %v6471_v13 = vld [vmem:[%s7927_s13 + $0x978] ss:$100 sps:$4 sm:$0xff]  }
 0x27e   : > { %3933 = vmatprep.subr.bf16.mxu0 %v6390_v48  ;;  %4006 = vmatprep.subr.bf16.mxu1 %v6392_v3  ;;  %v6476_v48 = vld [vmem:[%s7927_s13 + $0xa3c] ss:$100 sps:$4 sm:$0xff]   ;;  %v6479_v3 = vld [vmem:[%s7927_s13 + $0xa44] ss:$100 sps:$4 sm:$0xff]  }
 0x281   : > { %3934 = vmatpush1.bf16.msra.mxu0 %v6394_v14  ;;  %4007 = vmatpush1.bf16.msra.mxu1 %v6395_v24  ;;  %v6474_v14 = vld [vmem:[%s7927_s13 + $0xa38] ss:$100 sps:$4 sm:$0xff]   ;;  %v6477_v24 = vld [vmem:[%s7927_s13 + $0xa40] ss:$100 sps:$4 sm:$0xff]  }
 0x282   : > { %4049 = vmatprep.subr.bf16.mxu0 %v6398_v49  ;;  %4122 = vmatprep.subr.bf16.mxu1 %v6401_v17  ;;  %v6482_v49 = vld [vmem:[%s7927_s13 + $0xb04] ss:$100 sps:$4 sm:$0xff]   ;;  %v6485_v17 = vld [vmem:[%s7927_s13 + $0xb0c] ss:$100 sps:$4 sm:$0xff]  }
 0x284   : > { %3936 = vmatmul.mubr.bf16.vlgmr.msra.gmra.mrb[0].mxu0 %v8487_v25  ;;  %4009 = vmatmul.mubr.bf16.vlgmr.msra.gmra.mrb[0].mxu1 %v8487_v25 }
 0x285   : > { %4050 = vmatpush1.bf16.msra.mxu0 %v6396_v54  ;;  %4123 = vmatpush1.bf16.msra.mxu1 %v6399_v18  ;;  %v6480_v54 = vld [vmem:[%s7927_s13 + $0xb00] ss:$100 sps:$4 sm:$0xff]   ;;  %v6483_v18 = vld [vmem:[%s7927_s13 + $0xb08] ss:$100 sps:$4 sm:$0xff]  }
 0x286   : > { %4051 = vmatprep.subr.bf16.mxu0 %v6404_v9  ;;  %4124 = vmatprep.subr.bf16.mxu1 %v6407_v15  ;;  %v6488_v9 = vld [vmem:[%s7927_s13 + $0xbcc] ss:$100 sps:$4 sm:$0xff]   ;;  %v6491_v15 = vld [vmem:[%s7927_s13 + $0xbd4] ss:$100 sps:$4 sm:$0xff]  }
 0x287   : > { %3945 = vmatprep.mubr.bf16.mxu0 %v8500_v10  ;;  %4018 = vmatprep.mubr.bf16.mxu1 %v8500_v10 }
 0x289   : > { %4052 = vmatpush1.bf16.msra.mxu0 %v6402_v55  ;;  %4125 = vmatpush1.bf16.msra.mxu1 %v6405_v20  ;;  %v6486_v55 = vld [vmem:[%s7927_s13 + $0xbc8] ss:$100 sps:$4 sm:$0xff]   ;;  %v6489_v20 = vld [vmem:[%s7927_s13 + $0xbd0] ss:$100 sps:$4 sm:$0xff]  }
 0x28a   : > { %4053 = vmatprep.subr.bf16.mxu0 %v6410_v21  ;;  %4126 = vmatprep.subr.bf16.mxu1 %v6413_v6  ;;  %v6494_v21 = vld [vmem:[%s7927_s13 + $0x24] ss:$100 sps:$4 sm:$0xff]   ;;  %v6497_v6 = vld [vmem:[%s7927_s13 + $0x2c] ss:$100 sps:$4 sm:$0xff]  }
 0x28c   : > { %3946 = vmatmul.mubr.bf16.gmra.mrb[4].mxu0 %v8506_v8  ;;  %4019 = vmatmul.mubr.bf16.gmra.mrb[4].mxu1 %v8506_v8 }
 0x28d   : > { %4054 = vmatpush1.bf16.msra.mxu0 %v6408_v56  ;;  %4127 = vmatpush1.bf16.msra.mxu1 %v6411_v7  ;;  %v6492_v56 = vld [vmem:[%s7927_s13 + $0x20] ss:$100 sps:$4 sm:$0xff]   ;;  %v6495_v7 = vld [vmem:[%s7927_s13 + $0x28] ss:$100 sps:$4 sm:$0xff]  }
 0x28e   : > { %4055 = vmatprep.subr.bf16.mxu0 %v6416_v26  ;;  %4128 = vmatprep.subr.bf16.mxu1 %v6419_v27  ;;  %v6500_v26 = vld [vmem:[%s7927_s13 + $0xec] ss:$100 sps:$4 sm:$0xff]   ;;  %v6503_v27 = vld [vmem:[%s7927_s13 + $0xf4] ss:$100 sps:$4 sm:$0xff]  }
 0x28f   : > { %3955 = vmatprep.mubr.bf16.mxu0 %v8513_v40  ;;  %4028 = vmatprep.mubr.bf16.mxu1 %v8513_v40 }
 0x291   : > { %4056 = vmatpush1.bf16.msra.mxu0 %v6414_v28  ;;  %4129 = vmatpush1.bf16.msra.mxu1 %v6417_v29  ;;  %v6498_v28 = vld [vmem:[%s7927_s13 + $0xe8] ss:$100 sps:$4 sm:$0xff]   ;;  %v6501_v29 = vld [vmem:[%s7927_s13 + $0xf0] ss:$100 sps:$4 sm:$0xff]  }
 0x292   : > { %4057 = vmatprep.subr.bf16.mxu0 %v6422_v11  ;;  %4130 = vmatprep.subr.bf16.mxu1 %v6425_v32  ;;  %v6506_v11 = vld [vmem:[%s7927_s13 + $0x1b4] ss:$100 sps:$4 sm:$0xff]   ;;  %v6509_v32 = vld [vmem:[%s7927_s13 + $0x1bc] ss:$100 sps:$4 sm:$0xff]  }
 0x294   : > { %3956 = vmatmul.mubr.bf16.gmra.mrb[8].mxu0 %v8521_v36  ;;  %4029 = vmatmul.mubr.bf16.gmra.mrb[8].mxu1 %v8521_v36 }
 0x295   : > { %4058 = vmatpush1.bf16.msra.mxu0 %v6420_v33  ;;  %4131 = vmatpush1.bf16.msra.mxu1 %v6423_v34  ;;  %v6504_v33 = vld [vmem:[%s7927_s13 + $0x1b0] ss:$100 sps:$4 sm:$0xff]   ;;  %v6507_v34 = vld [vmem:[%s7927_s13 + $0x1b8] ss:$100 sps:$4 sm:$0xff]  }
 0x296   : > { %4059 = vmatprep.subr.bf16.mxu0 %v6428_v19  ;;  %4132 = vmatprep.subr.bf16.mxu1 %v6431_v37  ;;  %v6512_v19 = vld [vmem:[%s7927_s13 + $0x27c] ss:$100 sps:$4 sm:$0xff]   ;;  %v6515_v37 = vld [vmem:[%s7927_s13 + $0x284] ss:$100 sps:$4 sm:$0xff]  }
 0x297   : > { %3965 = vmatprep.mubr.bf16.mxu0 %v8529_v42  ;;  %4038 = vmatprep.mubr.bf16.mxu1 %v8529_v42 }
 0x299   : > { %4060 = vmatpush1.bf16.msra.mxu0 %v6426_v38  ;;  %4133 = vmatpush1.bf16.msra.mxu1 %v6429_v41  ;;  %v6510_v38 = vld [vmem:[%s7927_s13 + $0x278] ss:$100 sps:$4 sm:$0xff]   ;;  %v6513_v41 = vld [vmem:[%s7927_s13 + $0x280] ss:$100 sps:$4 sm:$0xff]  }
 0x29a   : > { %4061 = vmatprep.subr.bf16.mxu0 %v6434_v43  ;;  %4134 = vmatprep.subr.bf16.mxu1 %v6437_v46  ;;  %v6518_v43 = vld [vmem:[%s7927_s13 + $0x344] ss:$100 sps:$4 sm:$0xff]   ;;  %v6521_v46 = vld [vmem:[%s7927_s13 + $0x34c] ss:$100 sps:$4 sm:$0xff]  }
 0x29c   : > { %3966 = vmatmul.mubr.bf16.gmra.mrb[12].mxu0 %v8538_v58  ;;  %4039 = vmatmul.mubr.bf16.gmra.mrb[12].mxu1 %v8538_v58 }
 0x29d   : > { %4062 = vmatpush1.bf16.msra.mxu0 %v6432_v51  ;;  %4135 = vmatpush1.bf16.msra.mxu1 %v6435_v52  ;;  %v6516_v51 = vld [vmem:[%s7927_s13 + $0x340] ss:$100 sps:$4 sm:$0xff]   ;;  %v6519_v52 = vld [vmem:[%s7927_s13 + $0x348] ss:$100 sps:$4 sm:$0xff]  }
 0x29e   : > { %4063 = vmatprep.subr.bf16.mxu0 %v6440_v57  ;;  %4136 = vmatprep.subr.bf16.mxu1 %v6443_v59  ;;  %v6524_v57 = vld [vmem:[%s7927_s13 + $0x40c] ss:$100 sps:$4 sm:$0xff]   ;;  %v6527_v59 = vld [vmem:[%s7927_s13 + $0x414] ss:$100 sps:$4 sm:$0xff]  }
 0x29f   : > { %4081 = vmatprep.mubr.bf16.mxu0 %v8463_v62  ;;  %4154 = vmatprep.mubr.bf16.mxu1 %v8463_v62 }
 0x2a1   : > { %4064 = vmatpush1.bf16.msra.mxu0 %v6438_v60  ;;  %4137 = vmatpush1.bf16.msra.mxu1 %v6441_v61  ;;  %v6522_v60 = vld [vmem:[%s7927_s13 + $0x408] ss:$100 sps:$4 sm:$0xff]   ;;  %v6525_v61 = vld [vmem:[%s7927_s13 + $0x410] ss:$100 sps:$4 sm:$0xff]  }
 0x2a2   : > { %4065 = vmatprep.subr.bf16.mxu0 %v6446_v50  ;;  %4138 = vmatprep.subr.bf16.mxu1 %v6449_v22  ;;  %v6530_v50 = vld [vmem:[%s7927_s13 + $0x4d4] ss:$100 sps:$4 sm:$0xff]   ;;  %v6533_v22 = vld [vmem:[%s7927_s13 + $0x4dc] ss:$100 sps:$4 sm:$0xff]  }
 0x2a5   : > { %4066 = vmatpush1.bf16.msra.mxu0 %v6444_v35  ;;  %4139 = vmatpush1.bf16.msra.mxu1 %v6447_v39  ;;  %v6528_v35 = vld [vmem:[%s7927_s13 + $0x4d0] ss:$100 sps:$4 sm:$0xff]   ;;  %v6531_v39 = vld [vmem:[%s7927_s13 + $0x4d8] ss:$100 sps:$4 sm:$0xff]  }
 0x2a6   : > { %4067 = vmatprep.subr.bf16.mxu0 %v6452_v30  ;;  %4140 = vmatprep.subr.bf16.mxu1 %v6455_v4  ;;  %v6536_v30 = vld [vmem:[%s7927_s13 + $0x59c] ss:$100 sps:$4 sm:$0xff]   ;;  %v6539_v4 = vld [vmem:[%s7927_s13 + $0x5a4] ss:$100 sps:$4 sm:$0xff]  }
 0x2a9   : > { %4068 = vmatpush1.bf16.msra.mxu0 %v6450_v63  ;;  %4141 = vmatpush1.bf16.msra.mxu1 %v6453_v0  ;;  %v6534_v63 = vld [vmem:[%s7927_s13 + $0x598] ss:$100 sps:$4 sm:$0xff]   ;;  %v6537_v0 = vld [vmem:[%s7927_s13 + $0x5a0] ss:$100 sps:$4 sm:$0xff]  }
 0x2aa   : > { %4069 = vmatprep.subr.bf16.mxu0 %v6458_v45  ;;  %4142 = vmatprep.subr.bf16.mxu1 %v6461_v5  ;;  %v6542_v45 = vld [vmem:[%s7927_s13 + $0x664] ss:$100 sps:$4 sm:$0xff]   ;;  %v6545_v5 = vld [vmem:[%s7927_s13 + $0x66c] ss:$100 sps:$4 sm:$0xff]  }
 0x2ad   : > { %4070 = vmatpush1.bf16.msra.mxu0 %v6456_v44  ;;  %4143 = vmatpush1.bf16.msra.mxu1 %v6459_v47  ;;  %v6540_v44 = vld [vmem:[%s7927_s13 + $0x660] ss:$100 sps:$4 sm:$0xff]   ;;  %v6543_v47 = vld [vmem:[%s7927_s13 + $0x668] ss:$100 sps:$4 sm:$0xff]  }
 0x2ae   : > { %4071 = vmatprep.subr.bf16.mxu0 %v6464_v1  ;;  %4144 = vmatprep.subr.bf16.mxu1 %v6467_v53  ;;  %v6548_v1 = vld [vmem:[%s7927_s13 + $0x72c] ss:$100 sps:$4 sm:$0xff]   ;;  %v6551_v53 = vld [vmem:[%s7927_s13 + $0x734] ss:$100 sps:$4 sm:$0xff]  }
 0x2b1   : > { %4072 = vmatpush1.bf16.msra.mxu0 %v6462_v2  ;;  %4145 = vmatpush1.bf16.msra.mxu1 %v6465_v23  ;;  %v6546_v2 = vld [vmem:[%s7927_s13 + $0x728] ss:$100 sps:$4 sm:$0xff]   ;;  %v6549_v23 = vld [vmem:[%s7927_s13 + $0x730] ss:$100 sps:$4 sm:$0xff]  }
 0x2b2   : > { %4073 = vmatprep.subr.bf16.mxu0 %v6470_v31  ;;  %4146 = vmatprep.subr.bf16.mxu1 %v6473_v12  ;;  %v6557_v31 = vld [vmem:[%s7927_s13 + $0x7fc] ss:$100 sps:$4 sm:$0xff]   ;;  %v6552_v12 = vld [vmem:[%s7927_s13 + $0x7f0] ss:$100 sps:$4 sm:$0xff]  }
 0x2b5   : > { %4074 = vmatpush1.bf16.msra.mxu0 %v6468_v16  ;;  %4147 = vmatpush1.bf16.msra.mxu1 %v6471_v13  ;;  %v6555_v16 = vld [vmem:[%s7927_s13 + $0x7f8] ss:$100 sps:$4 sm:$0xff]  }
 0x2b6   : > { %4075 = vmatprep.subr.bf16.mxu0 %v6476_v48  ;;  %4148 = vmatprep.subr.bf16.mxu1 %v6479_v3  ;;  %v6560_v13 = vld [vmem:[%s7927_s13 + $0x8bc] ss:$100 sps:$4 sm:$0xff]   ;;  %v6563_v48 = vld [vmem:[%s7927_s13 + $0x8c4] ss:$100 sps:$4 sm:$0xff]  }
 0x2b7   : > { %v6558_v3 = vld [vmem:[%s7927_s13 + $0x8b8] ss:$100 sps:$4 sm:$0xff]  }
 0x2b9   : > { %4076 = vmatpush1.bf16.msra.mxu0 %v6474_v14  ;;  %4149 = vmatpush1.bf16.msra.mxu1 %v6477_v24  ;;  %v6561_v14 = vld [vmem:[%s7927_s13 + $0x8c0] ss:$100 sps:$4 sm:$0xff]  }
 0x2ba   : > { %4077 = vmatprep.subr.bf16.mxu0 %v6482_v49  ;;  %4150 = vmatprep.subr.bf16.mxu1 %v6485_v17  ;;  %v6566_v24 = vld [vmem:[%s7927_s13 + $0x984] ss:$100 sps:$4 sm:$0xff]   ;;  %v6569_v49 = vld [vmem:[%s7927_s13 + $0x98c] ss:$100 sps:$4 sm:$0xff]  }
 0x2bb   : > { %v6564_v17 = vld [vmem:[%s7927_s13 + $0x980] ss:$100 sps:$4 sm:$0xff]  }
 0x2bd   : > { %4078 = vmatpush1.bf16.msra.mxu0 %v6480_v54  ;;  %4151 = vmatpush1.bf16.msra.mxu1 %v6483_v18  ;;  %v6567_v54 = vld [vmem:[%s7927_s13 + $0x988] ss:$100 sps:$4 sm:$0xff]  }
 0x2be   : > { %4079 = vmatprep.subr.bf16.mxu0 %v6488_v9  ;;  %4152 = vmatprep.subr.bf16.mxu1 %v6491_v15  ;;  %v6572_v18 = vld [vmem:[%s7927_s13 + $0xa4c] ss:$100 sps:$4 sm:$0xff]   ;;  %v6575_v9 = vld [vmem:[%s7927_s13 + $0xa54] ss:$100 sps:$4 sm:$0xff]  }
 0x2bf   : > { %v6570_v15 = vld [vmem:[%s7927_s13 + $0xa48] ss:$100 sps:$4 sm:$0xff]  }
 0x2c1   : > { %4080 = vmatpush1.bf16.msra.mxu0 %v6486_v55  ;;  %4153 = vmatpush1.bf16.msra.mxu1 %v6489_v20  ;;  %v6573_v55 = vld [vmem:[%s7927_s13 + $0xa50] ss:$100 sps:$4 sm:$0xff]  }
 0x2c2   : > { %4195 = vmatprep.subr.bf16.mxu0 %v6494_v21  ;;  %4268 = vmatprep.subr.bf16.mxu1 %v6497_v6  ;;  %v6578_v20 = vld [vmem:[%s7927_s13 + $0xb14] ss:$100 sps:$4 sm:$0xff]   ;;  %v6581_v21 = vld [vmem:[%s7927_s13 + $0xb1c] ss:$100 sps:$4 sm:$0xff]  }
 0x2c3   : > { %v6576_v6 = vld [vmem:[%s7927_s13 + $0xb10] ss:$100 sps:$4 sm:$0xff]  }
 0x2c4   : > { %4082 = vmatmul.mubr.bf16.vlgmr.msra.gmra.mrb[16].mxu0 %v8487_v25  ;;  %4155 = vmatmul.mubr.bf16.vlgmr.msra.gmra.mrb[16].mxu1 %v8487_v25 }
 0x2c5   : > { %4196 = vmatpush1.bf16.msra.mxu0 %v6492_v56  ;;  %4269 = vmatpush1.bf16.msra.mxu1 %v6495_v7  ;;  %v6579_v56 = vld [vmem:[%s7927_s13 + $0xb18] ss:$100 sps:$4 sm:$0xff]  }
 0x2c6   : > { %4197 = vmatprep.subr.bf16.mxu0 %v6500_v26  ;;  %4270 = vmatprep.subr.bf16.mxu1 %v6503_v27  ;;  %v6584_v7 = vld [vmem:[%s7927_s13 + $0xbdc] ss:$100 sps:$4 sm:$0xff]   ;;  %v6587_v26 = vld [vmem:[%s7927_s13 + $0xbe4] ss:$100 sps:$4 sm:$0xff]  }
 0x2c7   : > { %4091 = vmatprep.mubr.bf16.mxu0 %v8500_v10  ;;  %4164 = vmatprep.mubr.bf16.mxu1 %v8500_v10  ;;  %v6582_v27 = vld [vmem:[%s7927_s13 + $0xbd8] ss:$100 sps:$4 sm:$0xff]  }
 0x2c9   : > { %4198 = vmatpush1.bf16.msra.mxu0 %v6498_v28  ;;  %4271 = vmatpush1.bf16.msra.mxu1 %v6501_v29  ;;  %v6585_v28 = vld [vmem:[%s7927_s13 + $0xbe0] ss:$100 sps:$4 sm:$0xff]   ;;  %v6590_v29 = vld [vmem:[%s7927_s13 + $0x34] ss:$100 sps:$4 sm:$0xff]  }
 0x2ca   : > { %4199 = vmatprep.subr.bf16.mxu0 %v6506_v11  ;;  %4272 = vmatprep.subr.bf16.mxu1 %v6509_v32  ;;  %v6593_v11 = vld [vmem:[%s7927_s13 + $0x3c] ss:$100 sps:$4 sm:$0xff]   ;;  %v6588_v32 = vld [vmem:[%s7927_s13 + $0x30] ss:$100 sps:$4 sm:$0xff]  }
 0x2cc   : > { %4092 = vmatmul.mubr.bf16.gmra.mrb[20].mxu0 %v8506_v8  ;;  %4165 = vmatmul.mubr.bf16.gmra.mrb[20].mxu1 %v8506_v8 }
 0x2cd   : > { %4200 = vmatpush1.bf16.msra.mxu0 %v6504_v33  ;;  %4273 = vmatpush1.bf16.msra.mxu1 %v6507_v34  ;;  %v6591_v33 = vld [vmem:[%s7927_s13 + $0x38] ss:$100 sps:$4 sm:$0xff]  }
 0x2ce   : > { %4201 = vmatprep.subr.bf16.mxu0 %v6512_v19  ;;  %4274 = vmatprep.subr.bf16.mxu1 %v6515_v37  ;;  %v6596_v34 = vld [vmem:[%s7927_s13 + $0xfc] ss:$100 sps:$4 sm:$0xff]   ;;  %v6599_v19 = vld [vmem:[%s7927_s13 + $0x104] ss:$100 sps:$4 sm:$0xff]  }
 0x2cf   : > { %4101 = vmatprep.mubr.bf16.mxu0 %v8513_v40  ;;  %4174 = vmatprep.mubr.bf16.mxu1 %v8513_v40  ;;  %v6594_v37 = vld [vmem:[%s7927_s13 + $0xf8] ss:$100 sps:$4 sm:$0xff]  }
 0x2d1   : > { %4202 = vmatpush1.bf16.msra.mxu0 %v6510_v38  ;;  %4275 = vmatpush1.bf16.msra.mxu1 %v6513_v41  ;;  %v6597_v38 = vld [vmem:[%s7927_s13 + $0x100] ss:$100 sps:$4 sm:$0xff]  }
 0x2d2   : > { %4203 = vmatprep.subr.bf16.mxu0 %v6518_v43  ;;  %4276 = vmatprep.subr.bf16.mxu1 %v6521_v46  ;;  %v6602_v41 = vld [vmem:[%s7927_s13 + $0x1c4] ss:$100 sps:$4 sm:$0xff]   ;;  %v6605_v43 = vld [vmem:[%s7927_s13 + $0x1cc] ss:$100 sps:$4 sm:$0xff]  }
 0x2d3   : > { %v6600_v46 = vld [vmem:[%s7927_s13 + $0x1c0] ss:$100 sps:$4 sm:$0xff]  }
 0x2d4   : > { %4102 = vmatmul.mubr.bf16.gmra.mrb[24].mxu0 %v8521_v36  ;;  %4175 = vmatmul.mubr.bf16.gmra.mrb[24].mxu1 %v8521_v36 }
 0x2d5   : > { %4204 = vmatpush1.bf16.msra.mxu0 %v6516_v51  ;;  %4277 = vmatpush1.bf16.msra.mxu1 %v6519_v52  ;;  %v6603_v51 = vld [vmem:[%s7927_s13 + $0x1c8] ss:$100 sps:$4 sm:$0xff]   ;;  %v6611_v52 = vld [vmem:[%s7927_s13 + $0x294] ss:$100 sps:$4 sm:$0xff]  }
 0x2d6   : > { %4205 = vmatprep.subr.bf16.mxu0 %v6524_v57  ;;  %4278 = vmatprep.subr.bf16.mxu1 %v6527_v59  ;;  %v6606_v57 = vld [vmem:[%s7927_s13 + $0x288] ss:$100 sps:$4 sm:$0xff]   ;;  %v6609_v59 = vld [vmem:[%s7927_s13 + $0x290] ss:$100 sps:$4 sm:$0xff]  }
 0x2d7   : > { %4111 = vmatprep.mubr.bf16.mxu0 %v8529_v42  ;;  %4184 = vmatprep.mubr.bf16.mxu1 %v8529_v42 }
 0x2d9   : > { %4206 = vmatpush1.bf16.msra.mxu0 %v6522_v60  ;;  %4279 = vmatpush1.bf16.msra.mxu1 %v6525_v61  ;;  %v6617_v60 = vld [vmem:[%s7927_s13 + $0x35c] ss:$100 sps:$4 sm:$0xff]   ;;  %v6612_v61 = vld [vmem:[%s7927_s13 + $0x350] ss:$100 sps:$4 sm:$0xff]  }
 0x2da   : > { %4207 = vmatprep.subr.bf16.mxu0 %v6530_v50  ;;  %4280 = vmatprep.subr.bf16.mxu1 %v6533_v22  ;;  %v6615_v50 = vld [vmem:[%s7927_s13 + $0x358] ss:$100 sps:$4 sm:$0xff]   ;;  %v6623_v22 = vld [vmem:[%s7927_s13 + $0x424] ss:$100 sps:$4 sm:$0xff]  }
 0x2dc   : > { %4112 = vmatmul.mubr.bf16.gmra.mrb[28].mxu0 %v8538_v58  ;;  %4185 = vmatmul.mubr.bf16.gmra.mrb[28].mxu1 %v8538_v58 }
 0x2dd   : > { %4208 = vmatpush1.bf16.msra.mxu0 %v6528_v35  ;;  %4281 = vmatpush1.bf16.msra.mxu1 %v6531_v39  ;;  %v6618_v35 = vld [vmem:[%s7927_s13 + $0x418] ss:$100 sps:$4 sm:$0xff]   ;;  %v6621_v39 = vld [vmem:[%s7927_s13 + $0x420] ss:$100 sps:$4 sm:$0xff]  }
 0x2de   : > { %4209 = vmatprep.subr.bf16.mxu0 %v6536_v30  ;;  %4282 = vmatprep.subr.bf16.mxu1 %v6539_v4  ;;  %v6629_v30 = vld [vmem:[%s7927_s13 + $0x4ec] ss:$100 sps:$4 sm:$0xff]   ;;  %v6624_v4 = vld [vmem:[%s7927_s13 + $0x4e0] ss:$100 sps:$4 sm:$0xff]  }
 0x2df   : > { %4227 = vmatprep.mubr.bf16.mxu0 %v8463_v62  ;;  %4300 = vmatprep.mubr.bf16.mxu1 %v8463_v62  ;;  %v6554_v62 = vld [vmem:[%s7927_s13 + $0x7f4] ss:$100 sps:$4 sm:$0xff]  }
 0x2e1   : > { %4210 = vmatpush1.bf16.msra.mxu0 %v6534_v63  ;;  %4283 = vmatpush1.bf16.msra.mxu1 %v6537_v0  ;;  %v6627_v63 = vld [vmem:[%s7927_s13 + $0x4e8] ss:$100 sps:$4 sm:$0xff]   ;;  %v6635_v0 = vld [vmem:[%s7927_s13 + $0x5b4] ss:$100 sps:$4 sm:$0xff]  }
 0x2e2   : > { %4211 = vmatprep.subr.bf16.mxu0 %v6542_v45  ;;  %4284 = vmatprep.subr.bf16.mxu1 %v6545_v5  ;;  %v6630_v45 = vld [vmem:[%s7927_s13 + $0x5a8] ss:$100 sps:$4 sm:$0xff]   ;;  %v6633_v5 = vld [vmem:[%s7927_s13 + $0x5b0] ss:$100 sps:$4 sm:$0xff]  }
 0x2e5   : > { %4212 = vmatpush1.bf16.msra.mxu0 %v6540_v44  ;;  %4285 = vmatpush1.bf16.msra.mxu1 %v6543_v47  ;;  %v6641_v44 = vld [vmem:[%s7927_s13 + $0x67c] ss:$100 sps:$4 sm:$0xff]   ;;  %v8707_v47 = vld [vmem:[#allocation2 + $0x8] sm:$0xff] }
 0x2e6   : > { %4213 = vmatprep.subr.bf16.mxu0 %v6548_v1  ;;  %4286 = vmatprep.subr.bf16.mxu1 %v6551_v53  ;;  %v6636_v1 = vld [vmem:[%s7927_s13 + $0x670] ss:$100 sps:$4 sm:$0xff]   ;;  %v6644_v53 = vld [vmem:[%s7927_s13 + $0x73c] ss:$100 sps:$4 sm:$0xff]  }
 0x2e9   : > { %4214 = vmatpush1.bf16.msra.mxu0 %v6546_v2  ;;  %4287 = vmatpush1.bf16.msra.mxu1 %v6549_v23  ;;  %v6647_v2 = vld [vmem:[%s7927_s13 + $0x744] ss:$100 sps:$4 sm:$0xff]   ;;  %v6642_v23 = vld [vmem:[%s7927_s13 + $0x738] ss:$100 sps:$4 sm:$0xff]  }
 0x2ea   : > { %4215 = vmatprep.subr.bf16.mxu0 %v6554_v62  ;;  %4288 = vmatprep.subr.bf16.mxu1 %v6557_v31  ;;  %v6645_v62 = vld [vmem:[%s7927_s13 + $0x740] ss:$100 sps:$4 sm:$0xff]  }
 0x2eb   : > { %v6650_v31 = vld [vmem:[%s7927_s13 + $0x804] ss:$100 sps:$4 sm:$0xff]  }
 0x2ed   : > { %4216 = vmatpush1.bf16.msra.mxu0 %v6552_v12  ;;  %4289 = vmatpush1.bf16.msra.mxu1 %v6555_v16  ;;  %v6653_v12 = vld [vmem:[%s7927_s13 + $0x80c] ss:$100 sps:$4 sm:$0xff]   ;;  %v6648_v16 = vld [vmem:[%s7927_s13 + $0x800] ss:$100 sps:$4 sm:$0xff]  }
 0x2ee   : > { %4217 = vmatprep.subr.bf16.mxu0 %v6560_v13  ;;  %4290 = vmatprep.subr.bf16.mxu1 %v6563_v48  ;;  %v6651_v13 = vld [vmem:[%s7927_s13 + $0x808] ss:$100 sps:$4 sm:$0xff]  }
 0x2ef   : > { %v6656_v48 = vld [vmem:[%s7927_s13 + $0x8cc] ss:$100 sps:$4 sm:$0xff]  }
 0x2f1   : > { %4218 = vmatpush1.bf16.msra.mxu0 %v6558_v3  ;;  %4291 = vmatpush1.bf16.msra.mxu1 %v6561_v14  ;;  %v6659_v3 = vld [vmem:[%s7927_s13 + $0x8d4] ss:$100 sps:$4 sm:$0xff]   ;;  %v6654_v14 = vld [vmem:[%s7927_s13 + $0x8c8] ss:$100 sps:$4 sm:$0xff]  }
 0x2f2   : > { %4219 = vmatprep.subr.bf16.mxu0 %v6566_v24  ;;  %4292 = vmatprep.subr.bf16.mxu1 %v6569_v49  ;;  %v6657_v24 = vld [vmem:[%s7927_s13 + $0x8d0] ss:$100 sps:$4 sm:$0xff]  }
 0x2f3   : > { %v6662_v49 = vld [vmem:[%s7927_s13 + $0x994] ss:$100 sps:$4 sm:$0xff]  }
 0x2f5   : > { %4220 = vmatpush1.bf16.msra.mxu0 %v6564_v17  ;;  %4293 = vmatpush1.bf16.msra.mxu1 %v6567_v54  ;;  %v6665_v17 = vld [vmem:[%s7927_s13 + $0x99c] ss:$100 sps:$4 sm:$0xff]   ;;  %v6660_v54 = vld [vmem:[%s7927_s13 + $0x990] ss:$100 sps:$4 sm:$0xff]  }
 0x2f6   : > { %4221 = vmatprep.subr.bf16.mxu0 %v6572_v18  ;;  %4294 = vmatprep.subr.bf16.mxu1 %v6575_v9  ;;  %v6663_v18 = vld [vmem:[%s7927_s13 + $0x998] ss:$100 sps:$4 sm:$0xff]  }
 0x2f7   : > { %v6668_v9 = vld [vmem:[%s7927_s13 + $0xa5c] ss:$100 sps:$4 sm:$0xff]  }
 0x2f9   : > { %4222 = vmatpush1.bf16.msra.mxu0 %v6570_v15  ;;  %4295 = vmatpush1.bf16.msra.mxu1 %v6573_v55  ;;  %v6671_v15 = vld [vmem:[%s7927_s13 + $0xa64] ss:$100 sps:$4 sm:$0xff]   ;;  %v6666_v55 = vld [vmem:[%s7927_s13 + $0xa58] ss:$100 sps:$4 sm:$0xff]  }
 0x2fa   : > { %4223 = vmatprep.subr.bf16.mxu0 %v6578_v20  ;;  %4296 = vmatprep.subr.bf16.mxu1 %v6581_v21  ;;  %v6669_v20 = vld [vmem:[%s7927_s13 + $0xa60] ss:$100 sps:$4 sm:$0xff]  }
 0x2fb   : > { %v6674_v21 = vld [vmem:[%s7927_s13 + $0xb24] ss:$100 sps:$4 sm:$0xff]  }
 0x2fd   : > { %4224 = vmatpush1.bf16.msra.mxu0 %v6576_v6  ;;  %4297 = vmatpush1.bf16.msra.mxu1 %v6579_v56  ;;  %v6677_v6 = vld [vmem:[%s7927_s13 + $0xb2c] ss:$100 sps:$4 sm:$0xff]   ;;  %v6672_v56 = vld [vmem:[%s7927_s13 + $0xb20] ss:$100 sps:$4 sm:$0xff]  }
 0x2fe   : > { %4225 = vmatprep.subr.bf16.mxu0 %v6584_v7  ;;  %4298 = vmatprep.subr.bf16.mxu1 %v6587_v26  ;;  %v6675_v7 = vld [vmem:[%s7927_s13 + $0xb28] ss:$100 sps:$4 sm:$0xff]  }
 0x2ff   : > { %v6680_v26 = vld [vmem:[%s7927_s13 + $0xbec] ss:$100 sps:$4 sm:$0xff]  }
 0x301   : > { %4226 = vmatpush1.bf16.msra.mxu0 %v6582_v27  ;;  %4299 = vmatpush1.bf16.msra.mxu1 %v6585_v28  ;;  %v6683_v27 = vld [vmem:[%s7927_s13 + $0xbf4] ss:$100 sps:$4 sm:$0xff]   ;;  %v6678_v28 = vld [vmem:[%s7927_s13 + $0xbe8] ss:$100 sps:$4 sm:$0xff]  }
 0x302   : > { %4341 = vmatprep.subr.bf16.mxu0 %v6590_v29  ;;  %4414 = vmatprep.subr.bf16.mxu1 %v6593_v11  ;;  %v6681_v29 = vld [vmem:[%s7927_s13 + $0xbf0] ss:$100 sps:$4 sm:$0xff]   ;;  %v6686_v11 = vld [vmem:[%s7927_s13 + $0x44] ss:$100 sps:$4 sm:$0xff]  }
 0x304   : > { %4228 = vmatmul.mubr.bf16.vlgmr.msra.gmra.mrb[32].mxu0 %v8487_v25  ;;  %4301 = vmatmul.mubr.bf16.vlgmr.msra.gmra.mrb[32].mxu1 %v8487_v25  ;;  %v6608_v25 = vld [vmem:[%s7927_s13 + $0x28c] ss:$100 sps:$4 sm:$0xff]  }
 0x305   : > { %4342 = vmatpush1.bf16.msra.mxu0 %v6588_v32  ;;  %4415 = vmatpush1.bf16.msra.mxu1 %v6591_v33  ;;  %v6689_v32 = vld [vmem:[%s7927_s13 + $0x4c] ss:$100 sps:$4 sm:$0xff]   ;;  %v6684_v33 = vld [vmem:[%s7927_s13 + $0x40] ss:$100 sps:$4 sm:$0xff]  }
 0x306   : > { %4343 = vmatprep.subr.bf16.mxu0 %v6596_v34  ;;  %4416 = vmatprep.subr.bf16.mxu1 %v6599_v19  ;;  %v6687_v34 = vld [vmem:[%s7927_s13 + $0x48] ss:$100 sps:$4 sm:$0xff]  }
 0x307   : > { %4237 = vmatprep.mubr.bf16.mxu0 %v8500_v10  ;;  %4310 = vmatprep.mubr.bf16.mxu1 %v8500_v10  ;;  %v6614_v10 = vld [vmem:[%s7927_s13 + $0x354] ss:$100 sps:$4 sm:$0xff]   ;;  %v6692_v19 = vld [vmem:[%s7927_s13 + $0x10c] ss:$100 sps:$4 sm:$0xff]  }
 0x309   : > { %4344 = vmatpush1.bf16.msra.mxu0 %v6594_v37  ;;  %4417 = vmatpush1.bf16.msra.mxu1 %v6597_v38  ;;  %v6695_v37 = vld [vmem:[%s7927_s13 + $0x114] ss:$100 sps:$4 sm:$0xff]   ;;  %v6690_v38 = vld [vmem:[%s7927_s13 + $0x108] ss:$100 sps:$4 sm:$0xff]  }
 0x30a   : > { %4345 = vmatprep.subr.bf16.mxu0 %v6602_v41  ;;  %4418 = vmatprep.subr.bf16.mxu1 %v6605_v43  ;;  %v8748_v41 = vld [vmem:[#allocation2] sm:$0xff]  ;;  %v6693_v43 = vld [vmem:[%s7927_s13 + $0x110] ss:$100 sps:$4 sm:$0xff]  }
 0x30c   : > { %4238 = vmatmul.mubr.bf16.gmra.mrb[36].mxu0 %v8506_v8  ;;  %4311 = vmatmul.mubr.bf16.gmra.mrb[36].mxu1 %v8506_v8  ;;  %v6620_v8 = vld [vmem:[%s7927_s13 + $0x41c] ss:$100 sps:$4 sm:$0xff]  }
 0x30d   : > { %4346 = vmatpush1.bf16.msra.mxu0 %v6600_v46  ;;  %4419 = vmatpush1.bf16.msra.mxu1 %v6603_v51  ;;  %v6698_v46 = vld [vmem:[%s7927_s13 + $0x1d4] ss:$100 sps:$4 sm:$0xff]   ;;  %v6701_v51 = vld [vmem:[%s7927_s13 + $0x1dc] ss:$100 sps:$4 sm:$0xff]  }
 0x30e   : > { %4347 = vmatprep.subr.bf16.mxu0 %v6608_v25  ;;  %4420 = vmatprep.subr.bf16.mxu1 %v6611_v52  ;;  %v6696_v25 = vld [vmem:[%s7927_s13 + $0x1d0] ss:$100 sps:$4 sm:$0xff]   ;;  %v6699_v52 = vld [vmem:[%s7927_s13 + $0x1d8] ss:$100 sps:$4 sm:$0xff]  }
 0x30f   : > { %4247 = vmatprep.mubr.bf16.mxu0 %v8513_v40  ;;  %4320 = vmatprep.mubr.bf16.mxu1 %v8513_v40  ;;  %v6626_v40 = vld [vmem:[%s7927_s13 + $0x4e4] ss:$100 sps:$4 sm:$0xff]  }
 0x311   : > { %4348 = vmatpush1.bf16.msra.mxu0 %v6606_v57  ;;  %4421 = vmatpush1.bf16.msra.mxu1 %v6609_v59  ;;  %v8757_v57 = vld [vmem:[#allocation2 + $0x18] sm:$0xff] }
 0x312   : > { %4349 = vmatprep.subr.bf16.mxu0 %v6614_v10  ;;  %4422 = vmatprep.subr.bf16.mxu1 %v6617_v60  ;;  %v6704_v59 = vld [vmem:[%s7927_s13 + $0x29c] ss:$100 sps:$4 sm:$0xff]   ;;  %v6707_v10 = vld [vmem:[%s7927_s13 + $0x2a4] ss:$100 sps:$4 sm:$0xff]  }
 0x313   : > { %v6702_v60 = vld [vmem:[%s7927_s13 + $0x298] ss:$100 sps:$4 sm:$0xff]  }
 0x314   : > { %4248 = vmatmul.mubr.bf16.gmra.mrb[40].mxu0 %v8521_v36  ;;  %4321 = vmatmul.mubr.bf16.gmra.mrb[40].mxu1 %v8521_v36  ;;  %v6632_v36 = vld [vmem:[%s7927_s13 + $0x5ac] ss:$100 sps:$4 sm:$0xff]  }
 0x315   : > { %4350 = vmatpush1.bf16.msra.mxu0 %v6612_v61  ;;  %4423 = vmatpush1.bf16.msra.mxu1 %v6615_v50  ;;  %v6705_v61 = vld [vmem:[%s7927_s13 + $0x2a0] ss:$100 sps:$4 sm:$0xff]   ;;  %v8765_v50 = vld [vmem:[#allocation2 + $0x10] sm:$0xff] }
 0x316   : > { %4351 = vmatprep.subr.bf16.mxu0 %v6620_v8  ;;  %4424 = vmatprep.subr.bf16.mxu1 %v6623_v22  ;;  %v6710_v8 = vld [vmem:[%s7927_s13 + $0x364] ss:$100 sps:$4 sm:$0xff]   ;;  %v6713_v22 = vld [vmem:[%s7927_s13 + $0x36c] ss:$100 sps:$4 sm:$0xff]  }
 0x317   : > { %4257 = vmatprep.mubr.bf16.mxu0 %v8529_v42  ;;  %4330 = vmatprep.mubr.bf16.mxu1 %v8529_v42  ;;  %v6638_v42 = vld [vmem:[%s7927_s13 + $0x674] ss:$100 sps:$4 sm:$0xff]  }
 0x319   : > { %4352 = vmatpush1.bf16.msra.mxu0 %v6618_v35  ;;  %4425 = vmatpush1.bf16.msra.mxu1 %v6621_v39  ;;  %v8771_v35 = vld [vmem:[#allocation2 + $0x28] sm:$0xff]  ;;  %v6708_v39 = vld [vmem:[%s7927_s13 + $0x360] ss:$100 sps:$4 sm:$0xff]  }
 0x31a   : > { %4353 = vmatprep.subr.bf16.mxu0 %v6626_v40  ;;  %4426 = vmatprep.subr.bf16.mxu1 %v6629_v30  ;;  %v6711_v40 = vld [vmem:[%s7927_s13 + $0x368] ss:$100 sps:$4 sm:$0xff]  }
 0x31b   : > { %v6716_v30 = vld [vmem:[%s7927_s13 + $0x42c] ss:$100 sps:$4 sm:$0xff]  }
 0x31c   : > { %4258 = vmatmul.mubr.bf16.gmra.mrb[44].mxu0 %v8538_v58  ;;  %4331 = vmatmul.mubr.bf16.gmra.mrb[44].mxu1 %v8538_v58  ;;  %v6639_v58 = vld [vmem:[%s7927_s13 + $0x678] ss:$100 sps:$4 sm:$0xff]  }
 0x31d   : > { %4354 = vmatpush1.bf16.msra.mxu0 %v6624_v4  ;;  %4427 = vmatpush1.bf16.msra.mxu1 %v6627_v63  ;;  %v6719_v4 = vld [vmem:[%s7927_s13 + $0x434] ss:$100 sps:$4 sm:$0xff]   ;;  %v8779_v63 = vld [vmem:[#allocation2 + $0x20] sm:$0xff] }
 0x31e   : > { %4355 = vmatprep.subr.bf16.mxu0 %v6632_v36  ;;  %4428 = vmatprep.subr.bf16.mxu1 %v6635_v0  ;;  %v6714_v36 = vld [vmem:[%s7927_s13 + $0x428] ss:$100 sps:$4 sm:$0xff]   ;;  %v6717_v0 = vld [vmem:[%s7927_s13 + $0x430] ss:$100 sps:$4 sm:$0xff]  }
 0x31f   : > { %4373 = vmatprep.mubr.bf16.mxu0 %v8707_v47  ;;  %4446 = vmatprep.mubr.bf16.mxu1 %v8707_v47 }
 0x321   : > { %4356 = vmatpush1.bf16.msra.mxu0 %v6630_v45  ;;  %4429 = vmatpush1.bf16.msra.mxu1 %v6633_v5  ;;  %v6722_v45 = vld [vmem:[%s7927_s13 + $0x4f4] ss:$100 sps:$4 sm:$0xff]   ;;  %v6725_v5 = vld [vmem:[%s7927_s13 + $0x4fc] ss:$100 sps:$4 sm:$0xff]  }
 0x322   : > { %4357 = vmatprep.subr.bf16.mxu0 %v6638_v42  ;;  %4430 = vmatprep.subr.bf16.mxu1 %v6641_v44 }
 0x325   : > { %4358 = vmatpush1.bf16.msra.mxu0 %v6636_v1  ;;  %4431 = vmatpush1.bf16.msra.mxu1 %v6639_v58  ;;  %v8787_v1 = vld [vmem:[#allocation2 + $0x38] sm:$0xff] }
 0x326   : > { %4359 = vmatprep.subr.bf16.mxu0 %v6644_v53  ;;  %4432 = vmatprep.subr.bf16.mxu1 %v6647_v2 }
 0x329   : > { %4360 = vmatpush1.bf16.msra.mxu0 %v6642_v23  ;;  %4433 = vmatpush1.bf16.msra.mxu1 %v6645_v62  ;;  %v6720_v62 = vld [vmem:[%s7927_s13 + $0x4f0] ss:$100 sps:$4 sm:$0xff]  }
 0x32a   : > { %4361 = vmatprep.subr.bf16.mxu0 %v6650_v31  ;;  %4434 = vmatprep.subr.bf16.mxu1 %v6653_v12  ;;  %v6723_v31 = vld [vmem:[%s7927_s13 + $0x4f8] ss:$100 sps:$4 sm:$0xff]  }
 0x32d   : > { %4362 = vmatpush1.bf16.msra.mxu0 %v6648_v16  ;;  %4435 = vmatpush1.bf16.msra.mxu1 %v6651_v13  ;;  %v6728_v13 = vld [vmem:[%s7927_s13 + $0x5bc] ss:$100 sps:$4 sm:$0xff]  }
 0x32e   : > { %4363 = vmatprep.subr.bf16.mxu0 %v6656_v48  ;;  %4436 = vmatprep.subr.bf16.mxu1 %v6659_v3  ;;  %v6731_v48 = vld [vmem:[%s7927_s13 + $0x5c4] ss:$100 sps:$4 sm:$0xff]   ;;  %v8803_v3 = vld [vmem:[#allocation2 + $0x30] sm:$0xff] }
 0x331   : > { %4364 = vmatpush1.bf16.msra.mxu0 %v6654_v14  ;;  %4437 = vmatpush1.bf16.msra.mxu1 %v6657_v24  ;;  %v6726_v14 = vld [vmem:[%s7927_s13 + $0x5b8] ss:$100 sps:$4 sm:$0xff]   ;;  %v6729_v24 = vld [vmem:[%s7927_s13 + $0x5c0] ss:$100 sps:$4 sm:$0xff]  }
 0x332   : > { %4365 = vmatprep.subr.bf16.mxu0 %v6662_v49  ;;  %4438 = vmatprep.subr.bf16.mxu1 %v6665_v17  ;;  %v6734_v49 = vld [vmem:[%s7927_s13 + $0x684] ss:$100 sps:$4 sm:$0xff]   ;;  %v6737_v17 = vld [vmem:[%s7927_s13 + $0x68c] ss:$100 sps:$4 sm:$0xff]  }
 0x335   : > { %4366 = vmatpush1.bf16.msra.mxu0 %v6660_v54  ;;  %4439 = vmatpush1.bf16.msra.mxu1 %v6663_v18 }
 0x336   : > { %4367 = vmatprep.subr.bf16.mxu0 %v6668_v9  ;;  %4440 = vmatprep.subr.bf16.mxu1 %v6671_v15 }
 0x339   : > { %4368 = vmatpush1.bf16.msra.mxu0 %v6666_v55  ;;  %4441 = vmatpush1.bf16.msra.mxu1 %v6669_v20  ;;  %v6732_v55 = vld [vmem:[%s7927_s13 + $0x680] ss:$100 sps:$4 sm:$0xff]   ;;  %v6735_v20 = vld [vmem:[%s7927_s13 + $0x688] ss:$100 sps:$4 sm:$0xff]  }
 0x33a   : > { %4369 = vmatprep.subr.bf16.mxu0 %v6674_v21  ;;  %4442 = vmatprep.subr.bf16.mxu1 %v6677_v6 }
 0x33d   : > { %4370 = vmatpush1.bf16.msra.mxu0 %v6672_v56  ;;  %4443 = vmatpush1.bf16.msra.mxu1 %v6675_v7  ;;  %v6740_v56 = vld [vmem:[%s7927_s13 + $0x74c] ss:$100 sps:$4 sm:$0xff]   ;;  %v6743_v7 = vld [vmem:[%s7927_s13 + $0x754] ss:$100 sps:$4 sm:$0xff]  }
 0x33e   : > { %4371 = vmatprep.subr.bf16.mxu0 %v6680_v26  ;;  %4444 = vmatprep.subr.bf16.mxu1 %v6683_v27 }
 0x341   : > { %4372 = vmatpush1.bf16.msra.mxu0 %v6678_v28  ;;  %4445 = vmatpush1.bf16.msra.mxu1 %v6681_v29  ;;  %v6738_v28 = vld [vmem:[%s7927_s13 + $0x748] ss:$100 sps:$4 sm:$0xff]   ;;  %v6741_v29 = vld [vmem:[%s7927_s13 + $0x750] ss:$100 sps:$4 sm:$0xff]  }
 0x342   : > { %4487 = vmatprep.subr.bf16.mxu0 %v6686_v11  ;;  %4560 = vmatprep.subr.bf16.mxu1 %v6689_v32  ;;  %v6746_v11 = vld [vmem:[%s7927_s13 + $0x814] ss:$100 sps:$4 sm:$0xff]   ;;  %v6749_v32 = vld [vmem:[%s7927_s13 + $0x81c] ss:$100 sps:$4 sm:$0xff]  }
 0x344   : > { %4374 = vmatmul.mubr.bf16.vlgmr.msra.gmra.mrb[48].mxu0 %v8748_v41  ;;  %4447 = vmatmul.mubr.bf16.vlgmr.msra.gmra.mrb[48].mxu1 %v8748_v41 }
 0x345   : > { %4488 = vmatpush1.bf16.msra.mxu0 %v6684_v33  ;;  %4561 = vmatpush1.bf16.msra.mxu1 %v6687_v34 }
 0x346   : > { %4489 = vmatprep.subr.bf16.mxu0 %v6692_v19  ;;  %4562 = vmatprep.subr.bf16.mxu1 %v6695_v37 }
 0x347   : > { %4383 = vmatprep.mubr.bf16.mxu0 %v8757_v57  ;;  %4456 = vmatprep.mubr.bf16.mxu1 %v8757_v57 }
 0x349   : > { %4490 = vmatpush1.bf16.msra.mxu0 %v6690_v38  ;;  %4563 = vmatpush1.bf16.msra.mxu1 %v6693_v43  ;;  %v6744_v38 = vld [vmem:[%s7927_s13 + $0x810] ss:$100 sps:$4 sm:$0xff]   ;;  %v6747_v43 = vld [vmem:[%s7927_s13 + $0x818] ss:$100 sps:$4 sm:$0xff]  }
 0x34a   : > { %4491 = vmatprep.subr.bf16.mxu0 %v6698_v46  ;;  %4564 = vmatprep.subr.bf16.mxu1 %v6701_v51 }
 0x34c   : > { %4384 = vmatmul.mubr.bf16.gmra.mrb[52].mxu0 %v8765_v50  ;;  %4457 = vmatmul.mubr.bf16.gmra.mrb[52].mxu1 %v8765_v50 }
 0x34d   : > { %4492 = vmatpush1.bf16.msra.mxu0 %v6696_v25  ;;  %4565 = vmatpush1.bf16.msra.mxu1 %v6699_v52  ;;  %v6752_v25 = vld [vmem:[%s7927_s13 + $0x8dc] ss:$100 sps:$4 sm:$0xff]   ;;  %v6755_v52 = vld [vmem:[%s7927_s13 + $0x8e4] ss:$100 sps:$4 sm:$0xff]  }
 0x34e   : > { %4493 = vmatprep.subr.bf16.mxu0 %v6704_v59  ;;  %4566 = vmatprep.subr.bf16.mxu1 %v6707_v10 }
 0x34f   : > { %4393 = vmatprep.mubr.bf16.mxu0 %v8771_v35  ;;  %4466 = vmatprep.mubr.bf16.mxu1 %v8771_v35 }
 0x351   : > { %4494 = vmatpush1.bf16.msra.mxu0 %v6702_v60  ;;  %4567 = vmatpush1.bf16.msra.mxu1 %v6705_v61  ;;  %v6750_v60 = vld [vmem:[%s7927_s13 + $0x8d8] ss:$100 sps:$4 sm:$0xff]   ;;  %v6753_v61 = vld [vmem:[%s7927_s13 + $0x8e0] ss:$100 sps:$4 sm:$0xff]  }
 0x352   : > { %4495 = vmatprep.subr.bf16.mxu0 %v6710_v8  ;;  %4568 = vmatprep.subr.bf16.mxu1 %v6713_v22  ;;  %v6758_v8 = vld [vmem:[%s7927_s13 + $0x9a4] ss:$100 sps:$4 sm:$0xff]   ;;  %v6761_v22 = vld [vmem:[%s7927_s13 + $0x9ac] ss:$100 sps:$4 sm:$0xff]  }
 0x354   : > { %4394 = vmatmul.mubr.bf16.gmra.mrb[56].mxu0 %v8779_v63  ;;  %4467 = vmatmul.mubr.bf16.gmra.mrb[56].mxu1 %v8779_v63 }
 0x355   : > { %4496 = vmatpush1.bf16.msra.mxu0 %v6708_v39  ;;  %4569 = vmatpush1.bf16.msra.mxu1 %v6711_v40 }
 0x356   : > { %4497 = vmatprep.subr.bf16.mxu0 %v6716_v30  ;;  %4570 = vmatprep.subr.bf16.mxu1 %v6719_v4 }
 0x357   : > { %v3937_v42 = vpop.f32.mrb[0].mxu0  ;;  %v4010_v44 = vpop.f32.mrb[0].mxu1  ;;  %4403 = vmatprep.mubr.bf16.mxu0 %v8787_v1  ;;  %4476 = vmatprep.mubr.bf16.mxu1 %v8787_v1 }
 0x358   : > { %4844 = vst [vmem:[%s7929_s14] sm:$0xff] %v3937_v42  ;;  %4846 = vst [vmem:[%s7929_s14 + $0x10] sm:$0xff] %v4010_v44  ;;  %v3939_v58 = vpop.f32.mrb[1].mxu0  ;;  %v4012_v53 = vpop.f32.mrb[1].mxu1  ;;  %v6764_v42 = vld [vmem:[%s7927_s13 + $0xa6c] ss:$100 sps:$4 sm:$0xff]  }
 0x359   : > { %4845 = vst [vmem:[%s7929_s14 + $0x8] sm:$0xff] %v3939_v58  ;;  %4847 = vst [vmem:[%s7929_s14 + $0x18] sm:$0xff] %v4012_v53  ;;  %v3941_v2 = vpop.f32.mrb[2].mxu0  ;;  %v4014_v23 = vpop.f32.mrb[2].mxu1  ;;  %4498 = vmatpush1.bf16.msra.mxu0 %v6714_v36  ;;  %4571 = vmatpush1.bf16.msra.mxu1 %v6717_v0  ;;  %v6756_v36 = vld [vmem:[%s7927_s13 + $0x9a0] ss:$100 sps:$4 sm:$0xff]  }
 0x35a   : > { %4869 = vst [vmem:[%s7929_s14 + $0xc8] sm:$0xff] %v3941_v2  ;;  %4871 = vst [vmem:[%s7929_s14 + $0xd8] sm:$0xff] %v4014_v23  ;;  %v3943_v12 = vpop.f32.mrb[3].mxu0  ;;  %v4016_v16 = vpop.f32.mrb[3].mxu1  ;;  %4499 = vmatprep.subr.bf16.mxu0 %v6722_v45  ;;  %4572 = vmatprep.subr.bf16.mxu1 %v6725_v5  ;;  %v6759_v0 = vld [vmem:[%s7927_s13 + $0x9a8] ss:$100 sps:$4 sm:$0xff]  }
 0x35b   : > { %4870 = vst [vmem:[%s7929_s14 + $0xd0] sm:$0xff] %v3943_v12  ;;  %4872 = vst [vmem:[%s7929_s14 + $0xe0] sm:$0xff] %v4016_v16  ;;  %v6767_v44 = vld [vmem:[%s7927_s13 + $0xa74] ss:$100 sps:$4 sm:$0xff]   ;;  %v6762_v2 = vld [vmem:[%s7927_s13 + $0xa68] ss:$100 sps:$4 sm:$0xff]  }
 0x35c   : > { %4404 = vmatmul.mubr.bf16.gmra.mrb[60].mxu0 %v8803_v3  ;;  %4477 = vmatmul.mubr.bf16.gmra.mrb[60].mxu1 %v8803_v3  ;;  %v6765_v23 = vld [vmem:[%s7927_s13 + $0xa70] ss:$100 sps:$4 sm:$0xff]   ;;  %v6771_v16 = vld [vmem:[%s7927_s13 + $0xb38] ss:$100 sps:$4 sm:$0xff]  }
 0x35d   : > { %4500 = vmatpush1.bf16.msra.mxu0 %v6720_v62  ;;  %4573 = vmatpush1.bf16.msra.mxu1 %v6723_v31  ;;  %v6770_v62 = vld [vmem:[%s7927_s13 + $0xb34] ss:$100 sps:$4 sm:$0xff]   ;;  %v6773_v31 = vld [vmem:[%s7927_s13 + $0xb3c] ss:$100 sps:$4 sm:$0xff]  }
 0x35e   : > { %4501 = vmatprep.subr.bf16.mxu0 %v6728_v13  ;;  %4574 = vmatprep.subr.bf16.mxu1 %v6731_v48  ;;  %v6768_v12 = vld [vmem:[%s7927_s13 + $0xb30] ss:$100 sps:$4 sm:$0xff]   ;;  %v6776_v13 = vld [vmem:[%s7927_s13 + $0xbfc] ss:$100 sps:$4 sm:$0xff]   ;;  %v6779_v48 = vld [vmem:[%s7927_s13 + $0xc04] ss:$100 sps:$4 sm:$0xff]  }
 0x35f   : > { %v3947_v54 = vpop.f32.mrb[4].mxu0  ;;  %v4020_v18 = vpop.f32.mrb[4].mxu1  ;;  %4519 = vmatprep.mubr.bf16.mxu0 %v8707_v47  ;;  %4592 = vmatprep.mubr.bf16.mxu1 %v8707_v47 }
 0x360   : > { %4894 = vst [vmem:[%s7929_s14 + $0x190] sm:$0xff] %v3947_v54  ;;  %4896 = vst [vmem:[%s7929_s14 + $0x1a0] sm:$0xff] %v4020_v18  ;;  %v3949_v9 = vpop.f32.mrb[5].mxu0  ;;  %v4022_v15 = vpop.f32.mrb[5].mxu1  ;;  %v6780_v54 = vld [vmem:[%s7927_s13 + $0x50] ss:$100 sps:$4 sm:$0xff]  }
 0x361   : > { %4502 = vmatpush1.bf16.msra.mxu0 %v6726_v14  ;;  %4575 = vmatpush1.bf16.msra.mxu1 %v6729_v24  ;;  %4895 = vst [vmem:[%s7929_s14 + $0x198] sm:$0xff] %v3949_v9  ;;  %4897 = vst [vmem:[%s7929_s14 + $0x1a8] sm:$0xff] %v4022_v15  ;;  %v3951_v21 = vpop.f32.mrb[6].mxu0  ;;  %v4024_v6 = vpop.f32.mrb[6].mxu1  ;;  %v6774_v14 = vld [vmem:[%s7927_s13 + $0xbf8] ss:$100 sps:$4 sm:$0xff]  }
 0x362   : > { %4503 = vmatprep.subr.bf16.mxu0 %v6734_v49  ;;  %4576 = vmatprep.subr.bf16.mxu1 %v6737_v17  ;;  %4919 = vst [vmem:[%s7929_s14 + $0x258] sm:$0xff] %v3951_v21  ;;  %4921 = vst [vmem:[%s7929_s14 + $0x268] sm:$0xff] %v4024_v6  ;;  %v3953_v26 = vpop.f32.mrb[7].mxu0  ;;  %v4026_v27 = vpop.f32.mrb[7].mxu1  ;;  %v6777_v24 = vld [vmem:[%s7927_s13 + $0xc00] ss:$100 sps:$4 sm:$0xff]  }
 0x363   : > { %4920 = vst [vmem:[%s7929_s14 + $0x260] sm:$0xff] %v3953_v26  ;;  %4922 = vst [vmem:[%s7929_s14 + $0x270] sm:$0xff] %v4026_v27  ;;  %v6782_v49 = vld [vmem:[%s7927_s13 + $0x54] ss:$100 sps:$4 sm:$0xff]   ;;  %v6785_v17 = vld [vmem:[%s7927_s13 + $0x5c] ss:$100 sps:$4 sm:$0xff]  }
 0x364   : > { %v6783_v18 = vld [vmem:[%s7927_s13 + $0x58] ss:$100 sps:$4 sm:$0xff]   ;;  %v6791_v15 = vld [vmem:[%s7927_s13 + $0x124] ss:$100 sps:$4 sm:$0xff]   ;;  %v6797_v6 = vld [vmem:[%s7927_s13 + $0x1ec] ss:$100 sps:$4 sm:$0xff]  }
 0x365   : > { %4504 = vmatpush1.bf16.msra.mxu0 %v6732_v55  ;;  %4577 = vmatpush1.bf16.msra.mxu1 %v6735_v20  ;;  %v6788_v9 = vld [vmem:[%s7927_s13 + $0x11c] ss:$100 sps:$4 sm:$0xff]   ;;  %v6794_v21 = vld [vmem:[%s7927_s13 + $0x1e4] ss:$100 sps:$4 sm:$0xff]   ;;  %v6800_v26 = vld [vmem:[%s7927_s13 + $0x2ac] ss:$100 sps:$4 sm:$0xff]  }
 0x366   : > { %4505 = vmatprep.subr.bf16.mxu0 %v6740_v56  ;;  %4578 = vmatprep.subr.bf16.mxu1 %v6743_v7  ;;  %v6786_v55 = vld [vmem:[%s7927_s13 + $0x118] ss:$100 sps:$4 sm:$0xff]   ;;  %v6789_v20 = vld [vmem:[%s7927_s13 + $0x120] ss:$100 sps:$4 sm:$0xff]   ;;  %v6795_v7 = vld [vmem:[%s7927_s13 + $0x1e8] ss:$100 sps:$4 sm:$0xff]  }
 0x367   : > { %v3957_v33 = vpop.f32.mrb[8].mxu0  ;;  %v4030_v34 = vpop.f32.mrb[8].mxu1  ;;  %v6792_v56 = vld [vmem:[%s7927_s13 + $0x1e0] ss:$100 sps:$4 sm:$0xff]   ;;  %v6803_v27 = vld [vmem:[%s7927_s13 + $0x2b4] ss:$100 sps:$4 sm:$0xff]  }
 0x368   : > { %4944 = vst [vmem:[%s7929_s14 + $0x320] sm:$0xff] %v3957_v33  ;;  %4946 = vst [vmem:[%s7929_s14 + $0x330] sm:$0xff] %v4030_v34  ;;  %v3959_v19 = vpop.f32.mrb[9].mxu0  ;;  %v4032_v37 = vpop.f32.mrb[9].mxu1  ;;  %v6804_v33 = vld [vmem:[%s7927_s13 + $0x370] ss:$100 sps:$4 sm:$0xff]  }
 0x369   : > { %4506 = vmatpush1.bf16.msra.mxu0 %v6738_v28  ;;  %4579 = vmatpush1.bf16.msra.mxu1 %v6741_v29  ;;  %4945 = vst [vmem:[%s7929_s14 + $0x328] sm:$0xff] %v3959_v19  ;;  %4947 = vst [vmem:[%s7929_s14 + $0x338] sm:$0xff] %v4032_v37  ;;  %v3961_v46 = vpop.f32.mrb[10].mxu0  ;;  %v4034_v51 = vpop.f32.mrb[10].mxu1  ;;  %v6798_v28 = vld [vmem:[%s7927_s13 + $0x2a8] ss:$100 sps:$4 sm:$0xff]  }
 0x36a   : > { %4507 = vmatprep.subr.bf16.mxu0 %v6746_v11  ;;  %4580 = vmatprep.subr.bf16.mxu1 %v6749_v32  ;;  %4969 = vst [vmem:[%s7929_s14 + $0x3e8] sm:$0xff] %v3961_v46  ;;  %4971 = vst [vmem:[%s7929_s14 + $0x3f8] sm:$0xff] %v4034_v51  ;;  %v3963_v59 = vpop.f32.mrb[11].mxu0  ;;  %v4036_v10 = vpop.f32.mrb[11].mxu1  ;;  %v6801_v29 = vld [vmem:[%s7927_s13 + $0x2b0] ss:$100 sps:$4 sm:$0xff]  }
 0x36b   : > { %4970 = vst [vmem:[%s7929_s14 + $0x3f0] sm:$0xff] %v3963_v59  ;;  %4972 = vst [vmem:[%s7929_s14 + $0x400] sm:$0xff] %v4036_v10  ;;  %v6806_v11 = vld [vmem:[%s7927_s13 + $0x374] ss:$100 sps:$4 sm:$0xff]   ;;  %v6809_v32 = vld [vmem:[%s7927_s13 + $0x37c] ss:$100 sps:$4 sm:$0xff]  }
 0x36c   : > { %v6807_v34 = vld [vmem:[%s7927_s13 + $0x378] ss:$100 sps:$4 sm:$0xff]   ;;  %v6815_v37 = vld [vmem:[%s7927_s13 + $0x444] ss:$100 sps:$4 sm:$0xff]   ;;  %v6821_v51 = vld [vmem:[%s7927_s13 + $0x50c] ss:$100 sps:$4 sm:$0xff]  }
 0x36d   : > { %4508 = vmatpush1.bf16.msra.mxu0 %v6744_v38  ;;  %4581 = vmatpush1.bf16.msra.mxu1 %v6747_v43  ;;  %v6812_v19 = vld [vmem:[%s7927_s13 + $0x43c] ss:$100 sps:$4 sm:$0xff]   ;;  %v6818_v46 = vld [vmem:[%s7927_s13 + $0x504] ss:$100 sps:$4 sm:$0xff]  }
 0x36e   : > { %4509 = vmatprep.subr.bf16.mxu0 %v6752_v25  ;;  %4582 = vmatprep.subr.bf16.mxu1 %v6755_v52  ;;  %v6810_v38 = vld [vmem:[%s7927_s13 + $0x438] ss:$100 sps:$4 sm:$0xff]   ;;  %v6813_v43 = vld [vmem:[%s7927_s13 + $0x440] ss:$100 sps:$4 sm:$0xff]  }
 0x36f   : > { %v3967_v39 = vpop.f32.mrb[12].mxu0  ;;  %v4040_v40 = vpop.f32.mrb[12].mxu1 }
 0x370   : > { %4994 = vst [vmem:[%s7929_s14 + $0x4b0] sm:$0xff] %v3967_v39  ;;  %4996 = vst [vmem:[%s7929_s14 + $0x4c0] sm:$0xff] %v4040_v40  ;;  %v3969_v30 = vpop.f32.mrb[13].mxu0  ;;  %v4042_v4 = vpop.f32.mrb[13].mxu1 }
 0x371   : > { %4510 = vmatpush1.bf16.msra.mxu0 %v6750_v60  ;;  %4583 = vmatpush1.bf16.msra.mxu1 %v6753_v61  ;;  %4995 = vst [vmem:[%s7929_s14 + $0x4b8] sm:$0xff] %v3969_v30  ;;  %4997 = vst [vmem:[%s7929_s14 + $0x4c8] sm:$0xff] %v4042_v4  ;;  %v3971_v45 = vpop.f32.mrb[14].mxu0  ;;  %v4044_v5 = vpop.f32.mrb[14].mxu1  ;;  %v6824_v30 = vld [vmem:[%s7927_s13 + $0x5cc] ss:$100 sps:$4 sm:$0xff]  }
 0x372   : > { %4511 = vmatprep.subr.bf16.mxu0 %v6758_v8  ;;  %4584 = vmatprep.subr.bf16.mxu1 %v6761_v22  ;;  %5019 = vst [vmem:[%s7929_s14 + $0x578] sm:$0xff] %v3971_v45  ;;  %5021 = vst [vmem:[%s7929_s14 + $0x588] sm:$0xff] %v4044_v5  ;;  %v3973_v58 = vpop.f32.mrb[15].mxu0  ;;  %v4046_v53 = vpop.f32.mrb[15].mxu1  ;;  %v6816_v8 = vld [vmem:[%s7927_s13 + $0x500] ss:$100 sps:$4 sm:$0xff]  }
 0x373   : > { %5020 = vst [vmem:[%s7929_s14 + $0x580] sm:$0xff] %v3973_v58  ;;  %5022 = vst [vmem:[%s7929_s14 + $0x590] sm:$0xff] %v4046_v53  ;;  %v6819_v22 = vld [vmem:[%s7927_s13 + $0x508] ss:$100 sps:$4 sm:$0xff]   ;;  %v6827_v4 = vld [vmem:[%s7927_s13 + $0x5d4] ss:$100 sps:$4 sm:$0xff]  }
 0x374   : > { %v6830_v45 = vld [vmem:[%s7927_s13 + $0x694] ss:$100 sps:$4 sm:$0xff]   ;;  %v6833_v5 = vld [vmem:[%s7927_s13 + $0x69c] ss:$100 sps:$4 sm:$0xff]  }
 0x375   : > { %4512 = vmatpush1.bf16.msra.mxu0 %v6756_v36  ;;  %4585 = vmatpush1.bf16.msra.mxu1 %v6759_v0  ;;  %v6822_v36 = vld [vmem:[%s7927_s13 + $0x5c8] ss:$100 sps:$4 sm:$0xff]   ;;  %v6825_v0 = vld [vmem:[%s7927_s13 + $0x5d0] ss:$100 sps:$4 sm:$0xff]  }
 0x376   : > { %4513 = vmatprep.subr.bf16.mxu0 %v6764_v42  ;;  %4586 = vmatprep.subr.bf16.mxu1 %v6767_v44 }
 0x379   : > { %4514 = vmatpush1.bf16.msra.mxu0 %v6762_v2  ;;  %4587 = vmatpush1.bf16.msra.mxu1 %v6765_v23  ;;  %v6828_v2 = vld [vmem:[%s7927_s13 + $0x690] ss:$100 sps:$4 sm:$0xff]   ;;  %v6831_v23 = vld [vmem:[%s7927_s13 + $0x698] ss:$100 sps:$4 sm:$0xff]  }
 0x37a   : > { %4515 = vmatprep.subr.bf16.mxu0 %v6770_v62  ;;  %4588 = vmatprep.subr.bf16.mxu1 %v6773_v31 }
 0x37d   : > { %4516 = vmatpush1.bf16.msra.mxu0 %v6768_v12  ;;  %4589 = vmatpush1.bf16.msra.mxu1 %v6771_v16  ;;  %v6839_v12 = vld [vmem:[%s7927_s13 + $0x764] ss:$100 sps:$4 sm:$0xff]  }
 0x37e   : > { %4517 = vmatprep.subr.bf16.mxu0 %v6776_v13  ;;  %4590 = vmatprep.subr.bf16.mxu1 %v6779_v48  ;;  %v6834_v48 = vld [vmem:[%s7927_s13 + $0x758] ss:$100 sps:$4 sm:$0xff]  }
 0x381   : > { %4518 = vmatpush1.bf16.msra.mxu0 %v6774_v14  ;;  %4591 = vmatpush1.bf16.msra.mxu1 %v6777_v24  ;;  %v6837_v14 = vld [vmem:[%s7927_s13 + $0x760] ss:$100 sps:$4 sm:$0xff]  }
 0x382   : > { %4633 = vmatprep.subr.bf16.mxu0 %v6782_v49  ;;  %4706 = vmatprep.subr.bf16.mxu1 %v6785_v17  ;;  %v6842_v24 = vld [vmem:[%s7927_s13 + $0x824] ss:$100 sps:$4 sm:$0xff]   ;;  %v6845_v49 = vld [vmem:[%s7927_s13 + $0x82c] ss:$100 sps:$4 sm:$0xff]  }
 0x384   : > { %4520 = vmatmul.mubr.bf16.vlgmr.msra.gmra.mrb[64].mxu0 %v8748_v41  ;;  %4593 = vmatmul.mubr.bf16.vlgmr.msra.gmra.mrb[64].mxu1 %v8748_v41 }
 0x385   : > { %4634 = vmatpush1.bf16.msra.mxu0 %v6780_v54  ;;  %4707 = vmatpush1.bf16.msra.mxu1 %v6783_v18 }
 0x386   : > { %4635 = vmatprep.subr.bf16.mxu0 %v6788_v9  ;;  %4708 = vmatprep.subr.bf16.mxu1 %v6791_v15  ;;  %v6840_v15 = vld [vmem:[%s7927_s13 + $0x820] ss:$100 sps:$4 sm:$0xff]  }
 0x387   : > { %4529 = vmatprep.mubr.bf16.mxu0 %v8757_v57  ;;  %4602 = vmatprep.mubr.bf16.mxu1 %v8757_v57 }
 0x389   : > { %4636 = vmatpush1.bf16.msra.mxu0 %v6786_v55  ;;  %4709 = vmatpush1.bf16.msra.mxu1 %v6789_v20  ;;  %v6843_v55 = vld [vmem:[%s7927_s13 + $0x828] ss:$100 sps:$4 sm:$0xff]  }
 0x38a   : > { %4637 = vmatprep.subr.bf16.mxu0 %v6794_v21  ;;  %4710 = vmatprep.subr.bf16.mxu1 %v6797_v6  ;;  %v6848_v6 = vld [vmem:[%s7927_s13 + $0x8ec] ss:$100 sps:$4 sm:$0xff]  }
 0x38c   : > { %4530 = vmatmul.mubr.bf16.gmra.mrb[68].mxu0 %v8765_v50  ;;  %4603 = vmatmul.mubr.bf16.gmra.mrb[68].mxu1 %v8765_v50 }
 0x38d   : > { %4638 = vmatpush1.bf16.msra.mxu0 %v6792_v56  ;;  %4711 = vmatpush1.bf16.msra.mxu1 %v6795_v7  ;;  %v6851_v56 = vld [vmem:[%s7927_s13 + $0x8f4] ss:$100 sps:$4 sm:$0xff]  }
 0x38e   : > { %4639 = vmatprep.subr.bf16.mxu0 %v6800_v26  ;;  %4712 = vmatprep.subr.bf16.mxu1 %v6803_v27  ;;  %v6846_v27 = vld [vmem:[%s7927_s13 + $0x8e8] ss:$100 sps:$4 sm:$0xff]  }
 0x38f   : > { %4539 = vmatprep.mubr.bf16.mxu0 %v8771_v35  ;;  %4612 = vmatprep.mubr.bf16.mxu1 %v8771_v35 }
 0x391   : > { %4640 = vmatpush1.bf16.msra.mxu0 %v6798_v28  ;;  %4713 = vmatpush1.bf16.msra.mxu1 %v6801_v29  ;;  %v6849_v28 = vld [vmem:[%s7927_s13 + $0x8f0] ss:$100 sps:$4 sm:$0xff]  }
 0x392   : > { %4641 = vmatprep.subr.bf16.mxu0 %v6806_v11  ;;  %4714 = vmatprep.subr.bf16.mxu1 %v6809_v32  ;;  %v6854_v29 = vld [vmem:[%s7927_s13 + $0x9b4] ss:$100 sps:$4 sm:$0xff]   ;;  %v6857_v11 = vld [vmem:[%s7927_s13 + $0x9bc] ss:$100 sps:$4 sm:$0xff]  }
 0x394   : > { %4540 = vmatmul.mubr.bf16.gmra.mrb[72].mxu0 %v8779_v63  ;;  %4613 = vmatmul.mubr.bf16.gmra.mrb[72].mxu1 %v8779_v63 }
 0x395   : > { %4642 = vmatpush1.bf16.msra.mxu0 %v6804_v33  ;;  %4715 = vmatpush1.bf16.msra.mxu1 %v6807_v34 }
 0x396   : > { %4643 = vmatprep.subr.bf16.mxu0 %v6812_v19  ;;  %4716 = vmatprep.subr.bf16.mxu1 %v6815_v37  ;;  %v6852_v37 = vld [vmem:[%s7927_s13 + $0x9b0] ss:$100 sps:$4 sm:$0xff]  }
 0x397   : > { %v4083_v25 = vpop.f32.mrb[16].mxu0  ;;  %v4156_v52 = vpop.f32.mrb[16].mxu1  ;;  %4549 = vmatprep.mubr.bf16.mxu0 %v8787_v1  ;;  %4622 = vmatprep.mubr.bf16.mxu1 %v8787_v1 }
 0x398   : > { %4848 = vst [vmem:[%s7929_s14 + $0x20] sm:$0xff] %v4083_v25  ;;  %4850 = vst [vmem:[%s7929_s14 + $0x30] sm:$0xff] %v4156_v52  ;;  %v4085_v59 = vpop.f32.mrb[17].mxu0  ;;  %v4158_v10 = vpop.f32.mrb[17].mxu1  ;;  %v6863_v25 = vld [vmem:[%s7927_s13 + $0xa84] ss:$100 sps:$4 sm:$0xff]  }
 0x399   : > { %4849 = vst [vmem:[%s7929_s14 + $0x28] sm:$0xff] %v4085_v59  ;;  %4851 = vst [vmem:[%s7929_s14 + $0x38] sm:$0xff] %v4158_v10  ;;  %v4087_v60 = vpop.f32.mrb[18].mxu0  ;;  %v4160_v61 = vpop.f32.mrb[18].mxu1  ;;  %4644 = vmatpush1.bf16.msra.mxu0 %v6810_v38  ;;  %4717 = vmatpush1.bf16.msra.mxu1 %v6813_v43  ;;  %v6855_v38 = vld [vmem:[%s7927_s13 + $0x9b8] ss:$100 sps:$4 sm:$0xff]  }
 0x39a   : > { %4873 = vst [vmem:[%s7929_s14 + $0xe8] sm:$0xff] %v4087_v60  ;;  %4875 = vst [vmem:[%s7929_s14 + $0xf8] sm:$0xff] %v4160_v61  ;;  %v4089_v39 = vpop.f32.mrb[19].mxu0  ;;  %v4162_v40 = vpop.f32.mrb[19].mxu1  ;;  %4645 = vmatprep.subr.bf16.mxu0 %v6818_v46  ;;  %4718 = vmatprep.subr.bf16.mxu1 %v6821_v51  ;;  %v6860_v51 = vld [vmem:[%s7927_s13 + $0xa7c] ss:$100 sps:$4 sm:$0xff]  }
 0x39b   : > { %4874 = vst [vmem:[%s7929_s14 + $0xf0] sm:$0xff] %v4089_v39  ;;  %4876 = vst [vmem:[%s7929_s14 + $0x100] sm:$0xff] %v4162_v40  ;;  %v6858_v10 = vld [vmem:[%s7927_s13 + $0xa78] ss:$100 sps:$4 sm:$0xff]   ;;  %v6861_v60 = vld [vmem:[%s7927_s13 + $0xa80] ss:$100 sps:$4 sm:$0xff]  }
 0x39c   : > { %4550 = vmatmul.mubr.bf16.gmra.mrb[76].mxu0 %v8803_v3  ;;  %4623 = vmatmul.mubr.bf16.gmra.mrb[76].mxu1 %v8803_v3  ;;  %v6866_v61 = vld [vmem:[%s7927_s13 + $0xb44] ss:$100 sps:$4 sm:$0xff]   ;;  %v6872_v40 = vld [vmem:[%s7927_s13 + $0xc0c] ss:$100 sps:$4 sm:$0xff]  }
 0x39d   : > { %4646 = vmatpush1.bf16.msra.mxu0 %v6816_v8  ;;  %4719 = vmatpush1.bf16.msra.mxu1 %v6819_v22  ;;  %v6869_v8 = vld [vmem:[%s7927_s13 + $0xb4c] ss:$100 sps:$4 sm:$0xff]   ;;  %v6864_v22 = vld [vmem:[%s7927_s13 + $0xb40] ss:$100 sps:$4 sm:$0xff]  }
 0x39e   : > { %4647 = vmatprep.subr.bf16.mxu0 %v6824_v30  ;;  %4720 = vmatprep.subr.bf16.mxu1 %v6827_v4  ;;  %v6867_v39 = vld [vmem:[%s7927_s13 + $0xb48] ss:$100 sps:$4 sm:$0xff]   ;;  %v6875_v30 = vld [vmem:[%s7927_s13 + $0xc14] ss:$100 sps:$4 sm:$0xff]  }
 0x39f   : > { %v4093_v42 = vpop.f32.mrb[20].mxu0  ;;  %v4166_v44 = vpop.f32.mrb[20].mxu1  ;;  %4665 = vmatprep.mubr.bf16.mxu0 %v8707_v47  ;;  %4738 = vmatprep.mubr.bf16.mxu1 %v8707_v47  ;;  %v6836_v47 = vld [vmem:[%s7927_s13 + $0x75c] ss:$100 sps:$4 sm:$0xff]   ;;  %v6870_v4 = vld [vmem:[%s7927_s13 + $0xc08] ss:$100 sps:$4 sm:$0xff]  }
 0x3a0   : > { %4898 = vst [vmem:[%s7929_s14 + $0x1b0] sm:$0xff] %v4093_v42  ;;  %4900 = vst [vmem:[%s7929_s14 + $0x1c0] sm:$0xff] %v4166_v44  ;;  %v4095_v58 = vpop.f32.mrb[21].mxu0  ;;  %v4168_v53 = vpop.f32.mrb[21].mxu1  ;;  %v6879_v42 = vld [vmem:[%s7927_s13 + $0x128] ss:$100 sps:$4 sm:$0xff]  }
 0x3a1   : > { %4648 = vmatpush1.bf16.msra.mxu0 %v6822_v36  ;;  %4721 = vmatpush1.bf16.msra.mxu1 %v6825_v0  ;;  %4899 = vst [vmem:[%s7929_s14 + $0x1b8] sm:$0xff] %v4095_v58  ;;  %4901 = vst [vmem:[%s7929_s14 + $0x1c8] sm:$0xff] %v4168_v53  ;;  %v4097_v62 = vpop.f32.mrb[22].mxu0  ;;  %v4170_v31 = vpop.f32.mrb[22].mxu1  ;;  %v6873_v36 = vld [vmem:[%s7927_s13 + $0xc10] ss:$100 sps:$4 sm:$0xff]  }
 0x3a2   : > { %4649 = vmatprep.subr.bf16.mxu0 %v6830_v45  ;;  %4722 = vmatprep.subr.bf16.mxu1 %v6833_v5  ;;  %4923 = vst [vmem:[%s7929_s14 + $0x278] sm:$0xff] %v4097_v62  ;;  %4925 = vst [vmem:[%s7929_s14 + $0x288] sm:$0xff] %v4170_v31  ;;  %v4099_v16 = vpop.f32.mrb[23].mxu0  ;;  %v4172_v13 = vpop.f32.mrb[23].mxu1  ;;  %v6876_v0 = vld [vmem:[%s7927_s13 + $0x6a0] ss:$100 sps:$4 sm:$0xff]  }
 0x3a3   : > { %4924 = vst [vmem:[%s7929_s14 + $0x280] sm:$0xff] %v4099_v16  ;;  %4926 = vst [vmem:[%s7929_s14 + $0x290] sm:$0xff] %v4172_v13  ;;  %v6877_v45 = vld [vmem:[%s7927_s13 + $0x60] ss:$100 sps:$4 sm:$0xff]   ;;  %v6878_v5 = vld [vmem:[%s7927_s13 + $0x768] ss:$100 sps:$4 sm:$0xff]  }
 0x3a4   : > { %v6880_v44 = vld [vmem:[%s7927_s13 + $0x830] ss:$100 sps:$4 sm:$0xff]   ;;  %v6882_v53 = vld [vmem:[%s7927_s13 + $0x8f8] ss:$100 sps:$4 sm:$0xff]  }
 0x3a5   : > { %4650 = vmatpush1.bf16.msra.mxu0 %v6828_v2  ;;  %4723 = vmatpush1.bf16.msra.mxu1 %v6831_v23  ;;  %v6881_v58 = vld [vmem:[%s7927_s13 + $0x1f0] ss:$100 sps:$4 sm:$0xff]   ;;  %v6884_v2 = vld [vmem:[%s7927_s13 + $0x9c0] ss:$100 sps:$4 sm:$0xff]   ;;  %v6887_v23 = vld [vmem:[%s7927_s13 + $0x448] ss:$100 sps:$4 sm:$0xff]  }
 0x3a6   : > { %4651 = vmatprep.subr.bf16.mxu0 %v6836_v47  ;;  %4724 = vmatprep.subr.bf16.mxu1 %v6839_v12  ;;  %v6888_v62 = vld [vmem:[%s7927_s13 + $0xb50] ss:$100 sps:$4 sm:$0xff]  }
 0x3a7   : > { %v4103_v17 = vpop.f32.mrb[24].mxu0  ;;  %v4176_v54 = vpop.f32.mrb[24].mxu1 }
 0x3a8   : > { %4948 = vst [vmem:[%s7929_s14 + $0x340] sm:$0xff] %v4103_v17  ;;  %4950 = vst [vmem:[%s7929_s14 + $0x350] sm:$0xff] %v4176_v54  ;;  %v4105_v18 = vpop.f32.mrb[25].mxu0  ;;  %v4178_v9 = vpop.f32.mrb[25].mxu1  ;;  %v6890_v17 = vld [vmem:[%s7927_s13 + $0xc18] ss:$100 sps:$4 sm:$0xff]  }
 0x3a9   : > { %4652 = vmatpush1.bf16.msra.mxu0 %v6834_v48  ;;  %4725 = vmatpush1.bf16.msra.mxu1 %v6837_v14  ;;  %4949 = vst [vmem:[%s7929_s14 + $0x348] sm:$0xff] %v4105_v18  ;;  %4951 = vst [vmem:[%s7929_s14 + $0x358] sm:$0xff] %v4178_v9  ;;  %v4107_v20 = vpop.f32.mrb[26].mxu0  ;;  %v4180_v21 = vpop.f32.mrb[26].mxu1  ;;  %v6889_v14 = vld [vmem:[%s7927_s13 + $0x510] ss:$100 sps:$4 sm:$0xff]  }
 0x3aa   : > { %4653 = vmatprep.subr.bf16.mxu0 %v6842_v24  ;;  %4726 = vmatprep.subr.bf16.mxu1 %v6845_v49  ;;  %4973 = vst [vmem:[%s7929_s14 + $0x408] sm:$0xff] %v4107_v20  ;;  %4975 = vst [vmem:[%s7929_s14 + $0x418] sm:$0xff] %v4180_v21  ;;  %v4109_v7 = vpop.f32.mrb[27].mxu0  ;;  %v4182_v26 = vpop.f32.mrb[27].mxu1  ;;  %v6891_v54 = vld [vmem:[%s7927_s13 + $0x5d8] ss:$100 sps:$4 sm:$0xff]  }
 0x3ab   : > { %4974 = vst [vmem:[%s7929_s14 + $0x410] sm:$0xff] %v4109_v7  ;;  %4976 = vst [vmem:[%s7929_s14 + $0x420] sm:$0xff] %v4182_v26  ;;  %v6900_v18 = vld [vmem:[#allocation2 + $0x8] sm:$0xff]  ;;  %v6901_v7 = vld [vmem:[#allocation2] sm:$0xff] }
 0x3ac   : > { %v6902_v26 = vld [vmem:[#allocation2 + $0x18] sm:$0xff] }
 0x3ad   : > { %4654 = vmatpush1.bf16.msra.mxu0 %v6840_v15  ;;  %4727 = vmatpush1.bf16.msra.mxu1 %v6843_v55 }
 0x3ae   : > { %4655 = vmatprep.subr.bf16.mxu0 %v6848_v6  ;;  %4728 = vmatprep.subr.bf16.mxu1 %v6851_v56 }
 0x3af   : > { %v4113_v32 = vpop.f32.mrb[28].mxu0  ;;  %v4186_v33 = vpop.f32.mrb[28].mxu1 }
 0x3b0   : > { %4998 = vst [vmem:[%s7929_s14 + $0x4d0] sm:$0xff] %v4113_v32  ;;  %5000 = vst [vmem:[%s7929_s14 + $0x4e0] sm:$0xff] %v4186_v33  ;;  %v4115_v34 = vpop.f32.mrb[29].mxu0  ;;  %v4188_v19 = vpop.f32.mrb[29].mxu1 }
 0x3b1   : > { %4656 = vmatpush1.bf16.msra.mxu0 %v6846_v27  ;;  %4729 = vmatpush1.bf16.msra.mxu1 %v6849_v28  ;;  %4999 = vst [vmem:[%s7929_s14 + $0x4d8] sm:$0xff] %v4115_v34  ;;  %5001 = vst [vmem:[%s7929_s14 + $0x4e8] sm:$0xff] %v4188_v19  ;;  %v4117_v43 = vpop.f32.mrb[30].mxu0  ;;  %v4190_v46 = vpop.f32.mrb[30].mxu1 }
 0x3b2   : > { %4657 = vmatprep.subr.bf16.mxu0 %v6854_v29  ;;  %4730 = vmatprep.subr.bf16.mxu1 %v6857_v11  ;;  %5023 = vst [vmem:[%s7929_s14 + $0x598] sm:$0xff] %v4117_v43  ;;  %5025 = vst [vmem:[%s7929_s14 + $0x5a8] sm:$0xff] %v4190_v46  ;;  %v4119_v52 = vpop.f32.mrb[31].mxu0  ;;  %v4192_v59 = vpop.f32.mrb[31].mxu1 }
 0x3b3   : > { %5024 = vst [vmem:[%s7929_s14 + $0x5a0] sm:$0xff] %v4119_v52  ;;  %5026 = vst [vmem:[%s7929_s14 + $0x5b0] sm:$0xff] %v4192_v59 }
 0x3b5   : > { %4658 = vmatpush1.bf16.msra.mxu0 %v6852_v37  ;;  %4731 = vmatpush1.bf16.msra.mxu1 %v6855_v38 }
 0x3b6   : > { %4659 = vmatprep.subr.bf16.mxu0 %v6860_v51  ;;  %4732 = vmatprep.subr.bf16.mxu1 %v6863_v25 }
 0x3b9   : > { %4660 = vmatpush1.bf16.msra.mxu0 %v6858_v10  ;;  %4733 = vmatpush1.bf16.msra.mxu1 %v6861_v60 }
 0x3ba   : > { %4661 = vmatprep.subr.bf16.mxu0 %v6866_v61  ;;  %4734 = vmatprep.subr.bf16.mxu1 %v6869_v8 }
 0x3bd   : > { %4662 = vmatpush1.bf16.msra.mxu0 %v6864_v22  ;;  %4735 = vmatpush1.bf16.msra.mxu1 %v6867_v39 }
 0x3be   : > { %4663 = vmatprep.subr.bf16.mxu0 %v6872_v40  ;;  %4736 = vmatprep.subr.bf16.mxu1 %v6875_v30 }
 0x3c1   : > { %4664 = vmatpush1.bf16.msra.mxu0 %v6870_v4  ;;  %4737 = vmatpush1.bf16.msra.mxu1 %v6873_v36 }
 0x3c2   : > { %6040 = vmatprep.subr.bf16.mxu0 %v6876_v0  ;;  %6176 = vmatprep.subr.bf16.mxu1 %v6876_v0 }
 0x3c4   : > { %4666 = vmatmul.mubr.bf16.vlgmr.msra.gmra.mrb[80].mxu0 %v8748_v41  ;;  %4739 = vmatmul.mubr.bf16.vlgmr.msra.gmra.mrb[80].mxu1 %v8748_v41  ;;  %v6883_v41 = vld [vmem:[%s7927_s13 + $0x2b8] ss:$100 sps:$4 sm:$0xff]  }
 0x3c5   : > { %6041 = vmatpush3.bf16.msra.mxu0 %v6877_v45  ;;  %6184 = vmatpush3.bf16.msra.mxu1 %v6877_v45 }
 0x3c6   : > { %6042 = vmatprep.subr.bf16.mxu0 %v6878_v5  ;;  %6177 = vmatprep.subr.bf16.mxu1 %v6878_v5 }
 0x3c7   : > { %4675 = vmatprep.mubr.bf16.mxu0 %v8757_v57  ;;  %4748 = vmatprep.mubr.bf16.mxu1 %v8757_v57  ;;  %v6885_v57 = vld [vmem:[%s7927_s13 + $0x380] ss:$100 sps:$4 sm:$0xff]  }
 0x3c9   : > { %6043 = vmatpush3.bf16.msra.mxu0 %v6879_v42  ;;  %6185 = vmatpush3.bf16.msra.mxu1 %v6879_v42 }
 0x3ca   : > { %6044 = vmatprep.subr.bf16.mxu0 %v6880_v44  ;;  %6178 = vmatprep.subr.bf16.mxu1 %v6880_v44 }
 0x3cc   : > { %4676 = vmatmul.mubr.bf16.gmra.mrb[84].mxu0 %v8765_v50  ;;  %4749 = vmatmul.mubr.bf16.gmra.mrb[84].mxu1 %v8765_v50  ;;  %v6886_v50 = vld [vmem:[%s7927_s13 + $0xa88] ss:$100 sps:$4 sm:$0xff]   ;;  %s6195_s13 = smul.u32 (%p7068_p9), 400, %s6962_s20 }
 0x3cd   : > { %6045 = vmatpush3.bf16.msra.mxu0 %v6881_v58  ;;  %6186 = vmatpush3.bf16.msra.mxu1 %v6881_v58 }
 0x3ce   : > { %6046 = vmatprep.subr.bf16.mxu0 %v6882_v53  ;;  %6179 = vmatprep.subr.bf16.mxu1 %v6882_v53  ;;  %s5054_s7 = sadd.s32 (%p7068_p9), %s6195_s13, %s5052_s12 }
 0x3cf   : > { %4685 = vmatprep.mubr.bf16.mxu0 %v8771_v35  ;;  %4758 = vmatprep.mubr.bf16.mxu1 %v8771_v35  ;;  %s6035_s19 = sshll.u32 (%p7068_p9), %s5054_s7, 3 }
 0x3d0   : > { %s9171_s11 = scalar_lea.vmem (%p7068_p9), %s9589_s4, %s6035_s19 }
 0x3d1   : > { %6047 = vmatpush3.bf16.msra.mxu0 %v6883_v41  ;;  %6187 = vmatpush3.bf16.msra.mxu1 %v6883_v41 }
 0x3d2   : > { %6048 = vmatprep.subr.bf16.mxu0 %v6884_v2  ;;  %6180 = vmatprep.subr.bf16.mxu1 %v6884_v2 }
 0x3d4   : > { %4686 = vmatmul.mubr.bf16.gmra.mrb[88].mxu0 %v8779_v63  ;;  %4759 = vmatmul.mubr.bf16.gmra.mrb[88].mxu1 %v8779_v63 }
 0x3d5   : > { %6049 = vmatpush3.bf16.msra.mxu0 %v6885_v57  ;;  %6188 = vmatpush3.bf16.msra.mxu1 %v6885_v57 }
 0x3d6   : > { %6050 = vmatprep.subr.bf16.mxu0 %v6886_v50  ;;  %6181 = vmatprep.subr.bf16.mxu1 %v6886_v50 }
 0x3d7   : > { %v4229_v31 = vpop.f32.mrb[32].mxu0  ;;  %v4302_v47 = vpop.f32.mrb[32].mxu1  ;;  %4695 = vmatprep.mubr.bf16.mxu0 %v8787_v1  ;;  %4768 = vmatprep.mubr.bf16.mxu1 %v8787_v1 }
 0x3d8   : > { %4852 = vst [vmem:[%s7929_s14 + $0x40] sm:$0xff] %v4229_v31  ;;  %4854 = vst [vmem:[%s7929_s14 + $0x50] sm:$0xff] %v4302_v47  ;;  %v4231_v12 = vpop.f32.mrb[33].mxu0  ;;  %v4304_v16 = vpop.f32.mrb[33].mxu1 }
 0x3d9   : > { %4853 = vst [vmem:[%s7929_s14 + $0x48] sm:$0xff] %v4231_v12  ;;  %4855 = vst [vmem:[%s7929_s14 + $0x58] sm:$0xff] %v4304_v16  ;;  %v4233_v13 = vpop.f32.mrb[34].mxu0  ;;  %v4306_v48 = vpop.f32.mrb[34].mxu1  ;;  %6051 = vmatpush3.bf16.msra.mxu0 %v6887_v23  ;;  %6189 = vmatpush3.bf16.msra.mxu1 %v6887_v23 }
 0x3da   : > { %4877 = vst [vmem:[%s7929_s14 + $0x108] sm:$0xff] %v4233_v13  ;;  %4879 = vst [vmem:[%s7929_s14 + $0x118] sm:$0xff] %v4306_v48  ;;  %v4235_v24 = vpop.f32.mrb[35].mxu0  ;;  %v4308_v49 = vpop.f32.mrb[35].mxu1  ;;  %6052 = vmatprep.subr.bf16.mxu0 %v6888_v62  ;;  %6182 = vmatprep.subr.bf16.mxu1 %v6888_v62 }
 0x3db   : > { %4878 = vst [vmem:[%s7929_s14 + $0x110] sm:$0xff] %v4235_v24  ;;  %4880 = vst [vmem:[%s7929_s14 + $0x120] sm:$0xff] %v4308_v49 }
 0x3dc   : > { %4696 = vmatmul.mubr.bf16.gmra.mrb[92].mxu0 %v8803_v3  ;;  %4769 = vmatmul.mubr.bf16.gmra.mrb[92].mxu1 %v8803_v3 }
 0x3dd   : > { %6053 = vmatpush3.bf16.msra.mxu0 %v6889_v14  ;;  %6190 = vmatpush3.bf16.msra.mxu1 %v6889_v14 }
 0x3de   : > { %6054 = vmatprep.subr.bf16.mxu0 %v6890_v17  ;;  %6183 = vmatprep.subr.bf16.mxu1 %v6890_v17 }
 0x3df   : > { %4811 = vmatprep.mubr.bf16.mxu0 %v6900_v18  ;;  %4827 = vmatprep.mubr.bf16.mxu1 %v8771_v35  ;;  %v4239_v9 = vpop.f32.mrb[36].mxu0  ;;  %v4312_v15 = vpop.f32.mrb[36].mxu1 }
 0x3e0   : > { %4902 = vst [vmem:[%s7929_s14 + $0x1d0] sm:$0xff] %v4239_v9  ;;  %4904 = vst [vmem:[%s7929_s14 + $0x1e0] sm:$0xff] %v4312_v15  ;;  %v4241_v55 = vpop.f32.mrb[37].mxu0  ;;  %v4314_v20 = vpop.f32.mrb[37].mxu1 }
 0x3e1   : > { %6055 = vmatpush3.bf16.msra.mxu0 %v6891_v54  ;;  %6191 = vmatpush3.bf16.msra.mxu1 %v6891_v54  ;;  %4903 = vst [vmem:[%s7929_s14 + $0x1d8] sm:$0xff] %v4241_v55  ;;  %4905 = vst [vmem:[%s7929_s14 + $0x1e8] sm:$0xff] %v4314_v20  ;;  %v4243_v21 = vpop.f32.mrb[38].mxu0  ;;  %v4316_v6 = vpop.f32.mrb[38].mxu1 }
 0x3e2   : > { %4927 = vst [vmem:[%s7929_s14 + $0x298] sm:$0xff] %v4243_v21  ;;  %4929 = vst [vmem:[%s7929_s14 + $0x2a8] sm:$0xff] %v4316_v6  ;;  %v4245_v56 = vpop.f32.mrb[39].mxu0  ;;  %v4318_v35 = vpop.f32.mrb[39].mxu1 }
 0x3e3   : > { %4928 = vst [vmem:[%s7929_s14 + $0x2a0] sm:$0xff] %v4245_v56  ;;  %4930 = vst [vmem:[%s7929_s14 + $0x2b0] sm:$0xff] %v4318_v35 }
 0x3e4   : > { %4812 = vmatmul.mubr.bf16.vlgmr.msra.gmra.mrb[96].mxu0 %v6901_v7  ;;  %4828 = vmatmul.mubr.bf16.vlgmr.msra.gmra.mrb[96].mxu1 %v8779_v63 }
 0x3e5   : > { %4819 = vmatprep.mubr.bf16.mxu0 %v6902_v26  ;;  %4835 = vmatprep.mubr.bf16.mxu1 %v8787_v1  ;;  %v6903_v1 = vld [vmem:[#allocation2 + $0x10] sm:$0xff] }
 0x3e7   : > { %v4249_v27 = vpop.f32.mrb[40].mxu0  ;;  %v4322_v28 = vpop.f32.mrb[40].mxu1 }
 0x3e8   : > { %4952 = vst [vmem:[%s7929_s14 + $0x360] sm:$0xff] %v4249_v27  ;;  %4954 = vst [vmem:[%s7929_s14 + $0x370] sm:$0xff] %v4322_v28  ;;  %v4251_v29 = vpop.f32.mrb[41].mxu0  ;;  %v4324_v11 = vpop.f32.mrb[41].mxu1 }
 0x3e9   : > { %4953 = vst [vmem:[%s7929_s14 + $0x368] sm:$0xff] %v4251_v29  ;;  %4955 = vst [vmem:[%s7929_s14 + $0x378] sm:$0xff] %v4324_v11  ;;  %v4253_v32 = vpop.f32.mrb[42].mxu0  ;;  %v4326_v33 = vpop.f32.mrb[42].mxu1 }
 0x3ea   : > { %4977 = vst [vmem:[%s7929_s14 + $0x428] sm:$0xff] %v4253_v32  ;;  %4979 = vst [vmem:[%s7929_s14 + $0x438] sm:$0xff] %v4326_v33  ;;  %v4255_v63 = vpop.f32.mrb[43].mxu0  ;;  %v4328_v34 = vpop.f32.mrb[43].mxu1 }
 0x3eb   : > { %4978 = vst [vmem:[%s7929_s14 + $0x430] sm:$0xff] %v4255_v63  ;;  %4980 = vst [vmem:[%s7929_s14 + $0x440] sm:$0xff] %v4328_v34 }
 0x3ec   : > { %4820 = vmatmul.mubr.bf16.gmra.mrb[100].mxu0 %v6903_v1  ;;  %4836 = vmatmul.mubr.bf16.gmra.mrb[100].mxu1 %v8803_v3 }
 0x3ef   : > { %v4259_v19 = vpop.f32.mrb[44].mxu0  ;;  %v4332_v37 = vpop.f32.mrb[44].mxu1 }
 0x3f0   : > { %5002 = vst [vmem:[%s7929_s14 + $0x4f0] sm:$0xff] %v4259_v19  ;;  %5004 = vst [vmem:[%s7929_s14 + $0x500] sm:$0xff] %v4332_v37  ;;  %v4261_v38 = vpop.f32.mrb[45].mxu0  ;;  %v4334_v43 = vpop.f32.mrb[45].mxu1 }
 0x3f1   : > { %5003 = vst [vmem:[%s7929_s14 + $0x4f8] sm:$0xff] %v4261_v38  ;;  %5005 = vst [vmem:[%s7929_s14 + $0x508] sm:$0xff] %v4334_v43  ;;  %v4263_v46 = vpop.f32.mrb[46].mxu0  ;;  %v4336_v51 = vpop.f32.mrb[46].mxu1 }
 0x3f2   : > { %5027 = vst [vmem:[%s7929_s14 + $0x5b8] sm:$0xff] %v4263_v46  ;;  %5029 = vst [vmem:[%s7929_s14 + $0x5c8] sm:$0xff] %v4336_v51  ;;  %v4265_v3 = vpop.f32.mrb[47].mxu0  ;;  %v4338_v25 = vpop.f32.mrb[47].mxu1 }
 0x3f3   : > { %5028 = vst [vmem:[%s7929_s14 + $0x5c0] sm:$0xff] %v4265_v3  ;;  %5030 = vst [vmem:[%s7929_s14 + $0x5d0] sm:$0xff] %v4338_v25 }
 0x417   : > { %v4375_v52 = vpop.f32.mrb[48].mxu0  ;;  %v4448_v59 = vpop.f32.mrb[48].mxu1 }
 0x418   : > { %4856 = vst [vmem:[%s7929_s14 + $0x60] sm:$0xff] %v4375_v52  ;;  %4858 = vst [vmem:[%s7929_s14 + $0x70] sm:$0xff] %v4448_v59  ;;  %v4377_v10 = vpop.f32.mrb[49].mxu0  ;;  %v4450_v60 = vpop.f32.mrb[49].mxu1 }
 0x419   : > { %4857 = vst [vmem:[%s7929_s14 + $0x68] sm:$0xff] %v4377_v10  ;;  %4859 = vst [vmem:[%s7929_s14 + $0x78] sm:$0xff] %v4450_v60  ;;  %v4379_v61 = vpop.f32.mrb[50].mxu0  ;;  %v4452_v8 = vpop.f32.mrb[50].mxu1 }
 0x41a   : > { %4881 = vst [vmem:[%s7929_s14 + $0x128] sm:$0xff] %v4379_v61  ;;  %4883 = vst [vmem:[%s7929_s14 + $0x138] sm:$0xff] %v4452_v8  ;;  %v4381_v22 = vpop.f32.mrb[51].mxu0  ;;  %v4454_v39 = vpop.f32.mrb[51].mxu1 }
 0x41b   : > { %4882 = vst [vmem:[%s7929_s14 + $0x130] sm:$0xff] %v4381_v22  ;;  %4884 = vst [vmem:[%s7929_s14 + $0x140] sm:$0xff] %v4454_v39 }
 0x41f   : > { %v4385_v40 = vpop.f32.mrb[52].mxu0  ;;  %v4458_v30 = vpop.f32.mrb[52].mxu1 }
 0x420   : > { %4906 = vst [vmem:[%s7929_s14 + $0x1f0] sm:$0xff] %v4385_v40  ;;  %4908 = vst [vmem:[%s7929_s14 + $0x200] sm:$0xff] %v4458_v30  ;;  %v4387_v4 = vpop.f32.mrb[53].mxu0  ;;  %v4460_v36 = vpop.f32.mrb[53].mxu1 }
 0x421   : > { %4907 = vst [vmem:[%s7929_s14 + $0x1f8] sm:$0xff] %v4387_v4  ;;  %4909 = vst [vmem:[%s7929_s14 + $0x208] sm:$0xff] %v4460_v36  ;;  %v4389_v0 = vpop.f32.mrb[54].mxu0  ;;  %v4462_v45 = vpop.f32.mrb[54].mxu1 }
 0x422   : > { %4931 = vst [vmem:[%s7929_s14 + $0x2b8] sm:$0xff] %v4389_v0  ;;  %4933 = vst [vmem:[%s7929_s14 + $0x2c8] sm:$0xff] %v4462_v45  ;;  %v4391_v5 = vpop.f32.mrb[55].mxu0  ;;  %v4464_v42 = vpop.f32.mrb[55].mxu1 }
 0x423   : > { %4932 = vst [vmem:[%s7929_s14 + $0x2c0] sm:$0xff] %v4391_v5  ;;  %4934 = vst [vmem:[%s7929_s14 + $0x2d0] sm:$0xff] %v4464_v42 }
 0x427   : > { %v4395_v44 = vpop.f32.mrb[56].mxu0  ;;  %v4468_v58 = vpop.f32.mrb[56].mxu1 }
 0x428   : > { %4956 = vst [vmem:[%s7929_s14 + $0x380] sm:$0xff] %v4395_v44  ;;  %4958 = vst [vmem:[%s7929_s14 + $0x390] sm:$0xff] %v4468_v58  ;;  %v4397_v53 = vpop.f32.mrb[57].mxu0  ;;  %v4470_v41 = vpop.f32.mrb[57].mxu1 }
 0x429   : > { %4957 = vst [vmem:[%s7929_s14 + $0x388] sm:$0xff] %v4397_v53  ;;  %4959 = vst [vmem:[%s7929_s14 + $0x398] sm:$0xff] %v4470_v41  ;;  %v4399_v2 = vpop.f32.mrb[58].mxu0  ;;  %v4472_v57 = vpop.f32.mrb[58].mxu1 }
 0x42a   : > { %4981 = vst [vmem:[%s7929_s14 + $0x448] sm:$0xff] %v4399_v2  ;;  %4983 = vst [vmem:[%s7929_s14 + $0x458] sm:$0xff] %v4472_v57  ;;  %v4401_v50 = vpop.f32.mrb[59].mxu0  ;;  %v4474_v23 = vpop.f32.mrb[59].mxu1 }
 0x42b   : > { %4982 = vst [vmem:[%s7929_s14 + $0x450] sm:$0xff] %v4401_v50  ;;  %4984 = vst [vmem:[%s7929_s14 + $0x460] sm:$0xff] %v4474_v23 }
 0x42f   : > { %v4405_v62 = vpop.f32.mrb[60].mxu0  ;;  %v4478_v31 = vpop.f32.mrb[60].mxu1 }
 0x430   : > { %5006 = vst [vmem:[%s7929_s14 + $0x510] sm:$0xff] %v4405_v62  ;;  %5008 = vst [vmem:[%s7929_s14 + $0x520] sm:$0xff] %v4478_v31  ;;  %v4407_v47 = vpop.f32.mrb[61].mxu0  ;;  %v4480_v12 = vpop.f32.mrb[61].mxu1 }
 0x431   : > { %5007 = vst [vmem:[%s7929_s14 + $0x518] sm:$0xff] %v4407_v47  ;;  %5009 = vst [vmem:[%s7929_s14 + $0x528] sm:$0xff] %v4480_v12  ;;  %v4409_v16 = vpop.f32.mrb[62].mxu0  ;;  %v4482_v13 = vpop.f32.mrb[62].mxu1 }
 0x432   : > { %5031 = vst [vmem:[%s7929_s14 + $0x5d8] sm:$0xff] %v4409_v16  ;;  %5033 = vst [vmem:[%s7929_s14 + $0x5e8] sm:$0xff] %v4482_v13  ;;  %v4411_v48 = vpop.f32.mrb[63].mxu0  ;;  %v4484_v14 = vpop.f32.mrb[63].mxu1 }
 0x433   : > { %5032 = vst [vmem:[%s7929_s14 + $0x5e0] sm:$0xff] %v4411_v48  ;;  %5034 = vst [vmem:[%s7929_s14 + $0x5f0] sm:$0xff] %v4484_v14 }
 0x457   : > { %v4521_v24 = vpop.f32.mrb[64].mxu0  ;;  %v4594_v49 = vpop.f32.mrb[64].mxu1 }
 0x458   : > { %4860 = vst [vmem:[%s7929_s14 + $0x80] sm:$0xff] %v4521_v24  ;;  %4862 = vst [vmem:[%s7929_s14 + $0x90] sm:$0xff] %v4594_v49  ;;  %v4523_v17 = vpop.f32.mrb[65].mxu0  ;;  %v4596_v54 = vpop.f32.mrb[65].mxu1 }
 0x459   : > { %4861 = vst [vmem:[%s7929_s14 + $0x88] sm:$0xff] %v4523_v17  ;;  %4863 = vst [vmem:[%s7929_s14 + $0x98] sm:$0xff] %v4596_v54  ;;  %v4525_v18 = vpop.f32.mrb[66].mxu0  ;;  %v4598_v9 = vpop.f32.mrb[66].mxu1 }
 0x45a   : > { %4885 = vst [vmem:[%s7929_s14 + $0x148] sm:$0xff] %v4525_v18  ;;  %4887 = vst [vmem:[%s7929_s14 + $0x158] sm:$0xff] %v4598_v9  ;;  %v4527_v15 = vpop.f32.mrb[67].mxu0  ;;  %v4600_v55 = vpop.f32.mrb[67].mxu1 }
 0x45b   : > { %4886 = vst [vmem:[%s7929_s14 + $0x150] sm:$0xff] %v4527_v15  ;;  %4888 = vst [vmem:[%s7929_s14 + $0x160] sm:$0xff] %v4600_v55 }
 0x45f   : > { %v4531_v20 = vpop.f32.mrb[68].mxu0  ;;  %v4604_v21 = vpop.f32.mrb[68].mxu1 }
 0x460   : > { %4910 = vst [vmem:[%s7929_s14 + $0x210] sm:$0xff] %v4531_v20  ;;  %4912 = vst [vmem:[%s7929_s14 + $0x220] sm:$0xff] %v4604_v21  ;;  %v4533_v6 = vpop.f32.mrb[69].mxu0  ;;  %v4606_v56 = vpop.f32.mrb[69].mxu1 }
 0x461   : > { %4911 = vst [vmem:[%s7929_s14 + $0x218] sm:$0xff] %v4533_v6  ;;  %4913 = vst [vmem:[%s7929_s14 + $0x228] sm:$0xff] %v4606_v56  ;;  %v4535_v35 = vpop.f32.mrb[70].mxu0  ;;  %v4608_v7 = vpop.f32.mrb[70].mxu1 }
 0x462   : > { %4935 = vst [vmem:[%s7929_s14 + $0x2d8] sm:$0xff] %v4535_v35  ;;  %4937 = vst [vmem:[%s7929_s14 + $0x2e8] sm:$0xff] %v4608_v7  ;;  %v4537_v26 = vpop.f32.mrb[71].mxu0  ;;  %v4610_v27 = vpop.f32.mrb[71].mxu1 }
 0x463   : > { %4936 = vst [vmem:[%s7929_s14 + $0x2e0] sm:$0xff] %v4537_v26  ;;  %4938 = vst [vmem:[%s7929_s14 + $0x2f0] sm:$0xff] %v4610_v27 }
 0x467   : > { %v4541_v28 = vpop.f32.mrb[72].mxu0  ;;  %v4614_v29 = vpop.f32.mrb[72].mxu1 }
 0x468   : > { %4960 = vst [vmem:[%s7929_s14 + $0x3a0] sm:$0xff] %v4541_v28  ;;  %4962 = vst [vmem:[%s7929_s14 + $0x3b0] sm:$0xff] %v4614_v29  ;;  %v4543_v11 = vpop.f32.mrb[73].mxu0  ;;  %v4616_v32 = vpop.f32.mrb[73].mxu1 }
 0x469   : > { %4961 = vst [vmem:[%s7929_s14 + $0x3a8] sm:$0xff] %v4543_v11  ;;  %4963 = vst [vmem:[%s7929_s14 + $0x3b8] sm:$0xff] %v4616_v32  ;;  %v4545_v33 = vpop.f32.mrb[74].mxu0  ;;  %v4618_v63 = vpop.f32.mrb[74].mxu1 }
 0x46a   : > { %4985 = vst [vmem:[%s7929_s14 + $0x468] sm:$0xff] %v4545_v33  ;;  %4987 = vst [vmem:[%s7929_s14 + $0x478] sm:$0xff] %v4618_v63  ;;  %v4547_v34 = vpop.f32.mrb[75].mxu0  ;;  %v4620_v1 = vpop.f32.mrb[75].mxu1 }
 0x46b   : > { %4986 = vst [vmem:[%s7929_s14 + $0x470] sm:$0xff] %v4547_v34  ;;  %4988 = vst [vmem:[%s7929_s14 + $0x480] sm:$0xff] %v4620_v1 }
 0x46f   : > { %v4551_v19 = vpop.f32.mrb[76].mxu0  ;;  %v4624_v37 = vpop.f32.mrb[76].mxu1 }
 0x470   : > { %5010 = vst [vmem:[%s7929_s14 + $0x530] sm:$0xff] %v4551_v19  ;;  %5012 = vst [vmem:[%s7929_s14 + $0x540] sm:$0xff] %v4624_v37  ;;  %v4553_v38 = vpop.f32.mrb[77].mxu0  ;;  %v4626_v43 = vpop.f32.mrb[77].mxu1  ;;  %v5069_v19 = vld [vmem:[%s7929_s14] sm:$0xff] (%p7068_p9)  ;;  %v5071_v37 = vld [vmem:[%s7929_s14 + $0x8] sm:$0xff] (%p7068_p9) }
 0x471   : > { %5011 = vst [vmem:[%s7929_s14 + $0x538] sm:$0xff] %v4553_v38  ;;  %5013 = vst [vmem:[%s7929_s14 + $0x548] sm:$0xff] %v4626_v43  ;;  %v4555_v46 = vpop.f32.mrb[78].mxu0  ;;  %v4628_v51 = vpop.f32.mrb[78].mxu1  ;;  %v5073_v38 = vld [vmem:[%s7929_s14 + $0x10] sm:$0xff] (%p7068_p9)  ;;  %v5075_v43 = vld [vmem:[%s7929_s14 + $0x18] sm:$0xff] (%p7068_p9) }
 0x472   : > { %5035 = vst [vmem:[%s7929_s14 + $0x5f8] sm:$0xff] %v4555_v46  ;;  %5037 = vst [vmem:[%s7929_s14 + $0x608] sm:$0xff] %v4628_v51  ;;  %v4557_v3 = vpop.f32.mrb[79].mxu0  ;;  %v4630_v25 = vpop.f32.mrb[79].mxu1  ;;  %v5077_v46 = vld [vmem:[%s7929_s14 + $0x20] sm:$0xff] (%p7068_p9)  ;;  %v5079_v51 = vld [vmem:[%s7929_s14 + $0x28] sm:$0xff] (%p7068_p9) }
 0x473   : > { %5036 = vst [vmem:[%s7929_s14 + $0x600] sm:$0xff] %v4557_v3  ;;  %5038 = vst [vmem:[%s7929_s14 + $0x610] sm:$0xff] %v4630_v25  ;;  %v5081_v3 = vld [vmem:[%s7929_s14 + $0x30] sm:$0xff] (%p7068_p9)  ;;  %v5083_v25 = vld [vmem:[%s7929_s14 + $0x38] sm:$0xff] (%p7068_p9) }
 0x474   : > { %5070 = vst [vmem:[%s9171_s11] sm:$0xff] (%p7068_p9), %v5069_v19  ;;  %5072 = vst [vmem:[%s9171_s11 + $0x8] sm:$0xff] (%p7068_p9), %v5071_v37  ;;  %v5197_v19 = vld [vmem:[%s7929_s14 + $0x200] sm:$0xff] (%p7068_p9)  ;;  %v5199_v37 = vld [vmem:[%s7929_s14 + $0x208] sm:$0xff] (%p7068_p9) }
 0x475   : > { %5074 = vst [vmem:[%s9171_s11 + $0x10] sm:$0xff] (%p7068_p9), %v5073_v38  ;;  %5076 = vst [vmem:[%s9171_s11 + $0x18] sm:$0xff] (%p7068_p9), %v5075_v43  ;;  %v5201_v38 = vld [vmem:[%s7929_s14 + $0x210] sm:$0xff] (%p7068_p9)  ;;  %v5203_v43 = vld [vmem:[%s7929_s14 + $0x218] sm:$0xff] (%p7068_p9) }
 0x476   : > { %5078 = vst [vmem:[%s9171_s11 + $0x20] sm:$0xff] (%p7068_p9), %v5077_v46  ;;  %5080 = vst [vmem:[%s9171_s11 + $0x28] sm:$0xff] (%p7068_p9), %v5079_v51  ;;  %v5205_v46 = vld [vmem:[%s7929_s14 + $0x220] sm:$0xff] (%p7068_p9)  ;;  %v5207_v51 = vld [vmem:[%s7929_s14 + $0x228] sm:$0xff] (%p7068_p9) }
 0x477   : > { %5082 = vst [vmem:[%s9171_s11 + $0x30] sm:$0xff] (%p7068_p9), %v5081_v3  ;;  %5084 = vst [vmem:[%s9171_s11 + $0x38] sm:$0xff] (%p7068_p9), %v5083_v25 }
 0x478   : > { %5198 = vst [vmem:[%s9171_s11 + $0x390] sm:$0xff] (%p7068_p9), %v5197_v19  ;;  %5200 = vst [vmem:[%s9171_s11 + $0x398] sm:$0xff] (%p7068_p9), %v5199_v37  ;;  %v5325_v19 = vld [vmem:[%s7929_s14 + $0x400] sm:$0xff] (%p7068_p9)  ;;  %v5327_v37 = vld [vmem:[%s7929_s14 + $0x408] sm:$0xff] (%p7068_p9) }
 0x479   : > { %5202 = vst [vmem:[%s9171_s11 + $0x3a0] sm:$0xff] (%p7068_p9), %v5201_v38  ;;  %5204 = vst [vmem:[%s9171_s11 + $0x3a8] sm:$0xff] (%p7068_p9), %v5203_v43  ;;  %v5329_v38 = vld [vmem:[%s7929_s14 + $0x410] sm:$0xff] (%p7068_p9)  ;;  %v5331_v43 = vld [vmem:[%s7929_s14 + $0x418] sm:$0xff] (%p7068_p9) }
 0x47a   : > { %5206 = vst [vmem:[%s9171_s11 + $0x3b0] sm:$0xff] (%p7068_p9), %v5205_v46  ;;  %5208 = vst [vmem:[%s9171_s11 + $0x3b8] sm:$0xff] (%p7068_p9), %v5207_v51  ;;  %v5333_v46 = vld [vmem:[%s7929_s14 + $0x420] sm:$0xff] (%p7068_p9)  ;;  %v5335_v51 = vld [vmem:[%s7929_s14 + $0x428] sm:$0xff] (%p7068_p9) }
 0x47b   : > { %5326 = vst [vmem:[%s9171_s11 + $0x7e8] sm:$0xff] (%p7068_p9), %v5325_v19  ;;  %5328 = vst [vmem:[%s9171_s11 + $0x7f0] sm:$0xff] (%p7068_p9), %v5327_v37  ;;  %v5453_v19 = vld [vmem:[%s7929_s14 + $0x600] sm:$0xff] (%p7068_p9)  ;;  %v5455_v37 = vld [vmem:[%s7929_s14 + $0x608] sm:$0xff] (%p7068_p9) }
 0x47c   : > { %5330 = vst [vmem:[%s9171_s11 + $0x7f8] sm:$0xff] (%p7068_p9), %v5329_v38  ;;  %5332 = vst [vmem:[%s9171_s11 + $0x800] sm:$0xff] (%p7068_p9), %v5331_v43  ;;  %v5457_v38 = vld [vmem:[%s7929_s14 + $0x610] sm:$0xff] (%p7068_p9) }
 0x47d   : > { %5334 = vst [vmem:[%s9171_s11 + $0x808] sm:$0xff] (%p7068_p9), %v5333_v46  ;;  %5336 = vst [vmem:[%s9171_s11 + $0x810] sm:$0xff] (%p7068_p9), %v5335_v51 }
 0x47e   : > { %5454 = vst [vmem:[%s9171_s11 + $0xb78] sm:$0xff] (%p7068_p9), %v5453_v19  ;;  %5456 = vst [vmem:[%s9171_s11 + $0xb80] sm:$0xff] (%p7068_p9), %v5455_v37 }
 0x47f   : > { %5458 = vst [vmem:[%s9171_s11 + $0xb88] sm:$0xff] (%p7068_p9), %v5457_v38 }
 0x497   : > { %v4667_v52 = vpop.f32.mrb[80].mxu0  ;;  %v4740_v59 = vpop.f32.mrb[80].mxu1 }
 0x498   : > { %4864 = vst [vmem:[%s7929_s14 + $0xa0] sm:$0xff] %v4667_v52  ;;  %4866 = vst [vmem:[%s7929_s14 + $0xb0] sm:$0xff] %v4740_v59  ;;  %v4669_v10 = vpop.f32.mrb[81].mxu0  ;;  %v4742_v60 = vpop.f32.mrb[81].mxu1  ;;  %v5085_v52 = vld [vmem:[%s7929_s14 + $0x40] sm:$0xff] (%p7068_p9)  ;;  %v5087_v59 = vld [vmem:[%s7929_s14 + $0x48] sm:$0xff] (%p7068_p9) }
 0x499   : > { %4865 = vst [vmem:[%s7929_s14 + $0xa8] sm:$0xff] %v4669_v10  ;;  %4867 = vst [vmem:[%s7929_s14 + $0xb8] sm:$0xff] %v4742_v60  ;;  %v4671_v61 = vpop.f32.mrb[82].mxu0  ;;  %v4744_v8 = vpop.f32.mrb[82].mxu1  ;;  %v5089_v10 = vld [vmem:[%s7929_s14 + $0x50] sm:$0xff] (%p7068_p9)  ;;  %v5091_v60 = vld [vmem:[%s7929_s14 + $0x58] sm:$0xff] (%p7068_p9) }
 0x49a   : > { %4889 = vst [vmem:[%s7929_s14 + $0x168] sm:$0xff] %v4671_v61  ;;  %4891 = vst [vmem:[%s7929_s14 + $0x178] sm:$0xff] %v4744_v8  ;;  %v4673_v22 = vpop.f32.mrb[83].mxu0  ;;  %v4746_v39 = vpop.f32.mrb[83].mxu1  ;;  %v5093_v61 = vld [vmem:[%s7929_s14 + $0x60] sm:$0xff] (%p7068_p9)  ;;  %v5095_v8 = vld [vmem:[%s7929_s14 + $0x68] sm:$0xff] (%p7068_p9) }
 0x49b   : > { %4890 = vst [vmem:[%s7929_s14 + $0x170] sm:$0xff] %v4673_v22  ;;  %4892 = vst [vmem:[%s7929_s14 + $0x180] sm:$0xff] %v4746_v39  ;;  %v5097_v22 = vld [vmem:[%s7929_s14 + $0x70] sm:$0xff] (%p7068_p9)  ;;  %v5099_v39 = vld [vmem:[%s7929_s14 + $0x78] sm:$0xff] (%p7068_p9) }
 0x49c   : > { %5086 = vst [vmem:[%s9171_s11 + $0x40] sm:$0xff] (%p7068_p9), %v5085_v52  ;;  %5088 = vst [vmem:[%s9171_s11 + $0x48] sm:$0xff] (%p7068_p9), %v5087_v59 }
 0x49d   : > { %5090 = vst [vmem:[%s9171_s11 + $0x50] sm:$0xff] (%p7068_p9), %v5089_v10  ;;  %5092 = vst [vmem:[%s9171_s11 + $0x58] sm:$0xff] (%p7068_p9), %v5091_v60  ;;  %v5219_v60 = vld [vmem:[%s7929_s14 + $0x258] sm:$0xff] (%p7068_p9) }
 0x49e   : > { %5094 = vst [vmem:[%s9171_s11 + $0x60] sm:$0xff] (%p7068_p9), %v5093_v61  ;;  %5096 = vst [vmem:[%s9171_s11 + $0x68] sm:$0xff] (%p7068_p9), %v5095_v8  ;;  %v5221_v61 = vld [vmem:[%s7929_s14 + $0x260] sm:$0xff] (%p7068_p9)  ;;  %v5223_v8 = vld [vmem:[%s7929_s14 + $0x268] sm:$0xff] (%p7068_p9) }
 0x49f   : > { %v4677_v40 = vpop.f32.mrb[84].mxu0  ;;  %v4750_v30 = vpop.f32.mrb[84].mxu1  ;;  %5098 = vst [vmem:[%s9171_s11 + $0x70] sm:$0xff] (%p7068_p9), %v5097_v22  ;;  %5100 = vst [vmem:[%s9171_s11 + $0x78] sm:$0xff] (%p7068_p9), %v5099_v39  ;;  %v5225_v22 = vld [vmem:[%s7929_s14 + $0x270] sm:$0xff] (%p7068_p9)  ;;  %v5227_v39 = vld [vmem:[%s7929_s14 + $0x278] sm:$0xff] (%p7068_p9) }
 0x4a0   : > { %4914 = vst [vmem:[%s7929_s14 + $0x230] sm:$0xff] %v4677_v40  ;;  %4916 = vst [vmem:[%s7929_s14 + $0x240] sm:$0xff] %v4750_v30  ;;  %v4679_v4 = vpop.f32.mrb[85].mxu0  ;;  %v4752_v36 = vpop.f32.mrb[85].mxu1  ;;  %v5101_v40 = vld [vmem:[%s7929_s14 + $0x80] sm:$0xff] (%p7068_p9)  ;;  %v5103_v30 = vld [vmem:[%s7929_s14 + $0x88] sm:$0xff] (%p7068_p9) }
 0x4a1   : > { %4915 = vst [vmem:[%s7929_s14 + $0x238] sm:$0xff] %v4679_v4  ;;  %4917 = vst [vmem:[%s7929_s14 + $0x248] sm:$0xff] %v4752_v36  ;;  %v4681_v0 = vpop.f32.mrb[86].mxu0  ;;  %v4754_v45 = vpop.f32.mrb[86].mxu1  ;;  %v5105_v4 = vld [vmem:[%s7929_s14 + $0x90] sm:$0xff] (%p7068_p9)  ;;  %v5107_v36 = vld [vmem:[%s7929_s14 + $0x98] sm:$0xff] (%p7068_p9) }
 0x4a2   : > { %4939 = vst [vmem:[%s7929_s14 + $0x2f8] sm:$0xff] %v4681_v0  ;;  %4941 = vst [vmem:[%s7929_s14 + $0x308] sm:$0xff] %v4754_v45  ;;  %v4683_v5 = vpop.f32.mrb[87].mxu0  ;;  %v4756_v42 = vpop.f32.mrb[87].mxu1  ;;  %v5109_v0 = vld [vmem:[%s7929_s14 + $0xa0] sm:$0xff] (%p7068_p9)  ;;  %v5111_v45 = vld [vmem:[%s7929_s14 + $0xa8] sm:$0xff] (%p7068_p9) }
 0x4a3   : > { %4940 = vst [vmem:[%s7929_s14 + $0x300] sm:$0xff] %v4683_v5  ;;  %4942 = vst [vmem:[%s7929_s14 + $0x310] sm:$0xff] %v4756_v42  ;;  %v5113_v5 = vld [vmem:[%s7929_s14 + $0xb0] sm:$0xff] (%p7068_p9)  ;;  %v5115_v42 = vld [vmem:[%s7929_s14 + $0xb8] sm:$0xff] (%p7068_p9) }
 0x4a4   : > { %5102 = vst [vmem:[%s9171_s11 + $0x80] sm:$0xff] (%p7068_p9), %v5101_v40  ;;  %5104 = vst [vmem:[%s9171_s11 + $0x88] sm:$0xff] (%p7068_p9), %v5103_v30  ;;  %v5229_v40 = vld [vmem:[%s7929_s14 + $0x280] sm:$0xff] (%p7068_p9)  ;;  %v5231_v30 = vld [vmem:[%s7929_s14 + $0x288] sm:$0xff] (%p7068_p9) }
 0x4a5   : > { %5106 = vst [vmem:[%s9171_s11 + $0x90] sm:$0xff] (%p7068_p9), %v5105_v4  ;;  %5108 = vst [vmem:[%s9171_s11 + $0x98] sm:$0xff] (%p7068_p9), %v5107_v36  ;;  %v5233_v4 = vld [vmem:[%s7929_s14 + $0x290] sm:$0xff] (%p7068_p9)  ;;  %v5235_v36 = vld [vmem:[%s7929_s14 + $0x298] sm:$0xff] (%p7068_p9) }
 0x4a6   : > { %5110 = vst [vmem:[%s9171_s11 + $0xa0] sm:$0xff] (%p7068_p9), %v5109_v0  ;;  %5112 = vst [vmem:[%s9171_s11 + $0xa8] sm:$0xff] (%p7068_p9), %v5111_v45  ;;  %v5237_v0 = vld [vmem:[%s7929_s14 + $0x2a0] sm:$0xff] (%p7068_p9)  ;;  %v5239_v45 = vld [vmem:[%s7929_s14 + $0x2a8] sm:$0xff] (%p7068_p9) }
 0x4a7   : > { %v4687_v44 = vpop.f32.mrb[88].mxu0  ;;  %v4760_v58 = vpop.f32.mrb[88].mxu1  ;;  %5114 = vst [vmem:[%s9171_s11 + $0xb0] sm:$0xff] (%p7068_p9), %v5113_v5  ;;  %5116 = vst [vmem:[%s9171_s11 + $0xb8] sm:$0xff] (%p7068_p9), %v5115_v42  ;;  %v5209_v3 = vld [vmem:[%s7929_s14 + $0x230] sm:$0xff] (%p7068_p9)  ;;  %v5213_v52 = vld [vmem:[%s7929_s14 + $0x240] sm:$0xff] (%p7068_p9) }
 0x4a8   : > { %4964 = vst [vmem:[%s7929_s14 + $0x3c0] sm:$0xff] %v4687_v44  ;;  %4966 = vst [vmem:[%s7929_s14 + $0x3d0] sm:$0xff] %v4760_v58  ;;  %v4689_v53 = vpop.f32.mrb[89].mxu0  ;;  %v4762_v41 = vpop.f32.mrb[89].mxu1  ;;  %v5119_v58 = vld [vmem:[%s7929_s14 + $0xc8] sm:$0xff] (%p7068_p9)  ;;  %v5211_v25 = vld [vmem:[%s7929_s14 + $0x238] sm:$0xff] (%p7068_p9) }
 0x4a9   : > { %4965 = vst [vmem:[%s7929_s14 + $0x3c8] sm:$0xff] %v4689_v53  ;;  %4967 = vst [vmem:[%s7929_s14 + $0x3d8] sm:$0xff] %v4762_v41  ;;  %v4691_v2 = vpop.f32.mrb[90].mxu0  ;;  %v4764_v57 = vpop.f32.mrb[90].mxu1  ;;  %v5121_v53 = vld [vmem:[%s7929_s14 + $0xd0] sm:$0xff] (%p7068_p9)  ;;  %v5123_v41 = vld [vmem:[%s7929_s14 + $0xd8] sm:$0xff] (%p7068_p9) }
 0x4aa   : > { %4989 = vst [vmem:[%s7929_s14 + $0x488] sm:$0xff] %v4691_v2  ;;  %4991 = vst [vmem:[%s7929_s14 + $0x498] sm:$0xff] %v4764_v57  ;;  %v4693_v50 = vpop.f32.mrb[91].mxu0  ;;  %v4766_v23 = vpop.f32.mrb[91].mxu1  ;;  %v5125_v2 = vld [vmem:[%s7929_s14 + $0xe0] sm:$0xff] (%p7068_p9)  ;;  %v5127_v57 = vld [vmem:[%s7929_s14 + $0xe8] sm:$0xff] (%p7068_p9) }
 0x4ab   : > { %4990 = vst [vmem:[%s7929_s14 + $0x490] sm:$0xff] %v4693_v50  ;;  %4992 = vst [vmem:[%s7929_s14 + $0x4a0] sm:$0xff] %v4766_v23  ;;  %v5129_v50 = vld [vmem:[%s7929_s14 + $0xf0] sm:$0xff] (%p7068_p9)  ;;  %v5131_v23 = vld [vmem:[%s7929_s14 + $0xf8] sm:$0xff] (%p7068_p9) }
 0x4ac   : > { %5120 = vst [vmem:[%s9171_s11 + $0x190] sm:$0xff] (%p7068_p9), %v5119_v58  ;;  %5122 = vst [vmem:[%s9171_s11 + $0x198] sm:$0xff] (%p7068_p9), %v5121_v53  ;;  %v5215_v59 = vld [vmem:[%s7929_s14 + $0x248] sm:$0xff] (%p7068_p9)  ;;  %v5241_v5 = vld [vmem:[%s7929_s14 + $0x2b0] sm:$0xff] (%p7068_p9) }
 0x4ad   : > { %5124 = vst [vmem:[%s9171_s11 + $0x1a0] sm:$0xff] (%p7068_p9), %v5123_v41  ;;  %5126 = vst [vmem:[%s9171_s11 + $0x1a8] sm:$0xff] (%p7068_p9), %v5125_v2  ;;  %v5243_v42 = vld [vmem:[%s7929_s14 + $0x2b8] sm:$0xff] (%p7068_p9)  ;;  %v5247_v58 = vld [vmem:[%s7929_s14 + $0x2c8] sm:$0xff] (%p7068_p9) }
 0x4ae   : > { %5128 = vst [vmem:[%s9171_s11 + $0x1b0] sm:$0xff] (%p7068_p9), %v5127_v57  ;;  %5130 = vst [vmem:[%s9171_s11 + $0x1b8] sm:$0xff] (%p7068_p9), %v5129_v50  ;;  %v5249_v53 = vld [vmem:[%s7929_s14 + $0x2d0] sm:$0xff] (%p7068_p9)  ;;  %v5251_v41 = vld [vmem:[%s7929_s14 + $0x2d8] sm:$0xff] (%p7068_p9) }
 0x4af   : > { %v4697_v62 = vpop.f32.mrb[92].mxu0  ;;  %v4770_v31 = vpop.f32.mrb[92].mxu1  ;;  %5132 = vst [vmem:[%s9171_s11 + $0x1c0] sm:$0xff] (%p7068_p9), %v5131_v23  ;;  %5210 = vst [vmem:[%s9171_s11 + $0x3c0] sm:$0xff] (%p7068_p9), %v5209_v3  ;;  %v5253_v2 = vld [vmem:[%s7929_s14 + $0x2e0] sm:$0xff] (%p7068_p9)  ;;  %v5255_v57 = vld [vmem:[%s7929_s14 + $0x2e8] sm:$0xff] (%p7068_p9) }
 0x4b0   : > { %5014 = vst [vmem:[%s7929_s14 + $0x550] sm:$0xff] %v4697_v62  ;;  %5016 = vst [vmem:[%s7929_s14 + $0x560] sm:$0xff] %v4770_v31  ;;  %v4699_v47 = vpop.f32.mrb[93].mxu0  ;;  %v4772_v12 = vpop.f32.mrb[93].mxu1  ;;  %v5133_v62 = vld [vmem:[%s7929_s14 + $0x100] sm:$0xff] (%p7068_p9)  ;;  %v5135_v31 = vld [vmem:[%s7929_s14 + $0x108] sm:$0xff] (%p7068_p9) }
 0x4b1   : > { %5015 = vst [vmem:[%s7929_s14 + $0x558] sm:$0xff] %v4699_v47  ;;  %5017 = vst [vmem:[%s7929_s14 + $0x568] sm:$0xff] %v4772_v12  ;;  %v4701_v16 = vpop.f32.mrb[94].mxu0  ;;  %v4774_v13 = vpop.f32.mrb[94].mxu1  ;;  %v5137_v47 = vld [vmem:[%s7929_s14 + $0x110] sm:$0xff] (%p7068_p9)  ;;  %v5139_v12 = vld [vmem:[%s7929_s14 + $0x118] sm:$0xff] (%p7068_p9) }
 0x4b2   : > { %5039 = vst [vmem:[%s7929_s14 + $0x618] sm:$0xff] %v4701_v16  ;;  %5041 = vst [vmem:[%s7929_s14 + $0x628] sm:$0xff] %v4774_v13  ;;  %v4703_v48 = vpop.f32.mrb[95].mxu0  ;;  %v4776_v14 = vpop.f32.mrb[95].mxu1  ;;  %v5141_v16 = vld [vmem:[%s7929_s14 + $0x120] sm:$0xff] (%p7068_p9)  ;;  %v5143_v13 = vld [vmem:[%s7929_s14 + $0x128] sm:$0xff] (%p7068_p9) }
 0x4b3   : > { %5040 = vst [vmem:[%s7929_s14 + $0x620] sm:$0xff] %v4703_v48  ;;  %5042 = vst [vmem:[%s7929_s14 + $0x630] sm:$0xff] %v4776_v14  ;;  %v5145_v48 = vld [vmem:[%s7929_s14 + $0x130] sm:$0xff] (%p7068_p9)  ;;  %v5147_v14 = vld [vmem:[%s7929_s14 + $0x138] sm:$0xff] (%p7068_p9) }
 0x4b4   : > { %5134 = vst [vmem:[%s9171_s11 + $0x1c8] sm:$0xff] (%p7068_p9), %v5133_v62  ;;  %5136 = vst [vmem:[%s9171_s11 + $0x1d0] sm:$0xff] (%p7068_p9), %v5135_v31  ;;  %v5257_v50 = vld [vmem:[%s7929_s14 + $0x2f0] sm:$0xff] (%p7068_p9)  ;;  %v5259_v23 = vld [vmem:[%s7929_s14 + $0x2f8] sm:$0xff] (%p7068_p9) }
 0x4b5   : > { %5138 = vst [vmem:[%s9171_s11 + $0x1d8] sm:$0xff] (%p7068_p9), %v5137_v47  ;;  %5140 = vst [vmem:[%s9171_s11 + $0x1e0] sm:$0xff] (%p7068_p9), %v5139_v12  ;;  %v5261_v62 = vld [vmem:[%s7929_s14 + $0x300] sm:$0xff] (%p7068_p9)  ;;  %v5263_v31 = vld [vmem:[%s7929_s14 + $0x308] sm:$0xff] (%p7068_p9) }
 0x4b6   : > { %5142 = vst [vmem:[%s9171_s11 + $0x1e8] sm:$0xff] (%p7068_p9), %v5141_v16  ;;  %5144 = vst [vmem:[%s9171_s11 + $0x1f0] sm:$0xff] (%p7068_p9), %v5143_v13  ;;  %v5265_v47 = vld [vmem:[%s7929_s14 + $0x310] sm:$0xff] (%p7068_p9)  ;;  %v5269_v16 = vld [vmem:[%s7929_s14 + $0x320] sm:$0xff] (%p7068_p9) }
 0x4b7   : > { %v6056_v24 = vpop.f32.mrb[96].mxu0  ;;  %v6068_v49 = vpop.f32.mrb[96].mxu1  ;;  %5146 = vst [vmem:[%s9171_s11 + $0x1f8] sm:$0xff] (%p7068_p9), %v5145_v48  ;;  %5148 = vst [vmem:[%s9171_s11 + $0x200] sm:$0xff] (%p7068_p9), %v5147_v14  ;;  %v5271_v13 = vld [vmem:[%s7929_s14 + $0x328] sm:$0xff] (%p7068_p9)  ;;  %v5273_v48 = vld [vmem:[%s7929_s14 + $0x330] sm:$0xff] (%p7068_p9) }
 0x4b8   : > { %v6057_v17 = vpop.f32.mrb[97].mxu0  ;;  %v6069_v54 = vpop.f32.mrb[97].mxu1  ;;  %5212 = vst [vmem:[%s9171_s11 + $0x3c8] sm:$0xff] (%p7068_p9), %v5211_v25  ;;  %5214 = vst [vmem:[%s9171_s11 + $0x3d0] sm:$0xff] (%p7068_p9), %v5213_v52  ;;  %v5275_v14 = vld [vmem:[%s7929_s14 + $0x338] sm:$0xff] (%p7068_p9)  ;;  %v5337_v3 = vld [vmem:[%s7929_s14 + $0x430] sm:$0xff] (%p7068_p9) }
 0x4b9   : > { %v6058_v18 = vadd.f32 %v6057_v17, %v6056_v24  ;;  %v6070_v9 = vadd.f32 %v6069_v54, %v6068_v49  ;;  %v6059_v15 = vpop.f32.mrb[98].mxu0  ;;  %v6071_v55 = vpop.f32.mrb[98].mxu1  ;;  %v5149_v24 = vld [vmem:[%s7929_s14 + $0x140] sm:$0xff] (%p7068_p9)  ;;  %v5151_v49 = vld [vmem:[%s7929_s14 + $0x148] sm:$0xff] (%p7068_p9)  ;;  %v5153_v17 = vld [vmem:[%s7929_s14 + $0x150] sm:$0xff] (%p7068_p9)  ;;  %5216 = vst [vmem:[%s9171_s11 + $0x3d8] sm:$0xff] (%p7068_p9), %v5215_v59 }
 0x4ba   : > { %v6060_v20 = vpop.f32.mrb[99].mxu0  ;;  %v6072_v21 = vpop.f32.mrb[99].mxu1  ;;  %5150 = vst [vmem:[%s9171_s11 + $0x208] sm:$0xff] (%p7068_p9), %v5149_v24  ;;  %5152 = vst [vmem:[%s9171_s11 + $0x210] sm:$0xff] (%p7068_p9), %v5151_v49  ;;  %v5155_v54 = vld [vmem:[%s7929_s14 + $0x158] sm:$0xff] (%p7068_p9)  ;;  %v5277_v24 = vld [vmem:[%s7929_s14 + $0x340] sm:$0xff] (%p7068_p9) }
 0x4bb   : > { %4868 = vst [vmem:[%s7929_s14 + $0xc0] sm:$0xff] %v6058_v18  ;;  %4968 = vst [vmem:[%s7929_s14 + $0x3e0] sm:$0xff] %v6070_v9  ;;  %v6061_v6 = vadd.f32 %v6060_v20, %v6059_v15  ;;  %v6073_v56 = vadd.f32 %v6072_v21, %v6071_v55  ;;  %v5157_v18 = vld [vmem:[%s7929_s14 + $0x160] sm:$0xff] (%p7068_p9)  ;;  %v5159_v9 = vld [vmem:[%s7929_s14 + $0x168] sm:$0xff] (%p7068_p9) }
 0x4bc   : > { %5154 = vst [vmem:[%s9171_s11 + $0x218] sm:$0xff] (%p7068_p9), %v5153_v17  ;;  %5156 = vst [vmem:[%s9171_s11 + $0x220] sm:$0xff] (%p7068_p9), %v5155_v54  ;;  %v5161_v15 = vld [vmem:[%s7929_s14 + $0x170] sm:$0xff] (%p7068_p9)  ;;  %v5163_v55 = vld [vmem:[%s7929_s14 + $0x178] sm:$0xff] (%p7068_p9) }
 0x4bd   : > { %4893 = vst [vmem:[%s7929_s14 + $0x188] sm:$0xff] %v6061_v6  ;;  %4993 = vst [vmem:[%s7929_s14 + $0x4a8] sm:$0xff] %v6073_v56  ;;  %v5165_v20 = vld [vmem:[%s7929_s14 + $0x180] sm:$0xff] (%p7068_p9)  ;;  %v5169_v6 = vld [vmem:[%s7929_s14 + $0x190] sm:$0xff] (%p7068_p9) }
 0x4be   : > { %5158 = vst [vmem:[%s9171_s11 + $0x228] sm:$0xff] (%p7068_p9), %v5157_v18  ;;  %5160 = vst [vmem:[%s9171_s11 + $0x230] sm:$0xff] (%p7068_p9), %v5159_v9  ;;  %v5171_v56 = vld [vmem:[%s7929_s14 + $0x198] sm:$0xff] (%p7068_p9)  ;;  %v5279_v49 = vld [vmem:[%s7929_s14 + $0x348] sm:$0xff] (%p7068_p9) }
 0x4bf   : > { %v6062_v35 = vpop.f32.mrb[100].mxu0  ;;  %v6074_v7 = vpop.f32.mrb[100].mxu1  ;;  %5050 = sbr.rel (!%p7068_p9) target bundleno = 1286 (0x506), region = 70  ;;  %5162 = vst [vmem:[%s9171_s11 + $0x238] sm:$0xff] (%p7068_p9), %v5161_v15  ;;  %5164 = vst [vmem:[%s9171_s11 + $0x240] sm:$0xff] (%p7068_p9), %v5163_v55  ;;  %v5281_v17 = vld [vmem:[%s7929_s14 + $0x350] sm:$0xff] (%p7068_p9) }
 0x4c0   : > { %v6063_v26 = vpop.f32.mrb[101].mxu0  ;;  %v6075_v27 = vpop.f32.mrb[101].mxu1  ;;  %5166 = vst [vmem:[%s9171_s11 + $0x248] sm:$0xff] (%p7068_p9), %v5165_v20  ;;  %5170 = vst [vmem:[%s9171_s11 + $0x320] sm:$0xff] (%p7068_p9), %v5169_v6  ;;  %v5283_v54 = vld [vmem:[%s7929_s14 + $0x358] sm:$0xff] (%p7068_p9)  ;;  %v5285_v18 = vld [vmem:[%s7929_s14 + $0x360] sm:$0xff] (%p7068_p9) }
 0x4c1   : > { %v6064_v28 = vadd.f32 %v6063_v26, %v6062_v35  ;;  %v6076_v29 = vadd.f32 %v6075_v27, %v6074_v7  ;;  %v6065_v11 = vpop.f32.mrb[102].mxu0  ;;  %v6077_v32 = vpop.f32.mrb[102].mxu1  ;;  %v5173_v35 = vld [vmem:[%s7929_s14 + $0x1a0] sm:$0xff] (%p7068_p9)  ;;  %v5175_v7 = vld [vmem:[%s7929_s14 + $0x1a8] sm:$0xff] (%p7068_p9)  ;;  %5172 = vst [vmem:[%s9171_s11 + $0x328] sm:$0xff] (%p7068_p9), %v5171_v56  ;;  %v5177_v26 = vld [vmem:[%s7929_s14 + $0x1b0] sm:$0xff] (%p7068_p9) }
 0x4c2   : > { %v6066_v33 = vpop.f32.mrb[103].mxu0  ;;  %v6078_v63 = vpop.f32.mrb[103].mxu1  ;;  %v5117_v44 = vld [vmem:[%s7929_s14 + $0xc0] sm:$0xff] (%p7068_p9)  ;;  %5174 = vst [vmem:[%s9171_s11 + $0x330] sm:$0xff] (%p7068_p9), %v5173_v35  ;;  %5176 = vst [vmem:[%s9171_s11 + $0x338] sm:$0xff] (%p7068_p9), %v5175_v7  ;;  %v5179_v27 = vld [vmem:[%s7929_s14 + $0x1b8] sm:$0xff] (%p7068_p9) }
 0x4c3   : > { %4918 = vst [vmem:[%s7929_s14 + $0x250] sm:$0xff] %v6064_v28  ;;  %5018 = vst [vmem:[%s7929_s14 + $0x570] sm:$0xff] %v6076_v29  ;;  %v6067_v34 = vadd.f32 %v6066_v33, %v6065_v11  ;;  %v6079_v1 = vadd.f32 %v6078_v63, %v6077_v32  ;;  %v5181_v28 = vld [vmem:[%s7929_s14 + $0x1c0] sm:$0xff] (%p7068_p9)  ;;  %v5183_v29 = vld [vmem:[%s7929_s14 + $0x1c8] sm:$0xff] (%p7068_p9) }
 0x4c4   : > { %5118 = vst [vmem:[%s9171_s11 + $0xc0] sm:$0xff] (%p7068_p9), %v5117_v44  ;;  %v5167_v21 = vld [vmem:[%s7929_s14 + $0x188] sm:$0xff] (%p7068_p9)  ;;  %5178 = vst [vmem:[%s9171_s11 + $0x340] sm:$0xff] (%p7068_p9), %v5177_v26  ;;  %v5185_v11 = vld [vmem:[%s7929_s14 + $0x1d0] sm:$0xff] (%p7068_p9) }
 0x4c5   : > { %4943 = vst [vmem:[%s7929_s14 + $0x318] sm:$0xff] %v6067_v34  ;;  %5043 = vst [vmem:[%s7929_s14 + $0x638] sm:$0xff] %v6079_v1  ;;  %v5187_v32 = vld [vmem:[%s7929_s14 + $0x1d8] sm:$0xff] (%p7068_p9)  ;;  %v5189_v33 = vld [vmem:[%s7929_s14 + $0x1e0] sm:$0xff] (%p7068_p9) }
 0x4c6   : > { %5168 = vst [vmem:[%s9171_s11 + $0x250] sm:$0xff] %v5167_v21  ;;  %5180 = vst [vmem:[%s9171_s11 + $0x348] sm:$0xff] %v5179_v27  ;;  %v5191_v63 = vld [vmem:[%s7929_s14 + $0x1e8] sm:$0xff]  ;;  %v5193_v34 = vld [vmem:[%s7929_s14 + $0x1f0] sm:$0xff] }
 0x4c7   : > { %5182 = vst [vmem:[%s9171_s11 + $0x350] sm:$0xff] %v5181_v28  ;;  %5184 = vst [vmem:[%s9171_s11 + $0x358] sm:$0xff] %v5183_v29  ;;  %v5195_v1 = vld [vmem:[%s7929_s14 + $0x1f8] sm:$0xff]  ;;  %v5245_v44 = vld [vmem:[%s7929_s14 + $0x2c0] sm:$0xff] }
 0x4c8   : > { %5186 = vst [vmem:[%s9171_s11 + $0x360] sm:$0xff] %v5185_v11  ;;  %5188 = vst [vmem:[%s9171_s11 + $0x368] sm:$0xff] %v5187_v32  ;;  %v5287_v9 = vld [vmem:[%s7929_s14 + $0x368] sm:$0xff]  ;;  %v5289_v15 = vld [vmem:[%s7929_s14 + $0x370] sm:$0xff] }
 0x4c9   : > { %5190 = vst [vmem:[%s9171_s11 + $0x370] sm:$0xff] %v5189_v33  ;;  %5192 = vst [vmem:[%s9171_s11 + $0x378] sm:$0xff] %v5191_v63  ;;  %v5291_v55 = vld [vmem:[%s7929_s14 + $0x378] sm:$0xff]  ;;  %v5293_v20 = vld [vmem:[%s7929_s14 + $0x380] sm:$0xff] }
 0x4ca   : > { %5194 = vst [vmem:[%s9171_s11 + $0x380] sm:$0xff] %v5193_v34  ;;  %5196 = vst [vmem:[%s9171_s11 + $0x388] sm:$0xff] %v5195_v1  ;;  %v5217_v10 = vld [vmem:[%s7929_s14 + $0x250] sm:$0xff]  ;;  %v5295_v21 = vld [vmem:[%s7929_s14 + $0x388] sm:$0xff] }
 0x4cb   : > { %5218 = vst [vmem:[%s9171_s11 + $0x3e0] sm:$0xff] %v5217_v10  ;;  %5220 = vst [vmem:[%s9171_s11 + $0x4b0] sm:$0xff] %v5219_v60  ;;  %v5297_v6 = vld [vmem:[%s7929_s14 + $0x390] sm:$0xff]  ;;  %v5299_v56 = vld [vmem:[%s7929_s14 + $0x398] sm:$0xff] }
 0x4cc   : > { %5222 = vst [vmem:[%s9171_s11 + $0x4b8] sm:$0xff] %v5221_v61  ;;  %5224 = vst [vmem:[%s9171_s11 + $0x4c0] sm:$0xff] %v5223_v8  ;;  %v5267_v12 = vld [vmem:[%s7929_s14 + $0x318] sm:$0xff]  ;;  %v5301_v35 = vld [vmem:[%s7929_s14 + $0x3a0] sm:$0xff] }
 0x4cd   : > { %5226 = vst [vmem:[%s9171_s11 + $0x4c8] sm:$0xff] %v5225_v22  ;;  %5228 = vst [vmem:[%s9171_s11 + $0x4d0] sm:$0xff] %v5227_v39  ;;  %v5303_v7 = vld [vmem:[%s7929_s14 + $0x3a8] sm:$0xff]  ;;  %v5305_v26 = vld [vmem:[%s7929_s14 + $0x3b0] sm:$0xff] }
 0x4ce   : > { %5230 = vst [vmem:[%s9171_s11 + $0x4d8] sm:$0xff] %v5229_v40  ;;  %5232 = vst [vmem:[%s9171_s11 + $0x4e0] sm:$0xff] %v5231_v30  ;;  %v5307_v27 = vld [vmem:[%s7929_s14 + $0x3b8] sm:$0xff]  ;;  %v5309_v28 = vld [vmem:[%s7929_s14 + $0x3c0] sm:$0xff] }
 0x4cf   : > { %5234 = vst [vmem:[%s9171_s11 + $0x4e8] sm:$0xff] %v5233_v4  ;;  %5236 = vst [vmem:[%s9171_s11 + $0x4f0] sm:$0xff] %v5235_v36  ;;  %v5311_v29 = vld [vmem:[%s7929_s14 + $0x3c8] sm:$0xff]  ;;  %v5313_v11 = vld [vmem:[%s7929_s14 + $0x3d0] sm:$0xff] }
 0x4d0   : > { %5238 = vst [vmem:[%s9171_s11 + $0x4f8] sm:$0xff] %v5237_v0  ;;  %5240 = vst [vmem:[%s9171_s11 + $0x500] sm:$0xff] %v5239_v45  ;;  %v5315_v32 = vld [vmem:[%s7929_s14 + $0x3d8] sm:$0xff]  ;;  %v5317_v33 = vld [vmem:[%s7929_s14 + $0x3e0] sm:$0xff] }
 0x4d1   : > { %5242 = vst [vmem:[%s9171_s11 + $0x508] sm:$0xff] %v5241_v5  ;;  %5244 = vst [vmem:[%s9171_s11 + $0x510] sm:$0xff] %v5243_v42  ;;  %v5319_v63 = vld [vmem:[%s7929_s14 + $0x3e8] sm:$0xff]  ;;  %v5321_v34 = vld [vmem:[%s7929_s14 + $0x3f0] sm:$0xff] }
 0x4d2   : > { %5246 = vst [vmem:[%s9171_s11 + $0x518] sm:$0xff] %v5245_v44  ;;  %5248 = vst [vmem:[%s9171_s11 + $0x520] sm:$0xff] %v5247_v58  ;;  %v5323_v1 = vld [vmem:[%s7929_s14 + $0x3f8] sm:$0xff]  ;;  %v5341_v52 = vld [vmem:[%s7929_s14 + $0x440] sm:$0xff] }
 0x4d3   : > { %5250 = vst [vmem:[%s9171_s11 + $0x528] sm:$0xff] %v5249_v53  ;;  %5252 = vst [vmem:[%s9171_s11 + $0x530] sm:$0xff] %v5251_v41  ;;  %v5339_v25 = vld [vmem:[%s7929_s14 + $0x438] sm:$0xff]  ;;  %v5343_v59 = vld [vmem:[%s7929_s14 + $0x448] sm:$0xff] }
 0x4d4   : > { %5254 = vst [vmem:[%s9171_s11 + $0x538] sm:$0xff] %v5253_v2  ;;  %5256 = vst [vmem:[%s9171_s11 + $0x540] sm:$0xff] %v5255_v57  ;;  %v5345_v10 = vld [vmem:[%s7929_s14 + $0x450] sm:$0xff]  ;;  %v5347_v60 = vld [vmem:[%s7929_s14 + $0x458] sm:$0xff] }
 0x4d5   : > { %5258 = vst [vmem:[%s9171_s11 + $0x548] sm:$0xff] %v5257_v50  ;;  %5260 = vst [vmem:[%s9171_s11 + $0x550] sm:$0xff] %v5259_v23  ;;  %v5349_v61 = vld [vmem:[%s7929_s14 + $0x460] sm:$0xff]  ;;  %v5351_v8 = vld [vmem:[%s7929_s14 + $0x468] sm:$0xff] }
 0x4d6   : > { %5262 = vst [vmem:[%s9171_s11 + $0x558] sm:$0xff] %v5261_v62  ;;  %5264 = vst [vmem:[%s9171_s11 + $0x560] sm:$0xff] %v5263_v31  ;;  %v5353_v22 = vld [vmem:[%s7929_s14 + $0x470] sm:$0xff]  ;;  %v5355_v39 = vld [vmem:[%s7929_s14 + $0x478] sm:$0xff] }
 0x4d7   : > { %5266 = vst [vmem:[%s9171_s11 + $0x568] sm:$0xff] %v5265_v47  ;;  %5268 = vst [vmem:[%s9171_s11 + $0x570] sm:$0xff] %v5267_v12  ;;  %v5357_v40 = vld [vmem:[%s7929_s14 + $0x480] sm:$0xff]  ;;  %v5359_v30 = vld [vmem:[%s7929_s14 + $0x488] sm:$0xff] }
 0x4d8   : > { %5270 = vst [vmem:[%s9171_s11 + $0x640] sm:$0xff] %v5269_v16  ;;  %5272 = vst [vmem:[%s9171_s11 + $0x648] sm:$0xff] %v5271_v13  ;;  %v5361_v4 = vld [vmem:[%s7929_s14 + $0x490] sm:$0xff]  ;;  %v5363_v36 = vld [vmem:[%s7929_s14 + $0x498] sm:$0xff] }
 0x4d9   : > { %5274 = vst [vmem:[%s9171_s11 + $0x650] sm:$0xff] %v5273_v48  ;;  %5276 = vst [vmem:[%s9171_s11 + $0x658] sm:$0xff] %v5275_v14  ;;  %v5365_v0 = vld [vmem:[%s7929_s14 + $0x4a0] sm:$0xff]  ;;  %v5367_v45 = vld [vmem:[%s7929_s14 + $0x4a8] sm:$0xff] }
 0x4da   : > { %5278 = vst [vmem:[%s9171_s11 + $0x660] sm:$0xff] %v5277_v24  ;;  %5280 = vst [vmem:[%s9171_s11 + $0x668] sm:$0xff] %v5279_v49  ;;  %v5369_v5 = vld [vmem:[%s7929_s14 + $0x4b0] sm:$0xff]  ;;  %v5371_v42 = vld [vmem:[%s7929_s14 + $0x4b8] sm:$0xff] }
 0x4db   : > { %5282 = vst [vmem:[%s9171_s11 + $0x670] sm:$0xff] %v5281_v17  ;;  %5284 = vst [vmem:[%s9171_s11 + $0x678] sm:$0xff] %v5283_v54  ;;  %v5373_v44 = vld [vmem:[%s7929_s14 + $0x4c0] sm:$0xff]  ;;  %v5375_v58 = vld [vmem:[%s7929_s14 + $0x4c8] sm:$0xff] }
 0x4dc   : > { %5286 = vst [vmem:[%s9171_s11 + $0x680] sm:$0xff] %v5285_v18  ;;  %5288 = vst [vmem:[%s9171_s11 + $0x688] sm:$0xff] %v5287_v9  ;;  %v5377_v53 = vld [vmem:[%s7929_s14 + $0x4d0] sm:$0xff]  ;;  %v5379_v41 = vld [vmem:[%s7929_s14 + $0x4d8] sm:$0xff] }
 0x4dd   : > { %5290 = vst [vmem:[%s9171_s11 + $0x690] sm:$0xff] %v5289_v15  ;;  %5292 = vst [vmem:[%s9171_s11 + $0x698] sm:$0xff] %v5291_v55  ;;  %v5381_v2 = vld [vmem:[%s7929_s14 + $0x4e0] sm:$0xff]  ;;  %v5383_v57 = vld [vmem:[%s7929_s14 + $0x4e8] sm:$0xff] }
 0x4de   : > { %5294 = vst [vmem:[%s9171_s11 + $0x6a0] sm:$0xff] %v5293_v20  ;;  %5296 = vst [vmem:[%s9171_s11 + $0x6a8] sm:$0xff] %v5295_v21  ;;  %v5385_v50 = vld [vmem:[%s7929_s14 + $0x4f0] sm:$0xff]  ;;  %v5387_v23 = vld [vmem:[%s7929_s14 + $0x4f8] sm:$0xff] }
 0x4df   : > { %5298 = vst [vmem:[%s9171_s11 + $0x6b0] sm:$0xff] %v5297_v6  ;;  %5300 = vst [vmem:[%s9171_s11 + $0x6b8] sm:$0xff] %v5299_v56  ;;  %v5389_v62 = vld [vmem:[%s7929_s14 + $0x500] sm:$0xff]  ;;  %v5391_v31 = vld [vmem:[%s7929_s14 + $0x508] sm:$0xff] }
 0x4e0   : > { %5302 = vst [vmem:[%s9171_s11 + $0x6c0] sm:$0xff] %v5301_v35  ;;  %5304 = vst [vmem:[%s9171_s11 + $0x6c8] sm:$0xff] %v5303_v7  ;;  %v5393_v47 = vld [vmem:[%s7929_s14 + $0x510] sm:$0xff]  ;;  %v5395_v12 = vld [vmem:[%s7929_s14 + $0x518] sm:$0xff] }
 0x4e1   : > { %5306 = vst [vmem:[%s9171_s11 + $0x6d0] sm:$0xff] %v5305_v26  ;;  %5308 = vst [vmem:[%s9171_s11 + $0x6d8] sm:$0xff] %v5307_v27  ;;  %v5397_v16 = vld [vmem:[%s7929_s14 + $0x520] sm:$0xff]  ;;  %v5399_v13 = vld [vmem:[%s7929_s14 + $0x528] sm:$0xff] }
 0x4e2   : > { %5310 = vst [vmem:[%s9171_s11 + $0x6e0] sm:$0xff] %v5309_v28  ;;  %5312 = vst [vmem:[%s9171_s11 + $0x6e8] sm:$0xff] %v5311_v29  ;;  %v5401_v48 = vld [vmem:[%s7929_s14 + $0x530] sm:$0xff]  ;;  %v5403_v14 = vld [vmem:[%s7929_s14 + $0x538] sm:$0xff] }
 0x4e3   : > { %5314 = vst [vmem:[%s9171_s11 + $0x6f0] sm:$0xff] %v5313_v11  ;;  %5316 = vst [vmem:[%s9171_s11 + $0x6f8] sm:$0xff] %v5315_v32  ;;  %v5405_v24 = vld [vmem:[%s7929_s14 + $0x540] sm:$0xff]  ;;  %v5407_v49 = vld [vmem:[%s7929_s14 + $0x548] sm:$0xff] }
 0x4e4   : > { %5318 = vst [vmem:[%s9171_s11 + $0x700] sm:$0xff] %v5317_v33  ;;  %5320 = vst [vmem:[%s9171_s11 + $0x7d0] sm:$0xff] %v5319_v63  ;;  %v5409_v17 = vld [vmem:[%s7929_s14 + $0x550] sm:$0xff]  ;;  %v5411_v54 = vld [vmem:[%s7929_s14 + $0x558] sm:$0xff] }
 0x4e5   : > { %5322 = vst [vmem:[%s9171_s11 + $0x7d8] sm:$0xff] %v5321_v34  ;;  %5324 = vst [vmem:[%s9171_s11 + $0x7e0] sm:$0xff] %v5323_v1  ;;  %v5413_v18 = vld [vmem:[%s7929_s14 + $0x560] sm:$0xff]  ;;  %v5415_v9 = vld [vmem:[%s7929_s14 + $0x568] sm:$0xff] }
 0x4e6   : > { %5338 = vst [vmem:[%s9171_s11 + $0x818] sm:$0xff] %v5337_v3  ;;  %5340 = vst [vmem:[%s9171_s11 + $0x820] sm:$0xff] %v5339_v25  ;;  %v5417_v15 = vld [vmem:[%s7929_s14 + $0x570] sm:$0xff]  ;;  %v5419_v55 = vld [vmem:[%s7929_s14 + $0x578] sm:$0xff] }
 0x4e7   : > { %5342 = vst [vmem:[%s9171_s11 + $0x828] sm:$0xff] %v5341_v52  ;;  %5344 = vst [vmem:[%s9171_s11 + $0x830] sm:$0xff] %v5343_v59  ;;  %v5421_v20 = vld [vmem:[%s7929_s14 + $0x580] sm:$0xff]  ;;  %v5423_v21 = vld [vmem:[%s7929_s14 + $0x588] sm:$0xff] }
 0x4e8   : > { %5346 = vst [vmem:[%s9171_s11 + $0x838] sm:$0xff] %v5345_v10  ;;  %5348 = vst [vmem:[%s9171_s11 + $0x840] sm:$0xff] %v5347_v60  ;;  %v5425_v6 = vld [vmem:[%s7929_s14 + $0x590] sm:$0xff]  ;;  %v5427_v56 = vld [vmem:[%s7929_s14 + $0x598] sm:$0xff] }
 0x4e9   : > { %5350 = vst [vmem:[%s9171_s11 + $0x848] sm:$0xff] %v5349_v61  ;;  %5352 = vst [vmem:[%s9171_s11 + $0x850] sm:$0xff] %v5351_v8  ;;  %v5429_v35 = vld [vmem:[%s7929_s14 + $0x5a0] sm:$0xff]  ;;  %v5431_v7 = vld [vmem:[%s7929_s14 + $0x5a8] sm:$0xff] }
 0x4ea   : > { %5354 = vst [vmem:[%s9171_s11 + $0x858] sm:$0xff] %v5353_v22  ;;  %5356 = vst [vmem:[%s9171_s11 + $0x860] sm:$0xff] %v5355_v39  ;;  %v5433_v26 = vld [vmem:[%s7929_s14 + $0x5b0] sm:$0xff]  ;;  %v5435_v27 = vld [vmem:[%s7929_s14 + $0x5b8] sm:$0xff] }
 0x4eb   : > { %5358 = vst [vmem:[%s9171_s11 + $0x868] sm:$0xff] %v5357_v40  ;;  %5360 = vst [vmem:[%s9171_s11 + $0x870] sm:$0xff] %v5359_v30  ;;  %v5437_v28 = vld [vmem:[%s7929_s14 + $0x5c0] sm:$0xff]  ;;  %v5439_v29 = vld [vmem:[%s7929_s14 + $0x5c8] sm:$0xff] }
 0x4ec   : > { %5362 = vst [vmem:[%s9171_s11 + $0x878] sm:$0xff] %v5361_v4  ;;  %5364 = vst [vmem:[%s9171_s11 + $0x880] sm:$0xff] %v5363_v36  ;;  %v5441_v11 = vld [vmem:[%s7929_s14 + $0x5d0] sm:$0xff]  ;;  %v5443_v32 = vld [vmem:[%s7929_s14 + $0x5d8] sm:$0xff] }
 0x4ed   : > { %5366 = vst [vmem:[%s9171_s11 + $0x888] sm:$0xff] %v5365_v0  ;;  %5368 = vst [vmem:[%s9171_s11 + $0x890] sm:$0xff] %v5367_v45  ;;  %v5445_v33 = vld [vmem:[%s7929_s14 + $0x5e0] sm:$0xff]  ;;  %v5447_v63 = vld [vmem:[%s7929_s14 + $0x5e8] sm:$0xff] }
 0x4ee   : > { %5370 = vst [vmem:[%s9171_s11 + $0x960] sm:$0xff] %v5369_v5  ;;  %5372 = vst [vmem:[%s9171_s11 + $0x968] sm:$0xff] %v5371_v42  ;;  %v5449_v34 = vld [vmem:[%s7929_s14 + $0x5f0] sm:$0xff]  ;;  %v5451_v1 = vld [vmem:[%s7929_s14 + $0x5f8] sm:$0xff] }
 0x4ef   : > { %5374 = vst [vmem:[%s9171_s11 + $0x970] sm:$0xff] %v5373_v44  ;;  %5376 = vst [vmem:[%s9171_s11 + $0x978] sm:$0xff] %v5375_v58  ;;  %v5459_v43 = vld [vmem:[%s7929_s14 + $0x618] sm:$0xff]  ;;  %v5461_v46 = vld [vmem:[%s7929_s14 + $0x620] sm:$0xff] }
 0x4f0   : > { %5378 = vst [vmem:[%s9171_s11 + $0x980] sm:$0xff] %v5377_v53  ;;  %5380 = vst [vmem:[%s9171_s11 + $0x988] sm:$0xff] %v5379_v41  ;;  %v5463_v51 = vld [vmem:[%s7929_s14 + $0x628] sm:$0xff]  ;;  %v5465_v3 = vld [vmem:[%s7929_s14 + $0x630] sm:$0xff] }
 0x4f1   : > { %5382 = vst [vmem:[%s9171_s11 + $0x990] sm:$0xff] %v5381_v2  ;;  %5384 = vst [vmem:[%s9171_s11 + $0x998] sm:$0xff] %v5383_v57  ;;  %v5467_v25 = vld [vmem:[%s7929_s14 + $0x638] sm:$0xff] }
 0x4f2   : > { %5386 = vst [vmem:[%s9171_s11 + $0x9a0] sm:$0xff] %v5385_v50  ;;  %5388 = vst [vmem:[%s9171_s11 + $0x9a8] sm:$0xff] %v5387_v23 }
 0x4f3   : > { %5390 = vst [vmem:[%s9171_s11 + $0x9b0] sm:$0xff] %v5389_v62  ;;  %5392 = vst [vmem:[%s9171_s11 + $0x9b8] sm:$0xff] %v5391_v31 }
 0x4f4   : > { %5394 = vst [vmem:[%s9171_s11 + $0x9c0] sm:$0xff] %v5393_v47  ;;  %5396 = vst [vmem:[%s9171_s11 + $0x9c8] sm:$0xff] %v5395_v12 }
 0x4f5   : > { %5398 = vst [vmem:[%s9171_s11 + $0x9d0] sm:$0xff] %v5397_v16  ;;  %5400 = vst [vmem:[%s9171_s11 + $0x9d8] sm:$0xff] %v5399_v13 }
 0x4f6   : > { %5402 = vst [vmem:[%s9171_s11 + $0x9e0] sm:$0xff] %v5401_v48  ;;  %5404 = vst [vmem:[%s9171_s11 + $0x9e8] sm:$0xff] %v5403_v14 }
 0x4f7   : > { %5406 = vst [vmem:[%s9171_s11 + $0x9f0] sm:$0xff] %v5405_v24  ;;  %5408 = vst [vmem:[%s9171_s11 + $0x9f8] sm:$0xff] %v5407_v49 }
 0x4f8   : > { %5410 = vst [vmem:[%s9171_s11 + $0xa00] sm:$0xff] %v5409_v17  ;;  %5412 = vst [vmem:[%s9171_s11 + $0xa08] sm:$0xff] %v5411_v54 }
 0x4f9   : > { %5414 = vst [vmem:[%s9171_s11 + $0xa10] sm:$0xff] %v5413_v18  ;;  %5416 = vst [vmem:[%s9171_s11 + $0xa18] sm:$0xff] %v5415_v9 }
 0x4fa   : > { %5418 = vst [vmem:[%s9171_s11 + $0xa20] sm:$0xff] %v5417_v15  ;;  %5420 = vst [vmem:[%s9171_s11 + $0xaf0] sm:$0xff] %v5419_v55 }
 0x4fb   : > { %5422 = vst [vmem:[%s9171_s11 + $0xaf8] sm:$0xff] %v5421_v20  ;;  %5424 = vst [vmem:[%s9171_s11 + $0xb00] sm:$0xff] %v5423_v21 }
 0x4fc   : > { %5426 = vst [vmem:[%s9171_s11 + $0xb08] sm:$0xff] %v5425_v6  ;;  %5428 = vst [vmem:[%s9171_s11 + $0xb10] sm:$0xff] %v5427_v56 }
 0x4fd   : > { %5430 = vst [vmem:[%s9171_s11 + $0xb18] sm:$0xff] %v5429_v35  ;;  %5432 = vst [vmem:[%s9171_s11 + $0xb20] sm:$0xff] %v5431_v7 }
 0x4fe   : > { %5434 = vst [vmem:[%s9171_s11 + $0xb28] sm:$0xff] %v5433_v26  ;;  %5436 = vst [vmem:[%s9171_s11 + $0xb30] sm:$0xff] %v5435_v27 }
 0x4ff   : > { %5438 = vst [vmem:[%s9171_s11 + $0xb38] sm:$0xff] %v5437_v28  ;;  %5440 = vst [vmem:[%s9171_s11 + $0xb40] sm:$0xff] %v5439_v29 }
 0x500   : > { %5442 = vst [vmem:[%s9171_s11 + $0xb48] sm:$0xff] %v5441_v11  ;;  %5444 = vst [vmem:[%s9171_s11 + $0xb50] sm:$0xff] %v5443_v32 }
 0x501   : > { %5446 = vst [vmem:[%s9171_s11 + $0xb58] sm:$0xff] %v5445_v33  ;;  %5448 = vst [vmem:[%s9171_s11 + $0xb60] sm:$0xff] %v5447_v63 }
 0x502   : > { %5450 = vst [vmem:[%s9171_s11 + $0xb68] sm:$0xff] %v5449_v34  ;;  %5452 = vst [vmem:[%s9171_s11 + $0xb70] sm:$0xff] %v5451_v1 }
 0x503   : > { %5460 = vst [vmem:[%s9171_s11 + $0xb90] sm:$0xff] %v5459_v43  ;;  %5462 = vst [vmem:[%s9171_s11 + $0xb98] sm:$0xff] %v5461_v46 }
 0x504   : > { %5464 = vst [vmem:[%s9171_s11 + $0xba0] sm:$0xff] %v5463_v51  ;;  %5466 = vst [vmem:[%s9171_s11 + $0xba8] sm:$0xff] %v5465_v3 }
 0x505   : > { %5468 = vst [vmem:[%s9171_s11 + $0xbb0] sm:$0xff] %v5467_v25 }
 0x506 PF: > { %s14_s23 = sadd.s32 1, %s6974_s23   ;;  %s9591_s15 = smov %s6946_s16 }
 0x507   : > { %p11_p2 = scmp.ge.s32.totalorder %s14_s23, 6   ;;  %s9592_s16 = smov %s7073_s8 }
 0x508   : > { %s9593_s17 = smov %s6954_s18  ;;  %s9594_s18 = smov %s7062_s30 }
 0x509   : > { %s9595_s19 = smov %s6966_s21  ;;  %s9596_s20 = smov %s6970_s22 }
 0x50a   : > { %s9597_s21 = smov %s9600_s25  ;;  %s9598_s22 = smov %s9604_s26 }
 0x50b   :  { %13 = sbr.rel (!%p11_p2) target bundleno = 5 (0x5), region = 133 }

// kernel: synthesis_forward.5
= control target key start
LH: loop header
LB: loop body
LE: loop exit
PB: predicated region body
PF: predicated region fallthrough
CT: control target
= control target key end

     0   :  { %s2271_s15 = smov 0   ;;  %s2273_s16 = smov 0   ;;  %s3608_s0 = inlined_call_operand.vmem [shape: f32[1024,256], index: 0, kind: input, shape index: {}]   ;;  %s3609_s1 = inlined_call_operand.vmem [shape: f32[256,256], index: 1, kind: input, shape index: {}]   ;;  %s3610_s2 = inlined_call_operand.vmem [shape: f32[1,256], index: 2, kind: input, shape index: {}]   ;;  %s3611_s3 = inlined_call_operand.vmem [shape: bf16[256,256], index: 3, kind: input, shape index: {}]   ;;  %s3612_s4 = inlined_call_operand.vmem [shape: f32[1024,256], index: 4, kind: output, shape index: {}]  }
   0x1   :  { %s2275_s17 = smov 0  }
   0x2 LB: > { %s26_s18 = sadd.s32 1, %s2240_s16  ;;  %p1877_p0 = scmp.ge.s32.totalorder %s2244_s17, 1  ;;  %s2244_s17 = sphi %s2275_s17, %s14_s17   ;;  %s2240_s16 = sphi %s2273_s16, %s3614_s16   ;;  %s2236_s15 = sphi %s2271_s15, %s3613_s15  }
   0x3   : > { %p28_p1 = scmp.ge.s32.totalorder %s26_s18, 4  ;;  %p189_p2 = scmp.lt.s32.totalorder %s2244_s17, 5 }
   0x5   : > { %s3616_s18 = smov (%p28_p1, %s26_s18), 0  ;;  %p190_p3 = pnand %p1877_p0, %p189_p2 }
   0x6   : > { %v384_v0 = vld [vmem:[%s3609_s1 + $0x8] sm:$0xff] (!%p190_p3)  ;;  %v386_v1 = vld [vmem:[%s3609_s1 + $0x18] sm:$0xff] (!%p190_p3)  ;;  %v383_v2 = vld [vmem:[%s3609_s1] sm:$0xff] (!%p190_p3)  ;;  %s1878_s13 = sshll.u32 (!%p190_p3), %s2236_s15, 5 }
   0x7   : > { %193 = sbr.rel (%p190_p3) target bundleno = 665 (0x299), region = 36  ;;  %v1920_v3 = vpack.c.bf16 (!%p190_p3), %v386_v1, %v384_v0  ;;  %v385_v4 = vld [vmem:[%s3609_s1 + $0x10] sm:$0xff] (!%p190_p3)  ;;  %v388_v5 = vld [vmem:[%s3609_s1 + $0x28] sm:$0xff] (!%p190_p3)  ;;  %v390_v6 = vld [vmem:[%s3609_s1 + $0x38] sm:$0xff] (!%p190_p3)  ;;  %p227_p4 = scmp.lt.s32.totalorder (!%p190_p3), %s1878_s13, 127 }
   0x8   : > { %v1922_v7 = vpack.c.bf16 (!%p190_p3), %v385_v4, %v383_v2  ;;  %v1924_v8 = vpack.c.bf16 (!%p190_p3), %v390_v6, %v388_v5  ;;  %v387_v9 = vld [vmem:[%s3609_s1 + $0x20] sm:$0xff] (!%p190_p3)  ;;  %v389_v10 = vld [vmem:[%s3609_s1 + $0x30] sm:$0xff] (!%p190_p3)  ;;  %v392_v11 = vld [vmem:[%s3609_s1 + $0x48] sm:$0xff] (!%p190_p3) }
   0x9   : > { %1921 = vmatprep.subr.bf16.mxu0 (!%p190_p3), %v1920_v3  ;;  %v394_v12 = vld [vmem:[%s3609_s1 + $0x58] sm:$0xff] (!%p190_p3)  ;;  %v1926_v13 = vpack.c.bf16 (!%p190_p3), %v389_v10, %v387_v9  ;;  %v391_v15 = vld [vmem:[%s3609_s1 + $0x40] sm:$0xff] (!%p190_p3)  ;;  %v393_v16 = vld [vmem:[%s3609_s1 + $0x50] sm:$0xff] (!%p190_p3) }
   0xa   : > { %1923 = vmatpush1.bf16.msra.mxu0 (!%p190_p3), %v1922_v7  ;;  %v1928_v14 = vpack.c.bf16 (!%p190_p3), %v394_v12, %v392_v11  ;;  %v396_v17 = vld [vmem:[%s3609_s1 + $0x68] sm:$0xff] (!%p190_p3)  ;;  %v398_v18 = vld [vmem:[%s3609_s1 + $0x78] sm:$0xff] (!%p190_p3)  ;;  %v1930_v19 = vpack.c.bf16 (!%p190_p3), %v393_v16, %v391_v15  ;;  %v395_v21 = vld [vmem:[%s3609_s1 + $0x60] sm:$0xff] (!%p190_p3) }
   0xb   : > { %1925 = vmatprep.subr.bf16.mxu0 (!%p190_p3), %v1924_v8  ;;  %v1932_v20 = vpack.c.bf16 (!%p190_p3), %v398_v18, %v396_v17  ;;  %v397_v22 = vld [vmem:[%s3609_s1 + $0x70] sm:$0xff] (!%p190_p3)  ;;  %v400_v23 = vld [vmem:[%s3609_s1 + $0x88] sm:$0xff] (!%p190_p3)  ;;  %v402_v24 = vld [vmem:[%s3609_s1 + $0x98] sm:$0xff] (!%p190_p3) }
   0xc   : > { %v1934_v25 = vpack.c.bf16 (!%p190_p3), %v397_v22, %v395_v21  ;;  %v1936_v26 = vpack.c.bf16 (!%p190_p3), %v402_v24, %v400_v23  ;;  %v399_v27 = vld [vmem:[%s3609_s1 + $0x80] sm:$0xff] (!%p190_p3)  ;;  %v401_v28 = vld [vmem:[%s3609_s1 + $0x90] sm:$0xff] (!%p190_p3)  ;;  %v404_v29 = vld [vmem:[%s3609_s1 + $0xa8] sm:$0xff] (!%p190_p3) }
   0xd   : > { %v406_v30 = vld [vmem:[%s3609_s1 + $0xb8] sm:$0xff] (!%p190_p3)  ;;  %v1938_v31 = vpack.c.bf16 (!%p190_p3), %v401_v28, %v399_v27  ;;  %v403_v33 = vld [vmem:[%s3609_s1 + $0xa0] sm:$0xff] (!%p190_p3)  ;;  %v405_v34 = vld [vmem:[%s3609_s1 + $0xb0] sm:$0xff] (!%p190_p3) }
   0xe   : > { %1927 = vmatpush1.bf16.msra.mxu0 %v1926_v13  ;;  %s3618_s13 = smov (!%p227_p4, %s1878_s13), 127  ;;  %v1940_v32 = vpack.c.bf16 %v406_v30, %v404_v29  ;;  %v408_v35 = vld [vmem:[%s3609_s1 + $0xc8] sm:$0xff]  ;;  %v410_v36 = vld [vmem:[%s3609_s1 + $0xd8] sm:$0xff]  ;;  %v1942_v37 = vpack.c.bf16 %v405_v34, %v403_v33  ;;  %v407_v39 = vld [vmem:[%s3609_s1 + $0xc0] sm:$0xff] }
   0xf   : > { %1929 = vmatprep.subr.bf16.mxu0 %v1928_v14  ;;  %s1918_s20 = sshll.u32 %s3618_s13, 4  ;;  %v1944_v38 = vpack.c.bf16 %v410_v36, %v408_v35  ;;  %v409_v40 = vld [vmem:[%s3609_s1 + $0xd0] sm:$0xff]  ;;  %v412_v42 = vld [vmem:[%s3609_s1 + $0xe8] sm:$0xff]  ;;  %v414_v43 = vld [vmem:[%s3609_s1 + $0xf8] sm:$0xff] }
  0x10   : > { %s2378_s30 = scalar_lea.vmem %s3608_s0, %s1918_s20  ;;  %v1946_v45 = vpack.c.bf16 %v409_v40, %v407_v39  ;;  %v1948_v46 = vpack.c.bf16 %v414_v43, %v412_v42  ;;  %v411_v47 = vld [vmem:[%s3609_s1 + $0xe0] sm:$0xff]  ;;  %v413_v48 = vld [vmem:[%s3609_s1 + $0xf0] sm:$0xff]  ;;  %v416_v49 = vld [vmem:[%s3609_s1 + $0x108] sm:$0xff]  ;;  %s3533_s9 = scalar_lea.vmem %s3612_s4, %s1918_s20 }
  0x11   : > { %v2387_v41 = vld [vmem:[%s2378_s30 + $0x8] sm:$0xff]  ;;  %v418_v50 = vld [vmem:[%s3609_s1 + $0x118] sm:$0xff]  ;;  %v1950_v51 = vpack.c.bf16 %v413_v48, %v411_v47  ;;  %v415_v53 = vld [vmem:[%s3609_s1 + $0x100] sm:$0xff] }
  0x12   : > { %1931 = vmatpush1.bf16.msra.mxu0 %v1930_v19  ;;  %v320_v44 = vmul.f32 %v2387_v41, %v2387_v41  ;;  %v1952_v52 = vpack.c.bf16 %v418_v50, %v416_v49  ;;  %v417_v54 = vld [vmem:[%s3609_s1 + $0x110] sm:$0xff]  ;;  %v420_v55 = vld [vmem:[%s3609_s1 + $0x128] sm:$0xff]  ;;  %v422_v56 = vld [vmem:[%s3609_s1 + $0x138] sm:$0xff] }
  0x13   : > { %1933 = vmatprep.subr.bf16.mxu0 %v1932_v20  ;;  %v1954_v57 = vpack.c.bf16 %v417_v54, %v415_v53  ;;  %v1956_v58 = vpack.c.bf16 %v422_v56, %v420_v55  ;;  %v419_v59 = vld [vmem:[%s3609_s1 + $0x120] sm:$0xff]  ;;  %v421_v60 = vld [vmem:[%s3609_s1 + $0x130] sm:$0xff]  ;;  %v424_v61 = vld [vmem:[%s3609_s1 + $0x148] sm:$0xff] }
  0x14   : > { %523 = vmatprep.mubr.f32.mxu0 %v320_v44  ;;  %v426_v62 = vld [vmem:[%s3609_s1 + $0x158] sm:$0xff]  ;;  %v1958_v63 = vpack.c.bf16 %v421_v60, %v419_v59  ;;  %v423_v1 = vld [vmem:[%s3609_s1 + $0x140] sm:$0xff]  ;;  %v425_v2 = vld [vmem:[%s3609_s1 + $0x150] sm:$0xff] }
  0x15   : > { %v1960_v0 = vpack.c.bf16 %v426_v62, %v424_v61  ;;  %v428_v3 = vld [vmem:[%s3609_s1 + $0x168] sm:$0xff]  ;;  %v430_v4 = vld [vmem:[%s3609_s1 + $0x178] sm:$0xff]  ;;  %v427_v5 = vld [vmem:[%s3609_s1 + $0x160] sm:$0xff]  ;;  %v1962_v7 = vpack.c.bf16 %v425_v2, %v423_v1 }
  0x16   : > { %1935 = vmatpush1.bf16.msra.mxu0 %v1934_v25  ;;  %v429_v6 = vld [vmem:[%s3609_s1 + $0x170] sm:$0xff]  ;;  %v432_v8 = vld [vmem:[%s3609_s1 + $0x188] sm:$0xff]  ;;  %v434_v9 = vld [vmem:[%s3609_s1 + $0x198] sm:$0xff]  ;;  %v1964_v10 = vpack.c.bf16 %v430_v4, %v428_v3 }
  0x17   : > { %1937 = vmatprep.subr.bf16.mxu0 %v1936_v26  ;;  %v431_v11 = vld [vmem:[%s3609_s1 + $0x180] sm:$0xff]  ;;  %v433_v12 = vld [vmem:[%s3609_s1 + $0x190] sm:$0xff]  ;;  %v1966_v13 = vpack.c.bf16 %v429_v6, %v427_v5  ;;  %v436_v14 = vld [vmem:[%s3609_s1 + $0x1a8] sm:$0xff]  ;;  %v1968_v16 = vpack.c.bf16 %v434_v9, %v432_v8 }
  0x18   : > { %v438_v15 = vld [vmem:[%s3609_s1 + $0x1b8] sm:$0xff]  ;;  %v435_v17 = vld [vmem:[%s3609_s1 + $0x1a0] sm:$0xff]  ;;  %v437_v18 = vld [vmem:[%s3609_s1 + $0x1b0] sm:$0xff]  ;;  %v1970_v19 = vpack.c.bf16 %v433_v12, %v431_v11 }
  0x19   : > { %v440_v20 = vld [vmem:[%s3609_s1 + $0x1c8] sm:$0xff]  ;;  %v442_v21 = vld [vmem:[%s3609_s1 + $0x1d8] sm:$0xff]  ;;  %v1972_v22 = vpack.c.bf16 %v438_v15, %v436_v14  ;;  %v1974_v23 = vpack.c.bf16 %v437_v18, %v435_v17  ;;  %v439_v25 = vld [vmem:[%s3609_s1 + $0x1c0] sm:$0xff] }
  0x1a   : > { %1939 = vmatpush1.bf16.msra.mxu0 %v1938_v31  ;;  %v1976_v24 = vpack.c.bf16 %v442_v21, %v440_v20  ;;  %v441_v26 = vld [vmem:[%s3609_s1 + $0x1d0] sm:$0xff]  ;;  %v444_v27 = vld [vmem:[%s3609_s1 + $0x1e8] sm:$0xff]  ;;  %v446_v28 = vld [vmem:[%s3609_s1 + $0x1f8] sm:$0xff] }
  0x1b   : > { %1941 = vmatprep.subr.bf16.mxu0 %v1940_v32  ;;  %v1978_v29 = vpack.c.bf16 %v441_v26, %v439_v25  ;;  %v1980_v30 = vpack.c.bf16 %v446_v28, %v444_v27  ;;  %v443_v31 = vld [vmem:[%s3609_s1 + $0x1e0] sm:$0xff]  ;;  %v445_v32 = vld [vmem:[%s3609_s1 + $0x1f0] sm:$0xff]  ;;  %v2503_v35 = vld [vmem:[%s2378_s30 + $0x18] sm:$0xff] }
  0x1c   : > { %v1982_v33 = vpack.c.bf16 %v445_v32, %v443_v31  ;;  %v2500_v34 = vld [vmem:[%s2378_s30] sm:$0xff]  ;;  %v2011_v39 = vld [vmem:[%s3611_s3 + $0x14] ss:$8 sps:$4 sm:$0xff]   ;;  %v322_v40 = vmul.f32 %v2503_v35, %v2503_v35  ;;  %v2522_v43 = vld [vmem:[%s2378_s30 + $0x28] sm:$0xff] }
  0x1d   : > { %v319_v36 = vmul.f32 %v2500_v34, %v2500_v34  ;;  %v2519_v42 = vld [vmem:[%s2378_s30 + $0x10] sm:$0xff]  ;;  %v324_v47 = vmul.f32 %v2522_v43, %v2522_v43  ;;  %v2535_v48 = vld [vmem:[%s2378_s30 + $0x20] sm:$0xff]  ;;  %v2538_v49 = vld [vmem:[%s2378_s30 + $0x38] sm:$0xff] }
  0x1e   : > { %1943 = vmatpush1.bf16.msra.mxu0 %v1942_v37  ;;  %v2008_v37 = vld [vmem:[%s3611_s3 + $0x4] ss:$8 sps:$4 sm:$0xff]   ;;  %v2013_v44 = vld [vmem:[%s3611_s3 + $0x10] ss:$8 sps:$4 sm:$0xff]   ;;  %v2016_v50 = vld [vmem:[%s3611_s3 + $0x20] ss:$8 sps:$4 sm:$0xff]   ;;  %v326_v53 = vmul.f32 %v2538_v49, %v2538_v49 }
  0x1f   : > { %1945 = vmatprep.subr.bf16.mxu0 %v1944_v38  ;;  %v2010_v38 = vld [vmem:[%s3611_s3] ss:$8 sps:$4 sm:$0xff]   ;;  %1516 = vmatprep.subr.bf16.mxu1 %v2008_v37  ;;  %v2551_v54 = vld [vmem:[%s2378_s30 + $0x30] sm:$0xff]  ;;  %v2570_v61 = vld [vmem:[%s2378_s30 + $0x58] sm:$0xff] }
  0x20   : > { %1517 = vmatpush1.bf16.msra.mxu1 %v2010_v38  ;;  %v2554_v55 = vld [vmem:[%s2378_s30 + $0x48] sm:$0xff]  ;;  %v2019_v56 = vld [vmem:[%s3611_s3 + $0x30] ss:$8 sps:$4 sm:$0xff]   ;;  %v2567_v60 = vld [vmem:[%s2378_s30 + $0x40] sm:$0xff]  ;;  %v330_v1 = vmul.f32 %v2570_v61, %v2570_v61 }
  0x21   : > { %1518 = vmatprep.subr.bf16.mxu1 %v2011_v39  ;;  %v328_v59 = vmul.f32 %v2554_v55, %v2554_v55  ;;  %v2022_v62 = vld [vmem:[%s3611_s3 + $0x40] ss:$8 sps:$4 sm:$0xff]   ;;  %v2583_v2 = vld [vmem:[%s2378_s30 + $0x50] sm:$0xff]  ;;  %v2026_v6 = vld [vmem:[%s3611_s3 + $0x64] ss:$8 sps:$4 sm:$0xff]  }
  0x22   : > { %1947 = vmatpush1.bf16.msra.mxu0 %v1946_v45  ;;  %v321_v45 = vmul.f32 %v2519_v42, %v2519_v42  ;;  %v2586_v3 = vld [vmem:[%s2378_s30 + $0x68] sm:$0xff]  ;;  %v2025_v4 = vld [vmem:[%s3611_s3 + $0x50] ss:$8 sps:$4 sm:$0xff]   ;;  %v329_v5 = vmul.f32 %v2583_v2, %v2583_v2  ;;  %v2599_v8 = vld [vmem:[%s2378_s30 + $0x60] sm:$0xff] }
  0x23   : > { %1949 = vmatprep.subr.bf16.mxu0 %v1948_v46  ;;  %v2014_v46 = vld [vmem:[%s3611_s3 + $0x24] ss:$8 sps:$4 sm:$0xff]   ;;  %v2602_v9 = vld [vmem:[%s2378_s30 + $0x78] sm:$0xff]  ;;  %v331_v11 = vmul.f32 %v2599_v8, %v2599_v8  ;;  %v2615_v14 = vld [vmem:[%s2378_s30 + $0x70] sm:$0xff] }
  0x24   : > { %1519 = vmatpush1.bf16.msra.mxu1 %v2013_v44  ;;  %v2029_v12 = vld [vmem:[%s3611_s3 + $0x74] ss:$8 sps:$4 sm:$0xff]   ;;  %v2618_v15 = vld [vmem:[%s2378_s30 + $0x88] sm:$0xff]  ;;  %v333_v17 = vmul.f32 %v2615_v14, %v2615_v14  ;;  %v2631_v20 = vld [vmem:[%s2378_s30 + $0x80] sm:$0xff] }
  0x25   : > { %1520 = vmatprep.subr.bf16.mxu1 %v2014_v46  ;;  %v2032_v18 = vld [vmem:[%s3611_s3 + $0x84] ss:$8 sps:$4 sm:$0xff]   ;;  %v2634_v21 = vld [vmem:[%s2378_s30 + $0x98] sm:$0xff]  ;;  %v2644_v25 = vld [vmem:[%s2378_s30 + $0x90] sm:$0xff] }
  0x26   : > { %1951 = vmatpush1.bf16.msra.mxu0 %v1950_v51  ;;  %v323_v51 = vmul.f32 %v2535_v48, %v2535_v48  ;;  %v2647_v26 = vld [vmem:[%s2378_s30 + $0xa8] sm:$0xff]  ;;  %v337_v27 = vmul.f32 %v2644_v25, %v2644_v25  ;;  %v279_v39 = vld [vmem:[%s2378_s30 + $0xc0] sm:$0xff]  ;;  %v281_v46 = vld [vmem:[%s2378_s30 + $0xd0] sm:$0xff] }
  0x27   : > { %1953 = vmatprep.subr.bf16.mxu0 %v1952_v52  ;;  %v2017_v52 = vld [vmem:[%s3611_s3 + $0x34] ss:$8 sps:$4 sm:$0xff]   ;;  %v340_v28 = vmul.f32 %v2647_v26, %v2647_v26  ;;  %v343_v44 = vmul.f32 %v279_v39, %v279_v39 }
  0x28   : > { %1521 = vmatpush1.bf16.msra.mxu1 %v2016_v50  ;;  %v345_v50 = vmul.f32 %v281_v46, %v281_v46  ;;  %v302_v46 = vld [vmem:[%s2378_s30 + $0x178] sm:$0xff] }
  0x29   : > { %1522 = vmatprep.subr.bf16.mxu1 %v2017_v52  ;;  %v283_v52 = vld [vmem:[%s2378_s30 + $0xe0] sm:$0xff] }
  0x2a   : > { %1955 = vmatpush1.bf16.msra.mxu0 %v1954_v57  ;;  %v325_v57 = vmul.f32 %v2551_v54, %v2551_v54 }
  0x2b   : > { %1957 = vmatprep.subr.bf16.mxu0 %v1956_v58  ;;  %v2020_v58 = vld [vmem:[%s3611_s3 + $0x44] ss:$8 sps:$4 sm:$0xff]  }
  0x2c   : > { %1523 = vmatpush1.bf16.msra.mxu1 %v2019_v56  ;;  %v347_v56 = vmul.f32 %v283_v52, %v283_v52  ;;  %v301_v52 = vld [vmem:[%s2378_s30 + $0x170] sm:$0xff] }
  0x2d   : > { %1524 = vmatprep.subr.bf16.mxu1 %v2020_v58  ;;  %v285_v58 = vld [vmem:[%s2378_s30 + $0xf0] sm:$0xff] }
  0x2e   : > { %1959 = vmatpush1.bf16.msra.mxu0 %v1958_v63  ;;  %v327_v63 = vmul.f32 %v2567_v60, %v2567_v60 }
  0x2f   : > { %1961 = vmatprep.subr.bf16.mxu0 %v1960_v0  ;;  %v2023_v0 = vld [vmem:[%s3611_s3 + $0x54] ss:$8 sps:$4 sm:$0xff]  }
  0x30   : > { %1525 = vmatpush1.bf16.msra.mxu1 %v2022_v62  ;;  %v349_v62 = vmul.f32 %v285_v58, %v285_v58  ;;  %v365_v58 = vmul.f32 %v301_v52, %v301_v52 }
  0x31   : > { %1526 = vmatprep.subr.bf16.mxu1 %v2023_v0  ;;  %v287_v0 = vld [vmem:[%s2378_s30 + $0x100] sm:$0xff] }
  0x32   : > { %1963 = vmatpush1.bf16.msra.mxu0 %v1962_v7  ;;  %v332_v7 = vmul.f32 %v2586_v3, %v2586_v3 }
  0x33   : > { %1965 = vmatprep.subr.bf16.mxu0 %v1964_v10  ;;  %v2028_v10 = vld [vmem:[%s3611_s3 + $0x60] ss:$8 sps:$4 sm:$0xff]  }
  0x34   : > { %1527 = vmatpush1.bf16.msra.mxu1 %v2025_v4  ;;  %v351_v4 = vmul.f32 %v287_v0, %v287_v0  ;;  %v306_v0 = vld [vmem:[%s2378_s30 + $0x198] sm:$0xff] }
  0x35   : > { %1528 = vmatprep.subr.bf16.mxu1 %v2026_v6  ;;  %v289_v6 = vld [vmem:[%s2378_s30 + $0x110] sm:$0xff] }
  0x36   : > { %1967 = vmatpush1.bf16.msra.mxu0 %v1966_v13  ;;  %v334_v13 = vmul.f32 %v2602_v9, %v2602_v9 }
  0x37   : > { %1969 = vmatprep.subr.bf16.mxu0 %v1968_v16  ;;  %v2031_v16 = vld [vmem:[%s3611_s3 + $0x70] ss:$8 sps:$4 sm:$0xff]  }
  0x38   : > { %1529 = vmatpush1.bf16.msra.mxu1 %v2028_v10  ;;  %v353_v10 = vmul.f32 %v289_v6, %v289_v6  ;;  %v305_v6 = vld [vmem:[%s2378_s30 + $0x190] sm:$0xff] }
  0x39   : > { %1530 = vmatprep.subr.bf16.mxu1 %v2029_v12  ;;  %v291_v12 = vld [vmem:[%s2378_s30 + $0x120] sm:$0xff] }
  0x3a   : > { %1971 = vmatpush1.bf16.msra.mxu0 %v1970_v19  ;;  %v336_v19 = vmul.f32 %v2618_v15, %v2618_v15 }
  0x3b   : > { %1973 = vmatprep.subr.bf16.mxu0 %v1972_v22  ;;  %v2034_v22 = vld [vmem:[%s3611_s3 + $0x80] ss:$8 sps:$4 sm:$0xff]  }
  0x3c   : > { %1531 = vmatpush1.bf16.msra.mxu1 %v2031_v16  ;;  %v355_v16 = vmul.f32 %v291_v12, %v291_v12  ;;  %v369_v12 = vmul.f32 %v305_v6, %v305_v6 }
  0x3d   : > { %1532 = vmatprep.subr.bf16.mxu1 %v2032_v18  ;;  %v293_v18 = vld [vmem:[%s2378_s30 + $0x130] sm:$0xff] }
  0x3e   : > { %1975 = vmatpush1.bf16.msra.mxu0 %v1974_v23  ;;  %v335_v23 = vmul.f32 %v2631_v20, %v2631_v20 }
  0x3f   : > { %1977 = vmatprep.subr.bf16.mxu0 %v1976_v24  ;;  %v338_v24 = vmul.f32 %v2634_v21, %v2634_v21 }
  0x40   : > { %1533 = vmatpush1.bf16.msra.mxu1 %v2034_v22  ;;  %v357_v22 = vmul.f32 %v293_v18, %v293_v18  ;;  %v310_v18 = vld [vmem:[%s2378_s30 + $0x1b8] sm:$0xff] }
  0x42   : > { %1979 = vmatpush1.bf16.msra.mxu0 %v1978_v29  ;;  %v2654_v29 = vld [vmem:[%s2378_s30 + $0xa0] sm:$0xff] }
  0x43   : > { %1981 = vmatprep.subr.bf16.mxu0 %v1980_v30  ;;  %v2657_v30 = vld [vmem:[%s2378_s30 + $0xb8] sm:$0xff]  ;;  %v339_v31 = vmul.f32 %v2654_v29, %v2654_v29 }
  0x44   : > { %v342_v32 = vmul.f32 %v2657_v30, %v2657_v30 }
  0x46   : > { %1983 = vmatpush1.bf16.msra.mxu0 %v1982_v33  ;;  %v2664_v33 = vld [vmem:[%s2378_s30 + $0xb0] sm:$0xff] }
  0x47   : > { %v341_v37 = vmul.f32 %v2664_v33, %v2664_v33 }
  0x49   : > { %524 = vmatmul.mubr.f32.vlgmr.msra.gmra.mrb[0].mxu0 %v319_v36  ;;  %v2667_v36 = vld [vmem:[%s2378_s30 + $0xc8] sm:$0xff] }
  0x4a   : > { %529 = vmatprep.mubr.f32.mxu0 %v322_v40  ;;  %v344_v38 = vmul.f32 %v2667_v36, %v2667_v36  ;;  %v2675_v40 = vld [vmem:[%s2378_s30 + $0xd8] sm:$0xff] }
  0x4d   : > { %530 = vmatmul.mubr.f32.gmra.mrb[2].mxu0 %v321_v45  ;;  %v346_v45 = vmul.f32 %v2675_v40, %v2675_v40 }
  0x4e   : > { %535 = vmatprep.mubr.f32.mxu0 %v324_v47  ;;  %v284_v47 = vld [vmem:[%s2378_s30 + $0xe8] sm:$0xff] }
  0x51   : > { %536 = vmatmul.mubr.f32.gmra.mrb[4].mxu0 %v323_v51  ;;  %v348_v51 = vmul.f32 %v284_v47, %v284_v47  ;;  %v2037_v47 = vld [vmem:[%s3611_s3 + $0x90] ss:$8 sps:$4 sm:$0xff]  }
  0x52   : > { %541 = vmatprep.mubr.f32.mxu0 %v326_v53  ;;  %v286_v53 = vld [vmem:[%s2378_s30 + $0xf8] sm:$0xff] }
  0x55   : > { %542 = vmatmul.mubr.f32.gmra.mrb[6].mxu0 %v325_v57  ;;  %v350_v57 = vmul.f32 %v286_v53, %v286_v53  ;;  %v2038_v53 = vld [vmem:[%s3611_s3 + $0xa4] ss:$8 sps:$4 sm:$0xff]  }
  0x56   : > { %547 = vmatprep.mubr.f32.mxu0 %v328_v59  ;;  %v288_v59 = vld [vmem:[%s2378_s30 + $0x108] sm:$0xff] }
  0x59   : > { %548 = vmatmul.mubr.f32.gmra.mrb[8].mxu0 %v327_v63  ;;  %v352_v63 = vmul.f32 %v288_v59, %v288_v59 }
  0x5a   : > { %553 = vmatprep.mubr.f32.mxu0 %v330_v1  ;;  %v290_v1 = vld [vmem:[%s2378_s30 + $0x118] sm:$0xff] }
  0x5d   : > { %554 = vmatmul.mubr.f32.gmra.mrb[10].mxu0 %v329_v5  ;;  %v354_v5 = vmul.f32 %v290_v1, %v290_v1  ;;  %v2043_v1 = vld [vmem:[%s3611_s3 + $0xb0] ss:$8 sps:$4 sm:$0xff]  }
  0x5e   : > { %559 = vmatprep.mubr.f32.mxu0 %v332_v7  ;;  %v292_v7 = vld [vmem:[%s2378_s30 + $0x128] sm:$0xff] }
  0x61   : > { %560 = vmatmul.mubr.f32.gmra.mrb[12].mxu0 %v331_v11  ;;  %v356_v11 = vmul.f32 %v292_v7, %v292_v7  ;;  %v2044_v7 = vld [vmem:[%s3611_s3 + $0xc4] ss:$8 sps:$4 sm:$0xff]  }
  0x62   : > { %565 = vmatprep.mubr.f32.mxu0 %v334_v13  ;;  %v294_v13 = vld [vmem:[%s2378_s30 + $0x138] sm:$0xff] }
  0x65   : > { %566 = vmatmul.mubr.f32.gmra.mrb[14].mxu0 %v333_v17  ;;  %v358_v17 = vmul.f32 %v294_v13, %v294_v13 }
  0x66   : > { %571 = vmatprep.mubr.f32.mxu0 %v336_v19  ;;  %v296_v19 = vld [vmem:[%s2378_s30 + $0x148] sm:$0xff] }
  0x69   : > { %572 = vmatmul.mubr.f32.gmra.mrb[16].mxu0 %v335_v23  ;;  %v360_v23 = vmul.f32 %v296_v19, %v296_v19  ;;  %v2049_v19 = vld [vmem:[%s3611_s3 + $0xd0] ss:$8 sps:$4 sm:$0xff]  }
  0x6a   : > { %577 = vmatprep.mubr.f32.mxu0 %v338_v24  ;;  %v295_v24 = vld [vmem:[%s2378_s30 + $0x140] sm:$0xff] }
  0x6d   : > { %578 = vmatmul.mubr.f32.gmra.mrb[18].mxu0 %v337_v27  ;;  %v298_v27 = vld [vmem:[%s2378_s30 + $0x158] sm:$0xff] }
  0x6e   : > { %583 = vmatprep.mubr.f32.mxu0 %v340_v28  ;;  %v359_v28 = vmul.f32 %v295_v24, %v295_v24  ;;  %v309_v24 = vld [vmem:[%s2378_s30 + $0x1b0] sm:$0xff] }
  0x71   : > { %584 = vmatmul.mubr.f32.gmra.mrb[20].mxu0 %v339_v31  ;;  %v362_v31 = vmul.f32 %v298_v27, %v298_v27  ;;  %v2050_v27 = vld [vmem:[%s3611_s3 + $0xe4] ss:$8 sps:$4 sm:$0xff]  }
  0x72   : > { %589 = vmatprep.mubr.f32.mxu0 %v342_v32  ;;  %v297_v32 = vld [vmem:[%s2378_s30 + $0x150] sm:$0xff] }
  0x75   : > { %590 = vmatmul.mubr.f32.gmra.mrb[22].mxu0 %v341_v37  ;;  %v300_v37 = vld [vmem:[%s2378_s30 + $0x168] sm:$0xff] }
  0x76   : > { %595 = vmatprep.mubr.f32.mxu0 %v344_v38  ;;  %v361_v38 = vmul.f32 %v297_v32, %v297_v32  ;;  %v364_v39 = vmul.f32 %v300_v37, %v300_v37  ;;  %v373_v32 = vmul.f32 %v309_v24, %v309_v24 }
  0x79   : > { %596 = vmatmul.mubr.f32.gmra.mrb[24].mxu0 %v343_v44  ;;  %v299_v44 = vld [vmem:[%s2378_s30 + $0x160] sm:$0xff] }
  0x7a   : > { %601 = vmatprep.mubr.f32.mxu0 %v346_v45  ;;  %v2035_v45 = vld [vmem:[%s3611_s3 + $0x94] ss:$8 sps:$4 sm:$0xff]  }
  0x7b   : > { %1534 = vmatprep.subr.bf16.mxu1 %v2035_v45  ;;  %v2055_v45 = vld [vmem:[%s3611_s3 + $0xf0] ss:$8 sps:$4 sm:$0xff]  }
  0x7c   : > { %1535 = vmatpush1.bf16.msra.mxu1 %v2037_v47 }
  0x7d   : > { %602 = vmatmul.mubr.f32.gmra.mrb[26].mxu0 %v345_v50  ;;  %v363_v50 = vmul.f32 %v299_v44, %v299_v44  ;;  %1536 = vmatprep.subr.bf16.mxu1 %v2038_v53  ;;  %v314_v44 = vld [vmem:[%s2378_s30 + $0x1d8] sm:$0xff] }
  0x7e   : > { %607 = vmatprep.mubr.f32.mxu0 %v348_v51  ;;  %v366_v51 = vmul.f32 %v302_v46, %v302_v46  ;;  %v378_v47 = vmul.f32 %v314_v44, %v314_v44 }
  0x81   : > { %608 = vmatmul.mubr.f32.gmra.mrb[28].mxu0 %v347_v56  ;;  %v304_v56 = vld [vmem:[%s2378_s30 + $0x188] sm:$0xff] }
  0x82   : > { %613 = vmatprep.mubr.f32.mxu0 %v350_v57  ;;  %v2040_v57 = vld [vmem:[%s3611_s3 + $0xa0] ss:$8 sps:$4 sm:$0xff]   ;;  %v368_v59 = vmul.f32 %v304_v56, %v304_v56 }
  0x83   : > { %1537 = vmatpush1.bf16.msra.mxu1 %v2040_v57  ;;  %v315_v56 = vld [vmem:[%s2378_s30 + $0x1e0] sm:$0xff]  ;;  %v318_v57 = vld [vmem:[%s2378_s30 + $0x1f8] sm:$0xff] }
  0x85   : > { %614 = vmatmul.mubr.f32.gmra.mrb[30].mxu0 %v349_v62  ;;  %v303_v62 = vld [vmem:[%s2378_s30 + $0x180] sm:$0xff] }
  0x86   : > { %619 = vmatprep.mubr.f32.mxu0 %v352_v63  ;;  %v2041_v63 = vld [vmem:[%s3611_s3 + $0xb4] ss:$8 sps:$4 sm:$0xff]  }
  0x87   : > { %1538 = vmatprep.subr.bf16.mxu1 %v2041_v63 }
  0x88   : > { %1539 = vmatpush1.bf16.msra.mxu1 %v2043_v1 }
  0x89   : > { %620 = vmatmul.mubr.f32.gmra.mrb[32].mxu0 %v351_v4  ;;  %v367_v4 = vmul.f32 %v303_v62, %v303_v62  ;;  %1540 = vmatprep.subr.bf16.mxu1 %v2044_v7  ;;  %v317_v62 = vld [vmem:[%s2378_s30 + $0x1f0] sm:$0xff] }
  0x8a   : > { %625 = vmatprep.mubr.f32.mxu0 %v354_v5  ;;  %v370_v5 = vmul.f32 %v306_v0, %v306_v0  ;;  %v381_v63 = vmul.f32 %v317_v62, %v317_v62  ;;  %v449_v0 = vlaneseq }
  0x8c   : > { %v450_v1 = vshrl.u32 %v449_v0, 7 }
  0x8d   : > { %626 = vmatmul.mubr.f32.gmra.mrb[34].mxu0 %v353_v10  ;;  %v308_v10 = vld [vmem:[%s2378_s30 + $0x1a8] sm:$0xff] }
  0x8e   : > { %631 = vmatprep.mubr.f32.mxu0 %v356_v11  ;;  %v2046_v11 = vld [vmem:[%s3611_s3 + $0xc0] ss:$8 sps:$4 sm:$0xff]   ;;  %v372_v13 = vmul.f32 %v308_v10, %v308_v10  ;;  %v455_v6 = vsub.s32 1, %v450_v1 }
  0x8f   : > { %1541 = vmatpush1.bf16.msra.mxu1 %v2046_v11 }
  0x91   : > { %632 = vmatmul.mubr.f32.gmra.mrb[36].mxu0 %v355_v16  ;;  %v307_v16 = vld [vmem:[%s2378_s30 + $0x1a0] sm:$0xff] }
  0x92   : > { %637 = vmatprep.mubr.f32.mxu0 %v358_v17  ;;  %v2047_v17 = vld [vmem:[%s3611_s3 + $0xd4] ss:$8 sps:$4 sm:$0xff]  }
  0x93   : > { %1542 = vmatprep.subr.bf16.mxu1 %v2047_v17 }
  0x94   : > { %1543 = vmatpush1.bf16.msra.mxu1 %v2049_v19 }
  0x95   : > { %638 = vmatmul.mubr.f32.gmra.mrb[38].mxu0 %v357_v22  ;;  %v371_v22 = vmul.f32 %v307_v16, %v307_v16  ;;  %1544 = vmatprep.subr.bf16.mxu1 %v2050_v27 }
  0x96   : > { %643 = vmatprep.mubr.f32.mxu0 %v360_v23  ;;  %v374_v23 = vmul.f32 %v310_v18, %v310_v18 }
  0x99   : > { %644 = vmatmul.mubr.f32.gmra.mrb[40].mxu0 %v359_v28  ;;  %v312_v28 = vld [vmem:[%s2378_s30 + $0x1c8] sm:$0xff] }
  0x9a   : > { %649 = vmatprep.mubr.f32.mxu0 %v362_v31  ;;  %v2052_v31 = vld [vmem:[%s3611_s3 + $0xe0] ss:$8 sps:$4 sm:$0xff]   ;;  %v376_v37 = vmul.f32 %v312_v28, %v312_v28 }
  0x9b   : > { %1545 = vmatpush1.bf16.msra.mxu1 %v2052_v31 }
  0x9d   : > { %650 = vmatmul.mubr.f32.gmra.mrb[42].mxu0 %v361_v38  ;;  %v311_v38 = vld [vmem:[%s2378_s30 + $0x1c0] sm:$0xff] }
  0x9e   : > { %655 = vmatprep.mubr.f32.mxu0 %v364_v39  ;;  %v2053_v39 = vld [vmem:[%s3611_s3 + $0xf4] ss:$8 sps:$4 sm:$0xff]   ;;  %v375_v46 = vmul.f32 %v311_v38, %v311_v38 }
  0x9f   : > { %1546 = vmatprep.subr.bf16.mxu1 %v2053_v39 }
  0xa0   : > { %1547 = vmatpush1.bf16.msra.mxu1 %v2055_v45 }
  0xa1   : > { %656 = vmatmul.mubr.f32.gmra.mrb[44].mxu0 %v363_v50  ;;  %v313_v50 = vld [vmem:[%s2378_s30 + $0x1d0] sm:$0xff] }
  0xa2   : > { %661 = vmatprep.mubr.f32.mxu0 %v366_v51  ;;  %v316_v51 = vld [vmem:[%s2378_s30 + $0x1e8] sm:$0xff]  ;;  %v377_v52 = vmul.f32 %v313_v50, %v313_v50 }
  0xa3   : > { %v380_v53 = vmul.f32 %v316_v51, %v316_v51 }
  0xa5   : > { %662 = vmatmul.mubr.f32.gmra.mrb[46].mxu0 %v365_v58  ;;  %v379_v58 = vmul.f32 %v315_v56, %v315_v56 }
  0xa6   : > { %667 = vmatprep.mubr.f32.mxu0 %v368_v59  ;;  %v382_v59 = vmul.f32 %v318_v57, %v318_v57 }
  0xa9   : > { %668 = vmatmul.mubr.f32.gmra.mrb[48].mxu0 %v367_v4  ;;  %v451_v4 = vsub.s32 0, %v450_v1 }
  0xaa   : > { %673 = vmatprep.mubr.f32.mxu0 %v370_v5  ;;  %v447_v5 = vld [vmem:[%s3610_s2] sm:$0x3] }
  0xab   : > { %v2761_v7 = vrot.slane %v447_v5, %v451_v4  ;;  %v2763_v10 = vrot.slane %v447_v5, %v455_v6 }
  0xad   : > { %674 = vmatmul.mubr.f32.gmra.mrb[50].mxu0 %v369_v12 }
  0xae   : > { %679 = vmatprep.mubr.f32.mxu0 %v372_v13 }
  0xb1   : > { %680 = vmatmul.mubr.f32.gmra.mrb[52].mxu0 %v371_v22 }
  0xb2   : > { %685 = vmatprep.mubr.f32.mxu0 %v374_v23 }
  0xb5   : > { %686 = vmatmul.mubr.f32.gmra.mrb[54].mxu0 %v373_v32 }
  0xb6   : > { %691 = vmatprep.mubr.f32.mxu0 %v376_v37 }
  0xb9   : > { %692 = vmatmul.mubr.f32.gmra.mrb[56].mxu0 %v375_v46 }
  0xba   : > { %697 = vmatprep.mubr.f32.mxu0 %v378_v47 }
  0xbd   : > { %698 = vmatmul.mubr.f32.gmra.mrb[58].mxu0 %v377_v52 }
  0xbe   : > { %703 = vmatprep.mubr.f32.mxu0 %v380_v53 }
  0xc1   : > { %704 = vmatmul.mubr.f32.gmra.mrb[60].mxu0 %v379_v58 }
  0xc2   : > { %709 = vmatprep.mubr.f32.mxu0 %v382_v59 }
  0xc5   : > { %710 = vmatmul.mubr.f32.gmra.mrb[62].mxu0 %v381_v63 }
 0x11c   : > { %v525_v11 = vpop.f32.mrb[0].mxu0 }
 0x11d   : > { %v526_v12 = vadd.f32 %v525_v11, %v2761_v7  ;;  %v527_v13 = vpop.f32.mrb[1].mxu0 }
 0x11e   : > { %v528_v16 = vadd.f32 %v527_v13, %v2763_v10 }
 0x11f   : > { %2056 = vrsqrt.f32 %v526_v12  ;;  %vm718_vm0 = vcmp.eq.f32.partialorder %v526_v12, inf  ;;  %vm720_vm1 = vcmp.eq.f32.partialorder %v526_v12, 0.0  ;;  %v721_v31 = vand.u32 2147483648, %v526_v12 }
 0x120   : > { %2058 = vrsqrt.f32 %v528_v16  ;;  %v531_v17 = vpop.f32.mrb[2].mxu0  ;;  %vm725_vm2 = vcmp.eq.f32.partialorder %v528_v16, inf  ;;  %vm727_vm3 = vcmp.eq.f32.partialorder %v528_v16, 0.0  ;;  %v728_v37 = vand.u32 2147483648, %v528_v16 }
 0x121   : > { %v2768_v18 = vadd.f32 %v531_v17, %v2761_v7  ;;  %v533_v19 = vpop.f32.mrb[3].mxu0 }
 0x122   : > { %v2771_v22 = vadd.f32 %v533_v19, %v2763_v10 }
 0x123   : > { %2060 = vrsqrt.f32 %v2768_v18  ;;  %vm732_vm4 = vcmp.eq.f32.partialorder %v2768_v18, inf  ;;  %vm734_vm5 = vcmp.eq.f32.partialorder %v2768_v18, 0.0  ;;  %v735_v45 = vand.u32 2147483648, %v2768_v18 }
 0x124   : > { %2062 = vrsqrt.f32 %v2771_v22  ;;  %v537_v23 = vpop.f32.mrb[4].mxu0  ;;  %vm739_vm6 = vcmp.eq.f32.partialorder %v2771_v22, inf  ;;  %vm741_vm7 = vcmp.eq.f32.partialorder %v2771_v22, 0.0  ;;  %v742_v52 = vand.u32 2147483648, %v2771_v22 }
 0x125   : > { %v2776_v24 = vadd.f32 %v537_v23, %v2761_v7  ;;  %v539_v27 = vpop.f32.mrb[5].mxu0 }
 0x126   : > { %v2779_v28 = vadd.f32 %v539_v27, %v2763_v10 }
 0x127   : > { %2064 = vrsqrt.f32 %v2776_v24  ;;  %vm746_vm8 = vcmp.eq.f32.partialorder %v2776_v24, inf  ;;  %vm748_vm9 = vcmp.eq.f32.partialorder %v2776_v24, 0.0  ;;  %v749_v57 = vand.u32 2147483648, %v2776_v24 }
 0x128   : > { %2066 = vrsqrt.f32 %v2779_v28  ;;  %v543_v32 = vpop.f32.mrb[6].mxu0  ;;  %vm753_vm10 = vcmp.eq.f32.partialorder %v2779_v28, inf  ;;  %vm755_vm11 = vcmp.eq.f32.partialorder %v2779_v28, 0.0  ;;  %v756_v13 = vand.u32 2147483648, %v2779_v28 }
 0x129   : > { %v2057_v38 = vpop.eup %2056  ;;  %v2784_v39 = vadd.f32 %v543_v32, %v2761_v7  ;;  %v545_v44 = vpop.f32.mrb[7].mxu0 }
 0x12a   : > { %v2059_v46 = vpop.eup %2058  ;;  %v2790_v47 = vadd.f32 %v545_v44, %v2763_v10  ;;  %v717_v50 = vmul.f32 %v2057_v38, %v526_v12 }
 0x12b   : > { %2068 = vrsqrt.f32 %v2784_v39  ;;  %v724_v51 = vmul.f32 %v2059_v46, %v528_v16  ;;  %vm760_vm12 = vcmp.eq.f32.partialorder %v2784_v39, inf  ;;  %vm762_vm14 = vcmp.eq.f32.partialorder %v2784_v39, 0.0 }
 0x12c   : > { %2070 = vrsqrt.f32 %v2790_v47  ;;  %v549_v53 = vpop.f32.mrb[8].mxu0  ;;  %v719_v56 = vsel %vm718_vm0, %v526_v12, %v717_v50  ;;  %vm767_vm13 = vcmp.eq.f32.partialorder %v2790_v47, inf  ;;  %v770_v19 = vand.u32 2147483648, %v2790_v47 }
 0x12d   : > { %v2061_v58 = vpop.eup %2060  ;;  %v2802_v59 = vadd.f32 %v549_v53, %v2761_v7  ;;  %v551_v62 = vpop.f32.mrb[9].mxu0  ;;  %v726_v63 = vsel %vm725_vm2, %v528_v16, %v724_v51  ;;  %v722_v0 = vsel %vm720_vm1, %v721_v31, %v719_v56  ;;  %vm769_vm15 = vcmp.eq.f32.partialorder %v2790_v47, 0.0 }
 0x12e   : > { %v2063_v1 = vpop.eup %2062  ;;  %v2808_v4 = vadd.f32 %v551_v62, %v2763_v10  ;;  %v729_v5 = vsel %vm727_vm3, %v728_v37, %v726_v63  ;;  %v731_v6 = vmul.f32 %v2061_v58, %v2768_v18  ;;  %v1164_v17 = vmul.f32 %v722_v0, %v2500_v34 }
 0x12f   : > { %2072 = vrsqrt.f32 %v2802_v59  ;;  %v738_v11 = vmul.f32 %v2063_v1, %v2771_v22  ;;  %v1165_v37 = vmul.f32 %v729_v5, %v2387_v41  ;;  %vm774_vm2 = vcmp.eq.f32.partialorder %v2802_v59, inf }
 0x130   : > { %2074 = vrsqrt.f32 %v2808_v4  ;;  %v555_v12 = vpop.f32.mrb[10].mxu0  ;;  %v733_v16 = vsel %vm732_vm4, %v2768_v18, %v731_v6  ;;  %vm781_vm0 = vcmp.eq.f32.partialorder %v2808_v4, inf  ;;  %vm783_vm1 = vcmp.eq.f32.partialorder %v2808_v4, 0.0 }
 0x131   : > { %v2065_v23 = vpop.eup %2064  ;;  %v2826_v27 = vadd.f32 %v555_v12, %v2761_v7  ;;  %v557_v31 = vpop.f32.mrb[11].mxu0  ;;  %v740_v32 = vsel %vm739_vm6, %v2771_v22, %v738_v11  ;;  %v736_v34 = vsel %vm734_vm5, %v735_v45, %v733_v16  ;;  %v763_v45 = vand.u32 2147483648, %v2784_v39 }
 0x132   : > { %v2067_v38 = vpop.eup %2066  ;;  %v2836_v44 = vadd.f32 %v557_v31, %v2763_v10  ;;  %v743_v46 = vsel %vm741_vm7, %v742_v52, %v740_v32  ;;  %v1166_v50 = vmul.f32 %v736_v34, %v2519_v42  ;;  %v745_v51 = vmul.f32 %v2065_v23, %v2776_v24 }
 0x133   : > { %2076 = vrsqrt.f32 %v2826_v27  ;;  %v1167_v41 = vmul.f32 %v743_v46, %v2503_v35  ;;  %v752_v18 = vmul.f32 %v2067_v38, %v2779_v28  ;;  %v784_v42 = vand.u32 2147483648, %v2808_v4 }
 0x134   : > { %2078 = vrsqrt.f32 %v2836_v44  ;;  %v561_v53 = vpop.f32.mrb[12].mxu0  ;;  %v1228_v56 = vpack.c.bf16 %v1166_v50, %v1164_v17  ;;  %v747_v22 = vsel %vm746_vm8, %v2776_v24, %v745_v51  ;;  %vm795_vm3 = vcmp.eq.f32.partialorder %v2836_v44, inf }
 0x135   : > { %v2069_v52 = vpop.eup %2068  ;;  %v2853_v58 = vadd.f32 %v561_v53, %v2761_v7  ;;  %v563_v35 = vpop.f32.mrb[13].mxu0  ;;  %v1229_v62 = vpack.c.bf16 %v1167_v41, %v1165_v37  ;;  %v754_v63 = vsel %vm753_vm10, %v2779_v28, %v752_v18  ;;  %v750_v0 = vsel %vm748_vm9, %v749_v57, %v747_v22 }
 0x136   : > { %v2071_v1 = vpop.eup %2070  ;;  %v2862_v5 = vadd.f32 %v563_v35, %v2763_v10  ;;  %v757_v6 = vsel %vm755_vm11, %v756_v13, %v754_v63  ;;  %v759_v11 = vmul.f32 %v2069_v52, %v2784_v39  ;;  %v1168_v57 = vmul.f32 %v750_v0, %v2535_v48 }
 0x137   : > { %2080 = vrsqrt.f32 %v2853_v58  ;;  %1548 = vmatprep.mubr.bf16.mxu1 %v1229_v62  ;;  %v766_v12 = vmul.f32 %v2071_v1, %v2790_v47  ;;  %v1169_v24 = vmul.f32 %v757_v6, %v2522_v43  ;;  %v798_v13 = vand.u32 2147483648, %v2836_v44 }
 0x138   : > { %2082 = vrsqrt.f32 %v2862_v5  ;;  %v567_v16 = vpop.f32.mrb[14].mxu0  ;;  %1549 = vmatmul.mubr.bf16.vlgmr.msra.gmra.mrb[0].mxu1 %v1228_v56  ;;  %v761_v28 = vsel %vm760_vm12, %v2784_v39, %v759_v11  ;;  %vm776_vm4 = vcmp.eq.f32.partialorder %v2802_v59, 0.0  ;;  %vm797_vm5 = vcmp.eq.f32.partialorder %v2836_v44, 0.0 }
 0x139   : > { %v2073_v17 = vpop.eup %2072  ;;  %v2880_v23 = vadd.f32 %v567_v16, %v2761_v7  ;;  %v569_v43 = vpop.f32.mrb[15].mxu0  ;;  %v768_v48 = vsel %vm767_vm13, %v2790_v47, %v766_v12  ;;  %v764_v31 = vsel %vm762_vm14, %v763_v45, %v761_v28  ;;  %v777_v32 = vand.u32 2147483648, %v2802_v59 }
 0x13a   : > { %v2075_v37 = vpop.eup %2074  ;;  %v2890_v34 = vadd.f32 %v569_v43, %v2763_v10  ;;  %v771_v38 = vsel %vm769_vm15, %v770_v19, %v768_v48  ;;  %v1170_v46 = vmul.f32 %v764_v31, %v2551_v54  ;;  %v773_v50 = vmul.f32 %v2073_v17, %v2802_v59 }
 0x13b   : > { %2084 = vrsqrt.f32 %v2880_v23  ;;  %v1171_v39 = vmul.f32 %v771_v38, %v2538_v49  ;;  %v780_v51 = vmul.f32 %v2075_v37, %v2808_v4  ;;  %vm788_vm6 = vcmp.eq.f32.partialorder %v2826_v27, inf }
 0x13c   : > { %2086 = vrsqrt.f32 %v2890_v34  ;;  %v573_v41 = vpop.f32.mrb[16].mxu0  ;;  %v1230_v18 = vpack.c.bf16 %v1170_v46, %v1168_v57  ;;  %v775_v47 = vsel %vm774_vm2, %v2802_v59, %v773_v50  ;;  %vm790_vm7 = vcmp.eq.f32.partialorder %v2826_v27, 0.0 }
 0x13d   : > { %v2077_v54 = vpop.eup %2076  ;;  %v2906_v19 = vadd.f32 %v573_v41, %v2761_v7  ;;  %v575_v45 = vpop.f32.mrb[17].mxu0  ;;  %v1231_v49 = vpack.c.bf16 %v1171_v39, %v1169_v24  ;;  %v782_v53 = vsel %vm781_vm0, %v2808_v4, %v780_v51  ;;  %v778_v56 = vsel %vm776_vm4, %v777_v32, %v775_v47 }
 0x13e   : > { %v2079_v22 = vpop.eup %2078  ;;  %v2914_v52 = vadd.f32 %v575_v45, %v2763_v10  ;;  %v785_v35 = vsel %vm783_vm1, %v784_v42, %v782_v53  ;;  %v787_v62 = vmul.f32 %v2077_v54, %v2826_v27  ;;  %v791_v63 = vand.u32 2147483648, %v2826_v27 }
 0x13f   : > { %2088 = vrsqrt.f32 %v2906_v19  ;;  %1558 = vmatprep.mubr.bf16.mxu1 %v1231_v49  ;;  %v794_v0 = vmul.f32 %v2079_v22, %v2836_v44  ;;  %v1173_v1 = vmul.f32 %v785_v35, %v2554_v55  ;;  %v1172_v59 = vmul.f32 %v778_v56, %v2567_v60 }
 0x140   : > { %2090 = vrsqrt.f32 %v2914_v52  ;;  %v579_v6 = vpop.f32.mrb[18].mxu0  ;;  %1559 = vmatmul.mubr.bf16.gmra.mrb[4].mxu1 %v1230_v18  ;;  %v789_v4 = vsel %vm788_vm6, %v2826_v27, %v787_v62  ;;  %vm809_vm8 = vcmp.eq.f32.partialorder %v2862_v5, inf  ;;  %vm811_vm9 = vcmp.eq.f32.partialorder %v2862_v5, 0.0 }
 0x141   : > { %v2081_v42 = vpop.eup %2080  ;;  %v2931_v11 = vadd.f32 %v579_v6, %v2761_v7  ;;  %v581_v12 = vpop.f32.mrb[19].mxu0  ;;  %v796_v55 = vsel %vm795_vm3, %v2836_v44, %v794_v0  ;;  %v792_v60 = vsel %vm790_vm7, %v791_v63, %v789_v4  ;;  %v812_v24 = vand.u32 2147483648, %v2862_v5 }
 0x142   : > { %v2083_v57 = vpop.eup %2082  ;;  %v2940_v16 = vadd.f32 %v581_v12, %v2763_v10  ;;  %v799_v28 = vsel %vm797_vm5, %v798_v13, %v796_v55  ;;  %v1174_v17 = vmul.f32 %v792_v60, %v2583_v2  ;;  %vm823_vm10 = vcmp.eq.f32.partialorder %v2890_v34, inf }
 0x143   : > { %2092 = vrsqrt.f32 %v2931_v11  ;;  %v1175_v43 = vmul.f32 %v799_v28, %v2570_v61  ;;  %v808_v27 = vmul.f32 %v2083_v57, %v2862_v5  ;;  %vm825_vm11 = vcmp.eq.f32.partialorder %v2890_v34, 0.0 }
 0x144   : > { %2094 = vrsqrt.f32 %v2940_v16  ;;  %v585_v48 = vpop.f32.mrb[20].mxu0  ;;  %v1232_v31 = vpack.c.bf16 %v1174_v17, %v1172_v59  ;;  %v826_v32 = vand.u32 2147483648, %v2890_v34  ;;  %v801_v44 = vmul.f32 %v2081_v42, %v2853_v58 }
 0x145   : > { %v2085_v13 = vpop.eup %2084  ;;  %v2954_v2 = vadd.f32 %v585_v48, %v2761_v7  ;;  %v587_v37 = vpop.f32.mrb[21].mxu0  ;;  %v1233_v38 = vpack.c.bf16 %v1175_v43, %v1173_v1  ;;  %v810_v61 = vsel %vm809_vm8, %v2862_v5, %v808_v27  ;;  %vm802_vm12 = vcmp.eq.f32.partialorder %v2853_v58, inf }
 0x146   : > { %v2087_v46 = vpop.eup %2086  ;;  %v2961_v50 = vadd.f32 %v587_v37, %v2763_v10  ;;  %v813_v39 = vsel %vm811_vm9, %v812_v24, %v810_v61  ;;  %v803_v51 = vsel %vm802_vm12, %v2853_v58, %v801_v44  ;;  %vm804_vm13 = vcmp.eq.f32.partialorder %v2853_v58, 0.0 }
 0x147   : > { %2096 = vrsqrt.f32 %v2954_v2  ;;  %1568 = vmatprep.mubr.bf16.mxu1 %v1233_v38  ;;  %v822_v41 = vmul.f32 %v2087_v46, %v2890_v34  ;;  %v1177_v18 = vmul.f32 %v813_v39, %v2586_v3  ;;  %v805_v47 = vand.u32 2147483648, %v2853_v58 }
 0x148   : > { %2098 = vrsqrt.f32 %v2961_v50  ;;  %v591_v54 = vpop.f32.mrb[22].mxu0  ;;  %1569 = vmatmul.mubr.bf16.gmra.mrb[8].mxu1 %v1232_v31  ;;  %v815_v5 = vmul.f32 %v2085_v13, %v2880_v23  ;;  %vm816_vm14 = vcmp.eq.f32.partialorder %v2880_v23, inf  ;;  %vm818_vm15 = vcmp.eq.f32.partialorder %v2880_v23, 0.0 }
 0x149   : > { %v2089_v45 = vpop.eup %2088  ;;  %v2976_v49 = vadd.f32 %v591_v54, %v2761_v7  ;;  %v593_v53 = vpop.f32.mrb[23].mxu0  ;;  %v824_v3 = vsel %vm823_vm10, %v2890_v34, %v822_v41  ;;  %v806_v56 = vsel %vm804_vm13, %v805_v47, %v803_v51  ;;  %v819_v22 = vand.u32 2147483648, %v2880_v23 }
 0x14a   : > { %v2091_v35 = vpop.eup %2090  ;;  %v2985_v62 = vadd.f32 %v593_v53, %v2763_v10  ;;  %v827_v63 = vsel %vm825_vm11, %v826_v32, %v824_v3  ;;  %v817_v0 = vsel %vm816_vm14, %v2880_v23, %v815_v5  ;;  %v1176_v1 = vmul.f32 %v806_v56, %v2599_v8 }
 0x14b   : > { %2100 = vrsqrt.f32 %v2976_v49  ;;  %v1179_v59 = vmul.f32 %v827_v63, %v2602_v9  ;;  %v820_v6 = vsel %vm818_vm15, %v819_v22, %v817_v0  ;;  %v836_v58 = vmul.f32 %v2091_v35, %v2914_v52 }
 0x14c   : > { %2102 = vrsqrt.f32 %v2985_v62  ;;  %v597_v4 = vpop.f32.mrb[24].mxu0  ;;  %v1178_v42 = vmul.f32 %v820_v6, %v2615_v14  ;;  %vm837_vm0 = vcmp.eq.f32.partialorder %v2914_v52, inf  ;;  %vm839_vm1 = vcmp.eq.f32.partialorder %v2914_v52, 0.0 }
 0x14d   : > { %v2093_v34 = vpop.eup %2092  ;;  %v2999_v23 = vadd.f32 %v597_v4, %v2761_v7  ;;  %v599_v8 = vpop.f32.mrb[25].mxu0  ;;  %v1235_v12 = vpack.c.bf16 %v1179_v59, %v1177_v18  ;;  %v838_v9 = vsel %vm837_vm0, %v2914_v52, %v836_v58  ;;  %v840_v55 = vand.u32 2147483648, %v2914_v52 }
 0x14e   : > { %v2095_v60 = vpop.eup %2094  ;;  %v3004_v24 = vadd.f32 %v599_v8, %v2763_v10  ;;  %v1234_v57 = vpack.c.bf16 %v1178_v42, %v1176_v1  ;;  %vm851_vm2 = vcmp.eq.f32.partialorder %v2940_v16, inf  ;;  %vm853_vm3 = vcmp.eq.f32.partialorder %v2940_v16, 0.0 }
 0x14f   : > { %2104 = vrsqrt.f32 %v2999_v23  ;;  %1578 = vmatprep.mubr.bf16.mxu1 %v1235_v12  ;;  %v841_v14 = vsel %vm839_vm1, %v840_v55, %v838_v9  ;;  %v850_v28 = vmul.f32 %v2095_v60, %v2940_v16  ;;  %v854_v17 = vand.u32 2147483648, %v2940_v16 }
 0x150   : > { %2106 = vrsqrt.f32 %v3004_v24  ;;  %v603_v52 = vpop.f32.mrb[26].mxu0  ;;  %1579 = vmatmul.mubr.bf16.gmra.mrb[12].mxu1 %v1234_v57  ;;  %v1181_v43 = vmul.f32 %v841_v14, %v2618_v15  ;;  %v829_v27 = vmul.f32 %v2089_v45, %v2906_v19  ;;  %vm830_vm4 = vcmp.eq.f32.partialorder %v2906_v19, inf }
 0x151   : > { %v2097_v48 = vpop.eup %2096  ;;  %v3016_v31 = vadd.f32 %v603_v52, %v2761_v7  ;;  %v605_v32 = vpop.f32.mrb[27].mxu0  ;;  %v852_v44 = vsel %vm851_vm2, %v2940_v16, %v850_v28  ;;  %vm832_vm5 = vcmp.eq.f32.partialorder %v2906_v19, 0.0  ;;  %v833_v13 = vand.u32 2147483648, %v2906_v19 }
 0x152   : > { %v2099_v37 = vpop.eup %2098  ;;  %v3024_v15 = vadd.f32 %v605_v32, %v2763_v10  ;;  %v855_v38 = vsel %vm853_vm3, %v854_v17, %v852_v44  ;;  %v831_v61 = vsel %vm830_vm4, %v2906_v19, %v829_v27  ;;  %v843_v46 = vmul.f32 %v2093_v34, %v2931_v11 }
 0x153   : > { %2108 = vrsqrt.f32 %v3016_v31  ;;  %v1183_v39 = vmul.f32 %v855_v38, %v2634_v21  ;;  %v834_v51 = vsel %vm832_vm5, %v833_v13, %v831_v61  ;;  %vm844_vm6 = vcmp.eq.f32.partialorder %v2931_v11, inf }
 0x154   : > { %2110 = vrsqrt.f32 %v3024_v15  ;;  %v609_v41 = vpop.f32.mrb[28].mxu0  ;;  %v845_v18 = vsel %vm844_vm6, %v2931_v11, %v843_v46  ;;  %vm846_vm7 = vcmp.eq.f32.partialorder %v2931_v11, 0.0  ;;  %v847_v16 = vand.u32 2147483648, %v2931_v11 }
 0x155   : > { %v2101_v47 = vpop.eup %2100  ;;  %v3038_v19 = vadd.f32 %v609_v41, %v2761_v7  ;;  %v611_v54 = vpop.f32.mrb[29].mxu0  ;;  %v1237_v5 = vpack.c.bf16 %v1183_v39, %v1181_v43  ;;  %v1180_v21 = vmul.f32 %v834_v51, %v2631_v20  ;;  %v864_v45 = vmul.f32 %v2099_v37, %v2961_v50 }
 0x156   : > { %v2103_v53 = vpop.eup %2102  ;;  %v3043_v3 = vadd.f32 %v611_v54, %v2763_v10  ;;  %v848_v56 = vsel %vm846_vm7, %v847_v16, %v845_v18  ;;  %vm865_vm8 = vcmp.eq.f32.partialorder %v2961_v50, inf  ;;  %vm867_vm9 = vcmp.eq.f32.partialorder %v2961_v50, 0.0 }
 0x157   : > { %2112 = vrsqrt.f32 %v3038_v19  ;;  %1588 = vmatprep.mubr.bf16.mxu1 %v1237_v5  ;;  %v1182_v11 = vmul.f32 %v848_v56, %v2644_v25  ;;  %v866_v22 = vsel %vm865_vm8, %v2961_v50, %v864_v45  ;;  %v868_v20 = vand.u32 2147483648, %v2961_v50 }
 0x158   : > { %2114 = vrsqrt.f32 %v3043_v3  ;;  %v615_v35 = vpop.f32.mrb[30].mxu0  ;;  %v878_v63 = vmul.f32 %v2103_v53, %v2985_v62  ;;  %vm879_vm10 = vcmp.eq.f32.partialorder %v2985_v62, inf  ;;  %vm881_vm11 = vcmp.eq.f32.partialorder %v2985_v62, 0.0 }
 0x159   : > { %v2105_v0 = vpop.eup %2104  ;;  %v3056_v1 = vadd.f32 %v615_v35, %v2761_v7  ;;  %v1236_v59 = vpack.c.bf16 %v1182_v11, %v1180_v21  ;;  %v617_v6 = vpop.f32.mrb[31].mxu0  ;;  %v869_v25 = vsel %vm867_vm9, %v868_v20, %v866_v22  ;;  %v882_v58 = vand.u32 2147483648, %v2985_v62 }
 0x15a   : > { %v2107_v4 = vpop.eup %2106  ;;  %v3060_v50 = vadd.f32 %v617_v6, %v2763_v10  ;;  %v880_v42 = vsel %vm879_vm10, %v2985_v62, %v878_v63  ;;  %v1185_v34 = vmul.f32 %v869_v25, %v2647_v26  ;;  %v857_v8 = vmul.f32 %v2097_v48, %v2954_v2 }
 0x15b   : > { %2116 = vrsqrt.f32 %v3056_v1  ;;  %1589 = vmatmul.mubr.bf16.gmra.mrb[16].mxu1 %v1236_v59  ;;  %v883_v12 = vsel %vm881_vm11, %v882_v58, %v880_v42  ;;  %vm858_vm12 = vcmp.eq.f32.partialorder %v2954_v2, inf  ;;  %vm860_vm13 = vcmp.eq.f32.partialorder %v2954_v2, 0.0  ;;  %v2184_v58 = vld [vmem:[%s2378_s30 + $0xc0] sm:$0xff] }
 0x15c   : > { %2118 = vrsqrt.f32 %v3060_v50  ;;  %v621_v9 = vpop.f32.mrb[32].mxu0  ;;  %v1187_v55 = vmul.f32 %v883_v12, %v2657_v30  ;;  %v859_v60 = vsel %vm858_vm12, %v2954_v2, %v857_v8  ;;  %v861_v62 = vand.u32 2147483648, %v2954_v2 }
 0x15d   : > { %v2109_v26 = vpop.eup %2108  ;;  %v3073_v57 = vadd.f32 %v621_v9, %v2761_v7  ;;  %v623_v14 = vpop.f32.mrb[33].mxu0  ;;  %v871_v28 = vmul.f32 %v2101_v47, %v2976_v49  ;;  %vm872_vm14 = vcmp.eq.f32.partialorder %v2976_v49, inf  ;;  %vm874_vm15 = vcmp.eq.f32.partialorder %v2976_v49, 0.0 }
 0x15e   : > { %v2111_v17 = vpop.eup %2110  ;;  %v3079_v52 = vadd.f32 %v623_v14, %v2763_v10  ;;  %v1239_v30 = vpack.c.bf16 %v1187_v55, %v1185_v34  ;;  %v862_v43 = vsel %vm860_vm13, %v861_v62, %v859_v60  ;;  %v875_v27 = vand.u32 2147483648, %v2976_v49  ;;  %v2185_v55 = vld [vmem:[%s2378_s30 + $0xd0] sm:$0xff] }
 0x15f   : > { %2120 = vrsqrt.f32 %v3073_v57  ;;  %v873_v2 = vsel %vm872_vm14, %v2976_v49, %v871_v28  ;;  %v1184_v48 = vmul.f32 %v862_v43, %v2654_v29  ;;  %v892_v32 = vmul.f32 %v2107_v4, %v3004_v24 }
 0x160   : > { %2122 = vrsqrt.f32 %v3079_v52  ;;  %1598 = vmatprep.mubr.bf16.mxu1 %v1239_v30  ;;  %v627_v44 = vpop.f32.mrb[34].mxu0  ;;  %v876_v13 = vsel %vm874_vm15, %v875_v27, %v873_v2  ;;  %vm893_vm0 = vcmp.eq.f32.partialorder %v3004_v24, inf  ;;  %vm895_vm1 = vcmp.eq.f32.partialorder %v3004_v24, 0.0 }
 0x161   : > { %v3089_v37 = vpop.eup %2112  ;;  %v3092_v38 = vadd.f32 %v627_v44, %v2761_v7  ;;  %v1186_v49 = vmul.f32 %v876_v13, %v2664_v33  ;;  %v629_v61 = vpop.f32.mrb[35].mxu0  ;;  %v894_v29 = vsel %vm893_vm0, %v3004_v24, %v892_v32  ;;  %v896_v46 = vand.u32 2147483648, %v3004_v24  ;;  %v2186_v44 = vld [vmem:[%s2378_s30 + $0xe8] sm:$0xff] }
 0x162   : > { %v2115_v39 = vpop.eup %2114  ;;  %v3098_v51 = vadd.f32 %v629_v61, %v2763_v10  ;;  %v906_v41 = vmul.f32 %v2111_v17, %v3024_v15  ;;  %vm907_vm2 = vcmp.eq.f32.partialorder %v3024_v15, inf  ;;  %vm909_vm3 = vcmp.eq.f32.partialorder %v3024_v15, 0.0 }
 0x163   : > { %2124 = vrsqrt.f32 %v3092_v38  ;;  %v1238_v18 = vpack.c.bf16 %v1186_v49, %v1184_v48  ;;  %v897_v16 = vsel %vm895_vm1, %v896_v46, %v894_v29  ;;  %v910_v33 = vand.u32 2147483648, %v3024_v15  ;;  %v2187_v29 = vld [vmem:[%s2378_s30 + $0xf8] sm:$0xff] }
 0x164   : > { %2126 = vrsqrt.f32 %v3098_v51  ;;  %v633_v47 = vpop.f32.mrb[36].mxu0  ;;  %v908_v24 = vsel %vm907_vm2, %v3024_v15, %v906_v41  ;;  %v1189_v54 = vmul.f32 %v897_v16, %v2667_v36  ;;  %v885_v5 = vmul.f32 %v2105_v0, %v2999_v23 }
 0x165   : > { %v3109_v21 = vpop.eup %2116  ;;  %1599 = vmatmul.mubr.bf16.gmra.mrb[20].mxu1 %v1238_v18  ;;  %v3112_v45 = vadd.f32 %v633_v47, %v2761_v7  ;;  %v635_v53 = vpop.f32.mrb[37].mxu0  ;;  %v911_v56 = vsel %vm909_vm3, %v910_v33, %v908_v24  ;;  %vm886_vm4 = vcmp.eq.f32.partialorder %v2999_v23, inf  ;;  %vm888_vm5 = vcmp.eq.f32.partialorder %v2999_v23, 0.0 }
 0x166   : > { %v2119_v11 = vpop.eup %2118  ;;  %v3117_v22 = vadd.f32 %v635_v53, %v2763_v10  ;;  %v1191_v36 = vmul.f32 %v911_v56, %v2675_v40  ;;  %v887_v15 = vsel %vm886_vm4, %v2999_v23, %v885_v5  ;;  %v889_v20 = vand.u32 2147483648, %v2999_v23 }
 0x167   : > { %2128 = vrsqrt.f32 %v3112_v45  ;;  %v899_v35 = vmul.f32 %v2109_v26, %v3016_v31  ;;  %vm900_vm6 = vcmp.eq.f32.partialorder %v3016_v31, inf  ;;  %vm902_vm7 = vcmp.eq.f32.partialorder %v3016_v31, 0.0 }
 0x168   : > { %2130 = vrsqrt.f32 %v3117_v22  ;;  %v1241_v63 = vpack.c.bf16 %v1191_v36, %v1189_v54  ;;  %v639_v0 = vpop.f32.mrb[38].mxu0  ;;  %v890_v59 = vsel %vm888_vm5, %v889_v20, %v887_v15  ;;  %v903_v40 = vand.u32 2147483648, %v3016_v31 }
 0x169   : > { %v3128_v6 = vpop.eup %2120  ;;  %v3131_v23 = vadd.f32 %v639_v0, %v2761_v7  ;;  %v901_v25 = vsel %vm900_vm6, %v3016_v31, %v899_v35  ;;  %v1188_v4 = vmul.f32 %v2184_v58, %v890_v59  ;;  %v641_v42 = vpop.f32.mrb[39].mxu0  ;;  %v920_v34 = vmul.f32 %v2115_v39, %v3043_v3  ;;  %v2189_v35 = vld [vmem:[%s2378_s30 + $0xf0] sm:$0xff] }
 0x16a   : > { %v2123_v8 = vpop.eup %2122  ;;  %1608 = vmatprep.mubr.bf16.mxu1 %v1241_v63  ;;  %v904_v12 = vsel %vm902_vm7, %v903_v40, %v901_v25  ;;  %v3137_v9 = vadd.f32 %v641_v42, %v2763_v10  ;;  %vm921_vm8 = vcmp.eq.f32.partialorder %v3043_v3, inf  ;;  %vm923_vm9 = vcmp.eq.f32.partialorder %v3043_v3, 0.0 }
 0x16b   : > { %2132 = vrsqrt.f32 %v3131_v23  ;;  %v1190_v60 = vmul.f32 %v2185_v55, %v904_v12  ;;  %v922_v31 = vsel %vm921_vm8, %v3043_v3, %v920_v34  ;;  %v924_v62 = vand.u32 2147483648, %v3043_v3  ;;  %v2190_v12 = vld [vmem:[%s2378_s30 + $0x108] sm:$0xff] }
 0x16c   : > { %2134 = vrsqrt.f32 %v3137_v9  ;;  %v645_v26 = vpop.f32.mrb[40].mxu0  ;;  %v934_v14 = vmul.f32 %v2119_v11, %v3060_v50  ;;  %vm935_vm10 = vcmp.eq.f32.partialorder %v3060_v50, inf  ;;  %vm937_vm11 = vcmp.eq.f32.partialorder %v3060_v50, 0.0 }
 0x16d   : > { %v3149_v28 = vpop.eup %2124  ;;  %v1240_v17 = vpack.c.bf16 %v1190_v60, %v1188_v4  ;;  %v3152_v30 = vadd.f32 %v645_v26, %v2761_v7  ;;  %v647_v43 = vpop.f32.mrb[41].mxu0  ;;  %v925_v27 = vsel %vm923_vm9, %v924_v62, %v922_v31  ;;  %v938_v3 = vand.u32 2147483648, %v3060_v50 }
 0x16e   : > { %v2127_v2 = vpop.eup %2126  ;;  %v3156_v48 = vadd.f32 %v647_v43, %v2763_v10  ;;  %v936_v32 = vsel %vm935_vm10, %v3060_v50, %v934_v14  ;;  %v1193_v13 = vmul.f32 %v2186_v44, %v925_v27  ;;  %v913_v49 = vmul.f32 %v3089_v37, %v3038_v19 }
 0x16f   : > { %1609 = vmatmul.mubr.bf16.gmra.mrb[24].mxu1 %v1240_v17  ;;  %2136 = vrsqrt.f32 %v3152_v30  ;;  %v939_v61 = vsel %vm937_vm11, %v938_v3, %v936_v32  ;;  %vm914_vm12 = vcmp.eq.f32.partialorder %v3038_v19, inf  ;;  %vm916_vm13 = vcmp.eq.f32.partialorder %v3038_v19, 0.0 }
 0x170   : > { %2138 = vrsqrt.f32 %v3156_v48  ;;  %v1195_v46 = vmul.f32 %v2187_v29, %v939_v61  ;;  %v651_v39 = vpop.f32.mrb[42].mxu0  ;;  %v915_v50 = vsel %vm914_vm12, %v3038_v19, %v913_v49  ;;  %v917_v41 = vand.u32 2147483648, %v3038_v19 }
 0x171   : > { %v3169_v18 = vpop.eup %2128  ;;  %v3172_v37 = vadd.f32 %v651_v39, %v2761_v7  ;;  %v927_v16 = vmul.f32 %v3109_v21, %v3056_v1  ;;  %vm928_vm14 = vcmp.eq.f32.partialorder %v3056_v1, inf  ;;  %vm930_vm15 = vcmp.eq.f32.partialorder %v3056_v1, 0.0  ;;  %v653_v33 = vpop.f32.mrb[43].mxu0  ;;  %v2188_v21 = vld [vmem:[%s2378_s30 + $0xe0] sm:$0xff] }
 0x172   : > { %v3178_v47 = vpop.eup %2130  ;;  %v1243_v24 = vpack.c.bf16 %v1195_v46, %v1193_v13  ;;  %v918_v54 = vsel %vm916_vm13, %v917_v41, %v915_v50  ;;  %v931_v19 = vand.u32 2147483648, %v3056_v1  ;;  %v3182_v5 = vadd.f32 %v653_v33, %v2763_v10  ;;  %v2192_v46 = vld [vmem:[%s2378_s30 + $0x100] sm:$0xff] }
 0x173   : > { %2140 = vrsqrt.f32 %v3172_v37  ;;  %v929_v53 = vsel %vm928_vm14, %v3056_v1, %v927_v16  ;;  %v1192_v56 = vmul.f32 %v2188_v21, %v918_v54  ;;  %v948_v11 = vmul.f32 %v2123_v8, %v3079_v52 }
 0x174   : > { %1618 = vmatprep.mubr.bf16.mxu1 %v1243_v24  ;;  %v932_v36 = vsel %vm930_vm15, %v931_v19, %v929_v53  ;;  %2142 = vrsqrt.f32 %v3182_v5  ;;  %v657_v15 = vpop.f32.mrb[44].mxu0  ;;  %vm949_vm0 = vcmp.eq.f32.partialorder %v3079_v52, inf  ;;  %vm951_vm1 = vcmp.eq.f32.partialorder %v3079_v52, 0.0 }
 0x175   : > { %v3191_v20 = vpop.eup %2132  ;;  %v1194_v63 = vmul.f32 %v2189_v35, %v932_v36  ;;  %v3195_v1 = vadd.f32 %v657_v15, %v2761_v7  ;;  %v659_v0 = vpop.f32.mrb[45].mxu0  ;;  %v950_v59 = vsel %vm949_vm0, %v3079_v52, %v948_v11  ;;  %v952_v40 = vand.u32 2147483648, %v3079_v52 }
 0x176   : > { %v2135_v25 = vpop.eup %2134  ;;  %v3200_v58 = vadd.f32 %v659_v0, %v2763_v10  ;;  %v962_v4 = vmul.f32 %v2127_v2, %v3098_v51  ;;  %vm963_vm2 = vcmp.eq.f32.partialorder %v3098_v51, inf  ;;  %vm965_vm3 = vcmp.eq.f32.partialorder %v3098_v51, 0.0 }
 0x177   : > { %v1242_v42 = vpack.c.bf16 %v1194_v63, %v1192_v56  ;;  %2144 = vrsqrt.f32 %v3195_v1  ;;  %v953_v34 = vsel %vm951_vm1, %v952_v40, %v950_v59  ;;  %v966_v8 = vand.u32 2147483648, %v3098_v51  ;;  %v2194_v59 = vld [vmem:[%s2378_s30 + $0x128] sm:$0xff] }
 0x178   : > { %2146 = vrsqrt.f32 %v3200_v58  ;;  %v964_v52 = vsel %vm963_vm2, %v3098_v51, %v962_v4  ;;  %v1197_v55 = vmul.f32 %v2190_v12, %v953_v34  ;;  %v663_v60 = vpop.f32.mrb[46].mxu0  ;;  %v941_v31 = vmul.f32 %v3128_v6, %v3073_v57  ;;  %v2191_v51 = vld [vmem:[%s2378_s30 + $0x118] sm:$0xff] }
 0x179   : > { %v3212_v62 = vpop.eup %2136  ;;  %1619 = vmatmul.mubr.bf16.gmra.mrb[28].mxu1 %v1242_v42  ;;  %v967_v26 = vsel %vm965_vm3, %v966_v8, %v964_v52  ;;  %v3215_v14 = vadd.f32 %v663_v60, %v2761_v7  ;;  %vm942_vm4 = vcmp.eq.f32.partialorder %v3073_v57, inf  ;;  %vm944_vm5 = vcmp.eq.f32.partialorder %v3073_v57, 0.0  ;;  %v665_v17 = vpop.f32.mrb[47].mxu0  ;;  %v2195_v34 = vld [vmem:[%s2378_s30 + $0x138] sm:$0xff] }
 0x17a   : > { %v3219_v43 = vpop.eup %2138  ;;  %v1199_v27 = vmul.f32 %v2191_v51, %v967_v26  ;;  %v943_v3 = vsel %vm942_vm4, %v3073_v57, %v941_v31  ;;  %v945_v6 = vand.u32 2147483648, %v3073_v57  ;;  %v955_v2 = vmul.f32 %v3149_v28, %v3092_v38  ;;  %v2196_v51 = vld [vmem:[%s2378_s30 + $0x120] sm:$0xff] }
 0x17b   : > { %2148 = vrsqrt.f32 %v3215_v14  ;;  %vm956_vm6 = vcmp.eq.f32.partialorder %v3092_v38, inf  ;;  %vm958_vm7 = vcmp.eq.f32.partialorder %v3092_v38, 0.0  ;;  %v959_v32 = vand.u32 2147483648, %v3092_v38 }
 0x17c   : > { %v1245_v44 = vpack.c.bf16 %v1199_v27, %v1197_v55  ;;  %v946_v13 = vsel %vm944_vm5, %v945_v6, %v943_v3  ;;  %v957_v49 = vsel %vm956_vm6, %v3092_v38, %v955_v2  ;;  %v3232_v61 = vadd.f32 %v665_v17, %v2763_v10  ;;  %v669_v57 = vpop.f32.mrb[48].mxu0  ;;  %v2193_v38 = vld [vmem:[%s2378_s30 + $0x110] sm:$0xff] }
 0x17d   : > { %v3234_v29 = vpop.eup %2140  ;;  %v960_v28 = vsel %vm958_vm7, %v959_v32, %v957_v49  ;;  %v1196_v39 = vmul.f32 %v2192_v46, %v946_v13  ;;  %v3238_v50 = vadd.f32 %v669_v57, %v2761_v7  ;;  %v671_v41 = vpop.f32.mrb[49].mxu0  ;;  %v976_v16 = vmul.f32 %v3178_v47, %v3117_v22 }
 0x17e   : > { %v3242_v33 = vpop.eup %2142  ;;  %1628 = vmatprep.mubr.bf16.mxu1 %v1245_v44  ;;  %v1198_v24 = vmul.f32 %v2193_v38, %v960_v28  ;;  %2150 = vrsqrt.f32 %v3232_v61  ;;  %v3247_v54 = vadd.f32 %v671_v41, %v2763_v10  ;;  %vm977_vm8 = vcmp.eq.f32.partialorder %v3117_v22, inf  ;;  %v2197_v44 = vld [vmem:[%s2378_s30 + $0x130] sm:$0xff] }
 0x17f   : > { %2152 = vrsqrt.f32 %v3238_v50  ;;  %v978_v19 = vsel %vm977_vm8, %v3117_v22, %v976_v16  ;;  %vm979_vm9 = vcmp.eq.f32.partialorder %v3117_v22, 0.0  ;;  %v980_v47 = vand.u32 2147483648, %v3117_v22 }
 0x180   : > { %v1244_v53 = vpack.c.bf16 %v1198_v24, %v1196_v39  ;;  %2154 = vrsqrt.f32 %v3247_v54  ;;  %v990_v21 = vmul.f32 %v2135_v25, %v3137_v9  ;;  %vm991_vm10 = vcmp.eq.f32.partialorder %v3137_v9, inf  ;;  %v675_v56 = vpop.f32.mrb[50].mxu0 }
 0x181   : > { %v3257_v11 = vpop.eup %2144  ;;  %v981_v36 = vsel %vm979_vm9, %v980_v47, %v978_v19  ;;  %vm993_vm11 = vcmp.eq.f32.partialorder %v3137_v9, 0.0  ;;  %v994_v15 = vand.u32 2147483648, %v3137_v9  ;;  %v3262_v35 = vadd.f32 %v675_v56, %v2761_v7  ;;  %v677_v22 = vpop.f32.mrb[51].mxu0  ;;  %v2198_v47 = vld [vmem:[%s2378_s30 + $0x148] sm:$0xff] }
 0x182   : > { %v3264_v63 = vpop.eup %2146  ;;  %1629 = vmatmul.mubr.bf16.gmra.mrb[32].mxu1 %v1244_v53  ;;  %v992_v0 = vsel %vm991_vm10, %v3137_v9, %v990_v21  ;;  %v1201_v40 = vmul.f32 %v2194_v59, %v981_v36  ;;  %v969_v25 = vmul.f32 %v3169_v18, %v3112_v45  ;;  %vm970_vm12 = vcmp.eq.f32.partialorder %v3112_v45, inf  ;;  %v2199_v36 = vld [vmem:[%s2378_s30 + $0x158] sm:$0xff] }
 0x183   : > { %v995_v4 = vsel %vm993_vm11, %v994_v15, %v992_v0  ;;  %2156 = vrsqrt.f32 %v3262_v35  ;;  %vm972_vm13 = vcmp.eq.f32.partialorder %v3112_v45, 0.0  ;;  %v973_v42 = vand.u32 2147483648, %v3112_v45 }
 0x184   : > { %v1203_v8 = vmul.f32 %v2195_v34, %v995_v4  ;;  %v971_v52 = vsel %vm970_vm12, %v3112_v45, %v969_v25  ;;  %v983_v9 = vmul.f32 %v3191_v20, %v3131_v23  ;;  %vm984_vm14 = vcmp.eq.f32.partialorder %v3131_v23, inf  ;;  %v681_v18 = vpop.f32.mrb[52].mxu0  ;;  %v2200_v34 = vld [vmem:[%s2378_s30 + $0x140] sm:$0xff] }
 0x185   : > { %v3279_v12 = vpop.eup %2148  ;;  %v974_v55 = vsel %vm972_vm13, %v973_v42, %v971_v52  ;;  %vm986_vm15 = vcmp.eq.f32.partialorder %v3131_v23, 0.0  ;;  %v987_v60 = vand.u32 2147483648, %v3131_v23  ;;  %v3284_v31 = vadd.f32 %v677_v22, %v2763_v10  ;;  %v683_v26 = vpop.f32.mrb[53].mxu0 }
 0x186   : > { %v1247_v17 = vpack.c.bf16 %v1203_v8, %v1201_v40  ;;  %v985_v45 = vsel %vm984_vm14, %v3131_v23, %v983_v9  ;;  %v1200_v20 = vmul.f32 %v2196_v51, %v974_v55  ;;  %v3289_v27 = vadd.f32 %v681_v18, %v2761_v7 }
 0x187   : > { %v988_v3 = vsel %vm986_vm15, %v987_v60, %v985_v45  ;;  %2158 = vrsqrt.f32 %v3284_v31  ;;  %v3293_v6 = vadd.f32 %v683_v26, %v2763_v10  ;;  %v1004_v2 = vmul.f32 %v3219_v43, %v3156_v48  ;;  %v2201_v26 = vld [vmem:[%s2378_s30 + $0x150] sm:$0xff] }
 0x188   : > { %v3297_v32 = vpop.eup %2150  ;;  %1638 = vmatprep.mubr.bf16.mxu1 %v1247_v17  ;;  %v1202_v13 = vmul.f32 %v2197_v44, %v988_v3  ;;  %2160 = vrsqrt.f32 %v3289_v27  ;;  %vm1005_vm0 = vcmp.eq.f32.partialorder %v3156_v48, inf  ;;  %vm1007_vm1 = vcmp.eq.f32.partialorder %v3156_v48, 0.0  ;;  %v687_v23 = vpop.f32.mrb[54].mxu0 }
 0x189   : > { %v3303_v49 = vpop.eup %2152  ;;  %2162 = vrsqrt.f32 %v3293_v6  ;;  %v1006_v57 = vsel %vm1005_vm0, %v3156_v48, %v1004_v2  ;;  %v1008_v43 = vand.u32 2147483648, %v3156_v48  ;;  %v1018_v28 = vmul.f32 %v3242_v33, %v3182_v5  ;;  %v689_v46 = vpop.f32.mrb[55].mxu0 }
 0x18a   : > { %v3310_v39 = vpop.eup %2154  ;;  %v1246_v41 = vpack.c.bf16 %v1202_v13, %v1200_v20  ;;  %vm1019_vm2 = vcmp.eq.f32.partialorder %v3182_v5, inf  ;;  %vm1021_vm3 = vcmp.eq.f32.partialorder %v3182_v5, 0.0  ;;  %v1022_v16 = vand.u32 2147483648, %v3182_v5 }
 0x18b   : > { %v1009_v38 = vsel %vm1007_vm1, %v1008_v43, %v1006_v57  ;;  %v1020_v24 = vsel %vm1019_vm2, %v3182_v5, %v1018_v28  ;;  %v3317_v19 = vadd.f32 %v687_v23, %v2761_v7  ;;  %v997_v48 = vmul.f32 %v3212_v62, %v3152_v30  ;;  %v2202_v57 = vld [vmem:[%s2378_s30 + $0x168] sm:$0xff] }
 0x18c   : > { %1639 = vmatmul.mubr.bf16.gmra.mrb[36].mxu1 %v1246_v41  ;;  %v1023_v33 = vsel %vm1021_vm3, %v1022_v16, %v1020_v24  ;;  %v1205_v53 = vmul.f32 %v2198_v47, %v1009_v38  ;;  %vm998_vm4 = vcmp.eq.f32.partialorder %v3152_v30, inf  ;;  %vm1000_vm5 = vcmp.eq.f32.partialorder %v3152_v30, 0.0  ;;  %v693_v21 = vpop.f32.mrb[56].mxu0 }
 0x18d   : > { %v3324_v56 = vpop.eup %2156  ;;  %v1207_v5 = vmul.f32 %v2199_v36, %v1023_v33  ;;  %2164 = vrsqrt.f32 %v3317_v19  ;;  %v999_v15 = vsel %vm998_vm4, %v3152_v30, %v997_v48  ;;  %v1001_v62 = vand.u32 2147483648, %v3152_v30  ;;  %v695_v22 = vpop.f32.mrb[57].mxu0 }
 0x18e   : > { %v1011_v0 = vmul.f32 %v3234_v29, %v3172_v37  ;;  %vm1012_vm6 = vcmp.eq.f32.partialorder %v3172_v37, inf  ;;  %vm1014_vm7 = vcmp.eq.f32.partialorder %v3172_v37, 0.0  ;;  %v1015_v59 = vand.u32 2147483648, %v3172_v37 }
 0x18f   : > { %v1249_v40 = vpack.c.bf16 %v1207_v5, %v1205_v53  ;;  %v1002_v25 = vsel %vm1000_vm5, %v1001_v62, %v999_v15  ;;  %v3336_v4 = vadd.f32 %v689_v46, %v2763_v10  ;;  %v3339_v42 = vadd.f32 %v693_v21, %v2761_v7  ;;  %v2204_v5 = vld [vmem:[%s2378_s30 + $0x160] sm:$0xff] }
 0x190   : > { %v1013_v30 = vsel %vm1012_vm6, %v3172_v37, %v1011_v0  ;;  %v1204_v8 = vmul.f32 %v2200_v34, %v1002_v25  ;;  %v3344_v29 = vadd.f32 %v695_v22, %v2763_v10  ;;  %v1032_v52 = vmul.f32 %v3264_v63, %v3200_v58  ;;  %v699_v9 = vpop.f32.mrb[58].mxu0 }
 0x191   : > { %v3348_v18 = vpop.eup %2158  ;;  %1648 = vmatprep.mubr.bf16.mxu1 %v1249_v40  ;;  %v1016_v55 = vsel %vm1014_vm7, %v1015_v59, %v1013_v30  ;;  %2166 = vrsqrt.f32 %v3336_v4  ;;  %vm1033_vm8 = vcmp.eq.f32.partialorder %v3200_v58, inf  ;;  %vm1035_vm9 = vcmp.eq.f32.partialorder %v3200_v58, 0.0  ;;  %v701_v37 = vpop.f32.mrb[59].mxu0  ;;  %v2205_v40 = vld [vmem:[%s2378_s30 + $0x170] sm:$0xff] }
 0x192   : > { %v3353_v60 = vpop.eup %2160  ;;  %v1206_v17 = vmul.f32 %v2201_v26, %v1016_v55  ;;  %2168 = vrsqrt.f32 %v3339_v42  ;;  %v1034_v63 = vsel %vm1033_vm8, %v3200_v58, %v1032_v52  ;;  %v1036_v45 = vand.u32 2147483648, %v3200_v58 }
 0x193   : > { %v3359_v51 = vpop.eup %2162  ;;  %2170 = vrsqrt.f32 %v3344_v29  ;;  %v1046_v20 = vmul.f32 %v3297_v32, %v3232_v61  ;;  %vm1047_vm10 = vcmp.eq.f32.partialorder %v3232_v61, inf  ;;  %vm1049_vm11 = vcmp.eq.f32.partialorder %v3232_v61, 0.0 }
 0x194   : > { %v1248_v3 = vpack.c.bf16 %v1206_v17, %v1204_v8  ;;  %v1037_v2 = vsel %vm1035_vm9, %v1036_v45, %v1034_v63  ;;  %v1050_v44 = vand.u32 2147483648, %v3232_v61  ;;  %v3368_v13 = vadd.f32 %v699_v9, %v2761_v7  ;;  %v705_v58 = vpop.f32.mrb[60].mxu0  ;;  %v2206_v17 = vld [vmem:[%s2378_s30 + $0x188] sm:$0xff] }
 0x195   : > { %v1048_v23 = vsel %vm1047_vm10, %v3232_v61, %v1046_v20  ;;  %v1209_v43 = vmul.f32 %v2202_v57, %v1037_v2  ;;  %v1025_v32 = vmul.f32 %v3257_v11, %v3195_v1  ;;  %vm1026_vm12 = vcmp.eq.f32.partialorder %v3195_v1, inf  ;;  %v707_v28 = vpop.f32.mrb[61].mxu0  ;;  %v2203_v61 = vld [vmem:[%s2378_s30 + $0x178] sm:$0xff] }
 0x196   : > { %1649 = vmatmul.mubr.bf16.gmra.mrb[40].mxu1 %v1248_v3  ;;  %v1051_v46 = vsel %vm1049_vm11, %v1050_v44, %v1048_v23  ;;  %2172 = vrsqrt.f32 %v3368_v13  ;;  %vm1028_vm13 = vcmp.eq.f32.partialorder %v3195_v1, 0.0  ;;  %v1029_v41 = vand.u32 2147483648, %v3195_v1  ;;  %v2207_v20 = vld [vmem:[%s2378_s30 + $0x198] sm:$0xff] }
 0x197   : > { %v3378_v16 = vpop.eup %2164  ;;  %v1211_v38 = vmul.f32 %v2203_v61, %v1051_v46  ;;  %v1027_v24 = vsel %vm1026_vm12, %v3195_v1, %v1025_v32  ;;  %v1039_v11 = vmul.f32 %v3279_v12, %v3215_v14  ;;  %vm1040_vm14 = vcmp.eq.f32.partialorder %v3215_v14, inf }
 0x198   : > { %v1030_v48 = vsel %vm1028_vm13, %v1029_v41, %v1027_v24  ;;  %vm1042_vm15 = vcmp.eq.f32.partialorder %v3215_v14, 0.0  ;;  %v1043_v33 = vand.u32 2147483648, %v3215_v14  ;;  %v3388_v47 = vadd.f32 %v701_v37, %v2763_v10  ;;  %v711_v53 = vpop.f32.mrb[62].mxu0 }
 0x199   : > { %v1251_v21 = vpack.c.bf16 %v1211_v38, %v1209_v43  ;;  %v1041_v36 = vsel %vm1040_vm14, %v3215_v14, %v1039_v11  ;;  %v1208_v1 = vmul.f32 %v2204_v5, %v1030_v48  ;;  %v3393_v15 = vadd.f32 %v705_v58, %v2761_v7  ;;  %v713_v12 = vpop.f32.mrb[63].mxu0  ;;  %v2208_v43 = vld [vmem:[%s2378_s30 + $0x180] sm:$0xff] }
 0x19a   : > { %v1044_v62 = vsel %vm1042_vm15, %v1043_v33, %v1041_v36  ;;  %2174 = vrsqrt.f32 %v3388_v47  ;;  %v3397_v22 = vadd.f32 %v707_v28, %v2763_v10  ;;  %v1060_v0 = vmul.f32 %v3310_v39, %v3247_v54 }
 0x19b   : > { %v2167_v59 = vpop.eup %2166  ;;  %1658 = vmatprep.mubr.bf16.mxu1 %v1251_v21  ;;  %v1210_v25 = vmul.f32 %v2205_v40, %v1044_v62  ;;  %2176 = vrsqrt.f32 %v3393_v15  ;;  %vm1061_vm0 = vcmp.eq.f32.partialorder %v3247_v54, inf  ;;  %vm1063_vm1 = vcmp.eq.f32.partialorder %v3247_v54, 0.0 }
 0x19c   : > { %v3405_v14 = vpop.eup %2168  ;;  %2178 = vrsqrt.f32 %v3397_v22  ;;  %v1062_v30 = vsel %vm1061_vm0, %v3247_v54, %v1060_v0  ;;  %v1064_v34 = vand.u32 2147483648, %v3247_v54  ;;  %v1074_v39 = vmul.f32 %v3348_v18, %v3284_v31 }
 0x19d   : > { %v3412_v8 = vpop.eup %2170  ;;  %v1250_v52 = vpack.c.bf16 %v1210_v25, %v1208_v1  ;;  %vm1075_vm2 = vcmp.eq.f32.partialorder %v3284_v31, inf  ;;  %vm1077_vm3 = vcmp.eq.f32.partialorder %v3284_v31, 0.0  ;;  %v1078_v9 = vand.u32 2147483648, %v3284_v31 }
 0x19e   : > { %v1065_v55 = vsel %vm1063_vm1, %v1064_v34, %v1062_v30  ;;  %v1076_v37 = vsel %vm1075_vm2, %v3284_v31, %v1074_v39  ;;  %v3419_v26 = vadd.f32 %v711_v53, %v2761_v7  ;;  %v1053_v54 = vmul.f32 %v3303_v49, %v3238_v50  ;;  %v2210_v53 = vld [vmem:[%s2378_s30 + $0x1a8] sm:$0xff]  ;;  %v2212_v30 = vld [vmem:[%s2378_s30 + $0x1a0] sm:$0xff]  ;;  %v2213_v39 = vld [vmem:[%s2378_s30 + $0x1b0] sm:$0xff] }
 0x19f   : > { %1659 = vmatmul.mubr.bf16.gmra.mrb[44].mxu1 %v1250_v52  ;;  %v1079_v18 = vsel %vm1077_vm3, %v1078_v9, %v1076_v37  ;;  %v1213_v63 = vmul.f32 %v2206_v17, %v1065_v55  ;;  %vm1054_vm4 = vcmp.eq.f32.partialorder %v3238_v50, inf  ;;  %vm1056_vm5 = vcmp.eq.f32.partialorder %v3238_v50, 0.0 }
 0x1a0   : > { %v3426_v45 = vpop.eup %2172  ;;  %v1215_v3 = vmul.f32 %v2207_v20, %v1079_v18  ;;  %2180 = vrsqrt.f32 %v3419_v26  ;;  %v1055_v7 = vsel %vm1054_vm4, %v3238_v50, %v1053_v54  ;;  %v1057_v31 = vand.u32 2147483648, %v3238_v50  ;;  %v2214_v20 = vld [vmem:[%s2378_s30 + $0x1c8] sm:$0xff] }
 0x1a1   : > { %v1067_v49 = vmul.f32 %v3324_v56, %v3262_v35  ;;  %vm1068_vm6 = vcmp.eq.f32.partialorder %v3262_v35, inf  ;;  %vm1070_vm7 = vcmp.eq.f32.partialorder %v3262_v35, 0.0  ;;  %v1071_v2 = vand.u32 2147483648, %v3262_v35 }
 0x1a2   : > { %v1253_v44 = vpack.c.bf16 %v1215_v3, %v1213_v63  ;;  %v1058_v58 = vsel %vm1056_vm5, %v1057_v31, %v1055_v7  ;;  %v3438_v23 = vadd.f32 %v713_v12, %v2763_v10  ;;  %v1088_v57 = vmul.f32 %v3359_v51, %v3293_v6  ;;  %v2209_v51 = vld [vmem:[%s2378_s30 + $0x190] sm:$0xff]  ;;  %v2215_v31 = vld [vmem:[%s2378_s30 + $0x1d8] sm:$0xff] }
 0x1a3   : > { %v1069_v50 = vsel %vm1068_vm6, %v3262_v35, %v1067_v49  ;;  %v1212_v32 = vmul.f32 %v2208_v43, %v1058_v58  ;;  %vm1089_vm8 = vcmp.eq.f32.partialorder %v3293_v6, inf  ;;  %vm1091_vm9 = vcmp.eq.f32.partialorder %v3293_v6, 0.0 }
 0x1a4   : > { %v2175_v56 = vpop.eup %2174  ;;  %1668 = vmatprep.mubr.bf16.mxu1 %v1253_v44  ;;  %v1072_v28 = vsel %vm1070_vm7, %v1071_v2, %v1069_v50  ;;  %2182 = vrsqrt.f32 %v3438_v23  ;;  %v1090_v10 = vsel %vm1089_vm8, %v3293_v6, %v1088_v57  ;;  %v1092_v46 = vand.u32 2147483648, %v3293_v6 }
 0x1a5   : > { %v3449_v41 = vpop.eup %2176  ;;  %v1214_v35 = vmul.f32 %v2209_v51, %v1072_v28  ;;  %v1102_v61 = vmul.f32 %v2167_v59, %v3336_v4  ;;  %vm1103_vm10 = vcmp.eq.f32.partialorder %v3336_v4, inf  ;;  %vm1105_vm11 = vcmp.eq.f32.partialorder %v3336_v4, 0.0  ;;  %v2217_v28 = vld [vmem:[%s2378_s30 + $0x1d0] sm:$0xff] }
 0x1a6   : > { %v2179_v38 = vpop.eup %2178  ;;  %v1093_v24 = vsel %vm1091_vm9, %v1092_v46, %v1090_v10  ;;  %v1106_v11 = vand.u32 2147483648, %v3336_v4  ;;  %v1081_v48 = vmul.f32 %v3353_v60, %v3289_v27  ;;  %vm1082_vm12 = vcmp.eq.f32.partialorder %v3289_v27, inf  ;;  %v2211_v60 = vld [vmem:[%s2378_s30 + $0x1b8] sm:$0xff] }
 0x1a7   : > { %v1252_v6 = vpack.c.bf16 %v1214_v35, %v1212_v32  ;;  %v1104_v33 = vsel %vm1103_vm10, %v3336_v4, %v1102_v61  ;;  %v1217_v21 = vmul.f32 %v2210_v53, %v1093_v24  ;;  %vm1084_vm13 = vcmp.eq.f32.partialorder %v3289_v27, 0.0  ;;  %v2216_v32 = vld [vmem:[%s2378_s30 + $0x1c0] sm:$0xff]  ;;  %v2219_v53 = vld [vmem:[%s2378_s30 + $0x1f8] sm:$0xff] }
 0x1a8   : > { %v1107_v36 = vsel %vm1105_vm11, %v1106_v11, %v1104_v33  ;;  %v1083_v5 = vsel %vm1082_vm12, %v3289_v27, %v1081_v48  ;;  %v1085_v1 = vand.u32 2147483648, %v3289_v27  ;;  %v1095_v12 = vmul.f32 %v3378_v16, %v3317_v19 }
 0x1a9   : > { %1669 = vmatmul.mubr.bf16.gmra.mrb[48].mxu1 %v1252_v6  ;;  %v1219_v62 = vmul.f32 %v2211_v60, %v1107_v36  ;;  %vm1096_vm14 = vcmp.eq.f32.partialorder %v3317_v19, inf  ;;  %vm1098_vm15 = vcmp.eq.f32.partialorder %v3317_v19, 0.0  ;;  %v1099_v4 = vand.u32 2147483648, %v3317_v19 }
 0x1aa   : > { %v3470_v0 = vpop.eup %2180  ;;  %v1086_v59 = vsel %vm1084_vm13, %v1085_v1, %v1083_v5  ;;  %v1097_v40 = vsel %vm1096_vm14, %v3317_v19, %v1095_v12  ;;  %v1116_v27 = vmul.f32 %v3412_v8, %v3344_v29  ;;  %vm1117_vm0 = vcmp.eq.f32.partialorder %v3344_v29, inf  ;;  %v2220_v12 = vld [vmem:[%s2378_s30 + $0x1e0] sm:$0xff] }
 0x1ab   : > { %v1255_v16 = vpack.c.bf16 %v1219_v62, %v1217_v21  ;;  %v1100_v25 = vsel %vm1098_vm15, %v1099_v4, %v1097_v40  ;;  %v1216_v34 = vmul.f32 %v2212_v30, %v1086_v59  ;;  %vm1119_vm1 = vcmp.eq.f32.partialorder %v3344_v29, 0.0  ;;  %v2221_v62 = vld [vmem:[%s2378_s30 + $0x1f0] sm:$0xff] }
 0x1ac   : > { %v1218_v52 = vmul.f32 %v2213_v39, %v1100_v25  ;;  %v1118_v9 = vsel %vm1117_vm0, %v3344_v29, %v1116_v27  ;;  %v1120_v55 = vand.u32 2147483648, %v3344_v29  ;;  %v1130_v19 = vmul.f32 %v2175_v56, %v3388_v47 }
 0x1ad   : > { %1678 = vmatprep.mubr.bf16.mxu1 %v1255_v16  ;;  %vm1131_vm2 = vcmp.eq.f32.partialorder %v3388_v47, inf  ;;  %vm1133_vm3 = vcmp.eq.f32.partialorder %v3388_v47, 0.0  ;;  %v1134_v8 = vand.u32 2147483648, %v3388_v47  ;;  %v1109_v37 = vmul.f32 %v3405_v14, %v3339_v42 }
 0x1ae   : > { %v2183_v54 = vpop.eup %2182  ;;  %v1254_v18 = vpack.c.bf16 %v1218_v52, %v1216_v34  ;;  %v1121_v17 = vsel %vm1119_vm1, %v1120_v55, %v1118_v9  ;;  %v1132_v63 = vsel %vm1131_vm2, %v3388_v47, %v1130_v19  ;;  %vm1110_vm4 = vcmp.eq.f32.partialorder %v3339_v42, inf }
 0x1af   : > { %v1135_v29 = vsel %vm1133_vm3, %v1134_v8, %v1132_v63  ;;  %v1221_v3 = vmul.f32 %v2214_v20, %v1121_v17  ;;  %v1111_v7 = vsel %vm1110_vm4, %v3339_v42, %v1109_v37  ;;  %vm1112_vm5 = vcmp.eq.f32.partialorder %v3339_v42, 0.0 }
 0x1b0   : > { %v1223_v49 = vmul.f32 %v2215_v31, %v1135_v29  ;;  %v1113_v2 = vand.u32 2147483648, %v3339_v42  ;;  %v1123_v14 = vmul.f32 %v3426_v45, %v3368_v13  ;;  %vm1124_vm6 = vcmp.eq.f32.partialorder %v3368_v13, inf }
 0x1b1   : > { %1679 = vmatmul.mubr.bf16.gmra.mrb[52].mxu1 %v1254_v18  ;;  %vm1126_vm7 = vcmp.eq.f32.partialorder %v3368_v13, 0.0  ;;  %v1127_v47 = vand.u32 2147483648, %v3368_v13  ;;  %v1144_v44 = vmul.f32 %v2179_v38, %v3397_v22  ;;  %vm1145_vm8 = vcmp.eq.f32.partialorder %v3397_v22, inf  ;;  %v2218_v38 = vld [vmem:[%s2378_s30 + $0x1e8] sm:$0xff] }
 0x1b2   : > { %v1257_v58 = vpack.c.bf16 %v1223_v49, %v1221_v3  ;;  %v1114_v57 = vsel %vm1112_vm5, %v1113_v2, %v1111_v7  ;;  %v1125_v50 = vsel %vm1124_vm6, %v3368_v13, %v1123_v14  ;;  %vm1147_vm9 = vcmp.eq.f32.partialorder %v3397_v22, 0.0 }
 0x1b3   : > { %v1128_v42 = vsel %vm1126_vm7, %v1127_v47, %v1125_v50  ;;  %v1146_v43 = vsel %vm1145_vm8, %v3397_v22, %v1144_v44  ;;  %v1148_v45 = vand.u32 2147483648, %v3397_v22  ;;  %v1220_v56 = vmul.f32 %v2216_v32, %v1114_v57 }
 0x1b4   : > { %1688 = vmatprep.mubr.bf16.mxu1 %v1257_v58  ;;  %v1222_v10 = vmul.f32 %v2217_v28, %v1128_v42  ;;  %v1158_v46 = vmul.f32 %v2183_v54, %v3438_v23  ;;  %vm1159_vm10 = vcmp.eq.f32.partialorder %v3438_v23, inf  ;;  %vm1161_vm11 = vcmp.eq.f32.partialorder %v3438_v23, 0.0 }
 0x1b5   : > { %v1149_v13 = vsel %vm1147_vm9, %v1148_v45, %v1146_v43  ;;  %v1162_v51 = vand.u32 2147483648, %v3438_v23  ;;  %v1137_v35 = vmul.f32 %v3449_v41, %v3393_v15  ;;  %vm1138_vm12 = vcmp.eq.f32.partialorder %v3393_v15, inf }
 0x1b6   : > { %v1256_v61 = vpack.c.bf16 %v1222_v10, %v1220_v56  ;;  %v1160_v22 = vsel %vm1159_vm10, %v3438_v23, %v1158_v46  ;;  %v1225_v24 = vmul.f32 %v2218_v38, %v1149_v13  ;;  %v1141_v6 = vand.u32 2147483648, %v3393_v15 }
 0x1b7   : > { %v1163_v11 = vsel %vm1161_vm11, %v1162_v51, %v1160_v22  ;;  %v1139_v48 = vsel %vm1138_vm12, %v3393_v15, %v1137_v35  ;;  %v1151_v33 = vmul.f32 %v3470_v0, %v3419_v26  ;;  %vm1140_vm13 = vcmp.eq.f32.partialorder %v3393_v15, 0.0 }
 0x1b8   : > { %v1227_v21 = vmul.f32 %v2219_v53, %v1163_v11  ;;  %vm1152_vm14 = vcmp.eq.f32.partialorder %v3419_v26, inf  ;;  %v1155_v23 = vand.u32 2147483648, %v3419_v26  ;;  %v1142_v41 = vsel %vm1140_vm13, %v1141_v6, %v1139_v48 }
 0x1b9   : > { %1689 = vmatmul.mubr.bf16.gmra.mrb[56].mxu1 %v1256_v61  ;;  %v1153_v36 = vsel %vm1152_vm14, %v3419_v26, %v1151_v33  ;;  %vm1154_vm15 = vcmp.eq.f32.partialorder %v3419_v26, 0.0  ;;  %v1224_v60 = vmul.f32 %v2220_v12, %v1142_v41 }
 0x1ba   : > { %v1259_v5 = vpack.c.bf16 %v1227_v21, %v1225_v24  ;;  %v1156_v1 = vsel %vm1154_vm15, %v1155_v23, %v1153_v36 }
 0x1bb   : > { %v1226_v4 = vmul.f32 %v2221_v62, %v1156_v1 }
 0x1bc   : > { %1698 = vmatprep.mubr.bf16.mxu1 %v1259_v5 }
 0x1bd   : > { %v1258_v0 = vpack.c.bf16 %v1226_v4, %v1224_v60 }
 0x1c1   : > { %1699 = vmatmul.mubr.bf16.gmra.mrb[60].mxu1 %v1258_v0 }
 0x20b   : > { %v1550_v15 = vpop.f32.mrb[0].mxu1 }
 0x20c   : > { %1709 = vst [vmem:[%s3533_s9] sm:$0xff] %v1550_v15  ;;  %v1552_v26 = vpop.f32.mrb[1].mxu1 }
 0x20d   : > { %1710 = vst [vmem:[%s3533_s9 + $0x8] sm:$0xff] %v1552_v26  ;;  %v1554_v59 = vpop.f32.mrb[2].mxu1 }
 0x20e   : > { %1711 = vst [vmem:[%s3533_s9 + $0x10] sm:$0xff] %v1554_v59  ;;  %v1556_v40 = vpop.f32.mrb[3].mxu1 }
 0x20f   : > { %1712 = vst [vmem:[%s3533_s9 + $0x18] sm:$0xff] %v1556_v40 }
 0x213   : > { %v1560_v27 = vpop.f32.mrb[4].mxu1 }
 0x214   : > { %1713 = vst [vmem:[%s3533_s9 + $0x20] sm:$0xff] %v1560_v27  ;;  %v1562_v16 = vpop.f32.mrb[5].mxu1 }
 0x215   : > { %1714 = vst [vmem:[%s3533_s9 + $0x28] sm:$0xff] %v1562_v16  ;;  %v1564_v25 = vpop.f32.mrb[6].mxu1 }
 0x216   : > { %1715 = vst [vmem:[%s3533_s9 + $0x30] sm:$0xff] %v1564_v25  ;;  %v1566_v30 = vpop.f32.mrb[7].mxu1 }
 0x217   : > { %1716 = vst [vmem:[%s3533_s9 + $0x38] sm:$0xff] %v1566_v30 }
 0x21b   : > { %v1570_v34 = vpop.f32.mrb[8].mxu1 }
 0x21c   : > { %1717 = vst [vmem:[%s3533_s9 + $0x40] sm:$0xff] %v1570_v34  ;;  %v1572_v39 = vpop.f32.mrb[9].mxu1 }
 0x21d   : > { %1718 = vst [vmem:[%s3533_s9 + $0x48] sm:$0xff] %v1572_v39  ;;  %v1574_v52 = vpop.f32.mrb[10].mxu1 }
 0x21e   : > { %1719 = vst [vmem:[%s3533_s9 + $0x50] sm:$0xff] %v1574_v52  ;;  %v1576_v9 = vpop.f32.mrb[11].mxu1 }
 0x21f   : > { %1720 = vst [vmem:[%s3533_s9 + $0x58] sm:$0xff] %v1576_v9 }
 0x223   : > { %v1580_v55 = vpop.f32.mrb[12].mxu1 }
 0x224   : > { %1721 = vst [vmem:[%s3533_s9 + $0x60] sm:$0xff] %v1580_v55  ;;  %v1582_v19 = vpop.f32.mrb[13].mxu1 }
 0x225   : > { %1722 = vst [vmem:[%s3533_s9 + $0x68] sm:$0xff] %v1582_v19  ;;  %v1584_v8 = vpop.f32.mrb[14].mxu1 }
 0x226   : > { %1723 = vst [vmem:[%s3533_s9 + $0x70] sm:$0xff] %v1584_v8  ;;  %v1586_v37 = vpop.f32.mrb[15].mxu1 }
 0x227   : > { %1724 = vst [vmem:[%s3533_s9 + $0x78] sm:$0xff] %v1586_v37 }
 0x22e   : > { %v1590_v54 = vpop.f32.mrb[16].mxu1 }
 0x22f   : > { %1725 = vst [vmem:[%s3533_s9 + $0x80] sm:$0xff] %v1590_v54  ;;  %v1592_v18 = vpop.f32.mrb[17].mxu1 }
 0x230   : > { %1726 = vst [vmem:[%s3533_s9 + $0x88] sm:$0xff] %v1592_v18  ;;  %v1594_v17 = vpop.f32.mrb[18].mxu1 }
 0x231   : > { %1727 = vst [vmem:[%s3533_s9 + $0x90] sm:$0xff] %v1594_v17  ;;  %v1596_v63 = vpop.f32.mrb[19].mxu1 }
 0x232   : > { %1728 = vst [vmem:[%s3533_s9 + $0x98] sm:$0xff] %v1596_v63 }
 0x238   : > { %v1600_v29 = vpop.f32.mrb[20].mxu1 }
 0x239   : > { %1729 = vst [vmem:[%s3533_s9 + $0xa0] sm:$0xff] %v1600_v29  ;;  %v1602_v20 = vpop.f32.mrb[21].mxu1 }
 0x23a   : > { %1730 = vst [vmem:[%s3533_s9 + $0xa8] sm:$0xff] %v1602_v20  ;;  %v1604_v3 = vpop.f32.mrb[22].mxu1 }
 0x23b   : > { %1731 = vst [vmem:[%s3533_s9 + $0xb0] sm:$0xff] %v1604_v3  ;;  %v1606_v7 = vpop.f32.mrb[23].mxu1 }
 0x23c   : > { %1732 = vst [vmem:[%s3533_s9 + $0xb8] sm:$0xff] %v1606_v7 }
 0x242   : > { %v1610_v31 = vpop.f32.mrb[24].mxu1 }
 0x243   : > { %1733 = vst [vmem:[%s3533_s9 + $0xc0] sm:$0xff] %v1610_v31  ;;  %v1612_v49 = vpop.f32.mrb[25].mxu1 }
 0x244   : > { %1734 = vst [vmem:[%s3533_s9 + $0xc8] sm:$0xff] %v1612_v49  ;;  %v1614_v2 = vpop.f32.mrb[26].mxu1 }
 0x245   : > { %1735 = vst [vmem:[%s3533_s9 + $0xd0] sm:$0xff] %v1614_v2  ;;  %v1616_v14 = vpop.f32.mrb[27].mxu1 }
 0x246   : > { %1736 = vst [vmem:[%s3533_s9 + $0xd8] sm:$0xff] %v1616_v14 }
 0x24c   : > { %v1620_v47 = vpop.f32.mrb[28].mxu1 }
 0x24d   : > { %1737 = vst [vmem:[%s3533_s9 + $0xe0] sm:$0xff] %v1620_v47  ;;  %v1622_v44 = vpop.f32.mrb[29].mxu1 }
 0x24e   : > { %1738 = vst [vmem:[%s3533_s9 + $0xe8] sm:$0xff] %v1622_v44  ;;  %v1624_v58 = vpop.f32.mrb[30].mxu1 }
 0x24f   : > { %1739 = vst [vmem:[%s3533_s9 + $0xf0] sm:$0xff] %v1624_v58  ;;  %v1626_v57 = vpop.f32.mrb[31].mxu1 }
 0x250   : > { %1740 = vst [vmem:[%s3533_s9 + $0xf8] sm:$0xff] %v1626_v57 }
 0x255   : > { %v1630_v50 = vpop.f32.mrb[32].mxu1 }
 0x256   : > { %1741 = vst [vmem:[%s3533_s9 + $0x100] sm:$0xff] %v1630_v50  ;;  %v1632_v42 = vpop.f32.mrb[33].mxu1 }
 0x257   : > { %1742 = vst [vmem:[%s3533_s9 + $0x108] sm:$0xff] %v1632_v42  ;;  %v1634_v43 = vpop.f32.mrb[34].mxu1 }
 0x258   : > { %1743 = vst [vmem:[%s3533_s9 + $0x110] sm:$0xff] %v1634_v43  ;;  %v1636_v45 = vpop.f32.mrb[35].mxu1 }
 0x259   : > { %1744 = vst [vmem:[%s3533_s9 + $0x118] sm:$0xff] %v1636_v45 }
 0x25f   : > { %v1640_v32 = vpop.f32.mrb[36].mxu1 }
 0x260   : > { %1745 = vst [vmem:[%s3533_s9 + $0x120] sm:$0xff] %v1640_v32  ;;  %v1642_v56 = vpop.f32.mrb[37].mxu1 }
 0x261   : > { %1746 = vst [vmem:[%s3533_s9 + $0x128] sm:$0xff] %v1642_v56  ;;  %v1644_v28 = vpop.f32.mrb[38].mxu1 }
 0x262   : > { %1747 = vst [vmem:[%s3533_s9 + $0x130] sm:$0xff] %v1644_v28  ;;  %v1646_v10 = vpop.f32.mrb[39].mxu1 }
 0x263   : > { %1748 = vst [vmem:[%s3533_s9 + $0x138] sm:$0xff] %v1646_v10 }
 0x269   : > { %v1650_v46 = vpop.f32.mrb[40].mxu1 }
 0x26a   : > { %1749 = vst [vmem:[%s3533_s9 + $0x140] sm:$0xff] %v1650_v46  ;;  %v1652_v13 = vpop.f32.mrb[41].mxu1 }
 0x26b   : > { %1750 = vst [vmem:[%s3533_s9 + $0x148] sm:$0xff] %v1652_v13  ;;  %v1654_v51 = vpop.f32.mrb[42].mxu1 }
 0x26c   : > { %1751 = vst [vmem:[%s3533_s9 + $0x150] sm:$0xff] %v1654_v51  ;;  %v1656_v35 = vpop.f32.mrb[43].mxu1 }
 0x26d   : > { %1752 = vst [vmem:[%s3533_s9 + $0x158] sm:$0xff] %v1656_v35 }
 0x272   : > { %v1660_v61 = vpop.f32.mrb[44].mxu1 }
 0x273   : > { %1753 = vst [vmem:[%s3533_s9 + $0x160] sm:$0xff] %v1660_v61  ;;  %v1662_v22 = vpop.f32.mrb[45].mxu1 }
 0x274   : > { %1754 = vst [vmem:[%s3533_s9 + $0x168] sm:$0xff] %v1662_v22  ;;  %v1664_v38 = vpop.f32.mrb[46].mxu1 }
 0x275   : > { %1755 = vst [vmem:[%s3533_s9 + $0x170] sm:$0xff] %v1664_v38  ;;  %v1666_v24 = vpop.f32.mrb[47].mxu1 }
 0x276   : > { %1756 = vst [vmem:[%s3533_s9 + $0x178] sm:$0xff] %v1666_v24 }
 0x27c   : > { %v1670_v11 = vpop.f32.mrb[48].mxu1 }
 0x27d   : > { %1757 = vst [vmem:[%s3533_s9 + $0x180] sm:$0xff] %v1670_v11  ;;  %v1672_v48 = vpop.f32.mrb[49].mxu1 }
 0x27e   : > { %1758 = vst [vmem:[%s3533_s9 + $0x188] sm:$0xff] %v1672_v48  ;;  %v1674_v6 = vpop.f32.mrb[50].mxu1 }
 0x27f   : > { %1759 = vst [vmem:[%s3533_s9 + $0x190] sm:$0xff] %v1674_v6  ;;  %v1676_v33 = vpop.f32.mrb[51].mxu1 }
 0x280   : > { %1760 = vst [vmem:[%s3533_s9 + $0x198] sm:$0xff] %v1676_v33 }
 0x284   : > { %v1680_v53 = vpop.f32.mrb[52].mxu1 }
 0x285   : > { %1761 = vst [vmem:[%s3533_s9 + $0x1a0] sm:$0xff] %v1680_v53  ;;  %v1682_v21 = vpop.f32.mrb[53].mxu1 }
 0x286   : > { %1762 = vst [vmem:[%s3533_s9 + $0x1a8] sm:$0xff] %v1682_v21  ;;  %v1684_v23 = vpop.f32.mrb[54].mxu1 }
 0x287   : > { %1763 = vst [vmem:[%s3533_s9 + $0x1b0] sm:$0xff] %v1684_v23  ;;  %v1686_v41 = vpop.f32.mrb[55].mxu1 }
 0x288   : > { %1764 = vst [vmem:[%s3533_s9 + $0x1b8] sm:$0xff] %v1686_v41 }
 0x28c   : > { %v1690_v36 = vpop.f32.mrb[56].mxu1 }
 0x28d   : > { %1765 = vst [vmem:[%s3533_s9 + $0x1c0] sm:$0xff] %v1690_v36  ;;  %v1692_v5 = vpop.f32.mrb[57].mxu1 }
 0x28e   : > { %1766 = vst [vmem:[%s3533_s9 + $0x1c8] sm:$0xff] %v1692_v5  ;;  %v1694_v1 = vpop.f32.mrb[58].mxu1 }
 0x28f   : > { %1767 = vst [vmem:[%s3533_s9 + $0x1d0] sm:$0xff] %v1694_v1  ;;  %v1696_v12 = vpop.f32.mrb[59].mxu1 }
 0x290   : > { %1768 = vst [vmem:[%s3533_s9 + $0x1d8] sm:$0xff] %v1696_v12 }
 0x294   : > { %v1700_v60 = vpop.f32.mrb[60].mxu1 }
 0x295   : > { %1769 = vst [vmem:[%s3533_s9 + $0x1e0] sm:$0xff] %v1700_v60  ;;  %v1702_v62 = vpop.f32.mrb[61].mxu1 }
 0x296   : > { %1770 = vst [vmem:[%s3533_s9 + $0x1e8] sm:$0xff] %v1702_v62  ;;  %v1704_v4 = vpop.f32.mrb[62].mxu1 }
 0x297   : > { %1771 = vst [vmem:[%s3533_s9 + $0x1f0] sm:$0xff] %v1704_v4  ;;  %v1706_v0 = vpop.f32.mrb[63].mxu1 }
 0x298   : > { %1772 = vst [vmem:[%s3533_s9 + $0x1f8] sm:$0xff] %v1706_v0 }
 0x299 PF: > { %s14_s17 = sadd.s32 1, %s2244_s17   ;;  %s3613_s15 = smov %s2240_s16 }
 0x29a   : > { %p11_p5 = scmp.ge.s32.totalorder %s14_s17, 6   ;;  %s3614_s16 = smov %s3616_s18 }
 0x29c   :  { %13 = sbr.rel (!%p11_p5) target bundleno = 2 (0x2), region = 73 }

</bundles_post_ra>
